<compile_context>
chip_gen: v7x
topology: tpu7x:2x2x1
jax: 0.10.0
libtpu: 0.0.40
codegen_flags: <defaults>
</compile_context>

<pallas_src>
import functools
import math

import jax
import jax.numpy as jnp
from jax.experimental import pallas as pl
from jax.experimental.pallas import tpu as pltpu


def _attn_block_kernel(x_ref, g1_ref, beta1_ref, wqkv_ref, bqkv_ref,
                       wo_ref, bo_ref, g2_ref, beta2_ref,
                       w1_ref, b1_ref, w2_ref, b2_ref, o_ref,
                       *, num_heads, head_dim, eps):
    C = num_heads * head_dim
    bb = x_ref.shape[0]                          # samples fused in this step
    S = x_ref.shape[2]
    inv_n = 1.0 / (C * S)

    mm_dtype = wqkv_ref.dtype                    # MXU operand dtype (bf16/f32)
    fast_recip = mm_dtype != jnp.float32         # approx recip only on fast path

    # ---- loads shared by every fused sample ---------------------------------
    g1 = g1_ref[...]
    beta1 = beta1_ref[...]
    g2 = g2_ref[...]
    beta2 = beta2_ref[...]
    wq = wqkv_ref[0]                             # static slices on the ref: free
    wk = wqkv_ref[1]
    wv = wqkv_ref[2]
    wo = wo_ref[...]
    w1 = w1_ref[...]
    w2 = w2_ref[...]
    # Hoist the (C,1)->(C,S) lane broadcasts out of the per-sample loop
    # (JAX does not CSE broadcast_in_dim).
    bq = jnp.broadcast_to(bqkv_ref[0], (C, S))   # 1/sqrt(head_dim) pre-folded
    bk = jnp.broadcast_to(bqkv_ref[1], (C, S))
    bv = jnp.broadcast_to(bqkv_ref[2], (C, S))
    bo = jnp.broadcast_to(bo_ref[...], (C, S))
    b1 = jnp.broadcast_to(b1_ref[...], (C, S))
    b2 = jnp.broadcast_to(b2_ref[...], (C, S))

    # Static unroll over the fused samples (bb is kept small by the wrapper).
    # TODO(synk): at production shapes, make heads / KV tiles extra grid axes
    # with an online-softmax accumulator instead of unrolling here.
    for b in range(bb):
        x = x_ref[b].astype(jnp.float32)         # (C, S) feature-major slab
        skip1 = x

        # -- LayerNorm 1 over the whole (S, C) slab (normalized_shape=[S*C]) --
        mu = jnp.sum(x) * inv_n
        xc = x - mu                              # centered tensor reused
        var = jnp.sum(xc * xc) * inv_n
        xn = xc * jax.lax.rsqrt(var + eps) * g1 + beta1

        # -- Q/K/V projections (bf16 operands, f32 accumulation) --------------
        xn_mm = xn.astype(mm_dtype)
        q = jnp.dot(wq, xn_mm, preferred_element_type=jnp.float32) + bq
        k = jnp.dot(wk, xn_mm, preferred_element_type=jnp.float32) + bk
        v = jnp.dot(wv, xn_mm, preferred_element_type=jnp.float32) + bv

        # Single C -> (heads, head_dim) split per tensor (head-major, matching
        # torch.nn.MultiheadAttention).
        qh = q.astype(mm_dtype).reshape(num_heads, head_dim, S)
        kh = k.astype(mm_dtype).reshape(num_heads, head_dim, S)
        vh = v.astype(mm_dtype).reshape(num_heads, head_dim, S)

        # scores[h, i, j] = <q_i, k_j>; contract head_dim, batch over heads.
        # TODO(synk): at tiny head_dim the MXU K-dim is nearly empty; prefer a
        # VPU formulation (or head_dim >= 128) at production shapes.
        s = jax.lax.dot_general(qh, kh, (((1,), (1,)), ((0,), (0,))),
                                preferred_element_type=jnp.float32)   # (H,S,S)
        s = s - jnp.max(s, axis=-1, keepdims=True)
        p = jnp.exp(s)
        denom = jnp.sum(p, axis=-1, keepdims=True)
        if fast_recip:
            p = p * pl.reciprocal(denom, approx=True)   # EUP slot, nearly free
        else:
            p = p / denom
        # ctx[h, d, i] = sum_j v[h, d, j] * p[h, i, j]
        ctx = jax.lax.dot_general(vh, p.astype(mm_dtype),
                                  (((2,), (2,)), ((0,), (0,))),
                                  preferred_element_type=jnp.float32)  # (H,hd,S)
        attn = jnp.dot(wo, ctx.reshape(C, S).astype(mm_dtype),
                       preferred_element_type=jnp.float32) + bo

        # PyTorch aliasing: `skip2 = x; skip2 += skip1` mutates x too, so both
        # the LN2 input and the final residual base are (attn + skip1).
        x2 = attn + skip1

        # -- LayerNorm 2 -------------------------------------------------------
        mu2 = jnp.sum(x2) * inv_n
        x2c = x2 - mu2
        var2 = jnp.sum(x2c * x2c) * inv_n
        x2n = x2c * jax.lax.rsqrt(var2 + eps) * g2 + beta2

        # -- Feed-forward: Linear -> exact GELU -> Linear ----------------------
        # TODO(synk): optionally switch to tanh-approx GELU (single EUP op) if
        # bundle dumps show this region VALU-bound at production shapes.
        h1 = jnp.dot(w1, x2n.astype(mm_dtype),
                     preferred_element_type=jnp.float32) + b1
        h1 = 0.5 * h1 * (1.0 + jax.lax.erf(h1 * (1.0 / math.sqrt(2.0))))
        h2 = jnp.dot(w2, h1.astype(mm_dtype),
                     preferred_element_type=jnp.float32) + b2

        o_ref[b] = (x2 + h2).astype(o_ref.dtype)


def _pick_samples_per_step(B, C, S, itemsize=4):
    """Samples fused per grid step: amortizes the ~0.35us/step overhead at
    small C*S; capped so the fused slab stays <=~512 KiB and the unroll short."""
    budget = min(8, max(1, (512 * 1024) // max(1, C * S * itemsize)))
    bb = 1
    for d in range(1, B + 1):
        if B % d == 0 and d <= budget:
            bb = d
    return bb


def self_attention_block(x, kernel_params, *, num_heads, samples_per_step=None):
    """x: (B, C, H, W) NCHW, returns the same shape.

    `kernel_params` must come from `prepare_params` (kernel-friendly layouts,
    1/sqrt(head_dim) folded into the Q projection, bf16/f32 matmul weights)."""
    B, C, H, W = x.shape
    S = H * W
    head_dim = C // num_heads
    assert head_dim * num_heads == C

    # Zero-cost reshape: kernel consumes the natural NCHW-derived feature-major
    # (B, C, S) layout with S on the lane axis (lane-dense I/O).
    x_fm = x.reshape(B, C, S)

    bb = samples_per_step or _pick_samples_per_step(B, C, S)
    assert B % bb == 0, "samples_per_step must divide the batch"
    # TODO(synk): on v7x (2 TensorCores), if B // bb == 1 in production promote
    # heads or a query tile to an additional 'parallel' grid axis.

    kernel = functools.partial(_attn_block_kernel, num_heads=num_heads,
                               head_dim=head_dim, eps=1e-5)

    # Grid-constant weights / LN affine params: single-buffered (their
    # index_map never changes, so double-buffering only burns VMEM).
    def wspec(a):
        zeros = (0,) * a.ndim
        return pl.BlockSpec(a.shape, lambda i: zeros,
                            pipeline_mode=pl.Buffered(1))

    # Rough per-step VMEM footprint -> explicit scoped-VMEM limit (matters for
    # the 16 MiB v5e / 32 MiB v6e-v7x scoped defaults at larger shapes).
    weight_bytes = sum(int(a.size) * a.dtype.itemsize for a in kernel_params)
    act_bytes = 2 * 2 * bb * C * S * 4                 # in+out, double-buffered
    inter_bytes = bb * (2 * num_heads * S * S * 4 + 8 * C * S * 4)
    est = weight_bytes + act_bytes + inter_bytes
    vmem_limit = int(min(64 << 20, max(16 << 20, 2 * est)))

    # One grid step per group of `bb` samples.  Both LayerNorms normalize over
    # a full (S, C) slab, so a sample cannot be split across steps without a
    # multi-pass reduction.
    # TODO(synk): for production S (>= 2k) / many heads, add heads + KV-tile
    # grid axes with a flash-style online softmax so only one score tile is
    # live at a time (required to fit v7x's 64 MiB VMEM).
    grid_spec = pltpu.PrefetchScalarGridSpec(
        num_scalar_prefetch=0,
        grid=(B // bb,),
        in_specs=[pl.BlockSpec((bb, C, S), lambda i: (i, 0, 0))]
                 + [wspec(a) for a in kernel_params],
        out_specs=pl.BlockSpec((bb, C, S), lambda i: (i, 0, 0)),
    )

    out_fm = pl.pallas_call(
        kernel,
        out_shape=jax.ShapeDtypeStruct((B, C, S), x.dtype),
        grid_spec=grid_spec,
        compiler_params=pltpu.CompilerParams(
            dimension_semantics=("parallel",),
            vmem_limit_bytes=vmem_limit),
    )(x_fm, *kernel_params)

    return out_fm.reshape(B, C, H, W)


def init_native_params(key, C, S):
    """Deterministic synthetic parameters in native PyTorch layouts."""
    ks = jax.random.split(key, 12)
    lim = 1.0 / math.sqrt(C)

    def u(k, shape, scale):
        return jax.random.uniform(k, shape, jnp.float32, -scale, scale)

    ln1_w = 1.0 + 0.1 * jax.random.normal(ks[0], (S, C), jnp.float32)
    ln1_b = 0.1 * jax.random.normal(ks[1], (S, C), jnp.float32)
    in_w = u(ks[2], (3 * C, C), lim)             # in_proj_weight
    in_b = u(ks[3], (3 * C,), 0.1)               # in_proj_bias
    out_w = u(ks[4], (C, C), lim)                # out_proj.weight
    out_b = u(ks[5], (C,), 0.1)
    ln2_w = 1.0 + 0.1 * jax.random.normal(ks[6], (S, C), jnp.float32)
    ln2_b = 0.1 * jax.random.normal(ks[7], (S, C), jnp.float32)
    lin1_w = u(ks[8], (C, C), lim)
    lin1_b = u(ks[9], (C,), 0.1)
    lin2_w = u(ks[10], (C, C), lim)
    lin2_b = u(ks[11], (C,), 0.1)
    return (ln1_w, ln1_b, in_w, in_b, out_w, out_b,
            ln2_w, ln2_b, lin1_w, lin1_b, lin2_w, lin2_b)


def prepare_params(native, *, num_heads, matmul_dtype=jnp.bfloat16):
    """One-time transform of native PyTorch params into the kernel layout:
    LN affine transposed to (C, S); in_proj packed as (3, C, C)/(3, C, 1) with
    the 1/sqrt(head_dim) scale folded into the Q block; matmul weights cast to
    the MXU operand dtype; biases kept f32 (added to f32 accumulators)."""
    (ln1_w, ln1_b, in_w, in_b, out_w, out_b,
     ln2_w, ln2_b, lin1_w, lin1_b, lin2_w, lin2_b) = native
    C = out_w.shape[0]
    hd = C // num_heads
    scale = 1.0 / math.sqrt(hd)

    wqkv = in_w.reshape(3, C, C)
    bqkv = in_b.reshape(3, C, 1)
    wqkv = wqkv.at[0].multiply(scale)            # fold attention scale into Wq
    bqkv = bqkv.at[0].multiply(scale)

    mm = matmul_dtype
    return (ln1_w.T, ln1_b.T,
            wqkv.astype(mm), bqkv,
            out_w.astype(mm), out_b.reshape(C, 1),
            ln2_w.T, ln2_b.T,
            lin1_w.astype(mm), lin1_b.reshape(C, 1),
            lin2_w.astype(mm), lin2_b.reshape(C, 1))


def reference(x, native, *, num_heads):
    """Pure-JAX f32 transcription of the PyTorch forward (sequence-major)."""
    (ln1_w, ln1_b, in_w, in_b, out_w, out_b,
     ln2_w, ln2_b, lin1_w, lin1_b, lin2_w, lin2_b) = native
    B, C, H, W = x.shape
    S = H * W
    hd = C // num_heads
    eps = 1e-5

    xs = jnp.transpose(x.reshape(B, C, S), (0, 2, 1))      # (B, S, C)
    skip1 = xs
    mu = jnp.mean(xs, axis=(1, 2), keepdims=True)
    var = jnp.mean((xs - mu) ** 2, axis=(1, 2), keepdims=True)
    xn = (xs - mu) / jnp.sqrt(var + eps) * ln1_w + ln1_b

    qkv = xn @ in_w.T + in_b
    q = qkv[..., :C].reshape(B, S, num_heads, hd)
    k = qkv[..., C:2 * C].reshape(B, S, num_heads, hd)
    v = qkv[..., 2 * C:].reshape(B, S, num_heads, hd)
    s = jnp.einsum('bqhd,bkhd->bhqk', q, k) / math.sqrt(hd)
    p = jax.nn.softmax(s, axis=-1)
    attn = jnp.einsum('bhqk,bkhd->bqhd', p, v).reshape(B, S, C)
    attn = attn @ out_w.T + out_b

    x2 = attn + skip1
    mu2 = jnp.mean(x2, axis=(1, 2), keepdims=True)
    var2 = jnp.mean((x2 - mu2) ** 2, axis=(1, 2), keepdims=True)
    x2n = (x2 - mu2) / jnp.sqrt(var2 + eps) * ln2_w + ln2_b
    h1 = x2n @ lin1_w.T + lin1_b
    h1 = 0.5 * h1 * (1.0 + jax.lax.erf(h1 / math.sqrt(2.0)))
    h2 = h1 @ lin2_w.T + lin2_b
    out = x2 + h2
    return jnp.transpose(out, (0, 2, 1)).reshape(B, C, H, W)


if __name__ == "__main__":
    B, C, H, W = 2, 4, 16, 16        # in_channels=4, height=width=16
    num_heads = 2
    key = jax.random.PRNGKey(0)
    kx, kp = jax.random.split(key)

    x = jax.random.normal(kx, (B, C, H, W), jnp.float32)
    native = init_native_params(kp, C, H * W)
    ref = reference(x, native, num_heads=num_heads)

    fwd = jax.jit(functools.partial(self_attention_block, num_heads=num_heads))

    # 1) f32 matmul operands: strict semantic check (exact softmax division).
    p_f32 = prepare_params(native, num_heads=num_heads, matmul_dtype=jnp.float32)
    out_f32 = jax.block_until_ready(fwd(x, p_f32))
    assert out_f32.shape == x.shape
    err32 = float(jnp.max(jnp.abs(out_f32 - ref)))
    assert jnp.allclose(out_f32, ref, atol=2e-3, rtol=2e-3), f"f32 max err {err32}"

    # 2) bf16 MXU-operand path (production default): looser bound absorbs the
    #    ~2^-9 operand rounding; a structural bug would be off by O(0.1+).
    p_bf16 = prepare_params(native, num_heads=num_heads, matmul_dtype=jnp.bfloat16)
    out_bf16 = jax.block_until_ready(fwd(x, p_bf16))
    err_bf = float(jnp.max(jnp.abs(out_bf16 - ref)))
    assert jnp.allclose(out_bf16, ref, atol=5e-2, rtol=5e-2), f"bf16 max err {err_bf}"

    print("KERNEL_OK")
</pallas_src>

<mosaic_0001>
module attributes {stable_mosaic.version = 11 : i64} {
  func.func @_attn_block_kernel(%arg0: i32, %arg1: memref<2x4x256xf32, #tpu.memory_space<vmem>>, %arg2: memref<4x256xf32, #tpu.memory_space<vmem>>, %arg3: memref<4x256xf32, #tpu.memory_space<vmem>>, %arg4: memref<3x4x4xf32, #tpu.memory_space<vmem>>, %arg5: memref<3x4x1xf32, #tpu.memory_space<vmem>>, %arg6: memref<4x4xf32, #tpu.memory_space<vmem>>, %arg7: memref<4x1xf32, #tpu.memory_space<vmem>>, %arg8: memref<4x256xf32, #tpu.memory_space<vmem>>, %arg9: memref<4x256xf32, #tpu.memory_space<vmem>>, %arg10: memref<4x4xf32, #tpu.memory_space<vmem>>, %arg11: memref<4x1xf32, #tpu.memory_space<vmem>>, %arg12: memref<4x4xf32, #tpu.memory_space<vmem>>, %arg13: memref<4x1xf32, #tpu.memory_space<vmem>>, %arg14: memref<2x4x256xf32, #tpu.memory_space<vmem>>) attributes {dimension_semantics = [#tpu.dimension_semantics<parallel>], iteration_bounds = array<i64: 1>, scalar_prefetch = 0 : i64, scratch_operands = 0 : i64, tpu.core_type = #tpu.core_type<tc>, window_params = [{transform_indices = @transform_0, window_bounds = array<i64: 2, 4, 256>}, {pipeline_mode = #tpu.pipeline_mode<synchronous>, transform_indices = @transform_1, window_bounds = array<i64: 4, 256>}, {pipeline_mode = #tpu.pipeline_mode<synchronous>, transform_indices = @transform_2, window_bounds = array<i64: 4, 256>}, {pipeline_mode = #tpu.pipeline_mode<synchronous>, transform_indices = @transform_3, window_bounds = array<i64: 3, 4, 4>}, {pipeline_mode = #tpu.pipeline_mode<synchronous>, transform_indices = @transform_4, window_bounds = array<i64: 3, 4, 1>}, {pipeline_mode = #tpu.pipeline_mode<synchronous>, transform_indices = @transform_5, window_bounds = array<i64: 4, 4>}, {pipeline_mode = #tpu.pipeline_mode<synchronous>, transform_indices = @transform_6, window_bounds = array<i64: 4, 1>}, {pipeline_mode = #tpu.pipeline_mode<synchronous>, transform_indices = @transform_7, window_bounds = array<i64: 4, 256>}, {pipeline_mode = #tpu.pipeline_mode<synchronous>, transform_indices = @transform_8, window_bounds = array<i64: 4, 256>}, {pipeline_mode = #tpu.pipeline_mode<synchronous>, transform_indices = @transform_9, window_bounds = array<i64: 4, 4>}, {pipeline_mode = #tpu.pipeline_mode<synchronous>, transform_indices = @transform_10, window_bounds = array<i64: 4, 1>}, {pipeline_mode = #tpu.pipeline_mode<synchronous>, transform_indices = @transform_11, window_bounds = array<i64: 4, 4>}, {pipeline_mode = #tpu.pipeline_mode<synchronous>, transform_indices = @transform_12, window_bounds = array<i64: 4, 1>}, {transform_indices = @transform_13, window_bounds = array<i64: 2, 4, 256>}]} {
    %c0 = arith.constant 0 : index
    %c0_0 = arith.constant 0 : index
    %0 = vector.load %arg2[%c0, %c0_0] : memref<4x256xf32, #tpu.memory_space<vmem>>, vector<4x256xf32>
    %c0_1 = arith.constant 0 : index
    %c0_2 = arith.constant 0 : index
    %1 = vector.load %arg3[%c0_1, %c0_2] : memref<4x256xf32, #tpu.memory_space<vmem>>, vector<4x256xf32>
    %c0_3 = arith.constant 0 : index
    %c0_4 = arith.constant 0 : index
    %2 = vector.load %arg8[%c0_3, %c0_4] : memref<4x256xf32, #tpu.memory_space<vmem>>, vector<4x256xf32>
    %c0_5 = arith.constant 0 : index
    %c0_6 = arith.constant 0 : index
    %3 = vector.load %arg9[%c0_5, %c0_6] : memref<4x256xf32, #tpu.memory_space<vmem>>, vector<4x256xf32>
    %c0_7 = arith.constant 0 : index
    %c0_8 = arith.constant 0 : index
    %c0_9 = arith.constant 0 : index
    %4 = vector.load %arg4[%c0_7, %c0_8, %c0_9] : memref<3x4x4xf32, #tpu.memory_space<vmem>>, vector<1x4x4xf32>
    %5 = vector.shape_cast %4 : vector<1x4x4xf32> to vector<4x4xf32>
    %c1 = arith.constant 1 : index
    %c0_10 = arith.constant 0 : index
    %c0_11 = arith.constant 0 : index
    %6 = vector.load %arg4[%c1, %c0_10, %c0_11] : memref<3x4x4xf32, #tpu.memory_space<vmem>>, vector<1x4x4xf32>
    %7 = vector.shape_cast %6 : vector<1x4x4xf32> to vector<4x4xf32>
    %c2 = arith.constant 2 : index
    %c0_12 = arith.constant 0 : index
    %c0_13 = arith.constant 0 : index
    %8 = vector.load %arg4[%c2, %c0_12, %c0_13] : memref<3x4x4xf32, #tpu.memory_space<vmem>>, vector<1x4x4xf32>
    %9 = vector.shape_cast %8 : vector<1x4x4xf32> to vector<4x4xf32>
    %c0_14 = arith.constant 0 : index
    %c0_15 = arith.constant 0 : index
    %10 = vector.load %arg6[%c0_14, %c0_15] : memref<4x4xf32, #tpu.memory_space<vmem>>, vector<4x4xf32>
    %c0_16 = arith.constant 0 : index
    %c0_17 = arith.constant 0 : index
    %11 = vector.load %arg10[%c0_16, %c0_17] : memref<4x4xf32, #tpu.memory_space<vmem>>, vector<4x4xf32>
    %c0_18 = arith.constant 0 : index
    %c0_19 = arith.constant 0 : index
    %12 = vector.load %arg12[%c0_18, %c0_19] : memref<4x4xf32, #tpu.memory_space<vmem>>, vector<4x4xf32>
    %c0_20 = arith.constant 0 : index
    %c0_21 = arith.constant 0 : index
    %c0_22 = arith.constant 0 : index
    %13 = vector.load %arg5[%c0_20, %c0_21, %c0_22] : memref<3x4x1xf32, #tpu.memory_space<vmem>>, vector<1x4x1xf32>
    %14 = vector.shape_cast %13 : vector<1x4x1xf32> to vector<4x1xf32>
    %15 = vector.shape_cast %14 : vector<4x1xf32> to vector<4x1xf32>
    %16 = vector.broadcast %15 : vector<4x1xf32> to vector<4x256xf32>
    %c1_23 = arith.constant 1 : index
    %c0_24 = arith.constant 0 : index
    %c0_25 = arith.constant 0 : index
    %17 = vector.load %arg5[%c1_23, %c0_24, %c0_25] : memref<3x4x1xf32, #tpu.memory_space<vmem>>, vector<1x4x1xf32>
    %18 = vector.shape_cast %17 : vector<1x4x1xf32> to vector<4x1xf32>
    %19 = vector.shape_cast %18 : vector<4x1xf32> to vector<4x1xf32>
    %20 = vector.broadcast %19 : vector<4x1xf32> to vector<4x256xf32>
    %c2_26 = arith.constant 2 : index
    %c0_27 = arith.constant 0 : index
    %c0_28 = arith.constant 0 : index
    %21 = vector.load %arg5[%c2_26, %c0_27, %c0_28] : memref<3x4x1xf32, #tpu.memory_space<vmem>>, vector<1x4x1xf32>
    %22 = vector.shape_cast %21 : vector<1x4x1xf32> to vector<4x1xf32>
    %23 = vector.shape_cast %22 : vector<4x1xf32> to vector<4x1xf32>
    %24 = vector.broadcast %23 : vector<4x1xf32> to vector<4x256xf32>
    %c0_29 = arith.constant 0 : index
    %c0_30 = arith.constant 0 : index
    %25 = vector.load %arg7[%c0_29, %c0_30] : memref<4x1xf32, #tpu.memory_space<vmem>>, vector<4x1xf32>
    %26 = vector.shape_cast %25 : vector<4x1xf32> to vector<4x1xf32>
    %27 = vector.broadcast %26 : vector<4x1xf32> to vector<4x256xf32>
    %c0_31 = arith.constant 0 : index
    %c0_32 = arith.constant 0 : index
    %28 = vector.load %arg11[%c0_31, %c0_32] : memref<4x1xf32, #tpu.memory_space<vmem>>, vector<4x1xf32>
    %29 = vector.shape_cast %28 : vector<4x1xf32> to vector<4x1xf32>
    %30 = vector.broadcast %29 : vector<4x1xf32> to vector<4x256xf32>
    %c0_33 = arith.constant 0 : index
    %c0_34 = arith.constant 0 : index
    %31 = vector.load %arg13[%c0_33, %c0_34] : memref<4x1xf32, #tpu.memory_space<vmem>>, vector<4x1xf32>
    %32 = vector.shape_cast %31 : vector<4x1xf32> to vector<4x1xf32>
    %33 = vector.broadcast %32 : vector<4x1xf32> to vector<4x256xf32>
    %c0_35 = arith.constant 0 : index
    %c0_36 = arith.constant 0 : index
    %c0_37 = arith.constant 0 : index
    %34 = vector.load %arg1[%c0_35, %c0_36, %c0_37] : memref<2x4x256xf32, #tpu.memory_space<vmem>>, vector<1x4x256xf32>
    %35 = vector.shape_cast %34 : vector<1x4x256xf32> to vector<4x256xf32>
    %36 = vector.shape_cast %35 : vector<4x256xf32> to vector<1x4x256xf32>
    %cst = arith.constant dense<0.000000e+00> : vector<1xf32>
    %37 = vector.multi_reduction <add>, %36, %cst [1, 2] : vector<1x4x256xf32> to vector<1xf32>
    %38 = vector.shape_cast %37 : vector<1xf32> to vector<1x1x1xf32>
    %39 = vector.extract %38[0, 0, 0] : f32 from vector<1x1x1xf32>
    %cst_38 = arith.constant 9.765625E-4 : f32
    %40 = arith.mulf %39, %cst_38 : f32
    %41 = vector.broadcast %40 : f32 to vector<4x256xf32>
    %42 = arith.subf %35, %41 : vector<4x256xf32>
    %43 = arith.mulf %42, %42 : vector<4x256xf32>
    %44 = vector.shape_cast %43 : vector<4x256xf32> to vector<1x4x256xf32>
    %cst_39 = arith.constant dense<0.000000e+00> : vector<1xf32>
    %45 = vector.multi_reduction <add>, %44, %cst_39 [1, 2] : vector<1x4x256xf32> to vector<1xf32>
    %46 = vector.shape_cast %45 : vector<1xf32> to vector<1x1x1xf32>
    %47 = vector.extract %46[0, 0, 0] : f32 from vector<1x1x1xf32>
    %cst_40 = arith.constant 9.765625E-4 : f32
    %48 = arith.mulf %47, %cst_40 : f32
    %cst_41 = arith.constant 9.99999974E-6 : f32
    %49 = arith.addf %48, %cst_41 : f32
    %50 = math.rsqrt %49 : f32
    %51 = vector.broadcast %50 : f32 to vector<4x256xf32>
    %52 = arith.mulf %42, %51 : vector<4x256xf32>
    %53 = arith.mulf %52, %0 : vector<4x256xf32>
    %54 = arith.addf %53, %1 : vector<4x256xf32>
    %cst_42 = arith.constant dense<0.000000e+00> : vector<4x256xf32>
    %55 = tpu.matmul %5, %54, %cst_42 {dimension_numbers = #tpu.dot_dimension_numbers<[1], [0], [0], [1], [0, 0, 1, 1], [], []>} : vector<4x4xf32>, vector<4x256xf32>, vector<4x256xf32> -> vector<4x256xf32>
    %56 = arith.addf %55, %16 : vector<4x256xf32>
    %cst_43 = arith.constant dense<0.000000e+00> : vector<4x256xf32>
    %57 = tpu.matmul %7, %54, %cst_43 {dimension_numbers = #tpu.dot_dimension_numbers<[1], [0], [0], [1], [0, 0, 1, 1], [], []>} : vector<4x4xf32>, vector<4x256xf32>, vector<4x256xf32> -> vector<4x256xf32>
    %58 = arith.addf %57, %20 : vector<4x256xf32>
    %cst_44 = arith.constant dense<0.000000e+00> : vector<4x256xf32>
    %59 = tpu.matmul %9, %54, %cst_44 {dimension_numbers = #tpu.dot_dimension_numbers<[1], [0], [0], [1], [0, 0, 1, 1], [], []>} : vector<4x4xf32>, vector<4x256xf32>, vector<4x256xf32> -> vector<4x256xf32>
    %60 = arith.addf %59, %24 : vector<4x256xf32>
    %61 = vector.shape_cast %56 : vector<4x256xf32> to vector<2x2x256xf32>
    %62 = vector.shape_cast %58 : vector<4x256xf32> to vector<2x2x256xf32>
    %63 = vector.shape_cast %60 : vector<4x256xf32> to vector<2x2x256xf32>
    %cst_45 = arith.constant dense<0.000000e+00> : vector<2x256x256xf32>
    %64 = tpu.matmul %61, %62, %cst_45 {dimension_numbers = #tpu.dot_dimension_numbers<[1], [1], [2], [2], [0, 0, 0, 2, 1, 2], [0], [0]>} : vector<2x2x256xf32>, vector<2x2x256xf32>, vector<2x256x256xf32> -> vector<2x256x256xf32>
    %cst_46 = arith.constant dense<0xFF800000> : vector<2x256xf32>
    %65 = vector.multi_reduction <maximumf>, %64, %cst_46 [2] : vector<2x256x256xf32> to vector<2x256xf32>
    %66 = vector.shape_cast %65 : vector<2x256xf32> to vector<2x256x1xf32>
    %67 = vector.broadcast %66 : vector<2x256x1xf32> to vector<2x256x256xf32>
    %68 = arith.subf %64, %67 : vector<2x256x256xf32>
    %69 = math.exp %68 : vector<2x256x256xf32>
    %cst_47 = arith.constant dense<0.000000e+00> : vector<2x256xf32>
    %70 = vector.multi_reduction <add>, %69, %cst_47 [2] : vector<2x256x256xf32> to vector<2x256xf32>
    %71 = vector.shape_cast %70 : vector<2x256xf32> to vector<2x256x1xf32>
    %72 = vector.broadcast %71 : vector<2x256x1xf32> to vector<2x256x256xf32>
    %73 = arith.divf %69, %72 : vector<2x256x256xf32>
    %cst_48 = arith.constant dense<0.000000e+00> : vector<2x2x256xf32>
    %74 = tpu.matmul %63, %73, %cst_48 {dimension_numbers = #tpu.dot_dimension_numbers<[2], [2], [1], [1], [0, 0, 0, 1, 1, 1], [0], [0]>} : vector<2x2x256xf32>, vector<2x256x256xf32>, vector<2x2x256xf32> -> vector<2x2x256xf32>
    %75 = vector.shape_cast %74 : vector<2x2x256xf32> to vector<4x256xf32>
    %cst_49 = arith.constant dense<0.000000e+00> : vector<4x256xf32>
    %76 = tpu.matmul %10, %75, %cst_49 {dimension_numbers = #tpu.dot_dimension_numbers<[1], [0], [0], [1], [0, 0, 1, 1], [], []>} : vector<4x4xf32>, vector<4x256xf32>, vector<4x256xf32> -> vector<4x256xf32>
    %77 = arith.addf %76, %27 : vector<4x256xf32>
    %78 = arith.addf %77, %35 : vector<4x256xf32>
    %79 = vector.shape_cast %78 : vector<4x256xf32> to vector<1x4x256xf32>
    %cst_50 = arith.constant dense<0.000000e+00> : vector<1xf32>
    %80 = vector.multi_reduction <add>, %79, %cst_50 [1, 2] : vector<1x4x256xf32> to vector<1xf32>
    %81 = vector.shape_cast %80 : vector<1xf32> to vector<1x1x1xf32>
    %82 = vector.extract %81[0, 0, 0] : f32 from vector<1x1x1xf32>
    %cst_51 = arith.constant 9.765625E-4 : f32
    %83 = arith.mulf %82, %cst_51 : f32
    %84 = vector.broadcast %83 : f32 to vector<4x256xf32>
    %85 = arith.subf %78, %84 : vector<4x256xf32>
    %86 = arith.mulf %85, %85 : vector<4x256xf32>
    %87 = vector.shape_cast %86 : vector<4x256xf32> to vector<1x4x256xf32>
    %cst_52 = arith.constant dense<0.000000e+00> : vector<1xf32>
    %88 = vector.multi_reduction <add>, %87, %cst_52 [1, 2] : vector<1x4x256xf32> to vector<1xf32>
    %89 = vector.shape_cast %88 : vector<1xf32> to vector<1x1x1xf32>
    %90 = vector.extract %89[0, 0, 0] : f32 from vector<1x1x1xf32>
    %cst_53 = arith.constant 9.765625E-4 : f32
    %91 = arith.mulf %90, %cst_53 : f32
    %cst_54 = arith.constant 9.99999974E-6 : f32
    %92 = arith.addf %91, %cst_54 : f32
    %93 = math.rsqrt %92 : f32
    %94 = vector.broadcast %93 : f32 to vector<4x256xf32>
    %95 = arith.mulf %85, %94 : vector<4x256xf32>
    %96 = arith.mulf %95, %2 : vector<4x256xf32>
    %97 = arith.addf %96, %3 : vector<4x256xf32>
    %cst_55 = arith.constant dense<0.000000e+00> : vector<4x256xf32>
    %98 = tpu.matmul %11, %97, %cst_55 {dimension_numbers = #tpu.dot_dimension_numbers<[1], [0], [0], [1], [0, 0, 1, 1], [], []>} : vector<4x4xf32>, vector<4x256xf32>, vector<4x256xf32> -> vector<4x256xf32>
    %99 = arith.addf %98, %30 : vector<4x256xf32>
    %cst_56 = arith.constant 5.000000e-01 : f32
    %100 = vector.broadcast %cst_56 : f32 to vector<4x256xf32>
    %101 = arith.mulf %100, %99 : vector<4x256xf32>
    %cst_57 = arith.constant 0.707106769 : f32
    %102 = vector.broadcast %cst_57 : f32 to vector<4x256xf32>
    %103 = arith.mulf %99, %102 : vector<4x256xf32>
    %104 = math.erf %103 : vector<4x256xf32>
    %cst_58 = arith.constant 1.000000e+00 : f32
    %105 = vector.broadcast %cst_58 : f32 to vector<4x256xf32>
    %106 = arith.addf %105, %104 : vector<4x256xf32>
    %107 = arith.mulf %101, %106 : vector<4x256xf32>
    %cst_59 = arith.constant dense<0.000000e+00> : vector<4x256xf32>
    %108 = tpu.matmul %12, %107, %cst_59 {dimension_numbers = #tpu.dot_dimension_numbers<[1], [0], [0], [1], [0, 0, 1, 1], [], []>} : vector<4x4xf32>, vector<4x256xf32>, vector<4x256xf32> -> vector<4x256xf32>
    %109 = arith.addf %108, %33 : vector<4x256xf32>
    %110 = arith.addf %78, %109 : vector<4x256xf32>
    %c0_60 = arith.constant 0 : index
    %c0_61 = arith.constant 0 : index
    %c0_62 = arith.constant 0 : index
    %111 = vector.load %arg14[%c0_60, %c0_61, %c0_62] : memref<2x4x256xf32, #tpu.memory_space<vmem>>, vector<1x4x256xf32>
    %112 = vector.shape_cast %111 : vector<1x4x256xf32> to vector<4x256xf32>
    %113 = vector.shape_cast %110 : vector<4x256xf32> to vector<1x4x256xf32>
    tpu.vector_store %arg14[%c0_60, %c0_61, %c0_62], %113 {strides = array<i32>} : memref<2x4x256xf32, #tpu.memory_space<vmem>>, vector<1x4x256xf32>,
    %c1_63 = arith.constant 1 : index
    %c0_64 = arith.constant 0 : index
    %c0_65 = arith.constant 0 : index
    %114 = vector.load %arg1[%c1_63, %c0_64, %c0_65] : memref<2x4x256xf32, #tpu.memory_space<vmem>>, vector<1x4x256xf32>
    %115 = vector.shape_cast %114 : vector<1x4x256xf32> to vector<4x256xf32>
    %116 = vector.shape_cast %115 : vector<4x256xf32> to vector<1x4x256xf32>
    %cst_66 = arith.constant dense<0.000000e+00> : vector<1xf32>
    %117 = vector.multi_reduction <add>, %116, %cst_66 [1, 2] : vector<1x4x256xf32> to vector<1xf32>
    %118 = vector.shape_cast %117 : vector<1xf32> to vector<1x1x1xf32>
    %119 = vector.extract %118[0, 0, 0] : f32 from vector<1x1x1xf32>
    %cst_67 = arith.constant 9.765625E-4 : f32
    %120 = arith.mulf %119, %cst_67 : f32
    %121 = vector.broadcast %120 : f32 to vector<4x256xf32>
    %122 = arith.subf %115, %121 : vector<4x256xf32>
    %123 = arith.mulf %122, %122 : vector<4x256xf32>
    %124 = vector.shape_cast %123 : vector<4x256xf32> to vector<1x4x256xf32>
    %cst_68 = arith.constant dense<0.000000e+00> : vector<1xf32>
    %125 = vector.multi_reduction <add>, %124, %cst_68 [1, 2] : vector<1x4x256xf32> to vector<1xf32>
    %126 = vector.shape_cast %125 : vector<1xf32> to vector<1x1x1xf32>
    %127 = vector.extract %126[0, 0, 0] : f32 from vector<1x1x1xf32>
    %cst_69 = arith.constant 9.765625E-4 : f32
    %128 = arith.mulf %127, %cst_69 : f32
    %cst_70 = arith.constant 9.99999974E-6 : f32
    %129 = arith.addf %128, %cst_70 : f32
    %130 = math.rsqrt %129 : f32
    %131 = vector.broadcast %130 : f32 to vector<4x256xf32>
    %132 = arith.mulf %122, %131 : vector<4x256xf32>
    %133 = arith.mulf %132, %0 : vector<4x256xf32>
    %134 = arith.addf %133, %1 : vector<4x256xf32>
    %cst_71 = arith.constant dense<0.000000e+00> : vector<4x256xf32>
    %135 = tpu.matmul %5, %134, %cst_71 {dimension_numbers = #tpu.dot_dimension_numbers<[1], [0], [0], [1], [0, 0, 1, 1], [], []>} : vector<4x4xf32>, vector<4x256xf32>, vector<4x256xf32> -> vector<4x256xf32>
    %136 = arith.addf %135, %16 : vector<4x256xf32>
    %cst_72 = arith.constant dense<0.000000e+00> : vector<4x256xf32>
    %137 = tpu.matmul %7, %134, %cst_72 {dimension_numbers = #tpu.dot_dimension_numbers<[1], [0], [0], [1], [0, 0, 1, 1], [], []>} : vector<4x4xf32>, vector<4x256xf32>, vector<4x256xf32> -> vector<4x256xf32>
    %138 = arith.addf %137, %20 : vector<4x256xf32>
    %cst_73 = arith.constant dense<0.000000e+00> : vector<4x256xf32>
    %139 = tpu.matmul %9, %134, %cst_73 {dimension_numbers = #tpu.dot_dimension_numbers<[1], [0], [0], [1], [0, 0, 1, 1], [], []>} : vector<4x4xf32>, vector<4x256xf32>, vector<4x256xf32> -> vector<4x256xf32>
    %140 = arith.addf %139, %24 : vector<4x256xf32>
    %141 = vector.shape_cast %136 : vector<4x256xf32> to vector<2x2x256xf32>
    %142 = vector.shape_cast %138 : vector<4x256xf32> to vector<2x2x256xf32>
    %143 = vector.shape_cast %140 : vector<4x256xf32> to vector<2x2x256xf32>
    %cst_74 = arith.constant dense<0.000000e+00> : vector<2x256x256xf32>
    %144 = tpu.matmul %141, %142, %cst_74 {dimension_numbers = #tpu.dot_dimension_numbers<[1], [1], [2], [2], [0, 0, 0, 2, 1, 2], [0], [0]>} : vector<2x2x256xf32>, vector<2x2x256xf32>, vector<2x256x256xf32> -> vector<2x256x256xf32>
    %cst_75 = arith.constant dense<0xFF800000> : vector<2x256xf32>
    %145 = vector.multi_reduction <maximumf>, %144, %cst_75 [2] : vector<2x256x256xf32> to vector<2x256xf32>
    %146 = vector.shape_cast %145 : vector<2x256xf32> to vector<2x256x1xf32>
    %147 = vector.broadcast %146 : vector<2x256x1xf32> to vector<2x256x256xf32>
    %148 = arith.subf %144, %147 : vector<2x256x256xf32>
    %149 = math.exp %148 : vector<2x256x256xf32>
    %cst_76 = arith.constant dense<0.000000e+00> : vector<2x256xf32>
    %150 = vector.multi_reduction <add>, %149, %cst_76 [2] : vector<2x256x256xf32> to vector<2x256xf32>
    %151 = vector.shape_cast %150 : vector<2x256xf32> to vector<2x256x1xf32>
    %152 = vector.broadcast %151 : vector<2x256x1xf32> to vector<2x256x256xf32>
    %153 = arith.divf %149, %152 : vector<2x256x256xf32>
    %cst_77 = arith.constant dense<0.000000e+00> : vector<2x2x256xf32>
    %154 = tpu.matmul %143, %153, %cst_77 {dimension_numbers = #tpu.dot_dimension_numbers<[2], [2], [1], [1], [0, 0, 0, 1, 1, 1], [0], [0]>} : vector<2x2x256xf32>, vector<2x256x256xf32>, vector<2x2x256xf32> -> vector<2x2x256xf32>
    %155 = vector.shape_cast %154 : vector<2x2x256xf32> to vector<4x256xf32>
    %cst_78 = arith.constant dense<0.000000e+00> : vector<4x256xf32>
    %156 = tpu.matmul %10, %155, %cst_78 {dimension_numbers = #tpu.dot_dimension_numbers<[1], [0], [0], [1], [0, 0, 1, 1], [], []>} : vector<4x4xf32>, vector<4x256xf32>, vector<4x256xf32> -> vector<4x256xf32>
    %157 = arith.addf %156, %27 : vector<4x256xf32>
    %158 = arith.addf %157, %115 : vector<4x256xf32>
    %159 = vector.shape_cast %158 : vector<4x256xf32> to vector<1x4x256xf32>
    %cst_79 = arith.constant dense<0.000000e+00> : vector<1xf32>
    %160 = vector.multi_reduction <add>, %159, %cst_79 [1, 2] : vector<1x4x256xf32> to vector<1xf32>
    %161 = vector.shape_cast %160 : vector<1xf32> to vector<1x1x1xf32>
    %162 = vector.extract %161[0, 0, 0] : f32 from vector<1x1x1xf32>
    %cst_80 = arith.constant 9.765625E-4 : f32
    %163 = arith.mulf %162, %cst_80 : f32
    %164 = vector.broadcast %163 : f32 to vector<4x256xf32>
    %165 = arith.subf %158, %164 : vector<4x256xf32>
    %166 = arith.mulf %165, %165 : vector<4x256xf32>
    %167 = vector.shape_cast %166 : vector<4x256xf32> to vector<1x4x256xf32>
    %cst_81 = arith.constant dense<0.000000e+00> : vector<1xf32>
    %168 = vector.multi_reduction <add>, %167, %cst_81 [1, 2] : vector<1x4x256xf32> to vector<1xf32>
    %169 = vector.shape_cast %168 : vector<1xf32> to vector<1x1x1xf32>
    %170 = vector.extract %169[0, 0, 0] : f32 from vector<1x1x1xf32>
    %cst_82 = arith.constant 9.765625E-4 : f32
    %171 = arith.mulf %170, %cst_82 : f32
    %cst_83 = arith.constant 9.99999974E-6 : f32
    %172 = arith.addf %171, %cst_83 : f32
    %173 = math.rsqrt %172 : f32
    %174 = vector.broadcast %173 : f32 to vector<4x256xf32>
    %175 = arith.mulf %165, %174 : vector<4x256xf32>
    %176 = arith.mulf %175, %2 : vector<4x256xf32>
    %177 = arith.addf %176, %3 : vector<4x256xf32>
    %cst_84 = arith.constant dense<0.000000e+00> : vector<4x256xf32>
    %178 = tpu.matmul %11, %177, %cst_84 {dimension_numbers = #tpu.dot_dimension_numbers<[1], [0], [0], [1], [0, 0, 1, 1], [], []>} : vector<4x4xf32>, vector<4x256xf32>, vector<4x256xf32> -> vector<4x256xf32>
    %179 = arith.addf %178, %30 : vector<4x256xf32>
    %cst_85 = arith.constant 5.000000e-01 : f32
    %180 = vector.broadcast %cst_85 : f32 to vector<4x256xf32>
    %181 = arith.mulf %180, %179 : vector<4x256xf32>
    %cst_86 = arith.constant 0.707106769 : f32
    %182 = vector.broadcast %cst_86 : f32 to vector<4x256xf32>
    %183 = arith.mulf %179, %182 : vector<4x256xf32>
    %184 = math.erf %183 : vector<4x256xf32>
    %cst_87 = arith.constant 1.000000e+00 : f32
    %185 = vector.broadcast %cst_87 : f32 to vector<4x256xf32>
    %186 = arith.addf %185, %184 : vector<4x256xf32>
    %187 = arith.mulf %181, %186 : vector<4x256xf32>
    %cst_88 = arith.constant dense<0.000000e+00> : vector<4x256xf32>
    %188 = tpu.matmul %12, %187, %cst_88 {dimension_numbers = #tpu.dot_dimension_numbers<[1], [0], [0], [1], [0, 0, 1, 1], [], []>} : vector<4x4xf32>, vector<4x256xf32>, vector<4x256xf32> -> vector<4x256xf32>
    %189 = arith.addf %188, %33 : vector<4x256xf32>
    %190 = arith.addf %158, %189 : vector<4x256xf32>
    %c1_89 = arith.constant 1 : index
    %c0_90 = arith.constant 0 : index
    %c0_91 = arith.constant 0 : index
    %191 = vector.load %arg14[%c1_89, %c0_90, %c0_91] : memref<2x4x256xf32, #tpu.memory_space<vmem>>, vector<1x4x256xf32>
    %192 = vector.shape_cast %191 : vector<1x4x256xf32> to vector<4x256xf32>
    %193 = vector.shape_cast %190 : vector<4x256xf32> to vector<1x4x256xf32>
    tpu.vector_store %arg14[%c1_89, %c0_90, %c0_91], %193 {strides = array<i32>} : memref<2x4x256xf32, #tpu.memory_space<vmem>>, vector<1x4x256xf32>,
    return
  }
  func.func @transform_0(%arg0: i32) -> (i32, i32, i32) {
    %c0_i32 = arith.constant 0 : i32
    %c0_i32_0 = arith.constant 0 : i32
    %c0_i32_1 = arith.constant 0 : i32
    return %arg0, %c0_i32, %c0_i32_0 : i32, i32, i32
  }
  func.func @transform_1(%arg0: i32) -> (i32, i32) {
    %c0_i32 = arith.constant 0 : i32
    %c0_i32_0 = arith.constant 0 : i32
    %c0_i32_1 = arith.constant 0 : i32
    return %c0_i32, %c0_i32_0 : i32, i32
  }
  func.func @transform_2(%arg0: i32) -> (i32, i32) {
    %c0_i32 = arith.constant 0 : i32
    %c0_i32_0 = arith.constant 0 : i32
    %c0_i32_1 = arith.constant 0 : i32
    return %c0_i32, %c0_i32_0 : i32, i32
  }
  func.func @transform_3(%arg0: i32) -> (i32, i32, i32) {
    %c0_i32 = arith.constant 0 : i32
    %c0_i32_0 = arith.constant 0 : i32
    %c0_i32_1 = arith.constant 0 : i32
    %c0_i32_2 = arith.constant 0 : i32
    return %c0_i32, %c0_i32_0, %c0_i32_1 : i32, i32, i32
  }
  func.func @transform_4(%arg0: i32) -> (i32, i32, i32) {
    %c0_i32 = arith.constant 0 : i32
    %c0_i32_0 = arith.constant 0 : i32
    %c0_i32_1 = arith.constant 0 : i32
    %c0_i32_2 = arith.constant 0 : i32
    return %c0_i32, %c0_i32_0, %c0_i32_1 : i32, i32, i32
  }
  func.func @transform_5(%arg0: i32) -> (i32, i32) {
    %c0_i32 = arith.constant 0 : i32
    %c0_i32_0 = arith.constant 0 : i32
    %c0_i32_1 = arith.constant 0 : i32
    return %c0_i32, %c0_i32_0 : i32, i32
  }
  func.func @transform_6(%arg0: i32) -> (i32, i32) {
    %c0_i32 = arith.constant 0 : i32
    %c0_i32_0 = arith.constant 0 : i32
    %c0_i32_1 = arith.constant 0 : i32
    return %c0_i32, %c0_i32_0 : i32, i32
  }
  func.func @transform_7(%arg0: i32) -> (i32, i32) {
    %c0_i32 = arith.constant 0 : i32
    %c0_i32_0 = arith.constant 0 : i32
    %c0_i32_1 = arith.constant 0 : i32
    return %c0_i32, %c0_i32_0 : i32, i32
  }
  func.func @transform_8(%arg0: i32) -> (i32, i32) {
    %c0_i32 = arith.constant 0 : i32
    %c0_i32_0 = arith.constant 0 : i32
    %c0_i32_1 = arith.constant 0 : i32
    return %c0_i32, %c0_i32_0 : i32, i32
  }
  func.func @transform_9(%arg0: i32) -> (i32, i32) {
    %c0_i32 = arith.constant 0 : i32
    %c0_i32_0 = arith.constant 0 : i32
    %c0_i32_1 = arith.constant 0 : i32
    return %c0_i32, %c0_i32_0 : i32, i32
  }
  func.func @transform_10(%arg0: i32) -> (i32, i32) {
    %c0_i32 = arith.constant 0 : i32
    %c0_i32_0 = arith.constant 0 : i32
    %c0_i32_1 = arith.constant 0 : i32
    return %c0_i32, %c0_i32_0 : i32, i32
  }
  func.func @transform_11(%arg0: i32) -> (i32, i32) {
    %c0_i32 = arith.constant 0 : i32
    %c0_i32_0 = arith.constant 0 : i32
    %c0_i32_1 = arith.constant 0 : i32
    return %c0_i32, %c0_i32_0 : i32, i32
  }
  func.func @transform_12(%arg0: i32) -> (i32, i32) {
    %c0_i32 = arith.constant 0 : i32
    %c0_i32_0 = arith.constant 0 : i32
    %c0_i32_1 = arith.constant 0 : i32
    return %c0_i32, %c0_i32_0 : i32, i32
  }
  func.func @transform_13(%arg0: i32) -> (i32, i32, i32) {
    %c0_i32 = arith.constant 0 : i32
    %c0_i32_0 = arith.constant 0 : i32
    %c0_i32_1 = arith.constant 0 : i32
    return %arg0, %c0_i32, %c0_i32_0 : i32, i32, i32
  }
}

</mosaic_0001>

<bundles_post_ra>
// kernel: self_attention_block.1
= control target key start
LH: loop header
LB: loop body
LE: loop exit
PB: predicated region body
PF: predicated region fallthrough
CT: control target
= control target key end

     0   :  { %vm98_vm0 = vcmask 1043456   ;;  %v9317_v26 = vmov 0.0   ;;  %v6622_v27 = vmov 0   ;;  %vm141_vm1 = vcmask 31744   ;;  %s9303_s0 = inlined_call_operand.vmem [shape: f32[2,4,256], index: 0, kind: input, shape index: {}]   ;;  %s9304_s4 = inlined_call_operand.vmem [shape: f32[3,4,1], index: 4, kind: input, shape index: {}]   ;;  %s9305_s1 = inlined_call_operand.vmem [shape: f32[4,256], index: 1, kind: input, shape index: {}]   ;;  %s9306_s2 = inlined_call_operand.vmem [shape: f32[4,256], index: 2, kind: input, shape index: {}]   ;;  %s9307_s3 = inlined_call_operand.vmem [shape: f32[3,4,4], index: 3, kind: input, shape index: {}]   ;;  %s9308_s6 = inlined_call_operand.vmem [shape: f32[4,1], index: 6, kind: input, shape index: {}]   ;;  %s9309_s5 = inlined_call_operand.vmem [shape: f32[4,4], index: 5, kind: input, shape index: {}]   ;;  %s9310_s7 = inlined_call_operand.vmem [shape: f32[4,256], index: 7, kind: input, shape index: {}]   ;;  %s9311_s8 = inlined_call_operand.vmem [shape: f32[4,256], index: 8, kind: input, shape index: {}]   ;;  %s9312_s9 = inlined_call_operand.vmem [shape: f32[4,4], index: 9, kind: input, shape index: {}]   ;;  %s9313_s10 = inlined_call_operand.vmem [shape: f32[4,1], index: 10, kind: input, shape index: {}]   ;;  %s9314_s11 = inlined_call_operand.vmem [shape: f32[4,4], index: 11, kind: input, shape index: {}]   ;;  %s9315_s12 = inlined_call_operand.vmem [shape: f32[4,1], index: 12, kind: input, shape index: {}]   ;;  %s9316_s13 = inlined_call_operand.vmem [shape: f32[2,4,256], index: 13, kind: output, shape index: {}]  }
   0x1   :  { %v94_v0 = vld [vmem:[%s9303_s0] sm:$0xff]  ;;  %213 = vmatprep.mubr.f32.mxu0 %v9317_v26  ;;  %287 = vmatprep.mubr.f32.mxu1 %v9317_v26  ;;  %v5359_v41 = vld [vmem:[%s9307_s3 + $0x8] sm:$0xf]  ;;  %v6623_v43 = vmov 1983009808   ;;  %v374_v45 = vlaneseq  ;;  %vm580_vm2 = vcmask 1041408  }
   0x2   :  { %v6697_v1 = vcombine.high %v94_v0, %v94_v0  ;;  %v99_v2 = vsel %vm98_vm0, %v94_v0, 0.0  ;;  %5819 = vset.pattern.permute.xlu1 %v6622_v27  ;;  %v56_v28 = vld [vmem:[%s9304_s4] sm:$0xf]  ;;  %v5360_v29 = vld [vmem:[%s9304_s4 + $0x4] sm:$0xf]  ;;  %v372_v44 = vunpack.c.l.s4 %v6623_v43  ;;  %vm483_vm3 = vcmask 15360  }
   0x3   :  { %59 = vperm.xlu1 %5819, %v56_v28   ;;  %v44_v32 = vld [vmem:[%s9305_s1] sm:$0xff]  ;;  %v375_v48 = vshrl.u32 %v374_v45, 7 }
   0x4   :  { %9655 = vst [vmem:[#allocation2_spill] sm:$0xff] %v6697_v1  ;;  %v100_v3 = vsel %vm98_vm0, %v6697_v1, 0.0  ;;  %v45_v35 = vld [vmem:[%s9306_s2] sm:$0xff]  ;;  %v373_v47 = vunpack.c.0.s8 %v372_v44 }
   0x5   :  { %v101_v4 = vadd.f32 %v100_v3, %v99_v2  ;;  %v48_v39 = vld [vmem:[%s9307_s3] sm:$0xf]  ;;  %v5358_v40 = vld [vmem:[%s9307_s3 + $0x4] sm:$0xf] }
   0x6   :  { %v6748_v57 = vsub.s32 %v373_v47, %v375_v48 }
   0x7   :  { %102 = vadd.xlane.f32.xlu0 %v101_v4  ;;  %66 = vperm.xlu1 %5819, %v5360_v29  }
   0x8   :  { %9658 = vst [vmem:[#allocation5_spill] sm:$0xff] %v6748_v57 }
  0x82   :  { %v6740_v42 = vpop.permute.xlu1 %59 }
  0x83   :  { %9656 = vst [vmem:[#allocation3_spill] sm:$0xff] %v6740_v42 }
  0x86   :  { %v6742_v46 = vpop.permute.xlu1 %66 }
  0x87   :  { %9657 = vst [vmem:[#allocation4_spill] sm:$0xff] %v6742_v46 }
  0x94   :  { %v103_v5 = vpop.xlane.xlu0 %102 }
  0x95   :  { %v104_v6 = vrot.slane %v103_v5, 4 }
  0x97   :  { %v105_v7 = vadd.f32 %v104_v6, %v103_v5 }
  0x99   :  { %v106_v8 = vrot.slane %v105_v7, 2 }
  0x9b   :  { %v107_v9 = vadd.f32 %v106_v8, %v105_v7 }
  0x9d   :  { %v108_v10 = vrot.slane %v107_v9, 1 }
  0x9f   :  { %v109_v11 = vadd.f32 %v108_v10, %v107_v9 }
  0xa1   :  { %5792 = vpush %v109_v11 }
  0xd2   :  { %s5793_s27 = spop %5792 }
  0xd3   :  { %s111_s28 = smul.f32 0.0009765625, %s5793_s27 }
  0xd5   :  { %v112_v12 = vstv %s111_s28 }
  0xd6   :  { %v113_v13 = vsub.f32 %v94_v0, %v112_v12 }
  0xd8   :  { %v114_v14 = vmul.f32 %v113_v13, %v113_v13 }
  0xda   :  { %v116_v15 = vcombine.high %v114_v14, %v114_v14  ;;  %v118_v16 = vsel %vm98_vm0, %v114_v14, 0.0 }
  0xdc   :  { %v119_v17 = vsel %vm98_vm0, %v116_v15, 0.0 }
  0xdd   :  { %v120_v18 = vadd.f32 %v119_v17, %v118_v16 }
  0xdf   :  { %121 = vadd.xlane.f32.xlu0 %v120_v18 }
 0x16c   :  { %v122_v19 = vpop.xlane.xlu0 %121 }
 0x16d   :  { %v123_v20 = vrot.slane %v122_v19, 4 }
 0x16f   :  { %v124_v21 = vadd.f32 %v123_v20, %v122_v19 }
 0x171   :  { %v125_v22 = vrot.slane %v124_v21, 2 }
 0x173   :  { %v126_v23 = vadd.f32 %v125_v22, %v124_v21 }
 0x175   :  { %v127_v24 = vrot.slane %v126_v23, 1 }
 0x177   :  { %v128_v25 = vadd.f32 %v127_v24, %v126_v23 }
 0x179   :  { %5794 = vpush %v128_v25 }
 0x1aa   :  { %s5795_s16 = spop %5794 }
 0x1ab   :  { %s130_s17 = smul.f32 0.0009765625, %s5795_s16 }
 0x1ad   :  { %s131_s18 = sadd.f32 1e-05, %s130_s17 }
 0x1af   :  { %v132_v30 = vstv %s131_s18 }
 0x1b0   :  { %5825 = vrsqrt.f32 %v132_v30 }
 0x1ba   :  { %v5826_v31 = vpop.eup %5825 }
 0x1bb   :  { %5796 = vpush %v5826_v31 }
 0x1ec   :  { %s5797_s19 = spop %5796 }
 0x1ed   :  { %v135_v33 = vstv %s5797_s19 }
 0x1ee   :  { %v136_v34 = vmul.f32 %v135_v33, %v113_v13 }
 0x1f0   :  { %v137_v36 = vmul.f32 %v136_v34, %v44_v32 }
 0x1f2   :  { %v138_v37 = vadd.f32 %v137_v36, %v45_v35 }
 0x1f4   :  { %v140_v38 = vcombine.high %v138_v37, %v138_v37 }
 0x1f6   :  { %5362 = vmatprep.subr.msk.mxu0 %vm98_vm0, %v140_v38  ;;  %5365 = vmatprep.subr.msk.mxu1 %vm98_vm0, %v140_v38 }
 0x1f7   :  { %5363 = vmatpush1.msk.msra.mxu0 %vm98_vm0, %v138_v37  ;;  %5366 = vmatpush1.msk.msra.mxu1 %vm98_vm0, %v138_v37 }
 0x1f8   :  { %5364 = vmatmul.mubr.msk.f32.vlgmr.msra.gmra.mrb[0].mxu0 %vm141_vm1, %v48_v39  ;;  %5367 = vmatmul.mubr.msk.f32.vlgmr.msra.gmra.mrb[0].mxu1 %vm141_vm1, %v5358_v40 }
 0x1f9   :  { %5368 = vmatprep.subr.msk.mxu0 %vm98_vm0, %v140_v38  ;;  %361 = vmatprep.mubr.f32.mxu0 %v9317_v26 }
 0x1fa   :  { %5369 = vmatpush1.msk.msra.mxu0 %vm98_vm0, %v138_v37  ;;  %649 = vmatprep.mubr.f32.mxu1 %v9317_v26 }
 0x1fc   :  { %5370 = vmatmul.mubr.msk.f32.vlgmr.msra.gmra.mrb[2].mxu0 %vm141_vm1, %v5359_v41 }
 0x1fd   :  { %1088 = vmatprep.mubr.f32.mxu0 %v9317_v26 }
 0x2cb   :  { %v215_v49 = vpop.f32.mrb[0].mxu0  ;;  %v289_v50 = vpop.f32.mrb[0].mxu1 }
 0x2cc   :  { %v216_v51 = vadd.f32 %v215_v49, %v6740_v42  ;;  %v217_v52 = vpop.f32.mrb[1].mxu0  ;;  %v290_v53 = vadd.f32 %v289_v50, %v6742_v46  ;;  %v291_v54 = vpop.f32.mrb[1].mxu1 }
 0x2cd   :  { %v218_v55 = vadd.f32 %v217_v52, %v6740_v42  ;;  %v292_v56 = vadd.f32 %v291_v54, %v6742_v46 }
 0x2cf   :  { %v370_v58 = vcombine.low %v216_v51, %v218_v55  ;;  %v381_v59 = vcombine.low %v290_v53, %v292_v56  ;;  %v6761_v9 = vpop.f32.mrb[2].mxu0 }
 0x2d0   :  { %9659 = vst [vmem:[#allocation6_spill] sm:$0xff] %v6761_v9  ;;  %v6847_v56 = vpop.f32.mrb[3].mxu0 }
 0x2d1   :  { %v388_v60 = vrot.slane %v381_v59, %v6748_v57  ;;  %v377_v61 = vrot.slane %v370_v58, %v6748_v57  ;;  %9660 = vst [vmem:[#allocation7_spill] sm:$0xff] %v6847_v56 }
 0x2d3   :  { %v389_v62 = vcombine.high %v388_v60, %v388_v60  ;;  %v481_v63 = vrot.slane %v388_v60, %v6748_v57  ;;  %v407_v0 = vrot.slane %v377_v61, %v6748_v57  ;;  %v378_v2 = vcombine.high %v377_v61, %v377_v61 }
 0x2d5   :  { %v922_v3 = vrot.slane %v389_v62, %v6748_v57  ;;  %411 = vxpose.xlu0.b32.start.end [1/1] (short) %v407_v0, 128  ;;  %v482_v4 = vcombine.high %v481_v63, %v481_v63  ;;  %v848_v5 = vrot.slane %v378_v2, %v6748_v57  ;;  %v408_v8 = vcombine.high %v407_v0, %v407_v0 }
 0x2d7   :  { %5371 = vmatprep.subr.msk.mxu1 %vm580_vm2, %v482_v4  ;;  %852 = vxpose.xlu1.b32.start.end [1/1] (short) %v848_v5, 128  ;;  %v923_v6 = vcombine.high %v922_v3, %v922_v3  ;;  %v849_v7 = vcombine.high %v848_v5, %v848_v5 }
 0x2d8   :  { %5372 = vmatpush1.msk.msra.mxu1 %vm580_vm2, %v481_v63 }
 0x2d9   :  { %5405 = vmatprep.subr.msk.mxu0 %vm580_vm2, %v923_v6 }
 0x2da   :  { %5406 = vmatpush1.msk.msra.mxu0 %vm580_vm2, %v922_v3 }
 0x312   :  { %884 = vxpose.xlu0.b32.start.end [1/1] (short) %v849_v7, 128 }
 0x314   :  { %443 = vxpose.xlu1.b32.start.end [1/1] (short) %v408_v8, 128 }
 0x33b   :  { %5820 = vset.pattern.permute.xlu0 %v6622_v27 }
 0x355   :  { %v427_v10 = vpop.trf.xlu0 }
 0x356   :  { %5373 = vmatmul.mubr.msk.f32.vlgmr.msra.gmra.mrb[2].mxu1 %vm483_vm3, %v427_v10 }
 0x357   :  { %v868_v11 = vpop.trf.xlu1  ;;  %655 = vmatprep.mubr.f32.mxu1 %v9317_v26 }
 0x358   :  { %5407 = vmatmul.mubr.msk.f32.vlgmr.msra.gmra.mrb[4].mxu0 %vm483_vm3, %v868_v11 }
 0x359   :  { %v428_v12 = vpop.trf.xlu0  ;;  %1094 = vmatprep.mubr.f32.mxu0 %v9317_v26 }
 0x35a   :  { %5374 = vmatmul.mubr.msk.f32.gmra.mrb[4].mxu1 %vm483_vm3, %v428_v12 }
 0x35b   :  { %v869_v13 = vpop.trf.xlu1  ;;  %661 = vmatprep.mubr.f32.mxu1 %v9317_v26 }
 0x35c   :  { %5408 = vmatmul.mubr.msk.f32.gmra.mrb[6].mxu0 %vm483_vm3, %v869_v13 }
 0x35d   :  { %v429_v14 = vpop.trf.xlu0  ;;  %1100 = vmatprep.mubr.f32.mxu0 %v9317_v26 }
 0x35e   :  { %5375 = vmatmul.mubr.msk.f32.gmra.mrb[6].mxu1 %vm483_vm3, %v429_v14 }
 0x35f   :  { %v870_v15 = vpop.trf.xlu1  ;;  %667 = vmatprep.mubr.f32.mxu1 %v9317_v26 }
 0x360   :  { %5409 = vmatmul.mubr.msk.f32.gmra.mrb[8].mxu0 %vm483_vm3, %v870_v15 }
 0x361   :  { %v430_v16 = vpop.trf.xlu0  ;;  %1106 = vmatprep.mubr.f32.mxu0 %v9317_v26 }
 0x362   :  { %5376 = vmatmul.mubr.msk.f32.gmra.mrb[8].mxu1 %vm483_vm3, %v430_v16 }
 0x363   :  { %v871_v17 = vpop.trf.xlu1  ;;  %673 = vmatprep.mubr.f32.mxu1 %v9317_v26 }
 0x364   :  { %5410 = vmatmul.mubr.msk.f32.gmra.mrb[10].mxu0 %vm483_vm3, %v871_v17 }
 0x365   :  { %v431_v18 = vpop.trf.xlu0  ;;  %1112 = vmatprep.mubr.f32.mxu0 %v9317_v26 }
 0x366   :  { %5377 = vmatmul.mubr.msk.f32.gmra.mrb[10].mxu1 %vm483_vm3, %v431_v18 }
 0x367   :  { %v872_v19 = vpop.trf.xlu1  ;;  %679 = vmatprep.mubr.f32.mxu1 %v9317_v26 }
 0x368   :  { %5411 = vmatmul.mubr.msk.f32.gmra.mrb[12].mxu0 %vm483_vm3, %v872_v19 }
 0x369   :  { %v432_v20 = vpop.trf.xlu0  ;;  %1118 = vmatprep.mubr.f32.mxu0 %v9317_v26 }
 0x36a   :  { %5378 = vmatmul.mubr.msk.f32.gmra.mrb[12].mxu1 %vm483_vm3, %v432_v20 }
 0x36b   :  { %v873_v21 = vpop.trf.xlu1  ;;  %685 = vmatprep.mubr.f32.mxu1 %v9317_v26 }
 0x36c   :  { %5412 = vmatmul.mubr.msk.f32.gmra.mrb[14].mxu0 %vm483_vm3, %v873_v21 }
 0x36d   :  { %v433_v22 = vpop.trf.xlu0  ;;  %1124 = vmatprep.mubr.f32.mxu0 %v9317_v26 }
 0x36e   :  { %5379 = vmatmul.mubr.msk.f32.gmra.mrb[14].mxu1 %vm483_vm3, %v433_v22 }
 0x36f   :  { %v874_v23 = vpop.trf.xlu1  ;;  %691 = vmatprep.mubr.f32.mxu1 %v9317_v26 }
 0x370   :  { %5413 = vmatmul.mubr.msk.f32.gmra.mrb[16].mxu0 %vm483_vm3, %v874_v23 }
 0x371   :  { %v434_v24 = vpop.trf.xlu0  ;;  %1130 = vmatprep.mubr.f32.mxu0 %v9317_v26 }
 0x372   :  { %5380 = vmatmul.mubr.msk.f32.gmra.mrb[16].mxu1 %vm483_vm3, %v434_v24 }
 0x373   :  { %v875_v25 = vpop.trf.xlu1  ;;  %697 = vmatprep.mubr.f32.mxu1 %v9317_v26 }
 0x374   :  { %5414 = vmatmul.mubr.msk.f32.gmra.mrb[18].mxu0 %vm483_vm3, %v875_v25 }
 0x375   :  { %v435_v27 = vpop.trf.xlu0  ;;  %1136 = vmatprep.mubr.f32.mxu0 %v9317_v26 }
 0x376   :  { %5381 = vmatmul.mubr.msk.f32.gmra.mrb[18].mxu1 %vm483_vm3, %v435_v27 }
 0x377   :  { %v876_v28 = vpop.trf.xlu1  ;;  %703 = vmatprep.mubr.f32.mxu1 %v9317_v26 }
 0x378   :  { %5415 = vmatmul.mubr.msk.f32.gmra.mrb[20].mxu0 %vm483_vm3, %v876_v28 }
 0x379   :  { %v436_v29 = vpop.trf.xlu0  ;;  %1142 = vmatprep.mubr.f32.mxu0 %v9317_v26 }
 0x37a   :  { %5382 = vmatmul.mubr.msk.f32.gmra.mrb[20].mxu1 %vm483_vm3, %v436_v29 }
 0x37b   :  { %v877_v30 = vpop.trf.xlu1  ;;  %709 = vmatprep.mubr.f32.mxu1 %v9317_v26 }
 0x37c   :  { %5416 = vmatmul.mubr.msk.f32.gmra.mrb[22].mxu0 %vm483_vm3, %v877_v30 }
 0x37d   :  { %v437_v31 = vpop.trf.xlu0  ;;  %1148 = vmatprep.mubr.f32.mxu0 %v9317_v26 }
 0x37e   :  { %5383 = vmatmul.mubr.msk.f32.gmra.mrb[22].mxu1 %vm483_vm3, %v437_v31 }
 0x37f   :  { %v878_v32 = vpop.trf.xlu1  ;;  %715 = vmatprep.mubr.f32.mxu1 %v9317_v26 }
 0x380   :  { %5417 = vmatmul.mubr.msk.f32.gmra.mrb[24].mxu0 %vm483_vm3, %v878_v32 }
 0x381   :  { %v438_v33 = vpop.trf.xlu0  ;;  %1154 = vmatprep.mubr.f32.mxu0 %v9317_v26 }
 0x382   :  { %5384 = vmatmul.mubr.msk.f32.gmra.mrb[24].mxu1 %vm483_vm3, %v438_v33 }
 0x383   :  { %v879_v34 = vpop.trf.xlu1  ;;  %721 = vmatprep.mubr.f32.mxu1 %v9317_v26 }
 0x384   :  { %5418 = vmatmul.mubr.msk.f32.gmra.mrb[26].mxu0 %vm483_vm3, %v879_v34 }
 0x385   :  { %v439_v35 = vpop.trf.xlu0  ;;  %1160 = vmatprep.mubr.f32.mxu0 %v9317_v26 }
 0x386   :  { %5385 = vmatmul.mubr.msk.f32.gmra.mrb[26].mxu1 %vm483_vm3, %v439_v35 }
 0x387   :  { %v880_v36 = vpop.trf.xlu1  ;;  %727 = vmatprep.mubr.f32.mxu1 %v9317_v26 }
 0x388   :  { %5419 = vmatmul.mubr.msk.f32.gmra.mrb[28].mxu0 %vm483_vm3, %v880_v36 }
 0x389   :  { %v440_v37 = vpop.trf.xlu0  ;;  %1166 = vmatprep.mubr.f32.mxu0 %v9317_v26 }
 0x38a   :  { %5386 = vmatmul.mubr.msk.f32.gmra.mrb[28].mxu1 %vm483_vm3, %v440_v37 }
 0x38b   :  { %v881_v38 = vpop.trf.xlu1  ;;  %733 = vmatprep.mubr.f32.mxu1 %v9317_v26 }
 0x38c   :  { %5420 = vmatmul.mubr.msk.f32.gmra.mrb[30].mxu0 %vm483_vm3, %v881_v38 }
 0x38d   :  { %v441_v39 = vpop.trf.xlu0  ;;  %1172 = vmatprep.mubr.f32.mxu0 %v9317_v26 }
 0x38e   :  { %5387 = vmatmul.mubr.msk.f32.gmra.mrb[30].mxu1 %vm483_vm3, %v441_v39 }
 0x38f   :  { %v882_v40 = vpop.trf.xlu1  ;;  %739 = vmatprep.mubr.f32.mxu1 %v9317_v26 }
 0x390   :  { %5421 = vmatmul.mubr.msk.f32.gmra.mrb[32].mxu0 %vm483_vm3, %v882_v40 }
 0x391   :  { %v442_v41 = vpop.trf.xlu0  ;;  %1178 = vmatprep.mubr.f32.mxu0 %v9317_v26 }
 0x392   :  { %5388 = vmatmul.mubr.msk.f32.gmra.mrb[32].mxu1 %vm483_vm3, %v442_v41 }
 0x393   :  { %v883_v43 = vpop.trf.xlu1  ;;  %745 = vmatprep.mubr.f32.mxu1 %v9317_v26 }
 0x394   :  { %5422 = vmatmul.mubr.msk.f32.gmra.mrb[34].mxu0 %vm483_vm3, %v883_v43 }
 0x395   :  { %1184 = vmatprep.mubr.f32.mxu0 %v9317_v26  ;;  %v900_v44 = vpop.trf.xlu0 }
 0x397   :  { %v459_v45 = vpop.trf.xlu1 }
 0x398   :  { %5389 = vmatmul.mubr.msk.f32.gmra.mrb[34].mxu1 %vm483_vm3, %v459_v45  ;;  %5423 = vmatmul.mubr.msk.f32.gmra.mrb[36].mxu0 %vm483_vm3, %v900_v44 }
 0x399   :  { %751 = vmatprep.mubr.f32.mxu1 %v9317_v26  ;;  %1190 = vmatprep.mubr.f32.mxu0 %v9317_v26  ;;  %v901_v47 = vpop.trf.xlu0 }
 0x39b   :  { %v460_v48 = vpop.trf.xlu1 }
 0x39c   :  { %5390 = vmatmul.mubr.msk.f32.gmra.mrb[36].mxu1 %vm483_vm3, %v460_v48  ;;  %5424 = vmatmul.mubr.msk.f32.gmra.mrb[38].mxu0 %vm483_vm3, %v901_v47 }
 0x39d   :  { %757 = vmatprep.mubr.f32.mxu1 %v9317_v26  ;;  %1196 = vmatprep.mubr.f32.mxu0 %v9317_v26  ;;  %v902_v49 = vpop.trf.xlu0 }
 0x39f   :  { %v461_v50 = vpop.trf.xlu1 }
 0x3a0   :  { %5391 = vmatmul.mubr.msk.f32.gmra.mrb[38].mxu1 %vm483_vm3, %v461_v50  ;;  %5425 = vmatmul.mubr.msk.f32.gmra.mrb[40].mxu0 %vm483_vm3, %v902_v49 }
 0x3a1   :  { %763 = vmatprep.mubr.f32.mxu1 %v9317_v26  ;;  %1202 = vmatprep.mubr.f32.mxu0 %v9317_v26  ;;  %v903_v51 = vpop.trf.xlu0 }
 0x3a3   :  { %v462_v52 = vpop.trf.xlu1 }
 0x3a4   :  { %5392 = vmatmul.mubr.msk.f32.gmra.mrb[40].mxu1 %vm483_vm3, %v462_v52  ;;  %5426 = vmatmul.mubr.msk.f32.gmra.mrb[42].mxu0 %vm483_vm3, %v903_v51 }
 0x3a5   :  { %769 = vmatprep.mubr.f32.mxu1 %v9317_v26  ;;  %1208 = vmatprep.mubr.f32.mxu0 %v9317_v26  ;;  %v904_v53 = vpop.trf.xlu0 }
 0x3a7   :  { %v463_v54 = vpop.trf.xlu1 }
 0x3a8   :  { %5393 = vmatmul.mubr.msk.f32.gmra.mrb[42].mxu1 %vm483_vm3, %v463_v54  ;;  %5427 = vmatmul.mubr.msk.f32.gmra.mrb[44].mxu0 %vm483_vm3, %v904_v53 }
 0x3a9   :  { %775 = vmatprep.mubr.f32.mxu1 %v9317_v26  ;;  %1214 = vmatprep.mubr.f32.mxu0 %v9317_v26  ;;  %v905_v55 = vpop.trf.xlu0 }
 0x3ab   :  { %v464_v58 = vpop.trf.xlu1 }
 0x3ac   :  { %5394 = vmatmul.mubr.msk.f32.gmra.mrb[44].mxu1 %vm483_vm3, %v464_v58  ;;  %5428 = vmatmul.mubr.msk.f32.gmra.mrb[46].mxu0 %vm483_vm3, %v905_v55 }
 0x3ad   :  { %781 = vmatprep.mubr.f32.mxu1 %v9317_v26  ;;  %1220 = vmatprep.mubr.f32.mxu0 %v9317_v26  ;;  %v906_v59 = vpop.trf.xlu0 }
 0x3af   :  { %v465_v60 = vpop.trf.xlu1 }
 0x3b0   :  { %5395 = vmatmul.mubr.msk.f32.gmra.mrb[46].mxu1 %vm483_vm3, %v465_v60  ;;  %5429 = vmatmul.mubr.msk.f32.gmra.mrb[48].mxu0 %vm483_vm3, %v906_v59 }
 0x3b1   :  { %787 = vmatprep.mubr.f32.mxu1 %v9317_v26  ;;  %1226 = vmatprep.mubr.f32.mxu0 %v9317_v26  ;;  %v907_v61 = vpop.trf.xlu0 }
 0x3b3   :  { %v466_v62 = vpop.trf.xlu1 }
 0x3b4   :  { %5396 = vmatmul.mubr.msk.f32.gmra.mrb[48].mxu1 %vm483_vm3, %v466_v62  ;;  %5430 = vmatmul.mubr.msk.f32.gmra.mrb[50].mxu0 %vm483_vm3, %v907_v61 }
 0x3b5   :  { %793 = vmatprep.mubr.f32.mxu1 %v9317_v26  ;;  %1232 = vmatprep.mubr.f32.mxu0 %v9317_v26  ;;  %v908_v63 = vpop.trf.xlu0 }
 0x3b7   :  { %v467_v0 = vpop.trf.xlu1 }
 0x3b8   :  { %5397 = vmatmul.mubr.msk.f32.gmra.mrb[50].mxu1 %vm483_vm3, %v467_v0  ;;  %5431 = vmatmul.mubr.msk.f32.gmra.mrb[52].mxu0 %vm483_vm3, %v908_v63 }
 0x3b9   :  { %799 = vmatprep.mubr.f32.mxu1 %v9317_v26  ;;  %1238 = vmatprep.mubr.f32.mxu0 %v9317_v26  ;;  %v909_v2 = vpop.trf.xlu0 }
 0x3bb   :  { %v468_v3 = vpop.trf.xlu1 }
 0x3bc   :  { %5398 = vmatmul.mubr.msk.f32.gmra.mrb[52].mxu1 %vm483_vm3, %v468_v3  ;;  %5432 = vmatmul.mubr.msk.f32.gmra.mrb[54].mxu0 %vm483_vm3, %v909_v2 }
 0x3bd   :  { %805 = vmatprep.mubr.f32.mxu1 %v9317_v26  ;;  %1244 = vmatprep.mubr.f32.mxu0 %v9317_v26  ;;  %v910_v4 = vpop.trf.xlu0 }
 0x3bf   :  { %v469_v5 = vpop.trf.xlu1 }
 0x3c0   :  { %5399 = vmatmul.mubr.msk.f32.gmra.mrb[54].mxu1 %vm483_vm3, %v469_v5  ;;  %5433 = vmatmul.mubr.msk.f32.gmra.mrb[56].mxu0 %vm483_vm3, %v910_v4 }
 0x3c1   :  { %811 = vmatprep.mubr.f32.mxu1 %v9317_v26  ;;  %1250 = vmatprep.mubr.f32.mxu0 %v9317_v26  ;;  %v911_v6 = vpop.trf.xlu0 }
 0x3c3   :  { %v470_v7 = vpop.trf.xlu1 }
 0x3c4   :  { %5400 = vmatmul.mubr.msk.f32.gmra.mrb[56].mxu1 %vm483_vm3, %v470_v7  ;;  %5434 = vmatmul.mubr.msk.f32.gmra.mrb[58].mxu0 %vm483_vm3, %v911_v6 }
 0x3c5   :  { %817 = vmatprep.mubr.f32.mxu1 %v9317_v26  ;;  %1256 = vmatprep.mubr.f32.mxu0 %v9317_v26  ;;  %v912_v8 = vpop.trf.xlu0 }
 0x3c7   :  { %v471_v10 = vpop.trf.xlu1 }
 0x3c8   :  { %5401 = vmatmul.mubr.msk.f32.gmra.mrb[58].mxu1 %vm483_vm3, %v471_v10  ;;  %5435 = vmatmul.mubr.msk.f32.gmra.mrb[60].mxu0 %vm483_vm3, %v912_v8 }
 0x3c9   :  { %823 = vmatprep.mubr.f32.mxu1 %v9317_v26  ;;  %1262 = vmatprep.mubr.f32.mxu0 %v9317_v26  ;;  %v913_v11 = vpop.trf.xlu0 }
 0x3cb   :  { %v472_v12 = vpop.trf.xlu1 }
 0x3cc   :  { %5402 = vmatmul.mubr.msk.f32.gmra.mrb[60].mxu1 %vm483_vm3, %v472_v12  ;;  %5436 = vmatmul.mubr.msk.f32.gmra.mrb[62].mxu0 %vm483_vm3, %v913_v11 }
 0x3cd   :  { %829 = vmatprep.mubr.f32.mxu1 %v9317_v26  ;;  %1268 = vmatprep.mubr.f32.mxu0 %v9317_v26  ;;  %v914_v13 = vpop.trf.xlu0 }
 0x3cf   :  { %v473_v14 = vpop.trf.xlu1 }
 0x3d0   :  { %5403 = vmatmul.mubr.msk.f32.gmra.mrb[62].mxu1 %vm483_vm3, %v473_v14  ;;  %5437 = vmatmul.mubr.msk.f32.gmra.mrb[64].mxu0 %vm483_vm3, %v914_v13 }
 0x3d1   :  { %835 = vmatprep.mubr.f32.mxu1 %v9317_v26  ;;  %1274 = vmatprep.mubr.f32.mxu0 %v9317_v26  ;;  %v915_v15 = vpop.trf.xlu0 }
 0x3d3   :  { %v474_v16 = vpop.trf.xlu1 }
 0x3d4   :  { %5404 = vmatmul.mubr.msk.f32.gmra.mrb[64].mxu1 %vm483_vm3, %v474_v16  ;;  %5438 = vmatmul.mubr.msk.f32.gmra.mrb[66].mxu0 %vm483_vm3, %v915_v15 }
 0x429   :  { %v6891_v17 = vpop.f32.mrb[2].mxu1 }
 0x42a   :  { %v6893_v18 = vpop.f32.mrb[3].mxu1 }
 0x42b   :  { %v6895_v19 = vpop.f32.mrb[4].mxu0  ;;  %v1281_v20 = vmax.f32 %v6891_v17, %v6893_v18 }
 0x42c   :  { %v6899_v21 = vpop.f32.mrb[5].mxu0 }
 0x42d   :  { %v6901_v22 = vpop.f32.mrb[4].mxu1  ;;  %1282 = vmax.xlane.f32.xlu1 %v1281_v20  ;;  %v1377_v23 = vmax.f32 %v6895_v19, %v6899_v21 }
 0x42e   :  { %v6905_v24 = vpop.f32.mrb[5].mxu1 }
 0x42f   :  { %v6907_v25 = vpop.f32.mrb[6].mxu0  ;;  %v1284_v27 = vmax.f32 %v6901_v22, %v6905_v24 }
 0x430   :  { %v6911_v28 = vpop.f32.mrb[7].mxu0 }
 0x431   :  { %1378 = vmax.xlane.f32.xlu1 %v1377_v23  ;;  %1285 = vmax.xlane.f32.xlu0 %v1284_v27  ;;  %v6913_v29 = vpop.f32.mrb[6].mxu1  ;;  %v1380_v30 = vmax.f32 %v6907_v25, %v6911_v28 }
 0x432   :  { %v6917_v31 = vpop.f32.mrb[7].mxu1 }
 0x433   :  { %v6919_v32 = vpop.f32.mrb[8].mxu0  ;;  %v1287_v33 = vmax.f32 %v6913_v29, %v6917_v31 }
 0x434   :  { %v6923_v34 = vpop.f32.mrb[9].mxu0 }
 0x435   :  { %v6925_v35 = vpop.f32.mrb[8].mxu1  ;;  %1381 = vmax.xlane.f32.xlu1 %v1380_v30  ;;  %v1383_v36 = vmax.f32 %v6919_v32, %v6923_v34 }
 0x436   :  { %v6929_v37 = vpop.f32.mrb[9].mxu1 }
 0x437   :  { %v6931_v38 = vpop.f32.mrb[10].mxu0  ;;  %v1290_v39 = vmax.f32 %v6925_v35, %v6929_v37 }
 0x438   :  { %v6935_v40 = vpop.f32.mrb[11].mxu0 }
 0x439   :  { %1288 = vmax.xlane.f32.xlu1 %v1287_v33  ;;  %1291 = vmax.xlane.f32.xlu0 %v1290_v39  ;;  %v6937_v41 = vpop.f32.mrb[10].mxu1  ;;  %v1386_v43 = vmax.f32 %v6931_v38, %v6935_v40 }
 0x43a   :  { %v6941_v44 = vpop.f32.mrb[11].mxu1 }
 0x43b   :  { %v6943_v45 = vpop.f32.mrb[12].mxu0  ;;  %v1293_v47 = vmax.f32 %v6937_v41, %v6941_v44 }
 0x43c   :  { %v6947_v48 = vpop.f32.mrb[13].mxu0 }
 0x43d   :  { %v6949_v49 = vpop.f32.mrb[12].mxu1  ;;  %1384 = vmax.xlane.f32.xlu1 %v1383_v36  ;;  %1387 = vmax.xlane.f32.xlu0 %v1386_v43  ;;  %v1389_v50 = vmax.f32 %v6943_v45, %v6947_v48 }
 0x43e   :  { %v6953_v51 = vpop.f32.mrb[13].mxu1 }
 0x43f   :  { %v6955_v52 = vpop.f32.mrb[14].mxu0  ;;  %v1296_v53 = vmax.f32 %v6949_v49, %v6953_v51 }
 0x440   :  { %v6959_v54 = vpop.f32.mrb[15].mxu0 }
 0x441   :  { %1294 = vmax.xlane.f32.xlu1 %v1293_v47  ;;  %1297 = vmax.xlane.f32.xlu0 %v1296_v53  ;;  %v6961_v55 = vpop.f32.mrb[14].mxu1  ;;  %v1392_v58 = vmax.f32 %v6955_v52, %v6959_v54 }
 0x442   :  { %v6965_v59 = vpop.f32.mrb[15].mxu1 }
 0x443   :  { %v6967_v60 = vpop.f32.mrb[16].mxu0  ;;  %v1299_v61 = vmax.f32 %v6961_v55, %v6965_v59 }
 0x444   :  { %v6971_v62 = vpop.f32.mrb[17].mxu0 }
 0x445   :  { %v6973_v63 = vpop.f32.mrb[16].mxu1  ;;  %1390 = vmax.xlane.f32.xlu1 %v1389_v50  ;;  %1393 = vmax.xlane.f32.xlu0 %v1392_v58  ;;  %v1395_v0 = vmax.f32 %v6967_v60, %v6971_v62 }
 0x446   :  { %v6977_v2 = vpop.f32.mrb[17].mxu1 }
 0x447   :  { %v6979_v3 = vpop.f32.mrb[18].mxu0  ;;  %v1302_v4 = vmax.f32 %v6973_v63, %v6977_v2 }
 0x448   :  { %v6983_v5 = vpop.f32.mrb[19].mxu0 }
 0x449   :  { %1300 = vmax.xlane.f32.xlu1 %v1299_v61  ;;  %1303 = vmax.xlane.f32.xlu0 %v1302_v4  ;;  %v6985_v6 = vpop.f32.mrb[18].mxu1  ;;  %v1398_v7 = vmax.f32 %v6979_v3, %v6983_v5 }
 0x44a   :  { %v6989_v8 = vpop.f32.mrb[19].mxu1 }
 0x44b   :  { %v6991_v10 = vpop.f32.mrb[20].mxu0  ;;  %v1305_v11 = vmax.f32 %v6985_v6, %v6989_v8 }
 0x44c   :  { %v6995_v12 = vpop.f32.mrb[21].mxu0 }
 0x44d   :  { %v6997_v13 = vpop.f32.mrb[20].mxu1  ;;  %1396 = vmax.xlane.f32.xlu1 %v1395_v0  ;;  %1399 = vmax.xlane.f32.xlu0 %v1398_v7  ;;  %v1401_v14 = vmax.f32 %v6991_v10, %v6995_v12 }
 0x44e   :  { %v7001_v15 = vpop.f32.mrb[21].mxu1 }
 0x44f   :  { %v7003_v16 = vpop.f32.mrb[22].mxu0  ;;  %v1308_v20 = vmax.f32 %v6997_v13, %v7001_v15 }
 0x450   :  { %v7007_v23 = vpop.f32.mrb[23].mxu0 }
 0x451   :  { %1306 = vmax.xlane.f32.xlu1 %v1305_v11  ;;  %1309 = vmax.xlane.f32.xlu0 %v1308_v20  ;;  %v7009_v27 = vpop.f32.mrb[22].mxu1  ;;  %v1404_v30 = vmax.f32 %v7003_v16, %v7007_v23 }
 0x452   :  { %v7013_v33 = vpop.f32.mrb[23].mxu1 }
 0x453   :  { %v7015_v36 = vpop.f32.mrb[24].mxu0  ;;  %v1311_v39 = vmax.f32 %v7009_v27, %v7013_v33 }
 0x454   :  { %v7019_v43 = vpop.f32.mrb[25].mxu0 }
 0x455   :  { %v7021_v47 = vpop.f32.mrb[24].mxu1  ;;  %1402 = vmax.xlane.f32.xlu1 %v1401_v14  ;;  %1405 = vmax.xlane.f32.xlu0 %v1404_v30  ;;  %v1407_v50 = vmax.f32 %v7015_v36, %v7019_v43 }
 0x456   :  { %v7025_v53 = vpop.f32.mrb[25].mxu1 }
 0x457   :  { %v7027_v58 = vpop.f32.mrb[26].mxu0  ;;  %v1314_v61 = vmax.f32 %v7021_v47, %v7025_v53 }
 0x458   :  { %v7031_v0 = vpop.f32.mrb[27].mxu0 }
 0x459   :  { %1312 = vmax.xlane.f32.xlu1 %v1311_v39  ;;  %1315 = vmax.xlane.f32.xlu0 %v1314_v61  ;;  %v7033_v4 = vpop.f32.mrb[26].mxu1  ;;  %v1410_v7 = vmax.f32 %v7027_v58, %v7031_v0 }
 0x45a   :  { %9661 = vst [vmem:[#allocation8_spill] sm:$0xff] %v7033_v4  ;;  %v7037_v11 = vpop.f32.mrb[27].mxu1 }
 0x45b   :  { %9662 = vst [vmem:[#allocation9_spill] sm:$0xff] %v7037_v11  ;;  %v7039_v14 = vpop.f32.mrb[28].mxu0  ;;  %v1317_v20 = vmax.f32 %v7033_v4, %v7037_v11 }
 0x45c   :  { %9663 = vst [vmem:[#allocation10_spill] sm:$0xff] %v7039_v14  ;;  %v7043_v30 = vpop.f32.mrb[29].mxu0 }
 0x45d   :  { %9664 = vst [vmem:[#allocation11_spill] sm:$0xff] %v7043_v30  ;;  %v7045_v26 = vpop.f32.mrb[28].mxu1  ;;  %1408 = vmax.xlane.f32.xlu1 %v1407_v50  ;;  %1411 = vmax.xlane.f32.xlu0 %v1410_v7  ;;  %v1413_v39 = vmax.f32 %v7039_v14, %v7043_v30 }
 0x45e   :  { %9665 = vst [vmem:[#allocation12_spill] sm:$0xff] %v7045_v26  ;;  %v7049_v61 = vpop.f32.mrb[29].mxu1 }
 0x45f   :  { %9666 = vst [vmem:[#allocation13_spill] sm:$0xff] %v7049_v61  ;;  %v7051_v46 = vpop.f32.mrb[30].mxu0  ;;  %v1320_v42 = vmax.f32 %v7045_v26, %v7049_v61 }
 0x460   :  { %9667 = vst [vmem:[#allocation14_spill] sm:$0xff] %v7051_v46  ;;  %v7055_v1 = vpop.f32.mrb[31].mxu0 }
 0x461   :  { %9668 = vst [vmem:[#allocation15_spill] sm:$0xff] %v7055_v1  ;;  %1318 = vmax.xlane.f32.xlu1 %v1317_v20  ;;  %1321 = vmax.xlane.f32.xlu0 %v1320_v42  ;;  %v7057_v57 = vpop.f32.mrb[30].mxu1  ;;  %v1416_v50 = vmax.f32 %v7051_v46, %v7055_v1 }
 0x462   :  { %9669 = vst [vmem:[#allocation16_spill] sm:$0xff] %v7057_v57  ;;  %v7061_v7 = vpop.f32.mrb[31].mxu1 }
 0x463   :  { %9670 = vst [vmem:[#allocation17_spill] sm:$0xff] %v7061_v7  ;;  %v1323_v56 = vmax.f32 %v7057_v57, %v7061_v7  ;;  %v7065_v9 = vpop.f32.mrb[32].mxu0 }
 0x464   :  { %9671 = vst [vmem:[#allocation18_spill] sm:$0xff] %v7065_v9  ;;  %v7067_v30 = vpop.f32.mrb[33].mxu0 }
 0x465   :  { %9672 = vst [vmem:[#allocation19_spill] sm:$0xff] %v7067_v30  ;;  %v1419_v14 = vmax.f32 %v7065_v9, %v7067_v30  ;;  %v7071_v61 = vpop.f32.mrb[32].mxu1  ;;  %1414 = vmax.xlane.f32.xlu1 %v1413_v39  ;;  %1417 = vmax.xlane.f32.xlu0 %v1416_v50 }
 0x466   :  { %9673 = vst [vmem:[#allocation20_spill] sm:$0xff] %v7071_v61  ;;  %v7073_v42 = vpop.f32.mrb[33].mxu1 }
 0x467   :  { %9674 = vst [vmem:[#allocation21_spill] sm:$0xff] %v7073_v42  ;;  %v7075_v20 = vpop.f32.mrb[34].mxu0  ;;  %v1326_v1 = vmax.f32 %v7071_v61, %v7073_v42 }
 0x468   :  { %9675 = vst [vmem:[#allocation22_spill] sm:$0xff] %v7075_v20  ;;  %v7079_v46 = vpop.f32.mrb[35].mxu0 }
 0x469   :  { %9676 = vst [vmem:[#allocation23_spill] sm:$0xff] %v7079_v46  ;;  %1324 = vmax.xlane.f32.xlu1 %v1323_v56  ;;  %1327 = vmax.xlane.f32.xlu0 %v1326_v1  ;;  %v1422_v7 = vmax.f32 %v7075_v20, %v7079_v46 }
 0x46b   :  { %v7083_v57 = vpop.f32.mrb[34].mxu1  ;;  %v7085_v30 = vpop.f32.mrb[36].mxu0 }
 0x46c   :  { %9677 = vst [vmem:[#allocation24_spill] sm:$0xff] %v7083_v57  ;;  %9678 = vst [vmem:[#allocation25_spill] sm:$0xff] %v7085_v30  ;;  %v7087_v39 = vpop.f32.mrb[35].mxu1  ;;  %v7089_v50 = vpop.f32.mrb[37].mxu0 }
 0x46d   :  { %9679 = vst [vmem:[#allocation26_spill] sm:$0xff] %v7087_v39  ;;  %9680 = vst [vmem:[#allocation27_spill] sm:$0xff] %v7089_v50  ;;  %v1329_v9 = vmax.f32 %v7083_v57, %v7087_v39  ;;  %1420 = vmax.xlane.f32.xlu1 %v1419_v14  ;;  %1423 = vmax.xlane.f32.xlu0 %v1422_v7  ;;  %v1425_v56 = vmax.f32 %v7085_v30, %v7089_v50 }
 0x46f   :  { %v7095_v1 = vpop.f32.mrb[36].mxu1  ;;  %v7097_v42 = vpop.f32.mrb[38].mxu0 }
 0x470   :  { %9681 = vst [vmem:[#allocation28_spill] sm:$0xff] %v7095_v1  ;;  %9682 = vst [vmem:[#allocation29_spill] sm:$0xff] %v7097_v42  ;;  %v7099_v46 = vpop.f32.mrb[37].mxu1  ;;  %v7101_v20 = vpop.f32.mrb[39].mxu0 }
 0x471   :  { %9683 = vst [vmem:[#allocation30_spill] sm:$0xff] %v7099_v46  ;;  %9684 = vst [vmem:[#allocation31_spill] sm:$0xff] %v7101_v20  ;;  %v1332_v61 = vmax.f32 %v7095_v1, %v7099_v46  ;;  %1330 = vmax.xlane.f32.xlu1 %v1329_v9  ;;  %v1428_v39 = vmax.f32 %v7097_v42, %v7101_v20 }
 0x473   :  { %v7107_v14 = vpop.f32.mrb[38].mxu1  ;;  %1333 = vmax.xlane.f32.xlu0 %v1332_v61  ;;  %v7109_v7 = vpop.f32.mrb[40].mxu0 }
 0x474   :  { %9685 = vst [vmem:[#allocation32_spill] sm:$0xff] %v7107_v14  ;;  %9686 = vst [vmem:[#allocation33_spill] sm:$0xff] %v7109_v7  ;;  %v7111_v50 = vpop.f32.mrb[39].mxu1  ;;  %v7113_v30 = vpop.f32.mrb[41].mxu0 }
 0x475   :  { %9687 = vst [vmem:[#allocation34_spill] sm:$0xff] %v7111_v50  ;;  %9688 = vst [vmem:[#allocation35_spill] sm:$0xff] %v7113_v30  ;;  %v1335_v57 = vmax.f32 %v7107_v14, %v7111_v50  ;;  %1426 = vmax.xlane.f32.xlu1 %v1425_v56  ;;  %v1431_v46 = vmax.f32 %v7109_v7, %v7113_v30 }
 0x477   :  { %v7119_v9 = vpop.f32.mrb[40].mxu1  ;;  %1429 = vmax.xlane.f32.xlu0 %v1428_v39  ;;  %v7121_v20 = vpop.f32.mrb[42].mxu0 }
 0x478   :  { %9689 = vst [vmem:[#allocation36_spill] sm:$0xff] %v7119_v9  ;;  %9690 = vst [vmem:[#allocation37_spill] sm:$0xff] %v7121_v20  ;;  %v7123_v42 = vpop.f32.mrb[41].mxu1  ;;  %v7125_v61 = vpop.f32.mrb[43].mxu0 }
 0x479   :  { %9691 = vst [vmem:[#allocation38_spill] sm:$0xff] %v7123_v42  ;;  %9692 = vst [vmem:[#allocation39_spill] sm:$0xff] %v7125_v61  ;;  %v1338_v1 = vmax.f32 %v7119_v9, %v7123_v42  ;;  %1336 = vmax.xlane.f32.xlu1 %v1335_v57  ;;  %v1434_v50 = vmax.f32 %v7121_v20, %v7125_v61 }
 0x47b   :  { %v7131_v56 = vpop.f32.mrb[42].mxu1  ;;  %1339 = vmax.xlane.f32.xlu0 %v1338_v1  ;;  %v7133_v30 = vpop.f32.mrb[44].mxu0 }
 0x47c   :  { %9693 = vst [vmem:[#allocation40_spill] sm:$0xff] %v7131_v56  ;;  %9694 = vst [vmem:[#allocation41_spill] sm:$0xff] %v7133_v30  ;;  %v7135_v7 = vpop.f32.mrb[43].mxu1  ;;  %v7137_v39 = vpop.f32.mrb[45].mxu0 }
 0x47d   :  { %9695 = vst [vmem:[#allocation42_spill] sm:$0xff] %v7135_v7  ;;  %9696 = vst [vmem:[#allocation43_spill] sm:$0xff] %v7137_v39  ;;  %v1341_v14 = vmax.f32 %v7131_v56, %v7135_v7  ;;  %1432 = vmax.xlane.f32.xlu1 %v1431_v46  ;;  %v1437_v42 = vmax.f32 %v7133_v30, %v7137_v39 }
 0x47f   :  { %v7143_v57 = vpop.f32.mrb[44].mxu1  ;;  %1435 = vmax.xlane.f32.xlu0 %v1434_v50  ;;  %v7145_v61 = vpop.f32.mrb[46].mxu0 }
 0x480   :  { %9697 = vst [vmem:[#allocation44_spill] sm:$0xff] %v7143_v57  ;;  %9698 = vst [vmem:[#allocation45_spill] sm:$0xff] %v7145_v61  ;;  %v7147_v20 = vpop.f32.mrb[45].mxu1  ;;  %v7149_v1 = vpop.f32.mrb[47].mxu0 }
 0x481   :  { %9699 = vst [vmem:[#allocation46_spill] sm:$0xff] %v7147_v20  ;;  %9700 = vst [vmem:[#allocation47_spill] sm:$0xff] %v7149_v1  ;;  %v1344_v9 = vmax.f32 %v7143_v57, %v7147_v20  ;;  %1342 = vmax.xlane.f32.xlu1 %v1341_v14  ;;  %v1440_v7 = vmax.f32 %v7145_v61, %v7149_v1 }
 0x483   :  { %v7155_v46 = vpop.f32.mrb[46].mxu1  ;;  %1345 = vmax.xlane.f32.xlu0 %v1344_v9  ;;  %v7157_v39 = vpop.f32.mrb[48].mxu0 }
 0x484   :  { %9701 = vst [vmem:[#allocation48_spill] sm:$0xff] %v7155_v46  ;;  %9702 = vst [vmem:[#allocation49_spill] sm:$0xff] %v7157_v39  ;;  %v7159_v30 = vpop.f32.mrb[47].mxu1  ;;  %v7161_v50 = vpop.f32.mrb[49].mxu0 }
 0x485   :  { %9703 = vst [vmem:[#allocation50_spill] sm:$0xff] %v7159_v30  ;;  %9704 = vst [vmem:[#allocation51_spill] sm:$0xff] %v7161_v50  ;;  %v1347_v56 = vmax.f32 %v7155_v46, %v7159_v30  ;;  %1438 = vmax.xlane.f32.xlu1 %v1437_v42  ;;  %v1443_v20 = vmax.f32 %v7157_v39, %v7161_v50 }
 0x487   :  { %v7167_v14 = vpop.f32.mrb[48].mxu1  ;;  %1441 = vmax.xlane.f32.xlu0 %v1440_v7  ;;  %v7169_v1 = vpop.f32.mrb[50].mxu0 }
 0x488   :  { %9705 = vst [vmem:[#allocation52_spill] sm:$0xff] %v7167_v14  ;;  %9706 = vst [vmem:[#allocation53_spill] sm:$0xff] %v7169_v1  ;;  %v7171_v61 = vpop.f32.mrb[49].mxu1  ;;  %v7173_v9 = vpop.f32.mrb[51].mxu0 }
 0x489   :  { %9707 = vst [vmem:[#allocation54_spill] sm:$0xff] %v7171_v61  ;;  %9708 = vst [vmem:[#allocation55_spill] sm:$0xff] %v7173_v9  ;;  %v1350_v57 = vmax.f32 %v7167_v14, %v7171_v61  ;;  %1348 = vmax.xlane.f32.xlu1 %v1347_v56  ;;  %v1446_v30 = vmax.f32 %v7169_v1, %v7173_v9 }
 0x48b   :  { %v7179_v42 = vpop.f32.mrb[50].mxu1  ;;  %1351 = vmax.xlane.f32.xlu0 %v1350_v57  ;;  %v7181_v50 = vpop.f32.mrb[52].mxu0 }
 0x48c   :  { %9709 = vst [vmem:[#allocation56_spill] sm:$0xff] %v7179_v42  ;;  %9710 = vst [vmem:[#allocation57_spill] sm:$0xff] %v7181_v50  ;;  %v7183_v39 = vpop.f32.mrb[51].mxu1  ;;  %v7185_v7 = vpop.f32.mrb[53].mxu0 }
 0x48d   :  { %9711 = vst [vmem:[#allocation58_spill] sm:$0xff] %v7183_v39  ;;  %9712 = vst [vmem:[#allocation59_spill] sm:$0xff] %v7185_v7  ;;  %v1353_v46 = vmax.f32 %v7179_v42, %v7183_v39  ;;  %1444 = vmax.xlane.f32.xlu1 %v1443_v20  ;;  %v1449_v61 = vmax.f32 %v7181_v50, %v7185_v7 }
 0x48f   :  { %v7191_v56 = vpop.f32.mrb[52].mxu1  ;;  %1447 = vmax.xlane.f32.xlu0 %v1446_v30  ;;  %v7193_v9 = vpop.f32.mrb[54].mxu0 }
 0x490   :  { %9713 = vst [vmem:[#allocation60_spill] sm:$0xff] %v7191_v56  ;;  %9714 = vst [vmem:[#allocation61_spill] sm:$0xff] %v7193_v9  ;;  %v7195_v1 = vpop.f32.mrb[53].mxu1  ;;  %v7197_v57 = vpop.f32.mrb[55].mxu0 }
 0x491   :  { %9715 = vst [vmem:[#allocation62_spill] sm:$0xff] %v7195_v1  ;;  %9716 = vst [vmem:[#allocation63_spill] sm:$0xff] %v7197_v57  ;;  %v1356_v14 = vmax.f32 %v7191_v56, %v7195_v1  ;;  %1354 = vmax.xlane.f32.xlu1 %v1353_v46  ;;  %v1452_v39 = vmax.f32 %v7193_v9, %v7197_v57 }
 0x493   :  { %v7203_v20 = vpop.f32.mrb[54].mxu1  ;;  %1357 = vmax.xlane.f32.xlu0 %v1356_v14  ;;  %v7205_v7 = vpop.f32.mrb[56].mxu0 }
 0x494   :  { %9717 = vst [vmem:[#allocation64_spill] sm:$0xff] %v7203_v20  ;;  %9718 = vst [vmem:[#allocation65_spill] sm:$0xff] %v7205_v7  ;;  %v7207_v50 = vpop.f32.mrb[55].mxu1  ;;  %v7209_v30 = vpop.f32.mrb[57].mxu0 }
 0x495   :  { %9719 = vst [vmem:[#allocation66_spill] sm:$0xff] %v7207_v50  ;;  %9720 = vst [vmem:[#allocation67_spill] sm:$0xff] %v7209_v30  ;;  %v1359_v42 = vmax.f32 %v7203_v20, %v7207_v50  ;;  %1450 = vmax.xlane.f32.xlu1 %v1449_v61  ;;  %v1455_v1 = vmax.f32 %v7205_v7, %v7209_v30 }
 0x497   :  { %v7215_v46 = vpop.f32.mrb[56].mxu1  ;;  %1453 = vmax.xlane.f32.xlu0 %v1452_v39  ;;  %v7217_v57 = vpop.f32.mrb[58].mxu0 }
 0x498   :  { %9721 = vst [vmem:[#allocation68_spill] sm:$0xff] %v7215_v46  ;;  %9722 = vst [vmem:[#allocation69_spill] sm:$0xff] %v7217_v57  ;;  %v7219_v9 = vpop.f32.mrb[57].mxu1  ;;  %v7221_v14 = vpop.f32.mrb[59].mxu0 }
 0x499   :  { %9723 = vst [vmem:[#allocation70_spill] sm:$0xff] %v7219_v9  ;;  %9724 = vst [vmem:[#allocation71_spill] sm:$0xff] %v7221_v14  ;;  %v1362_v56 = vmax.f32 %v7215_v46, %v7219_v9  ;;  %1360 = vmax.xlane.f32.xlu1 %v1359_v42  ;;  %v1458_v50 = vmax.f32 %v7217_v57, %v7221_v14 }
 0x49b   :  { %v7227_v61 = vpop.f32.mrb[58].mxu1  ;;  %1363 = vmax.xlane.f32.xlu0 %v1362_v56  ;;  %v7229_v30 = vpop.f32.mrb[60].mxu0 }
 0x49c   :  { %9725 = vst [vmem:[#allocation72_spill] sm:$0xff] %v7227_v61  ;;  %9726 = vst [vmem:[#allocation73_spill] sm:$0xff] %v7229_v30  ;;  %v7231_v7 = vpop.f32.mrb[59].mxu1  ;;  %v7233_v39 = vpop.f32.mrb[61].mxu0 }
 0x49d   :  { %9727 = vst [vmem:[#allocation74_spill] sm:$0xff] %v7231_v7  ;;  %9728 = vst [vmem:[#allocation75_spill] sm:$0xff] %v7233_v39  ;;  %v1365_v20 = vmax.f32 %v7227_v61, %v7231_v7  ;;  %1456 = vmax.xlane.f32.xlu1 %v1455_v1  ;;  %v1461_v9 = vmax.f32 %v7229_v30, %v7233_v39 }
 0x49f   :  { %v7239_v42 = vpop.f32.mrb[60].mxu1  ;;  %1459 = vmax.xlane.f32.xlu0 %v1458_v50  ;;  %v7241_v14 = vpop.f32.mrb[62].mxu0 }
 0x4a0   :  { %9729 = vst [vmem:[#allocation76_spill] sm:$0xff] %v7239_v42  ;;  %9730 = vst [vmem:[#allocation77_spill] sm:$0xff] %v7241_v14  ;;  %v7243_v57 = vpop.f32.mrb[61].mxu1  ;;  %v7245_v56 = vpop.f32.mrb[63].mxu0 }
 0x4a1   :  { %9731 = vst [vmem:[#allocation78_spill] sm:$0xff] %v7243_v57  ;;  %9732 = vst [vmem:[#allocation79_spill] sm:$0xff] %v7245_v56  ;;  %v1368_v46 = vmax.f32 %v7239_v42, %v7243_v57  ;;  %1366 = vmax.xlane.f32.xlu1 %v1365_v20  ;;  %v1464_v7 = vmax.f32 %v7241_v14, %v7245_v56 }
 0x4a3   :  { %v7251_v1 = vpop.f32.mrb[62].mxu1  ;;  %1369 = vmax.xlane.f32.xlu0 %v1368_v46  ;;  %v7253_v39 = vpop.f32.mrb[64].mxu0 }
 0x4a4   :  { %9733 = vst [vmem:[#allocation80_spill] sm:$0xff] %v7251_v1  ;;  %9734 = vst [vmem:[#allocation81_spill] sm:$0xff] %v7253_v39  ;;  %v7255_v30 = vpop.f32.mrb[63].mxu1  ;;  %v7257_v50 = vpop.f32.mrb[65].mxu0 }
 0x4a5   :  { %9735 = vst [vmem:[#allocation82_spill] sm:$0xff] %v7255_v30  ;;  %9736 = vst [vmem:[#allocation83_spill] sm:$0xff] %v7257_v50  ;;  %v1371_v61 = vmax.f32 %v7251_v1, %v7255_v30  ;;  %1462 = vmax.xlane.f32.xlu1 %v1461_v9  ;;  %v1467_v57 = vmax.f32 %v7253_v39, %v7257_v50 }
 0x4a7   :  { %v7263_v20 = vpop.f32.mrb[64].mxu1  ;;  %1465 = vmax.xlane.f32.xlu0 %v1464_v7  ;;  %v7265_v56 = vpop.f32.mrb[66].mxu0 }
 0x4a8   :  { %9737 = vst [vmem:[#allocation84_spill] sm:$0xff] %v7265_v56  ;;  %v7267_v14 = vpop.f32.mrb[65].mxu1  ;;  %v7269_v46 = vpop.f32.mrb[67].mxu0 }
 0x4a9   :  { %9738 = vst [vmem:[#allocation85_spill] sm:$0xff] %v7267_v14  ;;  %9739 = vst [vmem:[#allocation86_spill] sm:$0xff] %v7269_v46  ;;  %v1374_v42 = vmax.f32 %v7263_v20, %v7267_v14  ;;  %1372 = vmax.xlane.f32.xlu1 %v1371_v61  ;;  %v1470_v30 = vmax.f32 %v7265_v56, %v7269_v46 }
 0x4ab   :  { %1375 = vmax.xlane.f32.xlu0 %v1374_v42 }
 0x4ad   :  { %1468 = vmax.xlane.f32.xlu1 %v1467_v57 }
 0x4af   :  { %1471 = vmax.xlane.f32.xlu0 %v1470_v30 }
 0x4ba   :  { %v1283_v9 = vpop.xlane.xlu1 %1282 }
 0x4bb   :  { %v1473_v50 = vsub.f32 %v6891_v17, %v1283_v9  ;;  %v1474_v7 = vsub.f32 %v6893_v18, %v1283_v9 }
 0x4bd   :  { %v1601_v39 = vmul.f32 1.442695, %v1473_v50  ;;  %v1603_v1 = vmul.f32 1.442695, %v1474_v7 }
 0x4be   :  { %v1379_v26 = vpop.xlane.xlu1 %1378  ;;  %v1286_v11 = vpop.xlane.xlu0 %1285 }
 0x4bf   :  { %5827 = vpow2.f32 %v1601_v39  ;;  %v1537_v4 = vsub.f32 %v6895_v19, %v1379_v26  ;;  %v1538_v61 = vsub.f32 %v6899_v21, %v1379_v26  ;;  %v1475_v14 = vsub.f32 %v6901_v22, %v1286_v11 }
 0x4c0   :  { %5829 = vpow2.f32 %v1603_v1  ;;  %v1476_v57 = vsub.f32 %v6905_v24, %v1286_v11 }
 0x4c1   :  { %v1729_v30 = vmul.f32 1.442695, %v1537_v4  ;;  %v1731_v42 = vmul.f32 1.442695, %v1538_v61  ;;  %v1605_v46 = vmul.f32 1.442695, %v1475_v14 }
 0x4c2   :  { %v1607_v17 = vmul.f32 1.442695, %v1476_v57  ;;  %v1382_v56 = vpop.xlane.xlu1 %1381 }
 0x4c3   :  { %5831 = vpow2.f32 %v1729_v30  ;;  %v1539_v18 = vsub.f32 %v6907_v25, %v1382_v56  ;;  %v1540_v50 = vsub.f32 %v6911_v28, %v1382_v56 }
 0x4c4   :  { %5833 = vpow2.f32 %v1731_v42 }
 0x4c5   :  { %5835 = vpow2.f32 %v1605_v46  ;;  %v1733_v19 = vmul.f32 1.442695, %v1539_v18  ;;  %v1735_v39 = vmul.f32 1.442695, %v1540_v50 }
 0x4c6   :  { %5837 = vpow2.f32 %v1607_v17  ;;  %v1289_v26 = vpop.xlane.xlu1 %1288  ;;  %v1292_v21 = vpop.xlane.xlu0 %1291 }
 0x4c7   :  { %5839 = vpow2.f32 %v1733_v19  ;;  %v1477_v22 = vsub.f32 %v6913_v29, %v1289_v26  ;;  %v1478_v24 = vsub.f32 %v6917_v31, %v1289_v26  ;;  %v1479_v4 = vsub.f32 %v6925_v35, %v1292_v21 }
 0x4c8   :  { %5841 = vpow2.f32 %v1735_v39  ;;  %v1480_v11 = vsub.f32 %v6929_v37, %v1292_v21 }
 0x4c9   :  { %v7287_v25 = vpop.eup %5827  ;;  %v1609_v28 = vmul.f32 1.442695, %v1477_v22  ;;  %v1611_v14 = vmul.f32 1.442695, %v1478_v24  ;;  %v1613_v56 = vmul.f32 1.442695, %v1479_v4 }
 0x4ca   :  { %v7289_v1 = vpop.eup %5829  ;;  %v1615_v46 = vmul.f32 1.442695, %v1480_v11  ;;  %v1385_v9 = vpop.xlane.xlu1 %1384 }
 0x4cb   :  { %v1388_v7 = vpop.xlane.xlu0 %1387  ;;  %5843 = vpow2.f32 %v1609_v28  ;;  %v1541_v29 = vsub.f32 %v6919_v32, %v1385_v9  ;;  %v1542_v31 = vsub.f32 %v6923_v34, %v1385_v9  ;;  %v1857_v61 = vadd.f32 %v7289_v1, %v7287_v25 }
 0x4cc   :  { %v1543_v35 = vsub.f32 %v6931_v38, %v1388_v7  ;;  %5845 = vpow2.f32 %v1611_v14  ;;  %v1544_v37 = vsub.f32 %v6935_v40, %v1388_v7 }
 0x4cd   :  { %v7297_v57 = vpop.eup %5831  ;;  %5847 = vpow2.f32 %v1613_v56  ;;  %v1737_v30 = vmul.f32 1.442695, %v1541_v29  ;;  %v1739_v42 = vmul.f32 1.442695, %v1542_v31  ;;  %1858 = vadd.xlane.f32.xlu1 %v1857_v61 }
 0x4ce   :  { %v1741_v17 = vmul.f32 1.442695, %v1543_v35  ;;  %v7299_v18 = vpop.eup %5833  ;;  %5849 = vpow2.f32 %v1615_v46  ;;  %v1743_v32 = vmul.f32 1.442695, %v1544_v37  ;;  %v1295_v34 = vpop.xlane.xlu1 %1294 }
 0x4cf   :  { %v1298_v50 = vpop.xlane.xlu0 %1297  ;;  %v7301_v38 = vpop.eup %5835  ;;  %5851 = vpow2.f32 %v1737_v30  ;;  %v1481_v40 = vsub.f32 %v6937_v41, %v1295_v34  ;;  %v1482_v19 = vsub.f32 %v6941_v44, %v1295_v34  ;;  %v1953_v22 = vadd.f32 %v7299_v18, %v7297_v57 }
 0x4d0   :  { %v1483_v39 = vsub.f32 %v6949_v49, %v1298_v50  ;;  %v7306_v26 = vpop.eup %5837  ;;  %5853 = vpow2.f32 %v1739_v42  ;;  %v1484_v21 = vsub.f32 %v6953_v51, %v1298_v50 }
 0x4d1   :  { %v7311_v24 = vpop.eup %5839  ;;  %5855 = vpow2.f32 %v1741_v17  ;;  %v1617_v4 = vmul.f32 1.442695, %v1481_v40  ;;  %v1619_v11 = vmul.f32 1.442695, %v1482_v19  ;;  %1954 = vadd.xlane.f32.xlu1 %v1953_v22  ;;  %v1860_v44 = vadd.f32 %v7306_v26, %v7301_v38 }
 0x4d2   :  { %v1621_v28 = vmul.f32 1.442695, %v1483_v39  ;;  %v7313_v14 = vpop.eup %5841  ;;  %5857 = vpow2.f32 %v1743_v32  ;;  %v1623_v41 = vmul.f32 1.442695, %v1484_v21  ;;  %v1391_v49 = vpop.xlane.xlu1 %1390 }
 0x4d3   :  { %v1394_v56 = vpop.xlane.xlu0 %1393  ;;  %5859 = vpow2.f32 %v1617_v4  ;;  %v1545_v51 = vsub.f32 %v6943_v45, %v1391_v49  ;;  %v1546_v46 = vsub.f32 %v6947_v48, %v1391_v49  ;;  %1861 = vadd.xlane.f32.xlu0 %v1860_v44  ;;  %v1956_v29 = vadd.f32 %v7313_v14, %v7311_v24 }
 0x4d4   :  { %v1547_v9 = vsub.f32 %v6955_v52, %v1394_v56  ;;  %5861 = vpow2.f32 %v1619_v11  ;;  %v1548_v7 = vsub.f32 %v6959_v54, %v1394_v56 }
 0x4d5   :  { %v7323_v31 = vpop.eup %5843  ;;  %5863 = vpow2.f32 %v1621_v28  ;;  %v1745_v35 = vmul.f32 1.442695, %v1545_v51  ;;  %v1747_v37 = vmul.f32 1.442695, %v1546_v46 }
 0x4d6   :  { %v1749_v61 = vmul.f32 1.442695, %v1547_v9  ;;  %v7325_v30 = vpop.eup %5845  ;;  %5865 = vpow2.f32 %v1623_v41  ;;  %v1751_v45 = vmul.f32 1.442695, %v1548_v7  ;;  %v1301_v48 = vpop.xlane.xlu1 %1300 }
 0x4d7   :  { %v1304_v42 = vpop.xlane.xlu0 %1303  ;;  %v7327_v52 = vpop.eup %5847  ;;  %5867 = vpow2.f32 %v1745_v35  ;;  %v1485_v54 = vsub.f32 %v6961_v55, %v1301_v48  ;;  %v1486_v17 = vsub.f32 %v6965_v59, %v1301_v48  ;;  %1957 = vadd.xlane.f32.xlu0 %v1956_v29  ;;  %v1863_v40 = vadd.f32 %v7325_v30, %v7323_v31 }
 0x4d8   :  { %v1487_v32 = vsub.f32 %v6973_v63, %v1304_v42  ;;  %v7332_v34 = vpop.eup %5849  ;;  %5869 = vpow2.f32 %v1747_v37  ;;  %v1488_v50 = vsub.f32 %v6977_v2, %v1304_v42 }
 0x4d9   :  { %v7337_v19 = vpop.eup %5851  ;;  %5871 = vpow2.f32 %v1749_v61  ;;  %v1625_v39 = vmul.f32 1.442695, %v1485_v54  ;;  %v1627_v21 = vmul.f32 1.442695, %v1486_v17  ;;  %1864 = vadd.xlane.f32.xlu1 %v1863_v40  ;;  %v1866_v63 = vadd.f32 %v7332_v34, %v7327_v52 }
 0x4da   :  { %v1629_v22 = vmul.f32 1.442695, %v1487_v32  ;;  %v7339_v55 = vpop.eup %5853  ;;  %5873 = vpow2.f32 %v1751_v45  ;;  %v1631_v59 = vmul.f32 1.442695, %v1488_v50  ;;  %v1397_v4 = vpop.xlane.xlu1 %1396 }
 0x4db   :  { %v1400_v11 = vpop.xlane.xlu0 %1399  ;;  %v7343_v2 = vpop.eup %5855  ;;  %5875 = vpow2.f32 %v1625_v39  ;;  %v1549_v28 = vsub.f32 %v6967_v60, %v1397_v4  ;;  %v1550_v41 = vsub.f32 %v6971_v62, %v1397_v4  ;;  %1867 = vadd.xlane.f32.xlu0 %v1866_v63  ;;  %v1959_v51 = vadd.f32 %v7339_v55, %v7337_v19 }
 0x4dc   :  { %v1551_v44 = vsub.f32 %v6979_v3, %v1400_v11  ;;  %v7348_v49 = vpop.eup %5857  ;;  %5877 = vpow2.f32 %v1627_v21  ;;  %v1552_v56 = vsub.f32 %v6983_v5, %v1400_v11 }
 0x4dd   :  { %v7353_v46 = vpop.eup %5859  ;;  %5879 = vpow2.f32 %v1629_v22  ;;  %v1753_v9 = vmul.f32 1.442695, %v1549_v28  ;;  %v1755_v7 = vmul.f32 1.442695, %v1550_v41  ;;  %1960 = vadd.xlane.f32.xlu1 %v1959_v51  ;;  %v1962_v3 = vadd.f32 %v7348_v49, %v7343_v2 }
 0x4de   :  { %v1757_v29 = vmul.f32 1.442695, %v1551_v44  ;;  %v7355_v60 = vpop.eup %5861  ;;  %5881 = vpow2.f32 %v1631_v59  ;;  %v1759_v62 = vmul.f32 1.442695, %v1552_v56  ;;  %v1307_v35 = vpop.xlane.xlu1 %1306 }
 0x4df   :  { %v1310_v37 = vpop.xlane.xlu0 %1309  ;;  %v7359_v5 = vpop.eup %5863  ;;  %5883 = vpow2.f32 %v1753_v9  ;;  %v1489_v61 = vsub.f32 %v6985_v6, %v1307_v35  ;;  %v1490_v45 = vsub.f32 %v6989_v8, %v1307_v35  ;;  %1963 = vadd.xlane.f32.xlu0 %v1962_v3  ;;  %v1869_v17 = vadd.f32 %v7355_v60, %v7353_v46 }
 0x4e0   :  { %v1491_v48 = vsub.f32 %v6997_v13, %v1310_v37  ;;  %v7364_v42 = vpop.eup %5865  ;;  %5885 = vpow2.f32 %v1755_v7  ;;  %v1492_v54 = vsub.f32 %v7001_v15, %v1310_v37 }
 0x4e1   :  { %v7369_v32 = vpop.eup %5867  ;;  %5887 = vpow2.f32 %v1757_v29  ;;  %v1633_v50 = vmul.f32 1.442695, %v1489_v61  ;;  %v1635_v40 = vmul.f32 1.442695, %v1490_v45  ;;  %1870 = vadd.xlane.f32.xlu1 %v1869_v17  ;;  %v1872_v13 = vadd.f32 %v7364_v42, %v7359_v5 }
 0x4e2   :  { %v1637_v39 = vmul.f32 1.442695, %v1491_v48  ;;  %v7371_v6 = vpop.eup %5869  ;;  %5889 = vpow2.f32 %v1759_v62  ;;  %v1639_v8 = vmul.f32 1.442695, %v1492_v54  ;;  %v1403_v21 = vpop.xlane.xlu1 %1402 }
 0x4e3   :  { %v1406_v22 = vpop.xlane.xlu0 %1405  ;;  %v7375_v15 = vpop.eup %5871  ;;  %5891 = vpow2.f32 %v1633_v50  ;;  %v1553_v59 = vsub.f32 %v6991_v10, %v1403_v21  ;;  %v1554_v63 = vsub.f32 %v6995_v12, %v1403_v21  ;;  %1873 = vadd.xlane.f32.xlu0 %v1872_v13  ;;  %v1965_v41 = vadd.f32 %v7371_v6, %v7369_v32 }
 0x4e4   :  { %v1555_v4 = vsub.f32 %v7003_v16, %v1406_v22  ;;  %v7380_v11 = vpop.eup %5873  ;;  %5893 = vpow2.f32 %v1635_v40  ;;  %v1556_v28 = vsub.f32 %v7007_v23, %v1406_v22 }
 0x4e5   :  { %v7385_v44 = vpop.eup %5875  ;;  %5895 = vpow2.f32 %v1637_v39  ;;  %v1761_v56 = vmul.f32 1.442695, %v1553_v59  ;;  %v1763_v51 = vmul.f32 1.442695, %v1554_v63  ;;  %1966 = vadd.xlane.f32.xlu1 %v1965_v41  ;;  %v1968_v16 = vadd.f32 %v7380_v11, %v7375_v15 }
 0x4e6   :  { %v1765_v9 = vmul.f32 1.442695, %v1555_v4  ;;  %v7387_v10 = vpop.eup %5877  ;;  %5897 = vpow2.f32 %v1639_v8  ;;  %v1767_v12 = vmul.f32 1.442695, %v1556_v28  ;;  %v1313_v7 = vpop.xlane.xlu1 %1312 }
 0x4e7   :  { %v1316_v29 = vpop.xlane.xlu0 %1315  ;;  %v7391_v23 = vpop.eup %5879  ;;  %5899 = vpow2.f32 %v1761_v56  ;;  %v1493_v62 = vsub.f32 %v7009_v27, %v1313_v7  ;;  %v1494_v3 = vsub.f32 %v7013_v33, %v1313_v7  ;;  %1969 = vadd.xlane.f32.xlu0 %v1968_v16  ;;  %v1875_v45 = vadd.f32 %v7387_v10, %v7385_v44  ;;  %v9741_v7 = vld [vmem:[#allocation9_spill] sm:$0xff] }
 0x4e8   :  { %v1495_v35 = vsub.f32 %v7021_v47, %v1316_v29  ;;  %v7396_v37 = vpop.eup %5881  ;;  %5901 = vpow2.f32 %v1763_v51  ;;  %v1496_v61 = vsub.f32 %v7025_v53, %v1316_v29 }
 0x4e9   :  { %v7401_v48 = vpop.eup %5883  ;;  %5903 = vpow2.f32 %v1765_v9  ;;  %v1641_v54 = vmul.f32 1.442695, %v1493_v62  ;;  %v1643_v17 = vmul.f32 1.442695, %v1494_v3  ;;  %1876 = vadd.xlane.f32.xlu1 %v1875_v45  ;;  %v1878_v47 = vadd.f32 %v7396_v37, %v7391_v23  ;;  %v9742_v62 = vld [vmem:[#allocation12_spill] sm:$0xff] }
 0x4ea   :  { %v1645_v50 = vmul.f32 1.442695, %v1495_v35  ;;  %v7403_v27 = vpop.eup %5885  ;;  %5905 = vpow2.f32 %v1767_v12  ;;  %v1647_v33 = vmul.f32 1.442695, %v1496_v61  ;;  %v1409_v40 = vpop.xlane.xlu1 %1408  ;;  %v9740_v12 = vld [vmem:[#allocation8_spill] sm:$0xff]  ;;  %v9743_v61 = vld [vmem:[#allocation13_spill] sm:$0xff] }
 0x4eb   :  { %v1412_v39 = vpop.xlane.xlu0 %1411  ;;  %v7407_v53 = vpop.eup %5887  ;;  %5907 = vpow2.f32 %v1641_v54  ;;  %v1557_v8 = vsub.f32 %v7015_v36, %v1409_v40  ;;  %v1558_v13 = vsub.f32 %v7019_v43, %v1409_v40  ;;  %1879 = vadd.xlane.f32.xlu0 %v1878_v47  ;;  %v1971_v63 = vadd.f32 %v7403_v27, %v7401_v48 }
 0x4ec   :  { %v1559_v21 = vsub.f32 %v7027_v58, %v1412_v39  ;;  %v7412_v22 = vpop.eup %5889  ;;  %5909 = vpow2.f32 %v1643_v17  ;;  %v1560_v59 = vsub.f32 %v7031_v0, %v1412_v39 }
 0x4ed   :  { %v7417_v4 = vpop.eup %5891  ;;  %5911 = vpow2.f32 %v1645_v50  ;;  %v1769_v28 = vmul.f32 1.442695, %v1557_v8  ;;  %v1771_v41 = vmul.f32 1.442695, %v1558_v13  ;;  %1972 = vadd.xlane.f32.xlu1 %v1971_v63  ;;  %v1974_v58 = vadd.f32 %v7412_v22, %v7407_v53  ;;  %v9744_v63 = vld [vmem:[#allocation10_spill] sm:$0xff] }
 0x4ee   :  { %v1773_v56 = vmul.f32 1.442695, %v1559_v21  ;;  %v7419_v36 = vpop.eup %5893  ;;  %5913 = vpow2.f32 %v1647_v33  ;;  %v1775_v43 = vmul.f32 1.442695, %v1560_v59  ;;  %v1319_v51 = vpop.xlane.xlu1 %1318 }
 0x4ef   :  { %v1322_v9 = vpop.xlane.xlu0 %1321  ;;  %v7423_v0 = vpop.eup %5895  ;;  %5915 = vpow2.f32 %v1769_v28  ;;  %v1497_v16 = vsub.f32 %v9740_v12, %v1319_v51  ;;  %v1498_v29 = vsub.f32 %v9741_v7, %v1319_v51  ;;  %1975 = vadd.xlane.f32.xlu0 %v1974_v58  ;;  %v1881_v54 = vadd.f32 %v7419_v36, %v7417_v4  ;;  %v9746_v58 = vld [vmem:[#allocation14_spill] sm:$0xff] }
 0x4f0   :  { %v1499_v3 = vsub.f32 %v9742_v62, %v1322_v9  ;;  %v7428_v35 = vpop.eup %5897  ;;  %5917 = vpow2.f32 %v1771_v41  ;;  %v1500_v45 = vsub.f32 %v9743_v61, %v1322_v9  ;;  %v9745_v41 = vld [vmem:[#allocation11_spill] sm:$0xff] }
 0x4f1   :  { %v7433_v17 = vpop.eup %5899  ;;  %5919 = vpow2.f32 %v1773_v56  ;;  %v1649_v50 = vmul.f32 1.442695, %v1497_v16  ;;  %v1651_v33 = vmul.f32 1.442695, %v1498_v29  ;;  %1882 = vadd.xlane.f32.xlu1 %v1881_v54  ;;  %v1884_v8 = vadd.f32 %v7428_v35, %v7423_v0 }
 0x4f2   :  { %v1653_v47 = vmul.f32 1.442695, %v1499_v3  ;;  %v7435_v40 = vpop.eup %5901  ;;  %5921 = vpow2.f32 %v1775_v43  ;;  %v1655_v39 = vmul.f32 1.442695, %v1500_v45  ;;  %v1415_v13 = vpop.xlane.xlu1 %1414  ;;  %v9747_v43 = vld [vmem:[#allocation15_spill] sm:$0xff] }
 0x4f3   :  { %v1418_v21 = vpop.xlane.xlu0 %1417  ;;  %v7439_v59 = vpop.eup %5903  ;;  %5923 = vpow2.f32 %v1649_v50  ;;  %v1561_v28 = vsub.f32 %v9744_v63, %v1415_v13  ;;  %v1562_v56 = vsub.f32 %v9745_v41, %v1415_v13  ;;  %1885 = vadd.xlane.f32.xlu0 %v1884_v8  ;;  %v1977_v16 = vadd.f32 %v7435_v40, %v7433_v17  ;;  %v9751_v13 = vld [vmem:[#allocation16_spill] sm:$0xff]  ;;  %v9752_v63 = vld [vmem:[#allocation17_spill] sm:$0xff] }
 0x4f4   :  { %v1563_v51 = vsub.f32 %v9746_v58, %v1418_v21  ;;  %v7444_v9 = vpop.eup %5905  ;;  %5925 = vpow2.f32 %v1651_v33  ;;  %v1564_v12 = vsub.f32 %v9747_v43, %v1418_v21 }
 0x4f5   :  { %v7449_v7 = vpop.eup %5907  ;;  %5927 = vpow2.f32 %v1653_v47  ;;  %v1777_v29 = vmul.f32 1.442695, %v1561_v28  ;;  %v1779_v62 = vmul.f32 1.442695, %v1562_v56  ;;  %1978 = vadd.xlane.f32.xlu1 %v1977_v16  ;;  %v1980_v54 = vadd.f32 %v7444_v9, %v7439_v59  ;;  %v9753_v28 = vld [vmem:[#allocation20_spill] sm:$0xff] }
 0x4f6   :  { %9748 = vst [vmem:[#allocation8_spill] sm:$0xff] %v7449_v7  ;;  %v1781_v3 = vmul.f32 1.442695, %v1563_v51  ;;  %v7451_v61 = vpop.eup %5909  ;;  %5929 = vpow2.f32 %v1655_v39  ;;  %v1783_v45 = vmul.f32 1.442695, %v1564_v12  ;;  %v1325_v50 = vpop.xlane.xlu1 %1324  ;;  %v9755_v39 = vld [vmem:[#allocation21_spill] sm:$0xff] }
 0x4f7   :  { %9749 = vst [vmem:[#allocation9_spill] sm:$0xff] %v7451_v61  ;;  %v1328_v33 = vpop.xlane.xlu0 %1327  ;;  %v7455_v8 = vpop.eup %5911  ;;  %5931 = vpow2.f32 %v1777_v29  ;;  %v1501_v21 = vsub.f32 %v9751_v13, %v1325_v50  ;;  %v1502_v47 = vsub.f32 %v9752_v63, %v1325_v50  ;;  %1981 = vadd.xlane.f32.xlu0 %v1980_v54  ;;  %v1887_v51 = vadd.f32 %v7451_v61, %v7449_v7  ;;  %v9760_v7 = vld [vmem:[#allocation19_spill] sm:$0xff] }
 0x4f8   :  { %9750 = vst [vmem:[#allocation12_spill] sm:$0xff] %v7455_v8  ;;  %v1503_v41 = vsub.f32 %v9753_v28, %v1328_v33  ;;  %v7460_v56 = vpop.eup %5913  ;;  %5933 = vpow2.f32 %v1779_v62  ;;  %v1504_v58 = vsub.f32 %v9755_v39, %v1328_v33  ;;  %v9759_v28 = vld [vmem:[#allocation18_spill] sm:$0xff] }
 0x4f9   :  { %9754 = vst [vmem:[#allocation13_spill] sm:$0xff] %v7460_v56  ;;  %v7465_v43 = vpop.eup %5915  ;;  %5935 = vpow2.f32 %v1781_v3  ;;  %v1657_v12 = vmul.f32 1.442695, %v1501_v21  ;;  %v1659_v16 = vmul.f32 1.442695, %v1502_v47  ;;  %1888 = vadd.xlane.f32.xlu1 %v1887_v51  ;;  %v1890_v62 = vadd.f32 %v7460_v56, %v7455_v8  ;;  %v9761_v21 = vld [vmem:[#allocation22_spill] sm:$0xff] }
 0x4fa   :  { %9756 = vst [vmem:[#allocation10_spill] sm:$0xff] %v7465_v43  ;;  %v1661_v29 = vmul.f32 1.442695, %v1503_v41  ;;  %v7467_v13 = vpop.eup %5917  ;;  %5937 = vpow2.f32 %v1783_v45  ;;  %v1663_v50 = vmul.f32 1.442695, %v1504_v58  ;;  %v1421_v54 = vpop.xlane.xlu1 %1420  ;;  %v9763_v45 = vld [vmem:[#allocation23_spill] sm:$0xff] }
 0x4fb   :  { %9757 = vst [vmem:[#allocation11_spill] sm:$0xff] %v7467_v13  ;;  %v1424_v63 = vpop.xlane.xlu0 %1423  ;;  %v7471_v33 = vpop.eup %5919  ;;  %5939 = vpow2.f32 %v1657_v12  ;;  %v1565_v39 = vsub.f32 %v9759_v28, %v1421_v54  ;;  %v1566_v3 = vsub.f32 %v9760_v7, %v1421_v54  ;;  %1891 = vadd.xlane.f32.xlu0 %v1890_v62  ;;  %v1983_v51 = vadd.f32 %v7467_v13, %v7465_v43 }
 0x4fc   :  { %9758 = vst [vmem:[#allocation14_spill] sm:$0xff] %v7471_v33  ;;  %v1567_v47 = vsub.f32 %v9761_v21, %v1424_v63  ;;  %v7476_v41 = vpop.eup %5921  ;;  %5941 = vpow2.f32 %v1659_v16  ;;  %v1568_v58 = vsub.f32 %v9763_v45, %v1424_v63  ;;  %v9767_v63 = vld [vmem:[#allocation24_spill] sm:$0xff]  ;;  %v9768_v45 = vld [vmem:[#allocation26_spill] sm:$0xff] }
 0x4fd   :  { %9762 = vst [vmem:[#allocation15_spill] sm:$0xff] %v7476_v41  ;;  %v7481_v8 = vpop.eup %5923  ;;  %5943 = vpow2.f32 %v1661_v29  ;;  %v1785_v56 = vmul.f32 1.442695, %v1565_v39  ;;  %v1787_v12 = vmul.f32 1.442695, %v1566_v3  ;;  %1984 = vadd.xlane.f32.xlu1 %v1983_v51  ;;  %v1986_v16 = vadd.f32 %v7476_v41, %v7471_v33 }
 0x4fe   :  { %9764 = vst [vmem:[#allocation16_spill] sm:$0xff] %v7481_v8  ;;  %v1789_v61 = vmul.f32 1.442695, %v1567_v47  ;;  %v7483_v28 = vpop.eup %5925  ;;  %5945 = vpow2.f32 %v1663_v50  ;;  %v1791_v7 = vmul.f32 1.442695, %v1568_v58  ;;  %v1331_v62 = vpop.xlane.xlu1 %1330 }
 0x4ff   :  { %9765 = vst [vmem:[#allocation17_spill] sm:$0xff] %v7483_v28  ;;  %v7487_v54 = vpop.eup %5927  ;;  %5947 = vpow2.f32 %v1785_v56  ;;  %v1505_v21 = vsub.f32 %v9767_v63, %v1331_v62  ;;  %v1506_v43 = vsub.f32 %v9768_v45, %v1331_v62  ;;  %v1893_v29 = vadd.f32 %v7483_v28, %v7481_v8  ;;  %1987 = vadd.xlane.f32.xlu0 %v1986_v16  ;;  %v9772_v62 = vld [vmem:[#allocation28_spill] sm:$0xff]  ;;  %v9773_v45 = vld [vmem:[#allocation30_spill] sm:$0xff]  ;;  %v9775_v16 = vld [vmem:[#allocation25_spill] sm:$0xff] }
 0x500   :  { %9766 = vst [vmem:[#allocation20_spill] sm:$0xff] %v7487_v54  ;;  %v7493_v39 = vpop.eup %5929  ;;  %5949 = vpow2.f32 %v1787_v12  ;;  %v1334_v50 = vpop.xlane.xlu0 %1333 }
 0x501   :  { %9769 = vst [vmem:[#allocation21_spill] sm:$0xff] %v7493_v39  ;;  %v7495_v3 = vpop.eup %5931  ;;  %5951 = vpow2.f32 %v1789_v61  ;;  %v1665_v47 = vmul.f32 1.442695, %v1505_v21  ;;  %v1667_v58 = vmul.f32 1.442695, %v1506_v43  ;;  %v1896_v56 = vadd.f32 %v7493_v39, %v7487_v54  ;;  %1894 = vadd.xlane.f32.xlu1 %v1893_v29  ;;  %v9776_v61 = vld [vmem:[#allocation27_spill] sm:$0xff] }
 0x502   :  { %9770 = vst [vmem:[#allocation18_spill] sm:$0xff] %v7495_v3  ;;  %v7499_v51 = vpop.eup %5933  ;;  %5953 = vpow2.f32 %v1791_v7  ;;  %v1507_v63 = vsub.f32 %v9772_v62, %v1334_v50  ;;  %v1508_v8 = vsub.f32 %v9773_v45, %v1334_v50  ;;  %v1427_v28 = vpop.xlane.xlu1 %1426 }
 0x503   :  { %9771 = vst [vmem:[#allocation19_spill] sm:$0xff] %v7499_v51  ;;  %v7503_v12 = vpop.eup %5935  ;;  %5955 = vpow2.f32 %v1665_v47  ;;  %v1569_v33 = vsub.f32 %v9775_v16, %v1427_v28  ;;  %v1570_v21 = vsub.f32 %v9776_v61, %v1427_v28  ;;  %v1989_v43 = vadd.f32 %v7499_v51, %v7495_v3  ;;  %1897 = vadd.xlane.f32.xlu0 %v1896_v56  ;;  %v9779_v16 = vld [vmem:[#allocation29_spill] sm:$0xff]  ;;  %v9781_v61 = vld [vmem:[#allocation31_spill] sm:$0xff] }
 0x504   :  { %9774 = vst [vmem:[#allocation22_spill] sm:$0xff] %v7503_v12  ;;  %v7509_v54 = vpop.eup %5937  ;;  %5957 = vpow2.f32 %v1667_v58  ;;  %v1669_v7 = vmul.f32 1.442695, %v1507_v63  ;;  %v1671_v29 = vmul.f32 1.442695, %v1508_v8  ;;  %v1430_v62 = vpop.xlane.xlu0 %1429  ;;  %v9783_v63 = vld [vmem:[#allocation32_spill] sm:$0xff] }
 0x505   :  { %9777 = vst [vmem:[#allocation23_spill] sm:$0xff] %v7509_v54  ;;  %v7511_v39 = vpop.eup %5939  ;;  %v1793_v50 = vmul.f32 1.442695, %v1569_v33  ;;  %v1795_v45 = vmul.f32 1.442695, %v1570_v21  ;;  %v1992_v47 = vadd.f32 %v7509_v54, %v7503_v12  ;;  %v1571_v41 = vsub.f32 %v9779_v16, %v1430_v62  ;;  %1990 = vadd.xlane.f32.xlu1 %v1989_v43  ;;  %v9784_v33 = vld [vmem:[#allocation34_spill] sm:$0xff] }
 0x506   :  { %9778 = vst [vmem:[#allocation24_spill] sm:$0xff] %v7511_v39  ;;  %v7516_v28 = vpop.eup %5941  ;;  %5959 = vpow2.f32 %v1669_v7  ;;  %v1572_v3 = vsub.f32 %v9781_v61, %v1430_v62  ;;  %v1337_v58 = vpop.xlane.xlu1 %1336 }
 0x507   :  { %9780 = vst [vmem:[#allocation26_spill] sm:$0xff] %v7516_v28  ;;  %v7519_v56 = vpop.eup %5943  ;;  %5961 = vpow2.f32 %v1671_v29  ;;  %v1797_v8 = vmul.f32 1.442695, %v1571_v41  ;;  %v1509_v51 = vsub.f32 %v9783_v63, %v1337_v58  ;;  %v1510_v21 = vsub.f32 %v9784_v33, %v1337_v58  ;;  %1993 = vadd.xlane.f32.xlu0 %v1992_v47  ;;  %v9788_v58 = vld [vmem:[#allocation36_spill] sm:$0xff]  ;;  %v9789_v47 = vld [vmem:[#allocation38_spill] sm:$0xff] }
 0x508   :  { %9782 = vst [vmem:[#allocation28_spill] sm:$0xff] %v7519_v56  ;;  %v7523_v13 = vpop.eup %5945  ;;  %5963 = vpow2.f32 %v1793_v50  ;;  %v1799_v16 = vmul.f32 1.442695, %v1572_v3  ;;  %v1899_v7 = vadd.f32 %v7516_v28, %v7511_v39  ;;  %v1340_v43 = vpop.xlane.xlu0 %1339  ;;  %v9791_v39 = vld [vmem:[#allocation33_spill] sm:$0xff] }
 0x509   :  { %9785 = vst [vmem:[#allocation30_spill] sm:$0xff] %v7523_v13  ;;  %v7527_v12 = vpop.eup %5947  ;;  %5965 = vpow2.f32 %v1795_v45  ;;  %v1673_v62 = vmul.f32 1.442695, %v1509_v51  ;;  %v1675_v61 = vmul.f32 1.442695, %v1510_v21  ;;  %v1902_v41 = vadd.f32 %v7523_v13, %v7519_v56  ;;  %v9792_v45 = vld [vmem:[#allocation35_spill] sm:$0xff] }
 0x50a   :  { %9786 = vst [vmem:[#allocation25_spill] sm:$0xff] %v7527_v12  ;;  %v7531_v29 = vpop.eup %5949  ;;  %5967 = vpow2.f32 %v1797_v8  ;;  %1900 = vadd.xlane.f32.xlu1 %v1899_v7  ;;  %v1511_v50 = vsub.f32 %v9788_v58, %v1340_v43  ;;  %v1512_v3 = vsub.f32 %v9789_v47, %v1340_v43  ;;  %v1433_v63 = vpop.xlane.xlu1 %1432 }
 0x50b   :  { %9787 = vst [vmem:[#allocation27_spill] sm:$0xff] %v7531_v29  ;;  %v7535_v33 = vpop.eup %5951  ;;  %5969 = vpow2.f32 %v1799_v16  ;;  %v1573_v28 = vsub.f32 %v9791_v39, %v1433_v63  ;;  %v1574_v51 = vsub.f32 %v9792_v45, %v1433_v63  ;;  %v1995_v21 = vadd.f32 %v7531_v29, %v7527_v12  ;;  %1903 = vadd.xlane.f32.xlu0 %v1902_v41  ;;  %v9795_v63 = vld [vmem:[#allocation37_spill] sm:$0xff]  ;;  %v9796_v12 = vld [vmem:[#allocation39_spill] sm:$0xff]  ;;  %v9798_v29 = vld [vmem:[#allocation42_spill] sm:$0xff] }
 0x50c   :  { %9790 = vst [vmem:[#allocation29_spill] sm:$0xff] %v7535_v33  ;;  %v7541_v56 = vpop.eup %5953  ;;  %5971 = vpow2.f32 %v1673_v62  ;;  %v1677_v8 = vmul.f32 1.442695, %v1511_v50  ;;  %v1679_v7 = vmul.f32 1.442695, %v1512_v3  ;;  %v1436_v58 = vpop.xlane.xlu0 %1435  ;;  %v9797_v50 = vld [vmem:[#allocation40_spill] sm:$0xff] }
 0x50d   :  { %v7543_v13 = vpop.eup %5955  ;;  %5973 = vpow2.f32 %v1675_v61  ;;  %v1801_v43 = vmul.f32 1.442695, %v1573_v28  ;;  %v1803_v47 = vmul.f32 1.442695, %v1574_v51  ;;  %v1998_v39 = vadd.f32 %v7541_v56, %v7535_v33 }
 0x50e   :  { %9793 = vst [vmem:[#allocation31_spill] sm:$0xff] %v7543_v13  ;;  %v7547_v16 = vpop.eup %5957  ;;  %5975 = vpow2.f32 %v1677_v8  ;;  %1996 = vadd.xlane.f32.xlu1 %v1995_v21  ;;  %v1575_v45 = vsub.f32 %v9795_v63, %v1436_v58  ;;  %v1576_v62 = vsub.f32 %v9796_v12, %v1436_v58  ;;  %v1343_v41 = vpop.xlane.xlu1 %1342 }
 0x50f   :  { %9794 = vst [vmem:[#allocation32_spill] sm:$0xff] %v7547_v16  ;;  %5977 = vpow2.f32 %v1679_v7  ;;  %v1513_v3 = vsub.f32 %v9797_v50, %v1343_v41  ;;  %v1514_v54 = vsub.f32 %v9798_v29, %v1343_v41  ;;  %v1905_v28 = vadd.f32 %v7547_v16, %v7543_v13  ;;  %1999 = vadd.xlane.f32.xlu0 %v1998_v39  ;;  %v9801_v7 = vld [vmem:[#allocation44_spill] sm:$0xff]  ;;  %v9803_v29 = vld [vmem:[#allocation46_spill] sm:$0xff] }
 0x510   :  { %v7555_v61 = vpop.eup %5959  ;;  %5979 = vpow2.f32 %v1801_v43  ;;  %v1805_v51 = vmul.f32 1.442695, %v1575_v45  ;;  %v1807_v8 = vmul.f32 1.442695, %v1576_v62  ;;  %v1346_v21 = vpop.xlane.xlu0 %1345  ;;  %v9805_v62 = vld [vmem:[#allocation41_spill] sm:$0xff] }
 0x511   :  { %9799 = vst [vmem:[#allocation34_spill] sm:$0xff] %v7555_v61  ;;  %v7557_v33 = vpop.eup %5961  ;;  %5981 = vpow2.f32 %v1803_v47  ;;  %v1681_v12 = vmul.f32 1.442695, %v1513_v3  ;;  %v1683_v58 = vmul.f32 1.442695, %v1514_v54  ;;  %v1515_v63 = vsub.f32 %v9801_v7, %v1346_v21  ;;  %v9806_v3 = vld [vmem:[#allocation43_spill] sm:$0xff] }
 0x512   :  { %9800 = vst [vmem:[#allocation36_spill] sm:$0xff] %v7557_v33  ;;  %v7560_v50 = vpop.eup %5963  ;;  %5983 = vpow2.f32 %v1805_v51  ;;  %1906 = vadd.xlane.f32.xlu1 %v1905_v28  ;;  %v1516_v41 = vsub.f32 %v9803_v29, %v1346_v21  ;;  %v1439_v13 = vpop.xlane.xlu1 %1438  ;;  %v1908_v43 = vadd.f32 %v7557_v33, %v7555_v61 }
 0x513   :  { %9802 = vst [vmem:[#allocation38_spill] sm:$0xff] %v7560_v50  ;;  %v7565_v39 = vpop.eup %5965  ;;  %5985 = vpow2.f32 %v1807_v8  ;;  %v1685_v45 = vmul.f32 1.442695, %v1515_v63  ;;  %v1577_v47 = vsub.f32 %v9805_v62, %v1439_v13  ;;  %v1578_v54 = vsub.f32 %v9806_v3, %v1439_v13  ;;  %v9809_v8 = vld [vmem:[#allocation45_spill] sm:$0xff]  ;;  %v9811_v13 = vld [vmem:[#allocation47_spill] sm:$0xff] }
 0x514   :  { %9804 = vst [vmem:[#allocation33_spill] sm:$0xff] %v7565_v39  ;;  %v7569_v16 = vpop.eup %5967  ;;  %5987 = vpow2.f32 %v1681_v12  ;;  %v1687_v7 = vmul.f32 1.442695, %v1516_v41  ;;  %1909 = vadd.xlane.f32.xlu0 %v1908_v43  ;;  %v2001_v28 = vadd.f32 %v7565_v39, %v7560_v50  ;;  %v1442_v51 = vpop.xlane.xlu0 %1441  ;;  %v9813_v50 = vld [vmem:[#allocation48_spill] sm:$0xff] }
 0x515   :  { %9807 = vst [vmem:[#allocation35_spill] sm:$0xff] %v7569_v16  ;;  %v7573_v21 = vpop.eup %5969  ;;  %5989 = vpow2.f32 %v1683_v58  ;;  %v1809_v29 = vmul.f32 1.442695, %v1577_v47  ;;  %v1811_v61 = vmul.f32 1.442695, %v1578_v54  ;;  %v1579_v63 = vsub.f32 %v9809_v8, %v1442_v51  ;;  %v9814_v47 = vld [vmem:[#allocation50_spill] sm:$0xff] }
 0x516   :  { %9808 = vst [vmem:[#allocation37_spill] sm:$0xff] %v7573_v21  ;;  %v7576_v33 = vpop.eup %5971  ;;  %5991 = vpow2.f32 %v1685_v45  ;;  %2002 = vadd.xlane.f32.xlu1 %v2001_v28  ;;  %v1580_v62 = vsub.f32 %v9811_v13, %v1442_v51  ;;  %v1349_v12 = vpop.xlane.xlu1 %1348  ;;  %v2004_v41 = vadd.f32 %v7573_v21, %v7569_v16 }
 0x517   :  { %9810 = vst [vmem:[#allocation39_spill] sm:$0xff] %v7576_v33  ;;  %v7581_v43 = vpop.eup %5973  ;;  %5993 = vpow2.f32 %v1687_v7  ;;  %v1813_v3 = vmul.f32 1.442695, %v1579_v63  ;;  %v1517_v58 = vsub.f32 %v9813_v50, %v1349_v12  ;;  %v1518_v54 = vsub.f32 %v9814_v47, %v1349_v12  ;;  %v9817_v7 = vld [vmem:[#allocation52_spill] sm:$0xff]  ;;  %v9819_v50 = vld [vmem:[#allocation54_spill] sm:$0xff] }
 0x518   :  { %9812 = vst [vmem:[#allocation40_spill] sm:$0xff] %v7581_v43  ;;  %v7585_v39 = vpop.eup %5975  ;;  %5995 = vpow2.f32 %v1809_v29  ;;  %v1815_v8 = vmul.f32 1.442695, %v1580_v62  ;;  %2005 = vadd.xlane.f32.xlu0 %v2004_v41  ;;  %v1911_v45 = vadd.f32 %v7581_v43, %v7576_v33  ;;  %v1352_v28 = vpop.xlane.xlu0 %1351  ;;  %v9821_v33 = vld [vmem:[#allocation49_spill] sm:$0xff] }
 0x519   :  { %9815 = vst [vmem:[#allocation42_spill] sm:$0xff] %v7585_v39  ;;  %v7589_v51 = vpop.eup %5977  ;;  %5997 = vpow2.f32 %v1811_v61  ;;  %v1689_v13 = vmul.f32 1.442695, %v1517_v58  ;;  %v1691_v16 = vmul.f32 1.442695, %v1518_v54  ;;  %v1519_v63 = vsub.f32 %v9817_v7, %v1352_v28  ;;  %v9822_v58 = vld [vmem:[#allocation51_spill] sm:$0xff] }
 0x51a   :  { %9816 = vst [vmem:[#allocation44_spill] sm:$0xff] %v7589_v51  ;;  %v7592_v21 = vpop.eup %5979  ;;  %5999 = vpow2.f32 %v1813_v3  ;;  %1912 = vadd.xlane.f32.xlu1 %v1911_v45  ;;  %v1520_v12 = vsub.f32 %v9819_v50, %v1352_v28  ;;  %v1445_v29 = vpop.xlane.xlu1 %1444  ;;  %v1914_v62 = vadd.f32 %v7589_v51, %v7585_v39 }
 0x51b   :  { %9818 = vst [vmem:[#allocation46_spill] sm:$0xff] %v7592_v21  ;;  %v7597_v41 = vpop.eup %5981  ;;  %6001 = vpow2.f32 %v1815_v8  ;;  %v1693_v47 = vmul.f32 1.442695, %v1519_v63  ;;  %v1581_v61 = vsub.f32 %v9821_v33, %v1445_v29  ;;  %v1582_v54 = vsub.f32 %v9822_v58, %v1445_v29  ;;  %v9825_v8 = vld [vmem:[#allocation53_spill] sm:$0xff]  ;;  %v9827_v33 = vld [vmem:[#allocation55_spill] sm:$0xff] }
 0x51c   :  { %9820 = vst [vmem:[#allocation41_spill] sm:$0xff] %v7597_v41  ;;  %v7601_v43 = vpop.eup %5983  ;;  %6003 = vpow2.f32 %v1689_v13  ;;  %v1695_v7 = vmul.f32 1.442695, %v1520_v12  ;;  %1915 = vadd.xlane.f32.xlu0 %v1914_v62  ;;  %v2007_v3 = vadd.f32 %v7597_v41, %v7592_v21  ;;  %v1448_v45 = vpop.xlane.xlu0 %1447  ;;  %v9829_v21 = vld [vmem:[#allocation56_spill] sm:$0xff] }
 0x51d   :  { %9823 = vst [vmem:[#allocation43_spill] sm:$0xff] %v7601_v43  ;;  %v7605_v28 = vpop.eup %5985  ;;  %6005 = vpow2.f32 %v1691_v16  ;;  %v1817_v50 = vmul.f32 1.442695, %v1581_v61  ;;  %v1819_v39 = vmul.f32 1.442695, %v1582_v54  ;;  %v1583_v63 = vsub.f32 %v9825_v8, %v1448_v45  ;;  %v9830_v61 = vld [vmem:[#allocation58_spill] sm:$0xff] }
 0x51e   :  { %9824 = vst [vmem:[#allocation45_spill] sm:$0xff] %v7605_v28  ;;  %v7608_v51 = vpop.eup %5987  ;;  %6007 = vpow2.f32 %v1693_v47  ;;  %2008 = vadd.xlane.f32.xlu1 %v2007_v3  ;;  %v1584_v29 = vsub.f32 %v9827_v33, %v1448_v45  ;;  %v1355_v13 = vpop.xlane.xlu1 %1354  ;;  %v2010_v12 = vadd.f32 %v7605_v28, %v7601_v43 }
 0x51f   :  { %9826 = vst [vmem:[#allocation47_spill] sm:$0xff] %v7608_v51  ;;  %v7613_v62 = vpop.eup %5989  ;;  %6009 = vpow2.f32 %v1695_v7  ;;  %v1821_v58 = vmul.f32 1.442695, %v1583_v63  ;;  %v1521_v16 = vsub.f32 %v9829_v21, %v1355_v13  ;;  %v1522_v54 = vsub.f32 %v9830_v61, %v1355_v13  ;;  %v9833_v7 = vld [vmem:[#allocation60_spill] sm:$0xff]  ;;  %v9835_v21 = vld [vmem:[#allocation62_spill] sm:$0xff] }
 0x520   :  { %9828 = vst [vmem:[#allocation48_spill] sm:$0xff] %v7613_v62  ;;  %v7617_v41 = vpop.eup %5991  ;;  %6011 = vpow2.f32 %v1817_v50  ;;  %v1823_v8 = vmul.f32 1.442695, %v1584_v29  ;;  %2011 = vadd.xlane.f32.xlu0 %v2010_v12  ;;  %v1917_v47 = vadd.f32 %v7613_v62, %v7608_v51  ;;  %v1358_v3 = vpop.xlane.xlu0 %1357  ;;  %v9837_v51 = vld [vmem:[#allocation57_spill] sm:$0xff] }
 0x521   :  { %9831 = vst [vmem:[#allocation50_spill] sm:$0xff] %v7617_v41  ;;  %v7621_v45 = vpop.eup %5993  ;;  %6013 = vpow2.f32 %v1819_v39  ;;  %v1697_v33 = vmul.f32 1.442695, %v1521_v16  ;;  %v1699_v43 = vmul.f32 1.442695, %v1522_v54  ;;  %v1523_v63 = vsub.f32 %v9833_v7, %v1358_v3  ;;  %v9838_v16 = vld [vmem:[#allocation59_spill] sm:$0xff] }
 0x522   :  { %9832 = vst [vmem:[#allocation52_spill] sm:$0xff] %v7621_v45  ;;  %v7624_v28 = vpop.eup %5995  ;;  %6015 = vpow2.f32 %v1821_v58  ;;  %1918 = vadd.xlane.f32.xlu1 %v1917_v47  ;;  %v1524_v13 = vsub.f32 %v9835_v21, %v1358_v3  ;;  %v1451_v50 = vpop.xlane.xlu1 %1450  ;;  %v1920_v29 = vadd.f32 %v7621_v45, %v7617_v41 }
 0x523   :  { %9834 = vst [vmem:[#allocation54_spill] sm:$0xff] %v7624_v28  ;;  %v7629_v12 = vpop.eup %5997  ;;  %6017 = vpow2.f32 %v1823_v8  ;;  %v1701_v61 = vmul.f32 1.442695, %v1523_v63  ;;  %v1585_v39 = vsub.f32 %v9837_v51, %v1451_v50  ;;  %v1586_v54 = vsub.f32 %v9838_v16, %v1451_v50  ;;  %v9841_v8 = vld [vmem:[#allocation61_spill] sm:$0xff]  ;;  %v9843_v51 = vld [vmem:[#allocation63_spill] sm:$0xff] }
 0x524   :  { %9836 = vst [vmem:[#allocation49_spill] sm:$0xff] %v7629_v12  ;;  %v7633_v62 = vpop.eup %5999  ;;  %6019 = vpow2.f32 %v1697_v33  ;;  %v1703_v7 = vmul.f32 1.442695, %v1524_v13  ;;  %1921 = vadd.xlane.f32.xlu0 %v1920_v29  ;;  %v2013_v58 = vadd.f32 %v7629_v12, %v7624_v28  ;;  %v1454_v47 = vpop.xlane.xlu0 %1453  ;;  %v9845_v28 = vld [vmem:[#allocation64_spill] sm:$0xff] }
 0x525   :  { %9839 = vst [vmem:[#allocation51_spill] sm:$0xff] %v7633_v62  ;;  %v7637_v3 = vpop.eup %6001  ;;  %6021 = vpow2.f32 %v1699_v43  ;;  %v1825_v21 = vmul.f32 1.442695, %v1585_v39  ;;  %v1827_v41 = vmul.f32 1.442695, %v1586_v54  ;;  %v1587_v63 = vsub.f32 %v9841_v8, %v1454_v47  ;;  %v9846_v39 = vld [vmem:[#allocation66_spill] sm:$0xff] }
 0x526   :  { %9840 = vst [vmem:[#allocation53_spill] sm:$0xff] %v7637_v3  ;;  %v7640_v45 = vpop.eup %6003  ;;  %6023 = vpow2.f32 %v1701_v61  ;;  %2014 = vadd.xlane.f32.xlu1 %v2013_v58  ;;  %v1588_v50 = vsub.f32 %v9843_v51, %v1454_v47  ;;  %v1361_v33 = vpop.xlane.xlu1 %1360  ;;  %v2016_v13 = vadd.f32 %v7637_v3, %v7633_v62 }
 0x527   :  { %9842 = vst [vmem:[#allocation55_spill] sm:$0xff] %v7640_v45  ;;  %v7645_v29 = vpop.eup %6005  ;;  %6025 = vpow2.f32 %v1703_v7  ;;  %v1829_v16 = vmul.f32 1.442695, %v1587_v63  ;;  %v1525_v43 = vsub.f32 %v9845_v28, %v1361_v33  ;;  %v1526_v54 = vsub.f32 %v9846_v39, %v1361_v33  ;;  %v9849_v7 = vld [vmem:[#allocation68_spill] sm:$0xff]  ;;  %v9851_v28 = vld [vmem:[#allocation70_spill] sm:$0xff] }
 0x528   :  { %9844 = vst [vmem:[#allocation56_spill] sm:$0xff] %v7645_v29  ;;  %v7649_v12 = vpop.eup %6007  ;;  %6027 = vpow2.f32 %v1825_v21  ;;  %v1831_v8 = vmul.f32 1.442695, %v1588_v50  ;;  %2017 = vadd.xlane.f32.xlu0 %v2016_v13  ;;  %v1923_v61 = vadd.f32 %v7645_v29, %v7640_v45  ;;  %v1364_v58 = vpop.xlane.xlu0 %1363  ;;  %v9853_v45 = vld [vmem:[#allocation65_spill] sm:$0xff] }
 0x529   :  { %9847 = vst [vmem:[#allocation58_spill] sm:$0xff] %v7649_v12  ;;  %v7653_v47 = vpop.eup %6009  ;;  %6029 = vpow2.f32 %v1827_v41  ;;  %v1705_v51 = vmul.f32 1.442695, %v1525_v43  ;;  %v1707_v62 = vmul.f32 1.442695, %v1526_v54  ;;  %v1527_v63 = vsub.f32 %v9849_v7, %v1364_v58  ;;  %v9854_v43 = vld [vmem:[#allocation67_spill] sm:$0xff] }
 0x52a   :  { %9848 = vst [vmem:[#allocation60_spill] sm:$0xff] %v7653_v47  ;;  %v7656_v3 = vpop.eup %6011  ;;  %6031 = vpow2.f32 %v1829_v16  ;;  %1924 = vadd.xlane.f32.xlu1 %v1923_v61  ;;  %v1528_v33 = vsub.f32 %v9851_v28, %v1364_v58  ;;  %v1457_v21 = vpop.xlane.xlu1 %1456  ;;  %v1926_v50 = vadd.f32 %v7653_v47, %v7649_v12 }
 0x52b   :  { %9850 = vst [vmem:[#allocation62_spill] sm:$0xff] %v7656_v3  ;;  %v7661_v13 = vpop.eup %6013  ;;  %6033 = vpow2.f32 %v1831_v8  ;;  %v1709_v39 = vmul.f32 1.442695, %v1527_v63  ;;  %v1589_v41 = vsub.f32 %v9853_v45, %v1457_v21  ;;  %v1590_v54 = vsub.f32 %v9854_v43, %v1457_v21  ;;  %v9857_v8 = vld [vmem:[#allocation69_spill] sm:$0xff]  ;;  %v9859_v45 = vld [vmem:[#allocation71_spill] sm:$0xff] }
 0x52c   :  { %9852 = vst [vmem:[#allocation57_spill] sm:$0xff] %v7661_v13  ;;  %v7665_v29 = vpop.eup %6015  ;;  %6035 = vpow2.f32 %v1705_v51  ;;  %v1711_v7 = vmul.f32 1.442695, %v1528_v33  ;;  %1927 = vadd.xlane.f32.xlu0 %v1926_v50  ;;  %v2019_v16 = vadd.f32 %v7661_v13, %v7656_v3  ;;  %v1460_v61 = vpop.xlane.xlu0 %1459  ;;  %v9861_v3 = vld [vmem:[#allocation72_spill] sm:$0xff] }
 0x52d   :  { %9855 = vst [vmem:[#allocation59_spill] sm:$0xff] %v7665_v29  ;;  %v7669_v58 = vpop.eup %6017  ;;  %6037 = vpow2.f32 %v1707_v62  ;;  %v1833_v28 = vmul.f32 1.442695, %v1589_v41  ;;  %v1835_v12 = vmul.f32 1.442695, %v1590_v54  ;;  %v1591_v63 = vsub.f32 %v9857_v8, %v1460_v61  ;;  %v9862_v41 = vld [vmem:[#allocation74_spill] sm:$0xff] }
 0x52e   :  { %9856 = vst [vmem:[#allocation61_spill] sm:$0xff] %v7669_v58  ;;  %v7672_v47 = vpop.eup %6019  ;;  %6039 = vpow2.f32 %v1709_v39  ;;  %2020 = vadd.xlane.f32.xlu1 %v2019_v16  ;;  %v1592_v21 = vsub.f32 %v9859_v45, %v1460_v61  ;;  %v1367_v51 = vpop.xlane.xlu1 %1366  ;;  %v2022_v33 = vadd.f32 %v7669_v58, %v7665_v29 }
 0x52f   :  { %9858 = vst [vmem:[#allocation63_spill] sm:$0xff] %v7672_v47  ;;  %v7677_v50 = vpop.eup %6021  ;;  %6041 = vpow2.f32 %v1711_v7  ;;  %v1837_v43 = vmul.f32 1.442695, %v1591_v63  ;;  %v1529_v62 = vsub.f32 %v9861_v3, %v1367_v51  ;;  %v1530_v54 = vsub.f32 %v9862_v41, %v1367_v51  ;;  %v9865_v7 = vld [vmem:[#allocation76_spill] sm:$0xff]  ;;  %v9867_v3 = vld [vmem:[#allocation78_spill] sm:$0xff] }
 0x530   :  { %9860 = vst [vmem:[#allocation64_spill] sm:$0xff] %v7677_v50  ;;  %v7681_v13 = vpop.eup %6023  ;;  %6043 = vpow2.f32 %v1833_v28  ;;  %v1839_v8 = vmul.f32 1.442695, %v1592_v21  ;;  %2023 = vadd.xlane.f32.xlu0 %v2022_v33  ;;  %v1929_v39 = vadd.f32 %v7677_v50, %v7672_v47  ;;  %v1370_v16 = vpop.xlane.xlu0 %1369  ;;  %v9869_v47 = vld [vmem:[#allocation73_spill] sm:$0xff] }
 0x531   :  { %9863 = vst [vmem:[#allocation66_spill] sm:$0xff] %v7681_v13  ;;  %v7685_v61 = vpop.eup %6025  ;;  %6045 = vpow2.f32 %v1835_v12  ;;  %v1713_v45 = vmul.f32 1.442695, %v1529_v62  ;;  %v1715_v29 = vmul.f32 1.442695, %v1530_v54  ;;  %v1531_v63 = vsub.f32 %v9865_v7, %v1370_v16  ;;  %v9870_v62 = vld [vmem:[#allocation75_spill] sm:$0xff] }
 0x532   :  { %9864 = vst [vmem:[#allocation68_spill] sm:$0xff] %v7685_v61  ;;  %v7688_v58 = vpop.eup %6027  ;;  %6047 = vpow2.f32 %v1837_v43  ;;  %1930 = vadd.xlane.f32.xlu1 %v1929_v39  ;;  %v1532_v51 = vsub.f32 %v9867_v3, %v1370_v16  ;;  %v1463_v28 = vpop.xlane.xlu1 %1462  ;;  %v1932_v21 = vadd.f32 %v7685_v61, %v7681_v13 }
 0x533   :  { %9866 = vst [vmem:[#allocation70_spill] sm:$0xff] %v7688_v58  ;;  %v7693_v33 = vpop.eup %6029  ;;  %6049 = vpow2.f32 %v1839_v8  ;;  %v1717_v41 = vmul.f32 1.442695, %v1531_v63  ;;  %v1593_v12 = vsub.f32 %v9869_v47, %v1463_v28  ;;  %v1594_v54 = vsub.f32 %v9870_v62, %v1463_v28  ;;  %v9872_v8 = vld [vmem:[#allocation77_spill] sm:$0xff]  ;;  %v9874_v47 = vld [vmem:[#allocation79_spill] sm:$0xff] }
 0x534   :  { %9868 = vst [vmem:[#allocation65_spill] sm:$0xff] %v7693_v33  ;;  %v7697_v50 = vpop.eup %6031  ;;  %6051 = vpow2.f32 %v1713_v45  ;;  %v1719_v7 = vmul.f32 1.442695, %v1532_v51  ;;  %1933 = vadd.xlane.f32.xlu0 %v1932_v21  ;;  %v2025_v43 = vadd.f32 %v7693_v33, %v7688_v58  ;;  %v1466_v39 = vpop.xlane.xlu0 %1465  ;;  %v9876_v58 = vld [vmem:[#allocation80_spill] sm:$0xff] }
 0x535   :  { %9871 = vst [vmem:[#allocation67_spill] sm:$0xff] %v7697_v50  ;;  %v7701_v16 = vpop.eup %6033  ;;  %6053 = vpow2.f32 %v1715_v29  ;;  %v1841_v3 = vmul.f32 1.442695, %v1593_v12  ;;  %v1843_v13 = vmul.f32 1.442695, %v1594_v54  ;;  %v1595_v63 = vsub.f32 %v9872_v8, %v1466_v39  ;;  %v9877_v12 = vld [vmem:[#allocation82_spill] sm:$0xff] }
 0x536   :  { %v7704_v61 = vpop.eup %6035  ;;  %6055 = vpow2.f32 %v1717_v41  ;;  %2026 = vadd.xlane.f32.xlu1 %v2025_v43  ;;  %v1596_v28 = vsub.f32 %v9874_v47, %v1466_v39  ;;  %v1373_v45 = vpop.xlane.xlu1 %1372  ;;  %v2028_v51 = vadd.f32 %v7701_v16, %v7697_v50 }
 0x537   :  { %9873 = vst [vmem:[#allocation69_spill] sm:$0xff] %v7704_v61  ;;  %v7709_v21 = vpop.eup %6037  ;;  %6057 = vpow2.f32 %v1719_v7  ;;  %v1845_v62 = vmul.f32 1.442695, %v1595_v63  ;;  %v1533_v29 = vsub.f32 %v9876_v58, %v1373_v45  ;;  %v1534_v54 = vsub.f32 %v9877_v12, %v1373_v45  ;;  %v9880_v58 = vld [vmem:[#allocation85_spill] sm:$0xff] }
 0x538   :  { %9875 = vst [vmem:[#allocation71_spill] sm:$0xff] %v7709_v21  ;;  %v7713_v33 = vpop.eup %6039  ;;  %6059 = vpow2.f32 %v1841_v3  ;;  %v1847_v8 = vmul.f32 1.442695, %v1596_v28  ;;  %2029 = vadd.xlane.f32.xlu0 %v2028_v51  ;;  %v1935_v41 = vadd.f32 %v7709_v21, %v7704_v61  ;;  %v1376_v43 = vpop.xlane.xlu0 %1375  ;;  %v9881_v61 = vld [vmem:[#allocation81_spill] sm:$0xff] }
 0x539   :  { %9878 = vst [vmem:[#allocation72_spill] sm:$0xff] %v7713_v33  ;;  %v7717_v39 = vpop.eup %6041  ;;  %6061 = vpow2.f32 %v1843_v13  ;;  %v1721_v47 = vmul.f32 1.442695, %v1533_v29  ;;  %v1723_v50 = vmul.f32 1.442695, %v1534_v54  ;;  %v1535_v7 = vsub.f32 %v7263_v20, %v1376_v43  ;;  %v9882_v29 = vld [vmem:[#allocation83_spill] sm:$0xff] }
 0x53a   :  { %9879 = vst [vmem:[#allocation74_spill] sm:$0xff] %v7717_v39  ;;  %v7720_v63 = vpop.eup %6043  ;;  %6063 = vpow2.f32 %v1845_v62  ;;  %1936 = vadd.xlane.f32.xlu1 %v1935_v41  ;;  %v1536_v45 = vsub.f32 %v9880_v58, %v1376_v43  ;;  %v1469_v3 = vpop.xlane.xlu1 %1468  ;;  %v1938_v28 = vadd.f32 %v7717_v39, %v7713_v33 }
 0x53b   :  { %v7725_v51 = vpop.eup %6045  ;;  %6065 = vpow2.f32 %v1847_v8  ;;  %v1725_v12 = vmul.f32 1.442695, %v1535_v7  ;;  %v1597_v13 = vsub.f32 %v9881_v61, %v1469_v3  ;;  %v1598_v54 = vsub.f32 %v9882_v29, %v1469_v3  ;;  %v9883_v8 = vld [vmem:[#allocation84_spill] sm:$0xff]  ;;  %v9884_v61 = vld [vmem:[#allocation86_spill] sm:$0xff] }
 0x53c   :  { %v7729_v21 = vpop.eup %6047  ;;  %6067 = vpow2.f32 %v1721_v47  ;;  %v1727_v20 = vmul.f32 1.442695, %v1536_v45  ;;  %1939 = vadd.xlane.f32.xlu0 %v1938_v28  ;;  %v2031_v62 = vadd.f32 %v7725_v51, %v7720_v63  ;;  %v1472_v41 = vpop.xlane.xlu0 %1471 }
 0x53d   :  { %v7733_v43 = vpop.eup %6049  ;;  %6069 = vpow2.f32 %v1723_v50  ;;  %v1849_v58 = vmul.f32 1.442695, %v1597_v13  ;;  %v1851_v33 = vmul.f32 1.442695, %v1598_v54  ;;  %v1599_v7 = vsub.f32 %v9883_v8, %v1472_v41 }
 0x53e   :  { %v7736_v39 = vpop.eup %6051  ;;  %6071 = vpow2.f32 %v1725_v12  ;;  %2032 = vadd.xlane.f32.xlu1 %v2031_v62  ;;  %v1600_v3 = vsub.f32 %v9884_v61, %v1472_v41  ;;  %v2034_v47 = vadd.f32 %v7733_v43, %v7729_v21 }
 0x53f   :  { %v7741_v45 = vpop.eup %6053  ;;  %6073 = vpow2.f32 %v1727_v20  ;;  %v1853_v28 = vmul.f32 1.442695, %v1599_v7 }
 0x540   :  { %v7743_v29 = vpop.eup %6055  ;;  %6075 = vpow2.f32 %v1849_v58  ;;  %v1855_v50 = vmul.f32 1.442695, %v1600_v3  ;;  %2035 = vadd.xlane.f32.xlu0 %v2034_v47  ;;  %v1941_v13 = vadd.f32 %v7741_v45, %v7736_v39 }
 0x541   :  { %9885 = vst [vmem:[#allocation76_spill] sm:$0xff] %v7743_v29  ;;  %v7747_v54 = vpop.eup %6057  ;;  %6077 = vpow2.f32 %v1851_v33 }
 0x542   :  { %v7749_v12 = vpop.eup %6059  ;;  %6079 = vpow2.f32 %v1853_v28  ;;  %1942 = vadd.xlane.f32.xlu1 %v1941_v13  ;;  %v1944_v62 = vadd.f32 %v7747_v54, %v7743_v29 }
 0x543   :  { %9886 = vst [vmem:[#allocation78_spill] sm:$0xff] %v7749_v12  ;;  %v7753_v20 = vpop.eup %6061  ;;  %6081 = vpow2.f32 %v1855_v50 }
 0x544   :  { %9887 = vst [vmem:[#allocation73_spill] sm:$0xff] %v7753_v20  ;;  %v7755_v41 = vpop.eup %6063  ;;  %1945 = vadd.xlane.f32.xlu0 %v1944_v62  ;;  %v2037_v58 = vadd.f32 %v7753_v20, %v7749_v12 }
 0x545   :  { %9888 = vst [vmem:[#allocation75_spill] sm:$0xff] %v7755_v41  ;;  %v7759_v8 = vpop.eup %6065 }
 0x546   :  { %9889 = vst [vmem:[#allocation77_spill] sm:$0xff] %v7759_v8  ;;  %v7761_v7 = vpop.eup %6067  ;;  %2038 = vadd.xlane.f32.xlu1 %v2037_v58  ;;  %v2040_v33 = vadd.f32 %v7759_v8, %v7755_v41 }
 0x547   :  { %9890 = vst [vmem:[#allocation79_spill] sm:$0xff] %v7761_v7  ;;  %v7765_v61 = vpop.eup %6069 }
 0x548   :  { %9891 = vst [vmem:[#allocation80_spill] sm:$0xff] %v7765_v61  ;;  %v7767_v3 = vpop.eup %6071  ;;  %2041 = vadd.xlane.f32.xlu0 %v2040_v33  ;;  %v1947_v47 = vadd.f32 %v7765_v61, %v7761_v7 }
 0x549   :  { %9892 = vst [vmem:[#allocation82_spill] sm:$0xff] %v7767_v3  ;;  %v7771_v28 = vpop.eup %6073 }
 0x54a   :  { %9893 = vst [vmem:[#allocation85_spill] sm:$0xff] %v7771_v28  ;;  %v7773_v50 = vpop.eup %6075  ;;  %1948 = vadd.xlane.f32.xlu1 %v1947_v47  ;;  %v1950_v13 = vadd.f32 %v7771_v28, %v7767_v3  ;;  %v5361_v47 = vld [vmem:[%s9304_s4 + $0x8] sm:$0xf] }
 0x54b   :  { %9894 = vst [vmem:[#allocation81_spill] sm:$0xff] %v7773_v50  ;;  %v7777_v62 = vpop.eup %6077 }
 0x54c   :  { %9895 = vst [vmem:[#allocation83_spill] sm:$0xff] %v7777_v62  ;;  %v7779_v58 = vpop.eup %6079  ;;  %1951 = vadd.xlane.f32.xlu0 %v1950_v13  ;;  %v2043_v41 = vadd.f32 %v7777_v62, %v7773_v50 }
 0x54d   :  { %9896 = vst [vmem:[#allocation84_spill] sm:$0xff] %v7779_v58  ;;  %v7783_v33 = vpop.eup %6081 }
 0x54e   :  { %9897 = vst [vmem:[#allocation86_spill] sm:$0xff] %v7783_v33  ;;  %2044 = vadd.xlane.f32.xlu1 %v2043_v41  ;;  %v2046_v7 = vadd.f32 %v7783_v33, %v7779_v58 }
 0x550   :  { %2047 = vadd.xlane.f32.xlu0 %v2046_v7 }
 0x55a   :  { %v1859_v61 = vpop.xlane.xlu1 %1858 }
 0x55b   :  { %6083 = vrcp.f32 %v1859_v61 }
 0x55e   :  { %v1955_v3 = vpop.xlane.xlu1 %1954 }
 0x55f   :  { %73 = vperm.xlu1 %5819, %v5361_v47  }
 0x560   :  { %v1862_v28 = vpop.xlane.xlu0 %1861 }
 0x561   :  { %6085 = vrcp.f32 %v1862_v28 }
 0x562   :  { %6087 = vrcp.f32 %v1955_v3 }
 0x564   :  { %v1958_v13 = vpop.xlane.xlu0 %1957 }
 0x565   :  { %6089 = vrcp.f32 %v1958_v13  ;;  %v6084_v62 = vpop.eup %6083 }
 0x566   :  { %v1865_v50 = vpop.xlane.xlu1 %1864  ;;  %v2051_v12 = vmul.f32 %v6084_v62, %v7289_v1  ;;  %v2050_v61 = vmul.f32 %v6084_v62, %v7287_v25 }
 0x567   :  { %6091 = vrcp.f32 %v1865_v50 }
 0x568   :  { %v1868_v41 = vpop.xlane.xlu0 %1867 }
 0x569   :  { %6093 = vrcp.f32 %v1868_v41 }
 0x56a   :  { %v1961_v58 = vpop.xlane.xlu1 %1960 }
 0x56b   :  { %v6086_v7 = vpop.eup %6085  ;;  %6095 = vrcp.f32 %v1961_v58 }
 0x56c   :  { %v1964_v33 = vpop.xlane.xlu0 %1963  ;;  %v2054_v47 = vmul.f32 %v6086_v7, %v7306_v26  ;;  %v2053_v28 = vmul.f32 %v6086_v7, %v7301_v38  ;;  %v6088_v3 = vpop.eup %6087 }
 0x56d   :  { %6097 = vrcp.f32 %v1964_v33  ;;  %v2147_v58 = vmul.f32 %v6088_v3, %v7299_v18  ;;  %v2146_v1 = vmul.f32 %v6088_v3, %v7297_v57 }
 0x56e   :  { %v1871_v13 = vpop.xlane.xlu1 %1870  ;;  %v5536_v8 = vpack.c.bf16 %v2054_v47, %v2051_v12  ;;  %v5538_v50 = vpack.c.bf16 %v2053_v28, %v2050_v61 }
 0x56f   :  { %v6090_v20 = vpop.eup %6089  ;;  %6099 = vrcp.f32 %v1871_v13 }
 0x570   :  { %5537 = vmatprep.subr.bf16.mxu1 %v5536_v8  ;;  %v1874_v41 = vpop.xlane.xlu0 %1873  ;;  %v2150_v29 = vmul.f32 %v6090_v20, %v7313_v14  ;;  %v2149_v26 = vmul.f32 %v6090_v20, %v7311_v24 }
 0x571   :  { %v6092_v25 = vpop.eup %6091  ;;  %6101 = vrcp.f32 %v1874_v41  ;;  %5539 = vmatpush1.bf16.xpose.msra.mxu1 %v5538_v50 }
 0x572   :  { %v1967_v38 = vpop.xlane.xlu1 %1966  ;;  %v5600_v62 = vpack.c.bf16 %v2150_v29, %v2147_v58  ;;  %v5602_v33 = vpack.c.bf16 %v2149_v26, %v2146_v1  ;;  %v2057_v12 = vmul.f32 %v6092_v25, %v7325_v30  ;;  %v2056_v7 = vmul.f32 %v6092_v25, %v7323_v31 }
 0x573   :  { %v6094_v8 = vpop.eup %6093  ;;  %6103 = vrcp.f32 %v1967_v38 }
 0x574   :  { %5601 = vmatprep.subr.bf16.mxu0 %v5600_v62  ;;  %v1970_v18 = vpop.xlane.xlu0 %1969  ;;  %v2060_v14 = vmul.f32 %v6094_v8, %v7332_v34  ;;  %v2059_v57 = vmul.f32 %v6094_v8, %v7327_v52 }
 0x575   :  { %v6096_v47 = vpop.eup %6095  ;;  %6105 = vrcp.f32 %v1970_v18  ;;  %5603 = vmatpush1.bf16.xpose.msra.mxu0 %v5602_v33 }
 0x576   :  { %v1877_v24 = vpop.xlane.xlu1 %1876  ;;  %v5540_v20 = vpack.c.bf16 %v2060_v14, %v2057_v12  ;;  %v5542_v61 = vpack.c.bf16 %v2059_v57, %v2056_v7  ;;  %v2153_v29 = vmul.f32 %v6096_v47, %v7339_v55  ;;  %v2152_v30 = vmul.f32 %v6096_v47, %v7337_v19 }
 0x577   :  { %v6098_v28 = vpop.eup %6097  ;;  %6107 = vrcp.f32 %v1877_v24 }
 0x578   :  { %5541 = vmatprep.subr.bf16.mxu1 %v5540_v20  ;;  %v1880_v31 = vpop.xlane.xlu0 %1879  ;;  %v2156_v3 = vmul.f32 %v6098_v28, %v7348_v49  ;;  %v2155_v34 = vmul.f32 %v6098_v28, %v7343_v2 }
 0x579   :  { %v6100_v13 = vpop.eup %6099  ;;  %6109 = vrcp.f32 %v1880_v31  ;;  %5543 = vmatpush1.bf16.xpose.msra.mxu1 %v5542_v61 }
 0x57a   :  { %v1973_v52 = vpop.xlane.xlu1 %1972  ;;  %v5604_v50 = vpack.c.bf16 %v2156_v3, %v2153_v29  ;;  %v5606_v41 = vpack.c.bf16 %v2155_v34, %v2152_v30  ;;  %v2063_v58 = vmul.f32 %v6100_v13, %v7355_v60  ;;  %v2062_v55 = vmul.f32 %v6100_v13, %v7353_v46 }
 0x57b   :  { %v6102_v1 = vpop.eup %6101  ;;  %6111 = vrcp.f32 %v1973_v52 }
 0x57c   :  { %5605 = vmatprep.subr.bf16.mxu0 %v5604_v50  ;;  %v1976_v19 = vpop.xlane.xlu0 %1975  ;;  %v2066_v26 = vmul.f32 %v6102_v1, %v7364_v42  ;;  %v2065_v49 = vmul.f32 %v6102_v1, %v7359_v5 }
 0x57d   :  { %v6104_v25 = vpop.eup %6103  ;;  %6113 = vrcp.f32 %v1976_v19  ;;  %5607 = vmatpush1.bf16.xpose.msra.mxu0 %v5606_v41 }
 0x57e   :  { %v1883_v2 = vpop.xlane.xlu1 %1882  ;;  %v5544_v38 = vpack.c.bf16 %v2066_v26, %v2063_v58  ;;  %v5546_v62 = vpack.c.bf16 %v2065_v49, %v2062_v55  ;;  %v2159_v33 = vmul.f32 %v6104_v25, %v7371_v6  ;;  %v2158_v60 = vmul.f32 %v6104_v25, %v7369_v32 }
 0x57f   :  { %v6106_v12 = vpop.eup %6105  ;;  %6115 = vrcp.f32 %v1883_v2 }
 0x580   :  { %5545 = vmatprep.subr.bf16.mxu1 %v5544_v38  ;;  %v1886_v46 = vpop.xlane.xlu0 %1885  ;;  %v2162_v7 = vmul.f32 %v6106_v12, %v7380_v11  ;;  %v2161_v42 = vmul.f32 %v6106_v12, %v7375_v15 }
 0x581   :  { %v6108_v8 = vpop.eup %6107  ;;  %6117 = vrcp.f32 %v1886_v46  ;;  %5547 = vmatpush1.bf16.xpose.msra.mxu1 %v5546_v62  ;;  %v9898_v62 = vld [vmem:[#allocation9_spill] sm:$0xff] }
 0x582   :  { %v1979_v5 = vpop.xlane.xlu1 %1978  ;;  %v5608_v18 = vpack.c.bf16 %v2162_v7, %v2159_v33  ;;  %v5610_v14 = vpack.c.bf16 %v2161_v42, %v2158_v60  ;;  %v2069_v57 = vmul.f32 %v6108_v8, %v7387_v10  ;;  %v2068_v6 = vmul.f32 %v6108_v8, %v7385_v44  ;;  %v9899_v60 = vld [vmem:[#allocation8_spill] sm:$0xff]  ;;  %v9900_v46 = vld [vmem:[#allocation13_spill] sm:$0xff] }
 0x583   :  { %v6110_v47 = vpop.eup %6109  ;;  %6119 = vrcp.f32 %v1979_v5  ;;  %v9901_v42 = vld [vmem:[#allocation12_spill] sm:$0xff] }
 0x584   :  { %5609 = vmatprep.subr.bf16.mxu0 %v5608_v18  ;;  %v1982_v32 = vpop.xlane.xlu0 %1981  ;;  %v2072_v24 = vmul.f32 %v6110_v47, %v7396_v37  ;;  %v2071_v11 = vmul.f32 %v6110_v47, %v7391_v23 }
 0x585   :  { %v6112_v20 = vpop.eup %6111  ;;  %6121 = vrcp.f32 %v1982_v32  ;;  %5611 = vmatpush1.bf16.xpose.msra.mxu0 %v5610_v14  ;;  %v9902_v14 = vld [vmem:[#allocation11_spill] sm:$0xff] }
 0x586   :  { %v1889_v15 = vpop.xlane.xlu1 %1888  ;;  %v5548_v61 = vpack.c.bf16 %v2072_v24, %v2069_v57  ;;  %v5550_v29 = vpack.c.bf16 %v2071_v11, %v2068_v6  ;;  %v2165_v30 = vmul.f32 %v6112_v20, %v7403_v27  ;;  %v2164_v10 = vmul.f32 %v6112_v20, %v7401_v48  ;;  %v9903_v6 = vld [vmem:[#allocation10_spill] sm:$0xff]  ;;  %v9904_v11 = vld [vmem:[#allocation15_spill] sm:$0xff] }
 0x587   :  { %v6114_v28 = vpop.eup %6113  ;;  %6123 = vrcp.f32 %v1889_v15  ;;  %v9905_v15 = vld [vmem:[#allocation14_spill] sm:$0xff] }
 0x588   :  { %5549 = vmatprep.subr.bf16.mxu1 %v5548_v61  ;;  %v1892_v44 = vpop.xlane.xlu0 %1891  ;;  %v2168_v31 = vmul.f32 %v6114_v28, %v7412_v22  ;;  %v2167_v37 = vmul.f32 %v6114_v28, %v7407_v53 }
 0x589   :  { %v6116_v3 = vpop.eup %6115  ;;  %6125 = vrcp.f32 %v1892_v44  ;;  %5551 = vmatpush1.bf16.xpose.msra.mxu1 %v5550_v29  ;;  %v9906_v44 = vld [vmem:[#allocation17_spill] sm:$0xff] }
 0x58a   :  { %v1985_v23 = vpop.xlane.xlu1 %1984  ;;  %v5612_v34 = vpack.c.bf16 %v2168_v31, %v2165_v30  ;;  %v5614_v13 = vpack.c.bf16 %v2167_v37, %v2164_v10  ;;  %v2075_v52 = vmul.f32 %v6116_v3, %v7419_v36  ;;  %v2074_v27 = vmul.f32 %v6116_v3, %v7417_v4  ;;  %v9907_v37 = vld [vmem:[#allocation16_spill] sm:$0xff] }
 0x58b   :  { %v6118_v50 = vpop.eup %6117  ;;  %6127 = vrcp.f32 %v1985_v23 }
 0x58c   :  { %5613 = vmatprep.subr.bf16.mxu0 %v5612_v34  ;;  %v1988_v48 = vpop.xlane.xlu0 %1987  ;;  %v2078_v41 = vmul.f32 %v6118_v50, %v7428_v35  ;;  %v2077_v22 = vmul.f32 %v6118_v50, %v7423_v0 }
 0x58d   :  { %v6120_v58 = vpop.eup %6119  ;;  %6129 = vrcp.f32 %v1988_v48  ;;  %5615 = vmatpush1.bf16.xpose.msra.mxu0 %v5614_v13  ;;  %v9908_v13 = vld [vmem:[#allocation21_spill] sm:$0xff] }
 0x58e   :  { %v1895_v53 = vpop.xlane.xlu1 %1894  ;;  %v5552_v55 = vpack.c.bf16 %v2078_v41, %v2075_v52  ;;  %v5554_v1 = vpack.c.bf16 %v2077_v22, %v2074_v27  ;;  %v2171_v19 = vmul.f32 %v6120_v58, %v7435_v40  ;;  %v2170_v36 = vmul.f32 %v6120_v58, %v7433_v17  ;;  %v9909_v27 = vld [vmem:[#allocation20_spill] sm:$0xff] }
 0x58f   :  { %v6122_v26 = vpop.eup %6121  ;;  %6131 = vrcp.f32 %v1895_v53  ;;  %v9910_v53 = vld [vmem:[#allocation19_spill] sm:$0xff] }
 0x590   :  { %5553 = vmatprep.subr.bf16.mxu1 %v5552_v55  ;;  %v1898_v4 = vpop.xlane.xlu0 %1897  ;;  %v2174_v49 = vmul.f32 %v6122_v26, %v7444_v9  ;;  %v2173_v35 = vmul.f32 %v6122_v26, %v7439_v59 }
 0x591   :  { %v6124_v25 = vpop.eup %6123  ;;  %6133 = vrcp.f32 %v1898_v4  ;;  %5555 = vmatpush1.bf16.xpose.msra.mxu1 %v5554_v1  ;;  %v9911_v1 = vld [vmem:[#allocation18_spill] sm:$0xff]  ;;  %v9912_v4 = vld [vmem:[#allocation23_spill] sm:$0xff] }
 0x592   :  { %v1991_v0 = vpop.xlane.xlu1 %1990  ;;  %v5616_v2 = vpack.c.bf16 %v2174_v49, %v2171_v19  ;;  %v5618_v38 = vpack.c.bf16 %v2173_v35, %v2170_v36  ;;  %v2081_v33 = vmul.f32 %v6124_v25, %v9898_v62  ;;  %v2080_v40 = vmul.f32 %v6124_v25, %v9899_v60  ;;  %v9913_v35 = vld [vmem:[#allocation22_spill] sm:$0xff] }
 0x593   :  { %v6126_v12 = vpop.eup %6125  ;;  %6135 = vrcp.f32 %v1991_v0 }
 0x594   :  { %5617 = vmatprep.subr.bf16.mxu0 %v5616_v2  ;;  %v1994_v17 = vpop.xlane.xlu0 %1993  ;;  %v2084_v7 = vmul.f32 %v6126_v12, %v9900_v46  ;;  %v2083_v9 = vmul.f32 %v6126_v12, %v9901_v42 }
 0x595   :  { %v6128_v8 = vpop.eup %6127  ;;  %6137 = vrcp.f32 %v1994_v17  ;;  %5619 = vmatpush1.bf16.xpose.msra.mxu0 %v5618_v38 }
 0x596   :  { %v5556_v5 = vpack.c.bf16 %v2084_v7, %v2081_v33  ;;  %v5558_v18 = vpack.c.bf16 %v2083_v9, %v2080_v40  ;;  %v2177_v57 = vmul.f32 %v6128_v8, %v9902_v14  ;;  %v2176_v47 = vmul.f32 %v6128_v8, %v9903_v6  ;;  %v9914_v33 = vld [vmem:[#allocation26_spill] sm:$0xff]  ;;  %v9915_v40 = vld [vmem:[#allocation24_spill] sm:$0xff] }
 0x597   :  { %v1901_v59 = vpop.xlane.xlu1 %1900  ;;  %v6130_v32 = vpop.eup %6129  ;;  %v9916_v7 = vld [vmem:[#allocation30_spill] sm:$0xff]  ;;  %v9917_v9 = vld [vmem:[#allocation28_spill] sm:$0xff] }
 0x598   :  { %6139 = vrcp.f32 %v1901_v59  ;;  %5557 = vmatprep.subr.bf16.mxu1 %v5556_v5  ;;  %v1904_v24 = vpop.xlane.xlu0 %1903  ;;  %v2180_v20 = vmul.f32 %v6130_v32, %v9904_v11  ;;  %v2179_v61 = vmul.f32 %v6130_v32, %v9905_v15  ;;  %v9920_v15 = vld [vmem:[#allocation29_spill] sm:$0xff] }
 0x599   :  { %v6132_v29 = vpop.eup %6131  ;;  %6141 = vrcp.f32 %v1904_v24  ;;  %5559 = vmatpush1.bf16.xpose.msra.mxu1 %v5558_v18 }
 0x59a   :  { %v5620_v10 = vpack.c.bf16 %v2180_v20, %v2177_v57  ;;  %v5622_v28 = vpack.c.bf16 %v2179_v61, %v2176_v47  ;;  %v2087_v31 = vmul.f32 %v6132_v29, %v9906_v44  ;;  %v2086_v3 = vmul.f32 %v6132_v29, %v9907_v37  ;;  %v9918_v57 = vld [vmem:[#allocation27_spill] sm:$0xff]  ;;  %v9919_v47 = vld [vmem:[#allocation25_spill] sm:$0xff]  ;;  %v9921_v37 = vld [vmem:[#allocation32_spill] sm:$0xff] }
 0x59b   :  { %v1997_v30 = vpop.xlane.xlu1 %1996  ;;  %v6134_v23 = vpop.eup %6133 }
 0x59c   :  { %6143 = vrcp.f32 %v1997_v30  ;;  %5621 = vmatprep.subr.bf16.mxu0 %v5620_v10  ;;  %v2000_v34 = vpop.xlane.xlu0 %1999  ;;  %v2090_v52 = vmul.f32 %v6134_v23, %v9908_v13  ;;  %v2089_v50 = vmul.f32 %v6134_v23, %v9909_v27  ;;  %v9922_v23 = vld [vmem:[#allocation36_spill] sm:$0xff]  ;;  %v9923_v13 = vld [vmem:[#allocation31_spill] sm:$0xff]  ;;  %v9924_v27 = vld [vmem:[#allocation34_spill] sm:$0xff] }
 0x59d   :  { %v6136_v48 = vpop.eup %6135  ;;  %6145 = vrcp.f32 %v2000_v34  ;;  %5623 = vmatpush1.bf16.xpose.msra.mxu0 %v5622_v28 }
 0x59e   :  { %v5560_v22 = vpack.c.bf16 %v2090_v52, %v2087_v31  ;;  %v5562_v58 = vpack.c.bf16 %v2089_v50, %v2086_v3  ;;  %v2183_v55 = vmul.f32 %v6136_v48, %v9910_v53  ;;  %v2182_v19 = vmul.f32 %v6136_v48, %v9911_v1 }
 0x59f   :  { %v1907_v41 = vpop.xlane.xlu1 %1906  ;;  %v6138_v36 = vpop.eup %6137 }
 0x5a0   :  { %6147 = vrcp.f32 %v1907_v41  ;;  %5561 = vmatprep.subr.bf16.mxu1 %v5560_v22  ;;  %v2186_v49 = vmul.f32 %v6138_v36, %v9912_v4  ;;  %v2185_v25 = vmul.f32 %v6138_v36, %v9913_v35 }
 0x5a1   :  { %v1910_v26 = vpop.xlane.xlu0 %1909  ;;  %5563 = vmatpush1.bf16.xpose.msra.mxu1 %v5562_v58 }
 0x5a2   :  { %v6140_v0 = vpop.eup %6139  ;;  %6149 = vrcp.f32 %v1910_v26  ;;  %v5624_v38 = vpack.c.bf16 %v2186_v49, %v2183_v55  ;;  %v5626_v62 = vpack.c.bf16 %v2185_v25, %v2182_v19  ;;  %v9925_v55 = vld [vmem:[#allocation33_spill] sm:$0xff]  ;;  %v9927_v26 = vld [vmem:[#allocation38_spill] sm:$0xff]  ;;  %v9928_v49 = vld [vmem:[#allocation35_spill] sm:$0xff] }
 0x5a3   :  { %v2003_v2 = vpop.xlane.xlu1 %2002  ;;  %v2093_v60 = vmul.f32 %v6140_v0, %v9914_v33  ;;  %v2092_v12 = vmul.f32 %v6140_v0, %v9915_v40  ;;  %v6142_v17 = vpop.eup %6141  ;;  %v9926_v19 = vld [vmem:[#allocation37_spill] sm:$0xff] }
 0x5a4   :  { %6151 = vrcp.f32 %v2003_v2  ;;  %5625 = vmatprep.subr.bf16.mxu0 %v5624_v38  ;;  %v2096_v42 = vmul.f32 %v6142_v17, %v9916_v7  ;;  %v2095_v8 = vmul.f32 %v6142_v17, %v9917_v9 }
 0x5a5   :  { %v2006_v46 = vpop.xlane.xlu0 %2005  ;;  %5627 = vmatpush1.bf16.xpose.msra.mxu0 %v5626_v62 }
 0x5a6   :  { %v6144_v59 = vpop.eup %6143  ;;  %6153 = vrcp.f32 %v2006_v46  ;;  %v5564_v18 = vpack.c.bf16 %v2096_v42, %v2093_v60  ;;  %v5566_v14 = vpack.c.bf16 %v2095_v8, %v2092_v12  ;;  %v9929_v60 = vld [vmem:[#allocation40_spill] sm:$0xff]  ;;  %v9931_v46 = vld [vmem:[#allocation39_spill] sm:$0xff]  ;;  %v9932_v42 = vld [vmem:[#allocation42_spill] sm:$0xff] }
 0x5a7   :  { %v1913_v5 = vpop.xlane.xlu1 %1912  ;;  %v2189_v6 = vmul.f32 %v6144_v59, %v9918_v57  ;;  %v2188_v32 = vmul.f32 %v6144_v59, %v9919_v47  ;;  %v6146_v24 = vpop.eup %6145  ;;  %v9930_v12 = vld [vmem:[#allocation44_spill] sm:$0xff] }
 0x5a8   :  { %6155 = vrcp.f32 %v1913_v5  ;;  %5565 = vmatprep.subr.bf16.mxu1 %v5564_v18  ;;  %v2192_v20 = vmul.f32 %v6146_v24, %v7541_v56  ;;  %v2191_v61 = vmul.f32 %v6146_v24, %v9920_v15  ;;  %v9936_v15 = vld [vmem:[#allocation43_spill] sm:$0xff] }
 0x5a9   :  { %v1916_v11 = vpop.xlane.xlu0 %1915  ;;  %5567 = vmatpush1.bf16.xpose.msra.mxu1 %v5566_v14 }
 0x5aa   :  { %v6148_v29 = vpop.eup %6147  ;;  %6157 = vrcp.f32 %v1916_v11  ;;  %v5628_v10 = vpack.c.bf16 %v2192_v20, %v2189_v6  ;;  %v5630_v28 = vpack.c.bf16 %v2191_v61, %v2188_v32  ;;  %v9933_v6 = vld [vmem:[#allocation41_spill] sm:$0xff]  ;;  %v9935_v11 = vld [vmem:[#allocation46_spill] sm:$0xff] }
 0x5ab   :  { %v2009_v30 = vpop.xlane.xlu1 %2008  ;;  %v2099_v3 = vmul.f32 %v6148_v29, %v9921_v37  ;;  %v2098_v52 = vmul.f32 %v6148_v29, %v9923_v13  ;;  %v9934_v32 = vld [vmem:[#allocation45_spill] sm:$0xff]  ;;  %v9937_v37 = vld [vmem:[#allocation48_spill] sm:$0xff]  ;;  %v9939_v13 = vld [vmem:[#allocation47_spill] sm:$0xff] }
 0x5ac   :  { %v6150_v44 = vpop.eup %6149  ;;  %6159 = vrcp.f32 %v2009_v30  ;;  %5629 = vmatprep.subr.bf16.mxu0 %v5628_v10 }
 0x5ad   :  { %v2012_v31 = vpop.xlane.xlu0 %2011  ;;  %v2102_v34 = vmul.f32 %v6150_v44, %v9922_v23  ;;  %v2101_v56 = vmul.f32 %v6150_v44, %v9924_v27  ;;  %5631 = vmatpush1.bf16.xpose.msra.mxu0 %v5630_v28  ;;  %v9938_v23 = vld [vmem:[#allocation52_spill] sm:$0xff]  ;;  %v9940_v27 = vld [vmem:[#allocation50_spill] sm:$0xff] }
 0x5ae   :  { %v6152_v50 = vpop.eup %6151  ;;  %6161 = vrcp.f32 %v2012_v31 }
 0x5af   :  { %v1919_v48 = vpop.xlane.xlu1 %1918  ;;  %v5568_v41 = vpack.c.bf16 %v2102_v34, %v2099_v3  ;;  %v5570_v22 = vpack.c.bf16 %v2101_v56, %v2098_v52  ;;  %v2195_v1 = vmul.f32 %v6152_v50, %v9925_v55  ;;  %v2194_v4 = vmul.f32 %v6152_v50, %v9927_v26  ;;  %v9941_v55 = vld [vmem:[#allocation49_spill] sm:$0xff]  ;;  %v9943_v26 = vld [vmem:[#allocation54_spill] sm:$0xff] }
 0x5b0   :  { %v6154_v58 = vpop.eup %6153  ;;  %6163 = vrcp.f32 %v1919_v48 }
 0x5b1   :  { %5569 = vmatprep.subr.bf16.mxu1 %v5568_v41  ;;  %v1922_v53 = vpop.xlane.xlu0 %1921  ;;  %v2198_v36 = vmul.f32 %v6154_v58, %v9926_v19  ;;  %v2197_v35 = vmul.f32 %v6154_v58, %v9928_v49  ;;  %v9942_v19 = vld [vmem:[#allocation53_spill] sm:$0xff]  ;;  %v9944_v49 = vld [vmem:[#allocation51_spill] sm:$0xff] }
 0x5b2   :  { %v6156_v25 = vpop.eup %6155  ;;  %6165 = vrcp.f32 %v1922_v53  ;;  %5571 = vmatpush1.bf16.xpose.msra.mxu1 %v5570_v22 }
 0x5b3   :  { %v2015_v0 = vpop.xlane.xlu1 %2014  ;;  %v5632_v2 = vpack.c.bf16 %v2198_v36, %v2195_v1  ;;  %v5634_v38 = vpack.c.bf16 %v2197_v35, %v2194_v4  ;;  %v2105_v40 = vmul.f32 %v6156_v25, %v9929_v60  ;;  %v2104_v7 = vmul.f32 %v6156_v25, %v9931_v46  ;;  %v9945_v60 = vld [vmem:[#allocation56_spill] sm:$0xff]  ;;  %v9947_v46 = vld [vmem:[#allocation55_spill] sm:$0xff] }
 0x5b4   :  { %v6158_v62 = vpop.eup %6157  ;;  %6167 = vrcp.f32 %v2015_v0 }
 0x5b5   :  { %5633 = vmatprep.subr.bf16.mxu0 %v5632_v2  ;;  %v2018_v33 = vpop.xlane.xlu0 %2017  ;;  %v2108_v17 = vmul.f32 %v6158_v62, %v9930_v12  ;;  %v2107_v9 = vmul.f32 %v6158_v62, %v9932_v42  ;;  %v9946_v12 = vld [vmem:[#allocation60_spill] sm:$0xff]  ;;  %v9948_v42 = vld [vmem:[#allocation58_spill] sm:$0xff] }
 0x5b6   :  { %v6160_v8 = vpop.eup %6159  ;;  %6169 = vrcp.f32 %v2018_v33  ;;  %5635 = vmatpush1.bf16.xpose.msra.mxu0 %v5634_v38 }
 0x5b7   :  { %v1925_v59 = vpop.xlane.xlu1 %1924  ;;  %v5572_v5 = vpack.c.bf16 %v2108_v17, %v2105_v40  ;;  %v5574_v18 = vpack.c.bf16 %v2107_v9, %v2104_v7  ;;  %v2201_v47 = vmul.f32 %v6160_v8, %v9933_v6  ;;  %v2200_v20 = vmul.f32 %v6160_v8, %v9935_v11  ;;  %v9949_v6 = vld [vmem:[#allocation57_spill] sm:$0xff]  ;;  %v9951_v11 = vld [vmem:[#allocation62_spill] sm:$0xff] }
 0x5b8   :  { %v6162_v14 = vpop.eup %6161  ;;  %6171 = vrcp.f32 %v1925_v59 }
 0x5b9   :  { %5573 = vmatprep.subr.bf16.mxu1 %v5572_v5  ;;  %v1928_v57 = vpop.xlane.xlu0 %1927  ;;  %v2204_v24 = vmul.f32 %v6162_v14, %v9934_v32  ;;  %v2203_v61 = vmul.f32 %v6162_v14, %v9936_v15  ;;  %v9950_v32 = vld [vmem:[#allocation61_spill] sm:$0xff]  ;;  %v9952_v15 = vld [vmem:[#allocation59_spill] sm:$0xff] }
 0x5ba   :  { %v6164_v29 = vpop.eup %6163  ;;  %6173 = vrcp.f32 %v1928_v57  ;;  %5575 = vmatpush1.bf16.xpose.msra.mxu1 %v5574_v18 }
 0x5bb   :  { %v2021_v30 = vpop.xlane.xlu1 %2020  ;;  %v5636_v10 = vpack.c.bf16 %v2204_v24, %v2201_v47  ;;  %v5638_v28 = vpack.c.bf16 %v2203_v61, %v2200_v20  ;;  %v2111_v3 = vmul.f32 %v6164_v29, %v9937_v37  ;;  %v2110_v52 = vmul.f32 %v6164_v29, %v9939_v13  ;;  %v9953_v37 = vld [vmem:[#allocation64_spill] sm:$0xff]  ;;  %v9955_v13 = vld [vmem:[#allocation63_spill] sm:$0xff] }
 0x5bc   :  { %v6166_v44 = vpop.eup %6165  ;;  %6175 = vrcp.f32 %v2021_v30 }
 0x5bd   :  { %5637 = vmatprep.subr.bf16.mxu0 %v5636_v10  ;;  %v2024_v31 = vpop.xlane.xlu0 %2023  ;;  %v2114_v34 = vmul.f32 %v6166_v44, %v9938_v23  ;;  %v2113_v56 = vmul.f32 %v6166_v44, %v9940_v27  ;;  %v9954_v23 = vld [vmem:[#allocation68_spill] sm:$0xff]  ;;  %v9956_v27 = vld [vmem:[#allocation66_spill] sm:$0xff] }
 0x5be   :  { %v6168_v50 = vpop.eup %6167  ;;  %6177 = vrcp.f32 %v2024_v31  ;;  %5639 = vmatpush1.bf16.xpose.msra.mxu0 %v5638_v28 }
 0x5bf   :  { %v1931_v48 = vpop.xlane.xlu1 %1930  ;;  %v5576_v41 = vpack.c.bf16 %v2114_v34, %v2111_v3  ;;  %v5578_v22 = vpack.c.bf16 %v2113_v56, %v2110_v52  ;;  %v2207_v1 = vmul.f32 %v6168_v50, %v9941_v55  ;;  %v2206_v4 = vmul.f32 %v6168_v50, %v9943_v26  ;;  %v9957_v55 = vld [vmem:[#allocation65_spill] sm:$0xff] }
 0x5c0   :  { %v6170_v58 = vpop.eup %6169  ;;  %6179 = vrcp.f32 %v1931_v48 }
 0x5c1   :  { %5577 = vmatprep.subr.bf16.mxu1 %v5576_v41  ;;  %v1934_v53 = vpop.xlane.xlu0 %1933  ;;  %v2210_v36 = vmul.f32 %v6170_v58, %v9942_v19  ;;  %v2209_v35 = vmul.f32 %v6170_v58, %v9944_v49 }
 0x5c2   :  { %v6172_v25 = vpop.eup %6171  ;;  %6181 = vrcp.f32 %v1934_v53  ;;  %5579 = vmatpush1.bf16.xpose.msra.mxu1 %v5578_v22 }
 0x5c3   :  { %v2027_v0 = vpop.xlane.xlu1 %2026  ;;  %v5640_v2 = vpack.c.bf16 %v2210_v36, %v2207_v1  ;;  %v5642_v38 = vpack.c.bf16 %v2209_v35, %v2206_v4  ;;  %v2117_v40 = vmul.f32 %v6172_v25, %v9945_v60  ;;  %v2116_v7 = vmul.f32 %v6172_v25, %v9947_v46  ;;  %v9958_v36 = vld [vmem:[#allocation70_spill] sm:$0xff]  ;;  %v9959_v4 = vld [vmem:[#allocation67_spill] sm:$0xff]  ;;  %v9963_v46 = vld [vmem:[#allocation72_spill] sm:$0xff] }
 0x5c4   :  { %v6174_v62 = vpop.eup %6173  ;;  %6183 = vrcp.f32 %v2027_v0 }
 0x5c5   :  { %5641 = vmatprep.subr.bf16.mxu0 %v5640_v2  ;;  %v2030_v33 = vpop.xlane.xlu0 %2029  ;;  %v2120_v17 = vmul.f32 %v6174_v62, %v9946_v12  ;;  %v2119_v9 = vmul.f32 %v6174_v62, %v9948_v42 }
 0x5c6   :  { %v6176_v8 = vpop.eup %6175  ;;  %6185 = vrcp.f32 %v2030_v33  ;;  %5643 = vmatpush1.bf16.xpose.msra.mxu0 %v5642_v38  ;;  %v9960_v33 = vld [vmem:[#allocation71_spill] sm:$0xff] }
 0x5c7   :  { %v1937_v59 = vpop.xlane.xlu1 %1936  ;;  %v5580_v5 = vpack.c.bf16 %v2120_v17, %v2117_v40  ;;  %v5582_v18 = vpack.c.bf16 %v2119_v9, %v2116_v7  ;;  %v2213_v47 = vmul.f32 %v6176_v8, %v9949_v6  ;;  %v2212_v20 = vmul.f32 %v6176_v8, %v9951_v11  ;;  %v9961_v40 = vld [vmem:[#allocation74_spill] sm:$0xff]  ;;  %v9962_v17 = vld [vmem:[#allocation69_spill] sm:$0xff] }
 0x5c8   :  { %v6178_v14 = vpop.eup %6177  ;;  %6187 = vrcp.f32 %v1937_v59 }
 0x5c9   :  { %5581 = vmatprep.subr.bf16.mxu1 %v5580_v5  ;;  %v1940_v57 = vpop.xlane.xlu0 %1939  ;;  %v2216_v24 = vmul.f32 %v6178_v14, %v9950_v32  ;;  %v2215_v61 = vmul.f32 %v6178_v14, %v9952_v15 }
 0x5ca   :  { %v6180_v29 = vpop.eup %6179  ;;  %6189 = vrcp.f32 %v1940_v57  ;;  %5583 = vmatpush1.bf16.xpose.msra.mxu1 %v5582_v18 }
 0x5cb   :  { %v2033_v30 = vpop.xlane.xlu1 %2032  ;;  %v5644_v10 = vpack.c.bf16 %v2216_v24, %v2213_v47  ;;  %v5646_v28 = vpack.c.bf16 %v2215_v61, %v2212_v20  ;;  %v2123_v3 = vmul.f32 %v6180_v29, %v9953_v37  ;;  %v2122_v52 = vmul.f32 %v6180_v29, %v9955_v13  ;;  %v9965_v37 = vld [vmem:[#allocation6_spill] sm:$0xff] }
 0x5cc   :  { %v6182_v44 = vpop.eup %6181  ;;  %6191 = vrcp.f32 %v2033_v30  ;;  %v9964_v30 = vld [vmem:[#allocation76_spill] sm:$0xff] }
 0x5cd   :  { %5645 = vmatprep.subr.bf16.mxu0 %v5644_v10  ;;  %v2036_v31 = vpop.xlane.xlu0 %2035  ;;  %v2126_v34 = vmul.f32 %v6182_v44, %v9954_v23  ;;  %v2125_v56 = vmul.f32 %v6182_v44, %v9956_v27  ;;  %v9966_v23 = vld [vmem:[#allocation7_spill] sm:$0xff] }
 0x5ce   :  { %v6184_v50 = vpop.eup %6183  ;;  %6193 = vrcp.f32 %v2036_v31  ;;  %5647 = vmatpush1.bf16.xpose.msra.mxu0 %v5646_v28 }
 0x5cf   :  { %v1943_v48 = vpop.xlane.xlu1 %1942  ;;  %v5584_v41 = vpack.c.bf16 %v2126_v34, %v2123_v3  ;;  %v5586_v22 = vpack.c.bf16 %v2125_v56, %v2122_v52  ;;  %v2219_v1 = vmul.f32 %v6184_v50, %v9957_v55  ;;  %v2218_v26 = vmul.f32 %v6184_v50, %v9958_v36  ;;  %v9969_v52 = vld [vmem:[#allocation78_spill] sm:$0xff]  ;;  %v9970_v56 = vld [vmem:[#allocation75_spill] sm:$0xff]  ;;  %v9971_v55 = vld [vmem:[#allocation5_spill] sm:$0xff] }
 0x5d0   :  { %v6186_v58 = vpop.eup %6185  ;;  %6195 = vrcp.f32 %v1943_v48 }
 0x5d1   :  { %5585 = vmatprep.subr.bf16.mxu1 %v5584_v41  ;;  %v1946_v53 = vpop.xlane.xlu0 %1945  ;;  %v2222_v19 = vmul.f32 %v6186_v58, %v7701_v16  ;;  %v2221_v49 = vmul.f32 %v6186_v58, %v9959_v4 }
 0x5d2   :  { %v6188_v35 = vpop.eup %6187  ;;  %6197 = vrcp.f32 %v1946_v53  ;;  %5587 = vmatpush1.bf16.xpose.msra.mxu1 %v5586_v22 }
 0x5d3   :  { %v2039_v25 = vpop.xlane.xlu1 %2038  ;;  %v5648_v0 = vpack.c.bf16 %v2222_v19, %v2219_v1  ;;  %v5650_v2 = vpack.c.bf16 %v2221_v49, %v2218_v26  ;;  %v2129_v60 = vmul.f32 %v6188_v35, %v9960_v33  ;;  %v2128_v16 = vmul.f32 %v6188_v35, %v9962_v17  ;;  %v9972_v19 = vld [vmem:[#allocation80_spill] sm:$0xff]  ;;  %v9973_v26 = vld [vmem:[#allocation85_spill] sm:$0xff]  ;;  %v9974_v49 = vld [vmem:[#allocation79_spill] sm:$0xff] }
 0x5d4   :  { %v6190_v38 = vpop.eup %6189  ;;  %6199 = vrcp.f32 %v2039_v25  ;;  %v9975_v25 = vld [vmem:[#allocation82_spill] sm:$0xff] }
 0x5d5   :  { %5649 = vmatprep.subr.bf16.mxu0 %v5648_v0  ;;  %v2042_v62 = vpop.xlane.xlu0 %2041  ;;  %v2132_v12 = vmul.f32 %v6190_v38, %v9961_v40  ;;  %v2131_v7 = vmul.f32 %v6190_v38, %v9963_v46 }
 0x5d6   :  { %v6192_v42 = vpop.eup %6191  ;;  %6201 = vrcp.f32 %v2042_v62  ;;  %5651 = vmatpush1.bf16.xpose.msra.mxu0 %v5650_v2 }
 0x5d7   :  { %v1949_v9 = vpop.xlane.xlu1 %1948  ;;  %v5588_v8 = vpack.c.bf16 %v2132_v12, %v2129_v60  ;;  %v5590_v59 = vpack.c.bf16 %v2131_v7, %v2128_v16  ;;  %v2225_v14 = vmul.f32 %v6192_v42, %v7725_v51  ;;  %v2224_v6 = vmul.f32 %v6192_v42, %v7720_v63  ;;  %v9976_v16 = vld [vmem:[#allocation83_spill] sm:$0xff]  ;;  %v9977_v7 = vld [vmem:[#allocation86_spill] sm:$0xff] }
 0x5d8   :  { %v6194_v5 = vpop.eup %6193  ;;  %6203 = vrcp.f32 %v1949_v9  ;;  %v9978_v9 = vld [vmem:[#allocation81_spill] sm:$0xff] }
 0x5d9   :  { %5589 = vmatprep.subr.bf16.mxu1 %v5588_v8  ;;  %v1952_v18 = vpop.xlane.xlu0 %1951  ;;  %v2228_v57 = vmul.f32 %v6194_v5, %v7733_v43  ;;  %v2227_v47 = vmul.f32 %v6194_v5, %v7729_v21 }
 0x5da   :  { %v6196_v32 = vpop.eup %6195  ;;  %6205 = vrcp.f32 %v1952_v18  ;;  %5591 = vmatpush1.bf16.xpose.msra.mxu1 %v5590_v59  ;;  %v9979_v59 = vld [vmem:[#allocation84_spill] sm:$0xff] }
 0x5db   :  { %v2045_v24 = vpop.xlane.xlu1 %2044  ;;  %v5652_v11 = vpack.c.bf16 %v2228_v57, %v2225_v14  ;;  %v5654_v20 = vpack.c.bf16 %v2227_v47, %v2224_v6  ;;  %v2135_v29 = vmul.f32 %v6196_v32, %v7741_v45  ;;  %v2134_v43 = vmul.f32 %v6196_v32, %v7736_v39  ;;  %v9968_v39 = vld [vmem:[#allocation77_spill] sm:$0xff]  ;;  %v76_v47 = vld [vmem:[%s9308_s6] sm:$0xf] }
 0x5dc   :  { %v6198_v15 = vpop.eup %6197  ;;  %6207 = vrcp.f32 %v2045_v24  ;;  %v9980_v6 = vmov 0.0   ;;  %79 = vperm.xlu0 %5820, %v76_v47   ;;  %v46_v47 = vld [vmem:[%s9310_s7] sm:$0xff] }
 0x5dd   :  { %5653 = vmatprep.subr.bf16.mxu0 %v5652_v11  ;;  %v2048_v61 = vpop.xlane.xlu0 %2047  ;;  %v2138_v51 = vmul.f32 %v6198_v15, %v7747_v54  ;;  %v2137_v63 = vmul.f32 %v6198_v15, %v9964_v30  ;;  %v9967_v54 = vld [vmem:[#allocation73_spill] sm:$0xff] }
 0x5de   :  { %v6200_v10 = vpop.eup %6199  ;;  %6209 = vrcp.f32 %v2048_v61  ;;  %5655 = vmatpush1.bf16.xpose.msra.mxu0 %v5654_v20 }
 0x5df   :  { %v7906_v21 = vpop.permute.xlu1 %73  ;;  %v5592_v28 = vpack.c.bf16 %v2138_v51, %v2135_v29  ;;  %v5594_v44 = vpack.c.bf16 %v2137_v63, %v2134_v43  ;;  %v2231_v34 = vmul.f32 %v6200_v10, %v9967_v54  ;;  %v2230_v27 = vmul.f32 %v6200_v10, %v9969_v52  ;;  %v53_v10 = vld [vmem:[%s9309_s5] sm:$0xf] }
 0x5e0   :  { %v6202_v31 = vpop.eup %6201  ;;  %v364_v3 = vadd.f32 %v9965_v37, %v7906_v21  ;;  %v366_v45 = vadd.f32 %v9966_v23, %v7906_v21  ;;  %v6609_v23 = vld [vmem:[%s9303_s0] sm:$0xff] }
 0x5e1   :  { %5593 = vmatprep.subr.bf16.mxu1 %v5592_v28  ;;  %v2234_v13 = vmul.f32 %v6202_v31, %v9968_v39  ;;  %v2233_v50 = vmul.f32 %v6202_v31, %v9970_v56  ;;  %v9983_v54 = vld [vmem:[#allocation2_spill] sm:$0xff] }
 0x5e2   :  { %v6204_v48 = vpop.eup %6203  ;;  %5595 = vmatpush1.bf16.xpose.msra.mxu1 %v5594_v44  ;;  %v392_v41 = vcombine.low %v364_v3, %v366_v45 }
 0x5e3   :  { %v5656_v22 = vpack.c.bf16 %v2234_v13, %v2231_v34  ;;  %v5658_v58 = vpack.c.bf16 %v2233_v50, %v2230_v27  ;;  %v2141_v36 = vmul.f32 %v6204_v48, %v9972_v19  ;;  %v2140_v35 = vmul.f32 %v6204_v48, %v9974_v49  ;;  %v7961_v27 = vld [vmem:[%s9303_s0 + $0x8] sm:$0xff] }
 0x5e4   :  { %v6206_v53 = vpop.eup %6205  ;;  %v399_v1 = vrot.slane %v392_v41, %v9971_v55  ;;  %v7965_v56 = vcombine.high %v7961_v27, %v7961_v27  ;;  %v2742_v50 = vsel %vm98_vm0, %v7961_v27, 0.0 }
 0x5e5   :  { %5657 = vmatprep.subr.bf16.mxu0 %v5656_v22  ;;  %v2144_v4 = vmul.f32 %v6206_v53, %v9973_v26  ;;  %v2143_v0 = vmul.f32 %v6206_v53, %v9975_v25 }
 0x5e6   :  { %v6208_v2 = vpop.eup %6207  ;;  %5659 = vmatpush1.bf16.xpose.msra.mxu0 %v5658_v58  ;;  %v2247_v38 = vrot.slane %v399_v1, %v9971_v55  ;;  %v400_v62 = vcombine.high %v399_v1, %v399_v1  ;;  %9985 = vst [vmem:[#allocation12_spill] sm:$0xff] %v7965_v56  ;;  %v2743_v48 = vsel %vm98_vm0, %v7965_v56, 0.0 }
 0x5e7   :  { %v5596_v33 = vpack.c.bf16 %v2144_v4, %v2141_v36  ;;  %v5598_v60 = vpack.c.bf16 %v2143_v0, %v2140_v35  ;;  %v2237_v46 = vmul.f32 %v6208_v2, %v9976_v16  ;;  %v2236_v8 = vmul.f32 %v6208_v2, %v9978_v9 }
 0x5e8   :  { %v6210_v40 = vpop.eup %6209  ;;  %v2248_v12 = vcombine.high %v2247_v38, %v2247_v38  ;;  %v2328_v17 = vrot.slane %v400_v62, %v9971_v55  ;;  %v2744_v41 = vadd.f32 %v2743_v48, %v2742_v50 }
 0x5e9   :  { %5597 = vmatprep.subr.bf16.mxu1 %v5596_v33  ;;  %v2240_v42 = vmul.f32 %v6210_v40, %v9977_v7  ;;  %v2239_v5 = vmul.f32 %v6210_v40, %v9979_v59 }
 0x5ea   :  { %5599 = vmatpush1.bf16.xpose.msra.mxu1 %v5598_v60  ;;  %2315 = vmatprep.mubr.f32.mxu1 %v2248_v12  ;;  %v2329_v18 = vcombine.high %v2328_v17, %v2328_v17 }
 0x5eb   :  { %v5660_v14 = vpack.c.bf16 %v2240_v42, %v2237_v46  ;;  %v5662_v57 = vpack.c.bf16 %v2239_v5, %v2236_v8 }
 0x5ec   :  { %2396 = vmatprep.mubr.f32.mxu0 %v2329_v18 }
 0x5ed   :  { %5661 = vmatprep.subr.bf16.mxu0 %v5660_v14 }
 0x5ee   :  { %5663 = vmatpush1.bf16.xpose.msra.mxu0 %v5662_v57 }
 0x5f1   :  { %2316 = vmatmul.mubr.f32.vlgmr.msra.gmra.mrb[66].mxu1 %v2247_v38 }
 0x5f2   :  { %2503 = vmatprep.mubr.f32.mxu1 %v9980_v6 }
 0x5f5   :  { %2397 = vmatmul.mubr.f32.vlgmr.msra.gmra.mrb[68].mxu0 %v2328_v17 }
 0x5f6   :  { %2633 = vmatprep.mubr.f32.mxu0 %v9980_v6 }
 0x65b   :  { %v7942_v28 = vpop.permute.xlu0 %79 }
 0x65c   :  { %9981 = vst [vmem:[#allocation9_spill] sm:$0xff] %v7942_v28 }
 0x6c4   :  { %v2317_v32 = vpop.f32.mrb[66].mxu1 }
 0x6c5   :  { %v2319_v24 = vpop.f32.mrb[67].mxu1 }
 0x6c6   :  { %v2407_v11 = vcombine.low %v2317_v32, %v2319_v24  ;;  %v47_v32 = vld [vmem:[%s9311_s8] sm:$0xff]  ;;  %v7981_v24 = vcombine.high %v46_v47, %v46_v47 }
 0x6c8   :  { %v2398_v20 = vpop.f32.mrb[68].mxu0  ;;  %v2414_v29 = vrot.slane %v2407_v11, %v9971_v55  ;;  %9986 = vst [vmem:[#allocation11_spill] sm:$0xff] %v7981_v24 }
 0x6c9   :  { %v2400_v15 = vpop.f32.mrb[69].mxu0 }
 0x6ca   :  { %v2415_v61 = vcombine.low %v2398_v20, %v2400_v15 }
 0x6cc   :  { %v2422_v51 = vrot.slane %v2415_v61, %v9971_v55  ;;  %v7983_v61 = vcombine.high %v47_v32, %v47_v32 }
 0x6ce   :  { %v2423_v43 = vcombine.low %v2414_v29, %v2422_v51  ;;  %9987 = vst [vmem:[#allocation10_spill] sm:$0xff] %v7983_v61 }
 0x6d0   :  { %v2430_v30 = vrot.slane %v2423_v43, %v9971_v55 }
 0x6d2   :  { %v2431_v63 = vcombine.high %v2430_v30, %v2430_v30 }
 0x6d4   :  { %5439 = vmatprep.subr.msk.mxu1 %vm98_vm0, %v2431_v63 }
 0x6d5   :  { %5440 = vmatpush1.msk.msra.mxu1 %vm98_vm0, %v2430_v30 }
 0x6d6   :  { %5441 = vmatmul.mubr.msk.f32.vlgmr.msra.gmra.mrb[68].mxu1 %vm141_vm1, %v53_v10 }
 0x6d7   :  { %2723 = vmatprep.mubr.f32.mxu1 %v9980_v6 }
 0x7a9   :  { %v2505_v44 = vpop.f32.mrb[68].mxu1 }
 0x7aa   :  { %v2506_v31 = vadd.f32 %v2505_v44, %v7942_v28  ;;  %v2507_v37 = vpop.f32.mrb[69].mxu1 }
 0x7ab   :  { %v2508_v3 = vadd.f32 %v2507_v37, %v7942_v28 }
 0x7ac   :  { %v7949_v45 = vadd.f32 %v6609_v23, %v2506_v31  ;;  %v54_v31 = vld [vmem:[%s9312_s9] sm:$0xf] }
 0x7ad   :  { %v7952_v34 = vadd.f32 %v2508_v3, %v9983_v54 }
 0x7ae   :  { %9982 = vst [vmem:[#allocation8_spill] sm:$0xff] %v7949_v45  ;;  %v2512_v39 = vsel %vm98_vm0, %v7949_v45, 0.0 }
 0x7af   :  { %9984 = vst [vmem:[#allocation13_spill] sm:$0xff] %v7952_v34  ;;  %v2513_v13 = vsel %vm98_vm0, %v7952_v34, 0.0 }
 0x7b0   :  { %v2514_v52 = vadd.f32 %v2513_v13, %v2512_v39  ;;  %v82_v39 = vld [vmem:[%s9313_s10] sm:$0xf] }
 0x7b2   :  { %2515 = vadd.xlane.f32.xlu1 %v2514_v52 }
 0x7b6   :  { %2745 = vadd.xlane.f32.xlu1 %v2744_v41 }
 0x83f   :  { %v2516_v22 = vpop.xlane.xlu1 %2515 }
 0x840   :  { %v2517_v58 = vrot.slane %v2516_v22, 4 }
 0x842   :  { %v2518_v53 = vadd.f32 %v2517_v58, %v2516_v22 }
 0x843   :  { %v2746_v7 = vpop.xlane.xlu1 %2745 }
 0x844   :  { %v2519_v1 = vrot.slane %v2518_v53, 2  ;;  %v2747_v42 = vrot.slane %v2746_v7, 4 }
 0x846   :  { %v2520_v19 = vadd.f32 %v2519_v1, %v2518_v53  ;;  %v2748_v9 = vadd.f32 %v2747_v42, %v2746_v7  ;;  %v6611_v42 = vld [vmem:[%s9306_s2] sm:$0xff] }
 0x848   :  { %v2521_v36 = vrot.slane %v2520_v19, 1  ;;  %v2749_v8 = vrot.slane %v2748_v9, 2 }
 0x84a   :  { %v2522_v26 = vadd.f32 %v2521_v36, %v2520_v19  ;;  %v2750_v5 = vadd.f32 %v2749_v8, %v2748_v9 }
 0x84c   :  { %5798 = vpush %v2522_v26  ;;  %v2751_v18 = vrot.slane %v2750_v5, 1 }
 0x84e   :  { %v2752_v57 = vadd.f32 %v2751_v18, %v2750_v5  ;;  %v6613_v5 = vld [vmem:[%s9307_s3 + $0x4] sm:$0xf]  ;;  %v6614_v18 = vld [vmem:[%s9307_s3 + $0x8] sm:$0xf] }
 0x87d   :  { %s5799_s21 = spop %5798 }
 0x87e   :  { %s2524_s22 = smul.f32 0.0009765625, %s5799_s21 }
 0x880   :  { %v2525_v4 = vstv %s2524_s22 }
 0x881   :  { %v2526_v49 = vsub.f32 %v7949_v45, %v2525_v4  ;;  %v2527_v35 = vsub.f32 %v7952_v34, %v2525_v4 }
 0x883   :  { %v2528_v25 = vmul.f32 %v2526_v49, %v2526_v49  ;;  %v2529_v0 = vmul.f32 %v2527_v35, %v2527_v35 }
 0x885   :  { %v2530_v2 = vsel %vm98_vm0, %v2528_v25, 0.0  ;;  %v2531_v38 = vsel %vm98_vm0, %v2529_v0, 0.0 }
 0x886   :  { %v2532_v62 = vadd.f32 %v2531_v38, %v2530_v2 }
 0x888   :  { %2533 = vadd.xlane.f32.xlu0 %v2532_v62 }
 0x915   :  { %v2534_v33 = vpop.xlane.xlu0 %2533 }
 0x916   :  { %v2535_v60 = vrot.slane %v2534_v33, 4 }
 0x918   :  { %v2536_v40 = vadd.f32 %v2535_v60, %v2534_v33 }
 0x91a   :  { %v2537_v12 = vrot.slane %v2536_v40, 2 }
 0x91c   :  { %v2538_v17 = vadd.f32 %v2537_v12, %v2536_v40  ;;  %v55_v12 = vld [vmem:[%s9314_s11] sm:$0xf] }
 0x91e   :  { %v2539_v16 = vrot.slane %v2538_v17, 1 }
 0x920   :  { %v2540_v46 = vadd.f32 %v2539_v16, %v2538_v17 }
 0x922   :  { %5800 = vpush %v2540_v46  ;;  %v6610_v46 = vld [vmem:[%s9305_s1] sm:$0xff] }
 0x953   :  { %s5801_s23 = spop %5800 }
 0x954   :  { %s2542_s24 = smul.f32 0.0009765625, %s5801_s23 }
 0x956   :  { %s2543_s25 = sadd.f32 1e-05, %s2542_s24 }
 0x958   :  { %v2544_v59 = vstv %s2543_s25 }
 0x959   :  { %6211 = vrsqrt.f32 %v2544_v59  ;;  %v6612_v59 = vld [vmem:[%s9307_s3] sm:$0xf] }
 0x963   :  { %v6212_v14 = vpop.eup %6211 }
 0x964   :  { %5802 = vpush %v6212_v14 }
 0x965   :  { %5804 = vpush %v2752_v57 }
 0x995   :  { %s5803_s30 = spop %5802 }
 0x996   :  { %v2547_v11 = vstv %s5803_s30  ;;  %s5805_s14 = spop %5804 }
 0x997   :  { %v2548_v20 = vmul.f32 %v2547_v11, %v2526_v49  ;;  %v2549_v15 = vmul.f32 %v2547_v11, %v2527_v35  ;;  %s2754_s4 = smul.f32 0.0009765625, %s5805_s14  ;;  %v9991_v11 = vld [vmem:[#allocation3_spill] sm:$0xff] }
 0x999   :  { %v2553_v29 = vmul.f32 %v2548_v20, %v46_v47  ;;  %v2554_v51 = vmul.f32 %v7981_v24, %v2549_v15  ;;  %v2755_v43 = vstv %s2754_s4  ;;  %v9992_v15 = vld [vmem:[#allocation4_spill] sm:$0xff] }
 0x99a   :  { %v2756_v30 = vsub.f32 %v7961_v27, %v2755_v43 }
 0x99b   :  { %v2558_v63 = vadd.f32 %v2553_v29, %v47_v32  ;;  %v2559_v10 = vadd.f32 %v7983_v61, %v2554_v51 }
 0x99c   :  { %v2757_v44 = vmul.f32 %v2756_v30, %v2756_v30 }
 0x99d   :  { %5442 = vmatprep.subr.msk.mxu0 %vm98_vm0, %v2559_v10 }
 0x99e   :  { %v2759_v37 = vcombine.high %v2757_v44, %v2757_v44  ;;  %5443 = vmatpush1.msk.msra.mxu0 %vm98_vm0, %v2558_v63  ;;  %v2761_v3 = vsel %vm98_vm0, %v2757_v44, 0.0 }
 0x99f   :  { %5444 = vmatmul.mubr.msk.f32.vlgmr.msra.gmra.mrb[70].mxu0 %vm141_vm1, %v54_v31 }
 0x9a0   :  { %v2762_v23 = vsel %vm98_vm0, %v2759_v37, 0.0  ;;  %2852 = vmatprep.mubr.f32.mxu0 %v9980_v6 }
 0x9a1   :  { %v2763_v54 = vadd.f32 %v2762_v23, %v2761_v3 }
 0x9a3   :  { %2764 = vadd.xlane.f32.xlu1 %v2763_v54 }
 0x9b4   :  { %85 = vperm.xlu1 %5819, %v82_v39  }
 0xa30   :  { %v2765_v13 = vpop.xlane.xlu1 %2764 }
 0xa31   :  { %v2766_v52 = vrot.slane %v2765_v13, 4 }
 0xa33   :  { %v2767_v27 = vadd.f32 %v2766_v52, %v2765_v13 }
 0xa34   :  { %v8000_v58 = vpop.permute.xlu1 %85 }
 0xa35   :  { %v2768_v50 = vrot.slane %v2767_v27, 2  ;;  %9988 = vst [vmem:[#allocation15_spill] sm:$0xff] %v8000_v58 }
 0xa37   :  { %v2769_v48 = vadd.f32 %v2768_v50, %v2767_v27 }
 0xa39   :  { %v2770_v41 = vrot.slane %v2769_v48, 1 }
 0xa3b   :  { %v2771_v22 = vadd.f32 %v2770_v41, %v2769_v48 }
 0xa3d   :  { %5806 = vpush %v2771_v22 }
 0xa6e   :  { %s5807_s18 = spop %5806 }
 0xa6f   :  { %s2773_s19 = smul.f32 0.0009765625, %s5807_s18 }
 0xa71   :  { %s2774_s20 = sadd.f32 1e-05, %s2773_s19 }
 0xa72   :  { %v2635_v53 = vpop.f32.mrb[70].mxu0 }
 0xa73   :  { %v2775_v1 = vstv %s2774_s20  ;;  %v2636_v19 = vadd.f32 %v2635_v53, %v8000_v58  ;;  %v2637_v36 = vpop.f32.mrb[71].mxu0 }
 0xa74   :  { %6213 = vrsqrt.f32 %v2775_v1  ;;  %v2638_v26 = vadd.f32 %v2637_v36, %v8000_v58 }
 0xa75   :  { %v2642_v4 = vmul.f32 0.70710677, %v2636_v19  ;;  %v2640_v33 = vmul.f32 0.5, %v2636_v19 }
 0xa76   :  { %v2643_v49 = vmul.f32 0.70710677, %v2638_v26  ;;  %v2641_v38 = vmul.f32 0.5, %v2638_v26 }
 0xa77   :  { %6215 = verf.f32 %v2642_v4 }
 0xa78   :  { %6217 = verf.f32 %v2643_v49 }
 0xa7e   :  { %v6214_v35 = vpop.eup %6213 }
 0xa7f   :  { %5808 = vpush %v6214_v35 }
 0xa81   :  { %v6216_v25 = vpop.eup %6215 }
 0xa82   :  { %v6218_v0 = vpop.eup %6217  ;;  %v2646_v2 = vadd.f32 1.0, %v6216_v25 }
 0xa83   :  { %v2647_v62 = vadd.f32 1.0, %v6218_v0 }
 0xa84   :  { %v2648_v40 = vmul.f32 %v2646_v2, %v2640_v33 }
 0xa85   :  { %v2649_v60 = vmul.f32 %v2647_v62, %v2641_v38 }
 0xa87   :  { %5445 = vmatprep.subr.msk.mxu1 %vm98_vm0, %v2649_v60 }
 0xa88   :  { %5446 = vmatpush1.msk.msra.mxu1 %vm98_vm0, %v2648_v40 }
 0xa89   :  { %5447 = vmatmul.mubr.msk.f32.vlgmr.msra.gmra.mrb[70].mxu1 %vm141_vm1, %v55_v12 }
 0xa8a   :  { %2923 = vmatprep.mubr.f32.mxu1 %v9980_v6 }
 0xab0   :  { %s5809_s22 = spop %5808 }
 0xab1   :  { %v2778_v17 = vstv %s5809_s22 }
 0xab2   :  { %v2779_v16 = vmul.f32 %v2778_v17, %v2756_v30 }
 0xab4   :  { %v2780_v7 = vmul.f32 %v6610_v46, %v2779_v16 }
 0xab6   :  { %v2781_v9 = vadd.f32 %v6611_v42, %v2780_v7 }
 0xab8   :  { %v2783_v8 = vcombine.high %v2781_v9, %v2781_v9 }
 0xaba   :  { %5449 = vmatprep.subr.msk.mxu0 %vm98_vm0, %v2783_v8  ;;  %5452 = vmatprep.subr.msk.mxu1 %vm98_vm0, %v2783_v8 }
 0xabb   :  { %5450 = vmatpush1.msk.msra.mxu0 %vm98_vm0, %v2781_v9  ;;  %5453 = vmatpush1.msk.msra.mxu1 %vm98_vm0, %v2781_v9 }
 0xabc   :  { %5451 = vmatmul.mubr.msk.f32.vlgmr.msra.gmra.mrb[72].mxu0 %vm141_vm1, %v6612_v59  ;;  %5454 = vmatmul.mubr.msk.f32.vlgmr.msra.gmra.mrb[72].mxu1 %vm141_vm1, %v6613_v5 }
 0xabd   :  { %5455 = vmatprep.subr.msk.mxu0 %vm98_vm0, %v2783_v8  ;;  %2994 = vmatprep.mubr.f32.mxu0 %v9980_v6 }
 0xabe   :  { %5456 = vmatpush1.msk.msra.mxu0 %vm98_vm0, %v2781_v9  ;;  %3280 = vmatprep.mubr.f32.mxu1 %v9980_v6 }
 0xac0   :  { %5457 = vmatmul.mubr.msk.f32.vlgmr.msra.gmra.mrb[74].mxu0 %vm141_vm1, %v6614_v18 }
 0xac1   :  { %3719 = vmatprep.mubr.f32.mxu0 %v9980_v6 }
 0xb5c   :  { %v8038_v14 = vpop.f32.mrb[70].mxu1 }
 0xb5d   :  { %9989 = vst [vmem:[#allocation14_spill] sm:$0xff] %v8038_v14  ;;  %v8040_v57 = vpop.f32.mrb[71].mxu1 }
 0xb5e   :  { %9990 = vst [vmem:[#allocation17_spill] sm:$0xff] %v8040_v57 }
 0xb8f   :  { %v2854_v47 = vpop.f32.mrb[72].mxu0  ;;  %v2925_v32 = vpop.f32.mrb[72].mxu1 }
 0xb90   :  { %v2855_v20 = vadd.f32 %v2854_v47, %v9991_v11  ;;  %v2926_v29 = vadd.f32 %v2925_v32, %v9992_v15  ;;  %v2856_v51 = vpop.f32.mrb[73].mxu0  ;;  %v2927_v43 = vpop.f32.mrb[73].mxu1 }
 0xb91   :  { %v2857_v30 = vadd.f32 %v2856_v51, %v9991_v11  ;;  %v2928_v63 = vadd.f32 %v2927_v43, %v9992_v15 }
 0xb93   :  { %v3003_v10 = vcombine.low %v2855_v20, %v2857_v30  ;;  %v3014_v44 = vcombine.low %v2926_v29, %v2928_v63  ;;  %v2996_v31 = vpop.f32.mrb[74].mxu0 }
 0xb94   :  { %v8047_v37 = vadd.f32 %v2996_v31, %v7906_v21  ;;  %v2998_v3 = vpop.f32.mrb[75].mxu0 }
 0xb95   :  { %v3010_v23 = vrot.slane %v3003_v10, %v9971_v55  ;;  %v3021_v54 = vrot.slane %v3014_v44, %v9971_v55  ;;  %v8052_v39 = vadd.f32 %v2998_v3, %v7906_v21 }
 0xb97   :  { %v3011_v13 = vcombine.high %v3010_v23, %v3010_v23  ;;  %v3040_v52 = vrot.slane %v3010_v23, %v9971_v55  ;;  %v3022_v27 = vcombine.high %v3021_v54, %v3021_v54  ;;  %v3114_v50 = vrot.slane %v3021_v54, %v9971_v55 }
 0xb98   :  { %v3025_v48 = vcombine.low %v8047_v37, %v8052_v39 }
 0xb99   :  { %v3479_v41 = vrot.slane %v3011_v13, %v9971_v55  ;;  %v3553_v22 = vrot.slane %v3022_v27, %v9971_v55  ;;  %3044 = vxpose.xlu0.b32.start.end [1/1] (short) %v3040_v52, 128  ;;  %v3115_v53 = vcombine.high %v3114_v50, %v3114_v50  ;;  %v3041_v19 = vcombine.high %v3040_v52, %v3040_v52 }
 0xb9b   :  { %3483 = vxpose.xlu1.b32.start.end [1/1] (short) %v3479_v41, 128  ;;  %5458 = vmatprep.subr.msk.mxu1 %vm580_vm2, %v3115_v53  ;;  %v3554_v21 = vcombine.high %v3553_v22, %v3553_v22  ;;  %v3480_v1 = vcombine.high %v3479_v41, %v3479_v41 }
 0xb9c   :  { %5459 = vmatpush1.msk.msra.mxu1 %vm580_vm2, %v3114_v50 }
 0xb9d   :  { %5492 = vmatprep.subr.msk.mxu0 %vm580_vm2, %v3554_v21 }
 0xb9e   :  { %5493 = vmatpush1.msk.msra.mxu0 %vm580_vm2, %v3553_v22 }
 0xbd6   :  { %3515 = vxpose.xlu0.b32.start.end [1/1] (short) %v3480_v1, 128 }
 0xbd8   :  { %3076 = vxpose.xlu1.b32.start.end [1/1] (short) %v3041_v19, 128 }
 0xc19   :  { %v3060_v36 = vpop.trf.xlu0 }
 0xc1a   :  { %5460 = vmatmul.mubr.msk.f32.vlgmr.msra.gmra.mrb[74].mxu1 %vm483_vm3, %v3060_v36 }
 0xc1b   :  { %v3499_v26 = vpop.trf.xlu1  ;;  %3286 = vmatprep.mubr.f32.mxu1 %v9980_v6 }
 0xc1c   :  { %5494 = vmatmul.mubr.msk.f32.vlgmr.msra.gmra.mrb[76].mxu0 %vm483_vm3, %v3499_v26 }
 0xc1d   :  { %v3061_v4 = vpop.trf.xlu0  ;;  %3725 = vmatprep.mubr.f32.mxu0 %v9980_v6 }
 0xc1e   :  { %5461 = vmatmul.mubr.msk.f32.gmra.mrb[76].mxu1 %vm483_vm3, %v3061_v4 }
 0xc1f   :  { %v3500_v49 = vpop.trf.xlu1  ;;  %3292 = vmatprep.mubr.f32.mxu1 %v9980_v6 }
 0xc20   :  { %5495 = vmatmul.mubr.msk.f32.gmra.mrb[78].mxu0 %vm483_vm3, %v3500_v49 }
 0xc21   :  { %v3062_v35 = vpop.trf.xlu0  ;;  %3731 = vmatprep.mubr.f32.mxu0 %v9980_v6 }
 0xc22   :  { %5462 = vmatmul.mubr.msk.f32.gmra.mrb[78].mxu1 %vm483_vm3, %v3062_v35 }
 0xc23   :  { %v3501_v25 = vpop.trf.xlu1  ;;  %3298 = vmatprep.mubr.f32.mxu1 %v9980_v6 }
 0xc24   :  { %5496 = vmatmul.mubr.msk.f32.gmra.mrb[80].mxu0 %vm483_vm3, %v3501_v25 }
 0xc25   :  { %v3063_v0 = vpop.trf.xlu0  ;;  %3737 = vmatprep.mubr.f32.mxu0 %v9980_v6 }
 0xc26   :  { %5463 = vmatmul.mubr.msk.f32.gmra.mrb[80].mxu1 %vm483_vm3, %v3063_v0 }
 0xc27   :  { %v3502_v2 = vpop.trf.xlu1  ;;  %3304 = vmatprep.mubr.f32.mxu1 %v9980_v6 }
 0xc28   :  { %5497 = vmatmul.mubr.msk.f32.gmra.mrb[82].mxu0 %vm483_vm3, %v3502_v2  ;;  %v3032_v2 = vrot.slane %v3025_v48, %v9971_v55 }
 0xc29   :  { %v3064_v38 = vpop.trf.xlu0  ;;  %3743 = vmatprep.mubr.f32.mxu0 %v9980_v6 }
 0xc2a   :  { %5464 = vmatmul.mubr.msk.f32.gmra.mrb[82].mxu1 %vm483_vm3, %v3064_v38  ;;  %v8189_v39 = vrot.slane %v3032_v2, %v9971_v55 }
 0xc2b   :  { %v3503_v62 = vpop.trf.xlu1  ;;  %3310 = vmatprep.mubr.f32.mxu1 %v9980_v6 }
 0xc2c   :  { %5498 = vmatmul.mubr.msk.f32.gmra.mrb[84].mxu0 %vm483_vm3, %v3503_v62  ;;  %9993 = vst [vmem:[#allocation16_spill] sm:$0xff] %v8189_v39 }
 0xc2d   :  { %v3065_v33 = vpop.trf.xlu0  ;;  %3749 = vmatprep.mubr.f32.mxu0 %v9980_v6 }
 0xc2e   :  { %5465 = vmatmul.mubr.msk.f32.gmra.mrb[84].mxu1 %vm483_vm3, %v3065_v33  ;;  %v3033_v33 = vcombine.high %v3032_v2, %v3032_v2 }
 0xc2f   :  { %v3504_v60 = vpop.trf.xlu1  ;;  %3316 = vmatprep.mubr.f32.mxu1 %v9980_v6 }
 0xc30   :  { %5499 = vmatmul.mubr.msk.f32.gmra.mrb[86].mxu0 %vm483_vm3, %v3504_v60  ;;  %v8192_v48 = vrot.slane %v3033_v33, %v9971_v55 }
 0xc31   :  { %v3066_v40 = vpop.trf.xlu0  ;;  %3755 = vmatprep.mubr.f32.mxu0 %v9980_v6 }
 0xc32   :  { %5466 = vmatmul.mubr.msk.f32.gmra.mrb[86].mxu1 %vm483_vm3, %v3066_v40  ;;  %9994 = vst [vmem:[#allocation21_spill] sm:$0xff] %v8192_v48 }
 0xc33   :  { %v3505_v12 = vpop.trf.xlu1  ;;  %3322 = vmatprep.mubr.f32.mxu1 %v9980_v6 }
 0xc34   :  { %5500 = vmatmul.mubr.msk.f32.gmra.mrb[88].mxu0 %vm483_vm3, %v3505_v12 }
 0xc35   :  { %v3067_v17 = vpop.trf.xlu0  ;;  %3761 = vmatprep.mubr.f32.mxu0 %v9980_v6 }
 0xc36   :  { %5467 = vmatmul.mubr.msk.f32.gmra.mrb[88].mxu1 %vm483_vm3, %v3067_v17 }
 0xc37   :  { %v3506_v16 = vpop.trf.xlu1  ;;  %3328 = vmatprep.mubr.f32.mxu1 %v9980_v6 }
 0xc38   :  { %5501 = vmatmul.mubr.msk.f32.gmra.mrb[90].mxu0 %vm483_vm3, %v3506_v16  ;;  %v4879_v16 = vcombine.high %v8189_v39, %v8189_v39 }
 0xc39   :  { %v3068_v46 = vpop.trf.xlu0  ;;  %3767 = vmatprep.mubr.f32.mxu0 %v9980_v6 }
 0xc3a   :  { %5468 = vmatmul.mubr.msk.f32.gmra.mrb[90].mxu1 %vm483_vm3, %v3068_v46  ;;  %v4960_v46 = vcombine.high %v8192_v48, %v8192_v48 }
 0xc3b   :  { %v3507_v7 = vpop.trf.xlu1  ;;  %3334 = vmatprep.mubr.f32.mxu1 %v9980_v6 }
 0xc3c   :  { %5502 = vmatmul.mubr.msk.f32.gmra.mrb[92].mxu0 %vm483_vm3, %v3507_v7 }
 0xc3d   :  { %v3069_v42 = vpop.trf.xlu0  ;;  %3773 = vmatprep.mubr.f32.mxu0 %v9980_v6 }
 0xc3e   :  { %5469 = vmatmul.mubr.msk.f32.gmra.mrb[92].mxu1 %vm483_vm3, %v3069_v42 }
 0xc3f   :  { %v3508_v9 = vpop.trf.xlu1  ;;  %3340 = vmatprep.mubr.f32.mxu1 %v9980_v6 }
 0xc40   :  { %5503 = vmatmul.mubr.msk.f32.gmra.mrb[94].mxu0 %vm483_vm3, %v3508_v9 }
 0xc41   :  { %v3070_v8 = vpop.trf.xlu0  ;;  %3779 = vmatprep.mubr.f32.mxu0 %v9980_v6 }
 0xc42   :  { %5470 = vmatmul.mubr.msk.f32.gmra.mrb[94].mxu1 %vm483_vm3, %v3070_v8 }
 0xc43   :  { %v3509_v59 = vpop.trf.xlu1  ;;  %3346 = vmatprep.mubr.f32.mxu1 %v9980_v6 }
 0xc44   :  { %5504 = vmatmul.mubr.msk.f32.gmra.mrb[96].mxu0 %vm483_vm3, %v3509_v59 }
 0xc45   :  { %v3071_v5 = vpop.trf.xlu0  ;;  %3785 = vmatprep.mubr.f32.mxu0 %v9980_v6 }
 0xc46   :  { %5471 = vmatmul.mubr.msk.f32.gmra.mrb[96].mxu1 %vm483_vm3, %v3071_v5 }
 0xc47   :  { %v3510_v18 = vpop.trf.xlu1  ;;  %3352 = vmatprep.mubr.f32.mxu1 %v9980_v6 }
 0xc48   :  { %5505 = vmatmul.mubr.msk.f32.gmra.mrb[98].mxu0 %vm483_vm3, %v3510_v18 }
 0xc49   :  { %v3072_v47 = vpop.trf.xlu0  ;;  %3791 = vmatprep.mubr.f32.mxu0 %v9980_v6 }
 0xc4a   :  { %5472 = vmatmul.mubr.msk.f32.gmra.mrb[98].mxu1 %vm483_vm3, %v3072_v47 }
 0xc4b   :  { %v3511_v32 = vpop.trf.xlu1  ;;  %3358 = vmatprep.mubr.f32.mxu1 %v9980_v6 }
 0xc4c   :  { %5506 = vmatmul.mubr.msk.f32.gmra.mrb[100].mxu0 %vm483_vm3, %v3511_v32 }
 0xc4d   :  { %v3073_v11 = vpop.trf.xlu0  ;;  %3797 = vmatprep.mubr.f32.mxu0 %v9980_v6 }
 0xc4e   :  { %5473 = vmatmul.mubr.msk.f32.gmra.mrb[100].mxu1 %vm483_vm3, %v3073_v11 }
 0xc4f   :  { %v3512_v20 = vpop.trf.xlu1  ;;  %3364 = vmatprep.mubr.f32.mxu1 %v9980_v6 }
 0xc50   :  { %5507 = vmatmul.mubr.msk.f32.gmra.mrb[102].mxu0 %vm483_vm3, %v3512_v20 }
 0xc51   :  { %v3074_v15 = vpop.trf.xlu0  ;;  %3803 = vmatprep.mubr.f32.mxu0 %v9980_v6 }
 0xc52   :  { %5474 = vmatmul.mubr.msk.f32.gmra.mrb[102].mxu1 %vm483_vm3, %v3074_v15 }
 0xc53   :  { %v3513_v29 = vpop.trf.xlu1  ;;  %3370 = vmatprep.mubr.f32.mxu1 %v9980_v6 }
 0xc54   :  { %5508 = vmatmul.mubr.msk.f32.gmra.mrb[104].mxu0 %vm483_vm3, %v3513_v29 }
 0xc55   :  { %v3075_v51 = vpop.trf.xlu0  ;;  %3809 = vmatprep.mubr.f32.mxu0 %v9980_v6 }
 0xc56   :  { %5475 = vmatmul.mubr.msk.f32.gmra.mrb[104].mxu1 %vm483_vm3, %v3075_v51 }
 0xc57   :  { %v3514_v43 = vpop.trf.xlu1  ;;  %3376 = vmatprep.mubr.f32.mxu1 %v9980_v6 }
 0xc58   :  { %5509 = vmatmul.mubr.msk.f32.gmra.mrb[106].mxu0 %vm483_vm3, %v3514_v43 }
 0xc59   :  { %v3531_v30 = vpop.trf.xlu0  ;;  %3815 = vmatprep.mubr.f32.mxu0 %v9980_v6 }
 0xc5b   :  { %v3092_v63 = vpop.trf.xlu1 }
 0xc5c   :  { %5476 = vmatmul.mubr.msk.f32.gmra.mrb[106].mxu1 %vm483_vm3, %v3092_v63  ;;  %5510 = vmatmul.mubr.msk.f32.gmra.mrb[108].mxu0 %vm483_vm3, %v3531_v30 }
 0xc5d   :  { %v3532_v10 = vpop.trf.xlu0  ;;  %3382 = vmatprep.mubr.f32.mxu1 %v9980_v6  ;;  %3821 = vmatprep.mubr.f32.mxu0 %v9980_v6 }
 0xc5f   :  { %v3093_v44 = vpop.trf.xlu1 }
 0xc60   :  { %5477 = vmatmul.mubr.msk.f32.gmra.mrb[108].mxu1 %vm483_vm3, %v3093_v44  ;;  %5511 = vmatmul.mubr.msk.f32.gmra.mrb[110].mxu0 %vm483_vm3, %v3532_v10 }
 0xc61   :  { %v3533_v31 = vpop.trf.xlu0  ;;  %3388 = vmatprep.mubr.f32.mxu1 %v9980_v6  ;;  %3827 = vmatprep.mubr.f32.mxu0 %v9980_v6 }
 0xc63   :  { %v3094_v3 = vpop.trf.xlu1 }
 0xc64   :  { %5478 = vmatmul.mubr.msk.f32.gmra.mrb[110].mxu1 %vm483_vm3, %v3094_v3  ;;  %5512 = vmatmul.mubr.msk.f32.gmra.mrb[112].mxu0 %vm483_vm3, %v3533_v31 }
 0xc65   :  { %v3534_v23 = vpop.trf.xlu0  ;;  %3394 = vmatprep.mubr.f32.mxu1 %v9980_v6  ;;  %3833 = vmatprep.mubr.f32.mxu0 %v9980_v6 }
 0xc67   :  { %v3095_v54 = vpop.trf.xlu1 }
 0xc68   :  { %5479 = vmatmul.mubr.msk.f32.gmra.mrb[112].mxu1 %vm483_vm3, %v3095_v54  ;;  %5513 = vmatmul.mubr.msk.f32.gmra.mrb[114].mxu0 %vm483_vm3, %v3534_v23 }
 0xc69   :  { %v3535_v13 = vpop.trf.xlu0  ;;  %3400 = vmatprep.mubr.f32.mxu1 %v9980_v6  ;;  %3839 = vmatprep.mubr.f32.mxu0 %v9980_v6 }
 0xc6b   :  { %v3096_v52 = vpop.trf.xlu1 }
 0xc6c   :  { %5480 = vmatmul.mubr.msk.f32.gmra.mrb[114].mxu1 %vm483_vm3, %v3096_v52  ;;  %5514 = vmatmul.mubr.msk.f32.gmra.mrb[116].mxu0 %vm483_vm3, %v3535_v13 }
 0xc6d   :  { %v3536_v27 = vpop.trf.xlu0  ;;  %3406 = vmatprep.mubr.f32.mxu1 %v9980_v6  ;;  %3845 = vmatprep.mubr.f32.mxu0 %v9980_v6 }
 0xc6f   :  { %v3097_v50 = vpop.trf.xlu1 }
 0xc70   :  { %5481 = vmatmul.mubr.msk.f32.gmra.mrb[116].mxu1 %vm483_vm3, %v3097_v50  ;;  %5515 = vmatmul.mubr.msk.f32.gmra.mrb[118].mxu0 %vm483_vm3, %v3536_v27 }
 0xc71   :  { %v3537_v41 = vpop.trf.xlu0  ;;  %3412 = vmatprep.mubr.f32.mxu1 %v9980_v6  ;;  %3851 = vmatprep.mubr.f32.mxu0 %v9980_v6 }
 0xc73   :  { %v3098_v22 = vpop.trf.xlu1 }
 0xc74   :  { %5482 = vmatmul.mubr.msk.f32.gmra.mrb[118].mxu1 %vm483_vm3, %v3098_v22  ;;  %5516 = vmatmul.mubr.msk.f32.gmra.mrb[120].mxu0 %vm483_vm3, %v3537_v41 }
 0xc75   :  { %v3538_v53 = vpop.trf.xlu0  ;;  %3418 = vmatprep.mubr.f32.mxu1 %v9980_v6  ;;  %3857 = vmatprep.mubr.f32.mxu0 %v9980_v6 }
 0xc77   :  { %v3099_v21 = vpop.trf.xlu1 }
 0xc78   :  { %5483 = vmatmul.mubr.msk.f32.gmra.mrb[120].mxu1 %vm483_vm3, %v3099_v21  ;;  %5517 = vmatmul.mubr.msk.f32.gmra.mrb[122].mxu0 %vm483_vm3, %v3538_v53 }
 0xc79   :  { %v3539_v1 = vpop.trf.xlu0  ;;  %3424 = vmatprep.mubr.f32.mxu1 %v9980_v6  ;;  %3863 = vmatprep.mubr.f32.mxu0 %v9980_v6 }
 0xc7b   :  { %v3100_v19 = vpop.trf.xlu1 }
 0xc7c   :  { %5484 = vmatmul.mubr.msk.f32.gmra.mrb[122].mxu1 %vm483_vm3, %v3100_v19  ;;  %5518 = vmatmul.mubr.msk.f32.gmra.mrb[124].mxu0 %vm483_vm3, %v3539_v1 }
 0xc7d   :  { %v3540_v36 = vpop.trf.xlu0  ;;  %3430 = vmatprep.mubr.f32.mxu1 %v9980_v6  ;;  %3869 = vmatprep.mubr.f32.mxu0 %v9980_v6 }
 0xc7f   :  { %v3101_v26 = vpop.trf.xlu1 }
 0xc80   :  { %5485 = vmatmul.mubr.msk.f32.gmra.mrb[124].mxu1 %vm483_vm3, %v3101_v26  ;;  %5519 = vmatmul.mubr.msk.f32.gmra.mrb[126].mxu0 %vm483_vm3, %v3540_v36 }
 0xc81   :  { %v3541_v4 = vpop.trf.xlu0  ;;  %3436 = vmatprep.mubr.f32.mxu1 %v9980_v6  ;;  %3875 = vmatprep.mubr.f32.mxu0 %v9980_v6 }
 0xc83   :  { %v3102_v49 = vpop.trf.xlu1 }
 0xc84   :  { %5486 = vmatmul.mubr.msk.f32.gmra.mrb[126].mxu1 %vm483_vm3, %v3102_v49  ;;  %5520 = vmatmul.mubr.msk.f32.gmra.mrb[128].mxu0 %vm483_vm3, %v3541_v4 }
 0xc85   :  { %v3542_v35 = vpop.trf.xlu0  ;;  %3442 = vmatprep.mubr.f32.mxu1 %v9980_v6  ;;  %3881 = vmatprep.mubr.f32.mxu0 %v9980_v6 }
 0xc87   :  { %v3103_v25 = vpop.trf.xlu1 }
 0xc88   :  { %5487 = vmatmul.mubr.msk.f32.gmra.mrb[128].mxu1 %vm483_vm3, %v3103_v25  ;;  %5521 = vmatmul.mubr.msk.f32.gmra.mrb[130].mxu0 %vm483_vm3, %v3542_v35 }
 0xc89   :  { %v3543_v0 = vpop.trf.xlu0  ;;  %3448 = vmatprep.mubr.f32.mxu1 %v9980_v6  ;;  %3887 = vmatprep.mubr.f32.mxu0 %v9980_v6 }
 0xc8b   :  { %v3104_v38 = vpop.trf.xlu1 }
 0xc8c   :  { %5488 = vmatmul.mubr.msk.f32.gmra.mrb[130].mxu1 %vm483_vm3, %v3104_v38  ;;  %5522 = vmatmul.mubr.msk.f32.gmra.mrb[132].mxu0 %vm483_vm3, %v3543_v0 }
 0xc8d   :  { %v3544_v62 = vpop.trf.xlu0  ;;  %3454 = vmatprep.mubr.f32.mxu1 %v9980_v6  ;;  %3893 = vmatprep.mubr.f32.mxu0 %v9980_v6 }
 0xc8f   :  { %v3105_v60 = vpop.trf.xlu1 }
 0xc90   :  { %5489 = vmatmul.mubr.msk.f32.gmra.mrb[132].mxu1 %vm483_vm3, %v3105_v60  ;;  %5523 = vmatmul.mubr.msk.f32.gmra.mrb[134].mxu0 %vm483_vm3, %v3544_v62 }
 0xc91   :  { %v3545_v40 = vpop.trf.xlu0  ;;  %3460 = vmatprep.mubr.f32.mxu1 %v9980_v6  ;;  %3899 = vmatprep.mubr.f32.mxu0 %v9980_v6 }
 0xc93   :  { %v3106_v37 = vpop.trf.xlu1 }
 0xc94   :  { %5490 = vmatmul.mubr.msk.f32.gmra.mrb[134].mxu1 %vm483_vm3, %v3106_v37  ;;  %5524 = vmatmul.mubr.msk.f32.gmra.mrb[136].mxu0 %vm483_vm3, %v3545_v40 }
 0xc95   :  { %v3546_v12 = vpop.trf.xlu0  ;;  %3466 = vmatprep.mubr.f32.mxu1 %v9980_v6  ;;  %3905 = vmatprep.mubr.f32.mxu0 %v9980_v6 }
 0xc97   :  { %v3107_v17 = vpop.trf.xlu1 }
 0xc98   :  { %5491 = vmatmul.mubr.msk.f32.gmra.mrb[136].mxu1 %vm483_vm3, %v3107_v17  ;;  %5525 = vmatmul.mubr.msk.f32.gmra.mrb[138].mxu0 %vm483_vm3, %v3546_v12 }
 0xc99   :  { %4946 = vmatprep.mubr.f32.mxu1 %v4879_v16  ;;  %5027 = vmatprep.mubr.f32.mxu0 %v4960_v46 }
 0xced   :  { %v8204_v7 = vpop.f32.mrb[74].mxu1 }
 0xcee   :  { %v8206_v42 = vpop.f32.mrb[75].mxu1 }
 0xcef   :  { %v3912_v9 = vmax.f32 %v8204_v7, %v8206_v42  ;;  %v8210_v8 = vpop.f32.mrb[76].mxu0 }
 0xcf0   :  { %v8212_v59 = vpop.f32.mrb[77].mxu0 }
 0xcf1   :  { %v4008_v5 = vmax.f32 %v8210_v8, %v8212_v59  ;;  %3913 = vmax.xlane.f32.xlu1 %v3912_v9  ;;  %v8216_v18 = vpop.f32.mrb[76].mxu1 }
 0xcf2   :  { %v8218_v47 = vpop.f32.mrb[77].mxu1 }
 0xcf3   :  { %v3915_v32 = vmax.f32 %v8216_v18, %v8218_v47  ;;  %v8222_v11 = vpop.f32.mrb[78].mxu0 }
 0xcf4   :  { %v8224_v20 = vpop.f32.mrb[79].mxu0 }
 0xcf5   :  { %v4011_v15 = vmax.f32 %v8222_v11, %v8224_v20  ;;  %3916 = vmax.xlane.f32.xlu0 %v3915_v32  ;;  %4009 = vmax.xlane.f32.xlu1 %v4008_v5  ;;  %v8228_v29 = vpop.f32.mrb[78].mxu1 }
 0xcf6   :  { %v8230_v51 = vpop.f32.mrb[79].mxu1 }
 0xcf7   :  { %v3918_v43 = vmax.f32 %v8228_v29, %v8230_v51  ;;  %v8234_v30 = vpop.f32.mrb[80].mxu0 }
 0xcf8   :  { %v8236_v63 = vpop.f32.mrb[81].mxu0 }
 0xcf9   :  { %v4014_v10 = vmax.f32 %v8234_v30, %v8236_v63  ;;  %v8240_v44 = vpop.f32.mrb[80].mxu1  ;;  %4012 = vmax.xlane.f32.xlu1 %v4011_v15 }
 0xcfa   :  { %v8242_v31 = vpop.f32.mrb[81].mxu1 }
 0xcfb   :  { %v3921_v3 = vmax.f32 %v8240_v44, %v8242_v31  ;;  %v8246_v23 = vpop.f32.mrb[82].mxu0 }
 0xcfc   :  { %v8248_v54 = vpop.f32.mrb[83].mxu0 }
 0xcfd   :  { %v4017_v13 = vmax.f32 %v8246_v23, %v8248_v54  ;;  %3922 = vmax.xlane.f32.xlu0 %v3921_v3  ;;  %3919 = vmax.xlane.f32.xlu1 %v3918_v43  ;;  %v8252_v52 = vpop.f32.mrb[82].mxu1 }
 0xcfe   :  { %v8254_v27 = vpop.f32.mrb[83].mxu1 }
 0xcff   :  { %v3924_v50 = vmax.f32 %v8252_v52, %v8254_v27  ;;  %v8258_v41 = vpop.f32.mrb[84].mxu0 }
 0xd00   :  { %v8260_v22 = vpop.f32.mrb[85].mxu0 }
 0xd01   :  { %v4020_v53 = vmax.f32 %v8258_v41, %v8260_v22  ;;  %v8264_v21 = vpop.f32.mrb[84].mxu1  ;;  %4015 = vmax.xlane.f32.xlu1 %v4014_v10  ;;  %4018 = vmax.xlane.f32.xlu0 %v4017_v13 }
 0xd02   :  { %v8266_v1 = vpop.f32.mrb[85].mxu1 }
 0xd03   :  { %v3927_v19 = vmax.f32 %v8264_v21, %v8266_v1  ;;  %v8270_v36 = vpop.f32.mrb[86].mxu0 }
 0xd04   :  { %v8272_v26 = vpop.f32.mrb[87].mxu0 }
 0xd05   :  { %v4023_v4 = vmax.f32 %v8270_v36, %v8272_v26  ;;  %3925 = vmax.xlane.f32.xlu1 %v3924_v50  ;;  %3928 = vmax.xlane.f32.xlu0 %v3927_v19  ;;  %v8276_v49 = vpop.f32.mrb[86].mxu1 }
 0xd06   :  { %v8278_v35 = vpop.f32.mrb[87].mxu1 }
 0xd07   :  { %v3930_v25 = vmax.f32 %v8276_v49, %v8278_v35  ;;  %v8282_v0 = vpop.f32.mrb[88].mxu0 }
 0xd08   :  { %v8284_v2 = vpop.f32.mrb[89].mxu0 }
 0xd09   :  { %v4026_v38 = vmax.f32 %v8282_v0, %v8284_v2  ;;  %v8288_v62 = vpop.f32.mrb[88].mxu1  ;;  %4021 = vmax.xlane.f32.xlu1 %v4020_v53  ;;  %4024 = vmax.xlane.f32.xlu0 %v4023_v4 }
 0xd0a   :  { %v8290_v33 = vpop.f32.mrb[89].mxu1 }
 0xd0b   :  { %v3933_v60 = vmax.f32 %v8288_v62, %v8290_v33  ;;  %v8294_v40 = vpop.f32.mrb[90].mxu0 }
 0xd0c   :  { %v8296_v37 = vpop.f32.mrb[91].mxu0 }
 0xd0d   :  { %v4029_v12 = vmax.f32 %v8294_v40, %v8296_v37  ;;  %3931 = vmax.xlane.f32.xlu1 %v3930_v25  ;;  %3934 = vmax.xlane.f32.xlu0 %v3933_v60  ;;  %v8300_v17 = vpop.f32.mrb[90].mxu1 }
 0xd0e   :  { %v8302_v16 = vpop.f32.mrb[91].mxu1 }
 0xd0f   :  { %v3936_v46 = vmax.f32 %v8300_v17, %v8302_v16  ;;  %v8306_v9 = vpop.f32.mrb[92].mxu0 }
 0xd10   :  { %v8308_v5 = vpop.f32.mrb[93].mxu0 }
 0xd11   :  { %v4032_v32 = vmax.f32 %v8306_v9, %v8308_v5  ;;  %v8312_v15 = vpop.f32.mrb[92].mxu1  ;;  %4027 = vmax.xlane.f32.xlu1 %v4026_v38  ;;  %4030 = vmax.xlane.f32.xlu0 %v4029_v12 }
 0xd12   :  { %v8314_v43 = vpop.f32.mrb[93].mxu1 }
 0xd13   :  { %v3939_v10 = vmax.f32 %v8312_v15, %v8314_v43  ;;  %v8318_v3 = vpop.f32.mrb[94].mxu0 }
 0xd14   :  { %v8320_v13 = vpop.f32.mrb[95].mxu0 }
 0xd15   :  { %v4035_v50 = vmax.f32 %v8318_v3, %v8320_v13  ;;  %3937 = vmax.xlane.f32.xlu1 %v3936_v46  ;;  %3940 = vmax.xlane.f32.xlu0 %v3939_v10  ;;  %v8324_v53 = vpop.f32.mrb[94].mxu1 }
 0xd16   :  { %v8326_v19 = vpop.f32.mrb[95].mxu1 }
 0xd17   :  { %v3942_v4 = vmax.f32 %v8324_v53, %v8326_v19  ;;  %v8330_v25 = vpop.f32.mrb[96].mxu0 }
 0xd18   :  { %v8332_v38 = vpop.f32.mrb[97].mxu0 }
 0xd19   :  { %v4038_v60 = vmax.f32 %v8330_v25, %v8332_v38  ;;  %v8336_v12 = vpop.f32.mrb[96].mxu1  ;;  %4033 = vmax.xlane.f32.xlu1 %v4032_v32  ;;  %4036 = vmax.xlane.f32.xlu0 %v4035_v50 }
 0xd1a   :  { %v8338_v46 = vpop.f32.mrb[97].mxu1 }
 0xd1b   :  { %v3945_v10 = vmax.f32 %v8336_v12, %v8338_v46  ;;  %v8342_v58 = vpop.f32.mrb[98].mxu0 }
 0xd1c   :  { %v8344_v61 = vpop.f32.mrb[99].mxu0 }
 0xd1d   :  { %v4041_v24 = vmax.f32 %v8342_v58, %v8344_v61  ;;  %3943 = vmax.xlane.f32.xlu1 %v3942_v4  ;;  %3946 = vmax.xlane.f32.xlu0 %v3945_v10  ;;  %v8348_v34 = vpop.f32.mrb[98].mxu1 }
 0xd1e   :  { %9995 = vst [vmem:[#allocation20_spill] sm:$0xff] %v8348_v34  ;;  %v8350_v45 = vpop.f32.mrb[99].mxu1 }
 0xd1f   :  { %9996 = vst [vmem:[#allocation19_spill] sm:$0xff] %v8350_v45  ;;  %v3948_v32 = vmax.f32 %v8348_v34, %v8350_v45  ;;  %v8354_v50 = vpop.f32.mrb[100].mxu0 }
 0xd20   :  { %9997 = vst [vmem:[#allocation18_spill] sm:$0xff] %v8354_v50  ;;  %v8356_v57 = vpop.f32.mrb[101].mxu0 }
 0xd21   :  { %9998 = vst [vmem:[#allocation23_spill] sm:$0xff] %v8356_v57  ;;  %v4044_v14 = vmax.f32 %v8354_v50, %v8356_v57  ;;  %v8360_v56 = vpop.f32.mrb[100].mxu1  ;;  %4039 = vmax.xlane.f32.xlu1 %v4038_v60  ;;  %4042 = vmax.xlane.f32.xlu0 %v4041_v24 }
 0xd22   :  { %9999 = vst [vmem:[#allocation22_spill] sm:$0xff] %v8360_v56  ;;  %v8362_v4 = vpop.f32.mrb[101].mxu1 }
 0xd23   :  { %10000 = vst [vmem:[#allocation26_spill] sm:$0xff] %v8362_v4  ;;  %v3951_v10 = vmax.f32 %v8360_v56, %v8362_v4  ;;  %v8366_v28 = vpop.f32.mrb[102].mxu0 }
 0xd24   :  { %10001 = vst [vmem:[#allocation24_spill] sm:$0xff] %v8366_v28  ;;  %v8368_v55 = vpop.f32.mrb[103].mxu0 }
 0xd25   :  { %10002 = vst [vmem:[#allocation30_spill] sm:$0xff] %v8368_v55  ;;  %v4047_v48 = vmax.f32 %v8366_v28, %v8368_v55  ;;  %3949 = vmax.xlane.f32.xlu1 %v3948_v32  ;;  %3952 = vmax.xlane.f32.xlu0 %v3951_v10  ;;  %v8372_v6 = vpop.f32.mrb[102].mxu1 }
 0xd26   :  { %10003 = vst [vmem:[#allocation28_spill] sm:$0xff] %v8372_v6  ;;  %v8374_v39 = vpop.f32.mrb[103].mxu1 }
 0xd27   :  { %10004 = vst [vmem:[#allocation27_spill] sm:$0xff] %v8374_v39  ;;  %v3954_v24 = vmax.f32 %v8372_v6, %v8374_v39  ;;  %v8378_v60 = vpop.f32.mrb[104].mxu0 }
 0xd28   :  { %10005 = vst [vmem:[#allocation25_spill] sm:$0xff] %v8378_v60  ;;  %v8380_v57 = vpop.f32.mrb[105].mxu0 }
 0xd29   :  { %10006 = vst [vmem:[#allocation29_spill] sm:$0xff] %v8380_v57  ;;  %v4050_v50 = vmax.f32 %v8378_v60, %v8380_v57  ;;  %v8384_v45 = vpop.f32.mrb[104].mxu1  ;;  %4045 = vmax.xlane.f32.xlu1 %v4044_v14  ;;  %4048 = vmax.xlane.f32.xlu0 %v4047_v48 }
 0xd2a   :  { %10007 = vst [vmem:[#allocation32_spill] sm:$0xff] %v8384_v45  ;;  %v8386_v32 = vpop.f32.mrb[105].mxu1 }
 0xd2b   :  { %10008 = vst [vmem:[#allocation36_spill] sm:$0xff] %v8386_v32  ;;  %v3957_v10 = vmax.f32 %v8384_v45, %v8386_v32  ;;  %v8390_v55 = vpop.f32.mrb[106].mxu0 }
 0xd2c   :  { %10009 = vst [vmem:[#allocation31_spill] sm:$0xff] %v8390_v55  ;;  %v8392_v28 = vpop.f32.mrb[107].mxu0 }
 0xd2d   :  { %10010 = vst [vmem:[#allocation34_spill] sm:$0xff] %v8392_v28  ;;  %v4053_v39 = vmax.f32 %v8390_v55, %v8392_v28  ;;  %3955 = vmax.xlane.f32.xlu1 %v3954_v24  ;;  %3958 = vmax.xlane.f32.xlu0 %v3957_v10 }
 0xd2f   :  { %v8396_v6 = vpop.f32.mrb[106].mxu1  ;;  %v8398_v57 = vpop.f32.mrb[108].mxu0 }
 0xd30   :  { %10011 = vst [vmem:[#allocation33_spill] sm:$0xff] %v8396_v6  ;;  %10012 = vst [vmem:[#allocation37_spill] sm:$0xff] %v8398_v57  ;;  %v8400_v14 = vpop.f32.mrb[107].mxu1  ;;  %v8402_v48 = vpop.f32.mrb[109].mxu0 }
 0xd31   :  { %10013 = vst [vmem:[#allocation38_spill] sm:$0xff] %v8400_v14  ;;  %10014 = vst [vmem:[#allocation35_spill] sm:$0xff] %v8402_v48  ;;  %v3960_v60 = vmax.f32 %v8396_v6, %v8400_v14  ;;  %4051 = vmax.xlane.f32.xlu1 %v4050_v50  ;;  %4054 = vmax.xlane.f32.xlu0 %v4053_v39  ;;  %v4056_v32 = vmax.f32 %v8398_v57, %v8402_v48 }
 0xd33   :  { %v8408_v45 = vpop.f32.mrb[108].mxu1  ;;  %v8410_v24 = vpop.f32.mrb[110].mxu0 }
 0xd34   :  { %10015 = vst [vmem:[#allocation40_spill] sm:$0xff] %v8408_v45  ;;  %10016 = vst [vmem:[#allocation44_spill] sm:$0xff] %v8410_v24  ;;  %v8412_v10 = vpop.f32.mrb[109].mxu1  ;;  %v8414_v28 = vpop.f32.mrb[111].mxu0 }
 0xd35   :  { %10017 = vst [vmem:[#allocation39_spill] sm:$0xff] %v8412_v10  ;;  %10018 = vst [vmem:[#allocation42_spill] sm:$0xff] %v8414_v28  ;;  %v3963_v55 = vmax.f32 %v8408_v45, %v8412_v10  ;;  %3961 = vmax.xlane.f32.xlu1 %v3960_v60  ;;  %v4059_v14 = vmax.f32 %v8410_v24, %v8414_v28 }
 0xd37   :  { %3964 = vmax.xlane.f32.xlu0 %v3963_v55  ;;  %v8420_v39 = vpop.f32.mrb[110].mxu1  ;;  %v8422_v50 = vpop.f32.mrb[112].mxu0 }
 0xd38   :  { %10019 = vst [vmem:[#allocation41_spill] sm:$0xff] %v8420_v39  ;;  %10020 = vst [vmem:[#allocation45_spill] sm:$0xff] %v8422_v50  ;;  %v8424_v48 = vpop.f32.mrb[111].mxu1  ;;  %v8426_v57 = vpop.f32.mrb[113].mxu0 }
 0xd39   :  { %10021 = vst [vmem:[#allocation46_spill] sm:$0xff] %v8424_v48  ;;  %10022 = vst [vmem:[#allocation43_spill] sm:$0xff] %v8426_v57  ;;  %v3966_v6 = vmax.f32 %v8420_v39, %v8424_v48  ;;  %4057 = vmax.xlane.f32.xlu1 %v4056_v32  ;;  %v4062_v10 = vmax.f32 %v8422_v50, %v8426_v57 }
 0xd3b   :  { %4060 = vmax.xlane.f32.xlu0 %v4059_v14  ;;  %v8432_v60 = vpop.f32.mrb[112].mxu1  ;;  %v8434_v28 = vpop.f32.mrb[114].mxu0 }
 0xd3c   :  { %10023 = vst [vmem:[#allocation48_spill] sm:$0xff] %v8432_v60  ;;  %10024 = vst [vmem:[#allocation52_spill] sm:$0xff] %v8434_v28  ;;  %v8436_v55 = vpop.f32.mrb[113].mxu1  ;;  %v8438_v24 = vpop.f32.mrb[115].mxu0 }
 0xd3d   :  { %10025 = vst [vmem:[#allocation47_spill] sm:$0xff] %v8436_v55  ;;  %10026 = vst [vmem:[#allocation50_spill] sm:$0xff] %v8438_v24  ;;  %v3969_v45 = vmax.f32 %v8432_v60, %v8436_v55  ;;  %3967 = vmax.xlane.f32.xlu1 %v3966_v6  ;;  %v4065_v48 = vmax.f32 %v8434_v28, %v8438_v24 }
 0xd3f   :  { %3970 = vmax.xlane.f32.xlu0 %v3969_v45  ;;  %v8444_v32 = vpop.f32.mrb[114].mxu1  ;;  %v8446_v57 = vpop.f32.mrb[116].mxu0 }
 0xd40   :  { %10027 = vst [vmem:[#allocation49_spill] sm:$0xff] %v8444_v32  ;;  %10028 = vst [vmem:[#allocation53_spill] sm:$0xff] %v8446_v57  ;;  %v8448_v14 = vpop.f32.mrb[115].mxu1  ;;  %v8450_v50 = vpop.f32.mrb[117].mxu0 }
 0xd41   :  { %10029 = vst [vmem:[#allocation54_spill] sm:$0xff] %v8448_v14  ;;  %10030 = vst [vmem:[#allocation51_spill] sm:$0xff] %v8450_v50  ;;  %v3972_v39 = vmax.f32 %v8444_v32, %v8448_v14  ;;  %4063 = vmax.xlane.f32.xlu1 %v4062_v10  ;;  %v4068_v55 = vmax.f32 %v8446_v57, %v8450_v50 }
 0xd43   :  { %4066 = vmax.xlane.f32.xlu0 %v4065_v48  ;;  %v8456_v6 = vpop.f32.mrb[116].mxu1  ;;  %v8458_v24 = vpop.f32.mrb[118].mxu0 }
 0xd44   :  { %10031 = vst [vmem:[#allocation56_spill] sm:$0xff] %v8456_v6  ;;  %10032 = vst [vmem:[#allocation60_spill] sm:$0xff] %v8458_v24  ;;  %v8460_v45 = vpop.f32.mrb[117].mxu1  ;;  %v8462_v28 = vpop.f32.mrb[119].mxu0 }
 0xd45   :  { %10033 = vst [vmem:[#allocation55_spill] sm:$0xff] %v8460_v45  ;;  %10034 = vst [vmem:[#allocation58_spill] sm:$0xff] %v8462_v28  ;;  %v3975_v60 = vmax.f32 %v8456_v6, %v8460_v45  ;;  %3973 = vmax.xlane.f32.xlu1 %v3972_v39  ;;  %v4071_v14 = vmax.f32 %v8458_v24, %v8462_v28 }
 0xd47   :  { %3976 = vmax.xlane.f32.xlu0 %v3975_v60  ;;  %v8468_v10 = vpop.f32.mrb[118].mxu1  ;;  %v8470_v50 = vpop.f32.mrb[120].mxu0 }
 0xd48   :  { %10035 = vst [vmem:[#allocation57_spill] sm:$0xff] %v8468_v10  ;;  %10036 = vst [vmem:[#allocation61_spill] sm:$0xff] %v8470_v50  ;;  %v8472_v48 = vpop.f32.mrb[119].mxu1  ;;  %v8474_v57 = vpop.f32.mrb[121].mxu0 }
 0xd49   :  { %10037 = vst [vmem:[#allocation62_spill] sm:$0xff] %v8472_v48  ;;  %10038 = vst [vmem:[#allocation59_spill] sm:$0xff] %v8474_v57  ;;  %v3978_v32 = vmax.f32 %v8468_v10, %v8472_v48  ;;  %4069 = vmax.xlane.f32.xlu1 %v4068_v55  ;;  %v4074_v45 = vmax.f32 %v8470_v50, %v8474_v57 }
 0xd4b   :  { %4072 = vmax.xlane.f32.xlu0 %v4071_v14  ;;  %v8480_v39 = vpop.f32.mrb[120].mxu1  ;;  %v8482_v28 = vpop.f32.mrb[122].mxu0 }
 0xd4c   :  { %10039 = vst [vmem:[#allocation64_spill] sm:$0xff] %v8480_v39  ;;  %10040 = vst [vmem:[#allocation68_spill] sm:$0xff] %v8482_v28  ;;  %v8484_v60 = vpop.f32.mrb[121].mxu1  ;;  %v8486_v24 = vpop.f32.mrb[123].mxu0 }
 0xd4d   :  { %10041 = vst [vmem:[#allocation63_spill] sm:$0xff] %v8484_v60  ;;  %10042 = vst [vmem:[#allocation66_spill] sm:$0xff] %v8486_v24  ;;  %v3981_v6 = vmax.f32 %v8480_v39, %v8484_v60  ;;  %3979 = vmax.xlane.f32.xlu1 %v3978_v32  ;;  %v4077_v48 = vmax.f32 %v8482_v28, %v8486_v24 }
 0xd4f   :  { %3982 = vmax.xlane.f32.xlu0 %v3981_v6  ;;  %v8492_v55 = vpop.f32.mrb[122].mxu1  ;;  %v8494_v57 = vpop.f32.mrb[124].mxu0 }
 0xd50   :  { %10043 = vst [vmem:[#allocation65_spill] sm:$0xff] %v8492_v55  ;;  %10044 = vst [vmem:[#allocation70_spill] sm:$0xff] %v8494_v57  ;;  %v8496_v14 = vpop.f32.mrb[123].mxu1  ;;  %v8498_v50 = vpop.f32.mrb[125].mxu0 }
 0xd51   :  { %10045 = vst [vmem:[#allocation67_spill] sm:$0xff] %v8496_v14  ;;  %10046 = vst [vmem:[#allocation71_spill] sm:$0xff] %v8498_v50  ;;  %v3984_v10 = vmax.f32 %v8492_v55, %v8496_v14  ;;  %4075 = vmax.xlane.f32.xlu1 %v4074_v45  ;;  %v4080_v60 = vmax.f32 %v8494_v57, %v8498_v50 }
 0xd53   :  { %4078 = vmax.xlane.f32.xlu0 %v4077_v48  ;;  %v8504_v32 = vpop.f32.mrb[124].mxu1  ;;  %v8506_v24 = vpop.f32.mrb[126].mxu0 }
 0xd54   :  { %10047 = vst [vmem:[#allocation74_spill] sm:$0xff] %v8504_v32  ;;  %10048 = vst [vmem:[#allocation69_spill] sm:$0xff] %v8506_v24  ;;  %v8508_v6 = vpop.f32.mrb[125].mxu1  ;;  %v8510_v28 = vpop.f32.mrb[127].mxu0 }
 0xd55   :  { %10049 = vst [vmem:[#allocation72_spill] sm:$0xff] %v8508_v6  ;;  %10050 = vst [vmem:[#allocation76_spill] sm:$0xff] %v8510_v28  ;;  %v3987_v39 = vmax.f32 %v8504_v32, %v8508_v6  ;;  %3985 = vmax.xlane.f32.xlu1 %v3984_v10  ;;  %v4083_v14 = vmax.f32 %v8506_v24, %v8510_v28 }
 0xd57   :  { %3988 = vmax.xlane.f32.xlu0 %v3987_v39  ;;  %v8516_v45 = vpop.f32.mrb[126].mxu1  ;;  %v8518_v50 = vpop.f32.mrb[128].mxu0 }
 0xd58   :  { %10051 = vst [vmem:[#allocation6_spill] sm:$0xff] %v8516_v45  ;;  %10052 = vst [vmem:[#allocation7_spill] sm:$0xff] %v8518_v50  ;;  %v8520_v48 = vpop.f32.mrb[127].mxu1  ;;  %v8522_v57 = vpop.f32.mrb[129].mxu0 }
 0xd59   :  { %10053 = vst [vmem:[#allocation73_spill] sm:$0xff] %v8520_v48  ;;  %10054 = vst [vmem:[#allocation77_spill] sm:$0xff] %v8522_v57  ;;  %v3990_v55 = vmax.f32 %v8516_v45, %v8520_v48  ;;  %4081 = vmax.xlane.f32.xlu1 %v4080_v60  ;;  %v4086_v6 = vmax.f32 %v8518_v50, %v8522_v57 }
 0xd5b   :  { %4084 = vmax.xlane.f32.xlu0 %v4083_v14  ;;  %v8528_v10 = vpop.f32.mrb[128].mxu1  ;;  %v8530_v28 = vpop.f32.mrb[130].mxu0 }
 0xd5c   :  { %10055 = vst [vmem:[#allocation78_spill] sm:$0xff] %v8528_v10  ;;  %10056 = vst [vmem:[#allocation75_spill] sm:$0xff] %v8530_v28  ;;  %v8532_v39 = vpop.f32.mrb[129].mxu1  ;;  %v8534_v24 = vpop.f32.mrb[131].mxu0 }
 0xd5d   :  { %10057 = vst [vmem:[#allocation80_spill] sm:$0xff] %v8532_v39  ;;  %10058 = vst [vmem:[#allocation85_spill] sm:$0xff] %v8534_v24  ;;  %v3993_v32 = vmax.f32 %v8528_v10, %v8532_v39  ;;  %3991 = vmax.xlane.f32.xlu1 %v3990_v55  ;;  %v4089_v48 = vmax.f32 %v8530_v28, %v8534_v24 }
 0xd5f   :  { %3994 = vmax.xlane.f32.xlu0 %v3993_v32  ;;  %v8540_v60 = vpop.f32.mrb[130].mxu1  ;;  %v8542_v57 = vpop.f32.mrb[132].mxu0 }
 0xd60   :  { %10059 = vst [vmem:[#allocation79_spill] sm:$0xff] %v8540_v60  ;;  %10060 = vst [vmem:[#allocation82_spill] sm:$0xff] %v8542_v57  ;;  %v8544_v14 = vpop.f32.mrb[131].mxu1  ;;  %v8546_v50 = vpop.f32.mrb[133].mxu0 }
 0xd61   :  { %10061 = vst [vmem:[#allocation83_spill] sm:$0xff] %v8544_v14  ;;  %10062 = vst [vmem:[#allocation86_spill] sm:$0xff] %v8546_v50  ;;  %v3996_v45 = vmax.f32 %v8540_v60, %v8544_v14  ;;  %4087 = vmax.xlane.f32.xlu1 %v4086_v6  ;;  %v4092_v39 = vmax.f32 %v8542_v57, %v8546_v50 }
 0xd63   :  { %4090 = vmax.xlane.f32.xlu0 %v4089_v48  ;;  %v8552_v55 = vpop.f32.mrb[132].mxu1  ;;  %v8554_v24 = vpop.f32.mrb[134].mxu0 }
 0xd64   :  { %10063 = vst [vmem:[#allocation81_spill] sm:$0xff] %v8552_v55  ;;  %10064 = vst [vmem:[#allocation84_spill] sm:$0xff] %v8554_v24  ;;  %v8556_v32 = vpop.f32.mrb[133].mxu1  ;;  %v8558_v28 = vpop.f32.mrb[135].mxu0 }
 0xd65   :  { %10065 = vst [vmem:[#allocation2_spill] sm:$0xff] %v8556_v32  ;;  %10066 = vst [vmem:[#allocation3_spill] sm:$0xff] %v8558_v28  ;;  %v3999_v10 = vmax.f32 %v8552_v55, %v8556_v32  ;;  %3997 = vmax.xlane.f32.xlu1 %v3996_v45  ;;  %v4095_v14 = vmax.f32 %v8554_v24, %v8558_v28 }
 0xd67   :  { %4000 = vmax.xlane.f32.xlu0 %v3999_v10  ;;  %v8564_v6 = vpop.f32.mrb[134].mxu1  ;;  %v8566_v50 = vpop.f32.mrb[136].mxu0 }
 0xd68   :  { %10067 = vst [vmem:[#allocation4_spill] sm:$0xff] %v8564_v6  ;;  %10068 = vst [vmem:[#allocation87_spill] sm:$0xff] %v8566_v50  ;;  %v8568_v48 = vpop.f32.mrb[135].mxu1  ;;  %v8570_v57 = vpop.f32.mrb[137].mxu0 }
 0xd69   :  { %10069 = vst [vmem:[#allocation88_spill] sm:$0xff] %v8568_v48  ;;  %10070 = vst [vmem:[#allocation89_spill] sm:$0xff] %v8570_v57  ;;  %v4002_v60 = vmax.f32 %v8564_v6, %v8568_v48  ;;  %4093 = vmax.xlane.f32.xlu1 %v4092_v39  ;;  %v4098_v32 = vmax.f32 %v8566_v50, %v8570_v57 }
 0xd6b   :  { %4096 = vmax.xlane.f32.xlu0 %v4095_v14  ;;  %v8576_v45 = vpop.f32.mrb[136].mxu1  ;;  %v8578_v28 = vpop.f32.mrb[138].mxu0 }
 0xd6c   :  { %10071 = vst [vmem:[#allocation90_spill] sm:$0xff] %v8578_v28  ;;  %v8580_v10 = vpop.f32.mrb[137].mxu1  ;;  %v8582_v24 = vpop.f32.mrb[139].mxu0 }
 0xd6d   :  { %10072 = vst [vmem:[#allocation91_spill] sm:$0xff] %v8580_v10  ;;  %10073 = vst [vmem:[#allocation92_spill] sm:$0xff] %v8582_v24  ;;  %v4005_v55 = vmax.f32 %v8576_v45, %v8580_v10  ;;  %4003 = vmax.xlane.f32.xlu1 %v4002_v60  ;;  %v4101_v48 = vmax.f32 %v8578_v28, %v8582_v24 }
 0xd6f   :  { %4006 = vmax.xlane.f32.xlu0 %v4005_v55 }
 0xd71   :  { %4099 = vmax.xlane.f32.xlu1 %v4098_v32 }
 0xd73   :  { %4102 = vmax.xlane.f32.xlu0 %v4101_v48 }
 0xd7e   :  { %v3914_v39 = vpop.xlane.xlu1 %3913 }
 0xd7f   :  { %v4104_v14 = vsub.f32 %v8204_v7, %v3914_v39  ;;  %v4105_v57 = vsub.f32 %v8206_v42, %v3914_v39 }
 0xd81   :  { %v4232_v50 = vmul.f32 1.442695, %v4104_v14  ;;  %v4234_v6 = vmul.f32 1.442695, %v4105_v57 }
 0xd82   :  { %v3917_v34 = vpop.xlane.xlu0 %3916  ;;  %v4010_v4 = vpop.xlane.xlu1 %4009 }
 0xd83   :  { %6219 = vpow2.f32 %v4232_v50  ;;  %v4106_v56 = vsub.f32 %v8216_v18, %v3917_v34  ;;  %v4107_v60 = vsub.f32 %v8218_v47, %v3917_v34  ;;  %v4168_v10 = vsub.f32 %v8210_v8, %v4010_v4 }
 0xd84   :  { %6221 = vpow2.f32 %v4234_v6  ;;  %v4169_v55 = vsub.f32 %v8212_v59, %v4010_v4 }
 0xd85   :  { %v4236_v32 = vmul.f32 1.442695, %v4106_v56  ;;  %v4238_v48 = vmul.f32 1.442695, %v4107_v60  ;;  %v4360_v24 = vmul.f32 1.442695, %v4168_v10 }
 0xd86   :  { %v4362_v7 = vmul.f32 1.442695, %v4169_v55  ;;  %v4013_v28 = vpop.xlane.xlu1 %4012 }
 0xd87   :  { %6223 = vpow2.f32 %v4236_v32  ;;  %v4170_v57 = vsub.f32 %v8222_v11, %v4013_v28  ;;  %v4171_v42 = vsub.f32 %v8224_v20, %v4013_v28 }
 0xd88   :  { %6225 = vpow2.f32 %v4238_v48 }
 0xd89   :  { %6227 = vpow2.f32 %v4360_v24  ;;  %v4364_v18 = vmul.f32 1.442695, %v4170_v57  ;;  %v4366_v50 = vmul.f32 1.442695, %v4171_v42 }
 0xd8a   :  { %6229 = vpow2.f32 %v4362_v7  ;;  %v3923_v34 = vpop.xlane.xlu0 %3922  ;;  %v3920_v8 = vpop.xlane.xlu1 %3919 }
 0xd8b   :  { %6231 = vpow2.f32 %v4364_v18  ;;  %v4110_v59 = vsub.f32 %v8240_v44, %v3923_v34  ;;  %v4111_v56 = vsub.f32 %v8242_v31, %v3923_v34  ;;  %v4108_v47 = vsub.f32 %v8228_v29, %v3920_v8 }
 0xd8c   :  { %6233 = vpow2.f32 %v4366_v50  ;;  %v4109_v4 = vsub.f32 %v8230_v51, %v3920_v8 }
 0xd8d   :  { %v8600_v11 = vpop.eup %6219  ;;  %v4244_v28 = vmul.f32 1.442695, %v4110_v59  ;;  %v4246_v20 = vmul.f32 1.442695, %v4111_v56  ;;  %v4240_v24 = vmul.f32 1.442695, %v4108_v47 }
 0xd8e   :  { %v8602_v6 = vpop.eup %6221  ;;  %v4242_v10 = vmul.f32 1.442695, %v4109_v4  ;;  %v4019_v39 = vpop.xlane.xlu0 %4018 }
 0xd8f   :  { %v4016_v14 = vpop.xlane.xlu1 %4015  ;;  %6235 = vpow2.f32 %v4244_v28  ;;  %v4174_v44 = vsub.f32 %v8246_v23, %v4019_v39  ;;  %v4175_v31 = vsub.f32 %v8248_v54, %v4019_v39  ;;  %v4488_v60 = vadd.f32 %v8602_v6, %v8600_v11 }
 0xd90   :  { %v4172_v29 = vsub.f32 %v8234_v30, %v4016_v14  ;;  %6237 = vpow2.f32 %v4246_v20  ;;  %v4173_v51 = vsub.f32 %v8236_v63, %v4016_v14 }
 0xd91   :  { %v8610_v55 = vpop.eup %6223  ;;  %6239 = vpow2.f32 %v4240_v24  ;;  %v4372_v32 = vmul.f32 1.442695, %v4174_v44  ;;  %v4374_v48 = vmul.f32 1.442695, %v4175_v31  ;;  %4489 = vadd.xlane.f32.xlu1 %v4488_v60 }
 0xd92   :  { %v4368_v7 = vmul.f32 1.442695, %v4172_v29  ;;  %v8612_v57 = vpop.eup %6225  ;;  %6241 = vpow2.f32 %v4242_v10  ;;  %v4370_v23 = vmul.f32 1.442695, %v4173_v51  ;;  %v3929_v54 = vpop.xlane.xlu0 %3928 }
 0xd93   :  { %v3926_v42 = vpop.xlane.xlu1 %3925  ;;  %v8614_v30 = vpop.eup %6227  ;;  %6243 = vpow2.f32 %v4372_v32  ;;  %v4114_v63 = vsub.f32 %v8264_v21, %v3929_v54  ;;  %v4115_v18 = vsub.f32 %v8266_v1, %v3929_v54  ;;  %v4491_v59 = vadd.f32 %v8612_v57, %v8610_v55 }
 0xd94   :  { %v4112_v50 = vsub.f32 %v8252_v52, %v3926_v42  ;;  %v8619_v34 = vpop.eup %6229  ;;  %6245 = vpow2.f32 %v4374_v48  ;;  %v4113_v8 = vsub.f32 %v8254_v27, %v3926_v42 }
 0xd95   :  { %v8624_v56 = vpop.eup %6231  ;;  %6247 = vpow2.f32 %v4368_v7  ;;  %v4252_v47 = vmul.f32 1.442695, %v4114_v63  ;;  %v4254_v4 = vmul.f32 1.442695, %v4115_v18  ;;  %4492 = vadd.xlane.f32.xlu0 %v4491_v59  ;;  %v4584_v52 = vadd.f32 %v8619_v34, %v8614_v30 }
 0xd96   :  { %v4248_v28 = vmul.f32 1.442695, %v4112_v50  ;;  %v8626_v20 = vpop.eup %6233  ;;  %6249 = vpow2.f32 %v4370_v23  ;;  %v4250_v21 = vmul.f32 1.442695, %v4113_v8  ;;  %v4025_v1 = vpop.xlane.xlu0 %4024 }
 0xd97   :  { %v4022_v24 = vpop.xlane.xlu1 %4021  ;;  %6251 = vpow2.f32 %v4252_v47  ;;  %v4178_v27 = vsub.f32 %v8270_v36, %v4025_v1  ;;  %v4179_v10 = vsub.f32 %v8272_v26, %v4025_v1  ;;  %4585 = vadd.xlane.f32.xlu1 %v4584_v52  ;;  %v4587_v44 = vadd.f32 %v8626_v20, %v8624_v56 }
 0xd98   :  { %v4176_v39 = vsub.f32 %v8258_v41, %v4022_v24  ;;  %6253 = vpow2.f32 %v4254_v4  ;;  %v4177_v14 = vsub.f32 %v8260_v22, %v4022_v24 }
 0xd99   :  { %v8636_v31 = vpop.eup %6235  ;;  %6255 = vpow2.f32 %v4248_v28  ;;  %v4380_v29 = vmul.f32 1.442695, %v4178_v27  ;;  %v4382_v51 = vmul.f32 1.442695, %v4179_v10  ;;  %4588 = vadd.xlane.f32.xlu0 %v4587_v44 }
 0xd9a   :  { %v4376_v60 = vmul.f32 1.442695, %v4176_v39  ;;  %v8638_v32 = vpop.eup %6237  ;;  %6257 = vpow2.f32 %v4250_v21  ;;  %v4378_v36 = vmul.f32 1.442695, %v4177_v14  ;;  %v3935_v26 = vpop.xlane.xlu0 %3934 }
 0xd9b   :  { %v3932_v41 = vpop.xlane.xlu1 %3931  ;;  %v8640_v48 = vpop.eup %6239  ;;  %6259 = vpow2.f32 %v4380_v29  ;;  %v4118_v22 = vsub.f32 %v8288_v62, %v3935_v26  ;;  %v4119_v7 = vsub.f32 %v8290_v33, %v3935_v26  ;;  %v4497_v63 = vadd.f32 %v8638_v32, %v8636_v31 }
 0xd9c   :  { %v4116_v23 = vsub.f32 %v8276_v49, %v3932_v41  ;;  %v8645_v54 = vpop.eup %6241  ;;  %6261 = vpow2.f32 %v4382_v51  ;;  %v4117_v42 = vsub.f32 %v8278_v35, %v3932_v41 }
 0xd9d   :  { %v8650_v18 = vpop.eup %6243  ;;  %6263 = vpow2.f32 %v4376_v60  ;;  %v4260_v50 = vmul.f32 1.442695, %v4118_v22  ;;  %v4262_v8 = vmul.f32 1.442695, %v4119_v7  ;;  %4498 = vadd.xlane.f32.xlu0 %v4497_v63  ;;  %v4494_v49 = vadd.f32 %v8645_v54, %v8640_v48 }
 0xd9e   :  { %v4256_v59 = vmul.f32 1.442695, %v4116_v23  ;;  %v8652_v47 = vpop.eup %6245  ;;  %6265 = vpow2.f32 %v4378_v36  ;;  %v4258_v62 = vmul.f32 1.442695, %v4117_v42  ;;  %v4031_v33 = vpop.xlane.xlu0 %4030 }
 0xd9f   :  { %v4028_v4 = vpop.xlane.xlu1 %4027  ;;  %v8656_v35 = vpop.eup %6247  ;;  %6267 = vpow2.f32 %v4260_v50  ;;  %v4182_v28 = vsub.f32 %v8294_v40, %v4031_v33  ;;  %v4183_v21 = vsub.f32 %v8296_v37, %v4031_v33  ;;  %4495 = vadd.xlane.f32.xlu1 %v4494_v49  ;;  %v4593_v27 = vadd.f32 %v8652_v47, %v8650_v18 }
 0xda0   :  { %v4180_v52 = vsub.f32 %v8282_v0, %v4028_v4  ;;  %v8661_v1 = vpop.eup %6249  ;;  %6269 = vpow2.f32 %v4262_v8  ;;  %v4181_v24 = vsub.f32 %v8284_v2, %v4028_v4 }
 0xda1   :  { %v8666_v10 = vpop.eup %6251  ;;  %6271 = vpow2.f32 %v4256_v59  ;;  %v4388_v39 = vmul.f32 1.442695, %v4182_v28  ;;  %v4390_v14 = vmul.f32 1.442695, %v4183_v21  ;;  %4594 = vadd.xlane.f32.xlu0 %v4593_v27  ;;  %v4590_v0 = vadd.f32 %v8661_v1, %v8656_v35 }
 0xda2   :  { %v4384_v44 = vmul.f32 1.442695, %v4180_v52  ;;  %v8668_v40 = vpop.eup %6253  ;;  %6273 = vpow2.f32 %v4258_v62  ;;  %v4386_v37 = vmul.f32 1.442695, %v4181_v24  ;;  %v3941_v29 = vpop.xlane.xlu0 %3940 }
 0xda3   :  { %v3938_v51 = vpop.xlane.xlu1 %3937  ;;  %v8672_v2 = vpop.eup %6255  ;;  %6275 = vpow2.f32 %v4388_v39  ;;  %v4122_v60 = vsub.f32 %v8312_v15, %v3941_v29  ;;  %v4123_v36 = vsub.f32 %v8314_v43, %v3941_v29  ;;  %4591 = vadd.xlane.f32.xlu1 %v4590_v0  ;;  %v4503_v7 = vadd.f32 %v8668_v40, %v8666_v10 }
 0xda4   :  { %v4120_v26 = vsub.f32 %v8300_v17, %v3938_v51  ;;  %v8677_v41 = vpop.eup %6257  ;;  %6277 = vpow2.f32 %v4390_v14  ;;  %v4121_v22 = vsub.f32 %v8302_v16, %v3938_v51 }
 0xda5   :  { %v8682_v23 = vpop.eup %6259  ;;  %6279 = vpow2.f32 %v4384_v44  ;;  %v4268_v42 = vmul.f32 1.442695, %v4122_v60  ;;  %v4270_v63 = vmul.f32 1.442695, %v4123_v36  ;;  %4504 = vadd.xlane.f32.xlu0 %v4503_v7  ;;  %v4500_v17 = vadd.f32 %v8677_v41, %v8672_v2 }
 0xda6   :  { %v4264_v50 = vmul.f32 1.442695, %v4120_v26  ;;  %v8684_v15 = vpop.eup %6261  ;;  %6281 = vpow2.f32 %v4386_v37  ;;  %v4266_v43 = vmul.f32 1.442695, %v4121_v22  ;;  %v4037_v8 = vpop.xlane.xlu0 %4036 }
 0xda7   :  { %v4034_v59 = vpop.xlane.xlu1 %4033  ;;  %v8688_v16 = vpop.eup %6263  ;;  %6283 = vpow2.f32 %v4268_v42  ;;  %v4186_v62 = vsub.f32 %v8318_v3, %v4037_v8  ;;  %v4187_v49 = vsub.f32 %v8320_v13, %v4037_v8  ;;  %4501 = vadd.xlane.f32.xlu1 %v4500_v17  ;;  %v4599_v21 = vadd.f32 %v8684_v15, %v8682_v23 }
 0xda8   :  { %v4184_v33 = vsub.f32 %v8306_v9, %v4034_v59  ;;  %v8693_v4 = vpop.eup %6265  ;;  %6285 = vpow2.f32 %v4270_v63  ;;  %v4185_v28 = vsub.f32 %v8308_v5, %v4034_v59 }
 0xda9   :  { %v8698_v52 = vpop.eup %6267  ;;  %6287 = vpow2.f32 %v4264_v50  ;;  %v4396_v24 = vmul.f32 1.442695, %v4186_v62  ;;  %v4398_v27 = vmul.f32 1.442695, %v4187_v49  ;;  %4600 = vadd.xlane.f32.xlu0 %v4599_v21  ;;  %v4596_v9 = vadd.f32 %v8693_v4, %v8688_v16 }
 0xdaa   :  { %v4392_v39 = vmul.f32 1.442695, %v4184_v33  ;;  %v8700_v3 = vpop.eup %6269  ;;  %6289 = vpow2.f32 %v4266_v43  ;;  %v4394_v13 = vmul.f32 1.442695, %v4185_v28  ;;  %v3947_v14 = vpop.xlane.xlu0 %3946 }
 0xdab   :  { %v3944_v44 = vpop.xlane.xlu1 %3943  ;;  %v8704_v5 = vpop.eup %6271  ;;  %6291 = vpow2.f32 %v4396_v24  ;;  %v4126_v37 = vsub.f32 %v8336_v12, %v3947_v14  ;;  %v4127_v0 = vsub.f32 %v8338_v46, %v3947_v14  ;;  %4597 = vadd.xlane.f32.xlu1 %v4596_v9  ;;  %v4509_v36 = vadd.f32 %v8700_v3, %v8698_v52  ;;  %v10075_v14 = vld [vmem:[#allocation26_spill] sm:$0xff] }
 0xdac   :  { %v4124_v29 = vsub.f32 %v8324_v53, %v3944_v44  ;;  %v8709_v51 = vpop.eup %6273  ;;  %6293 = vpow2.f32 %v4398_v27  ;;  %v4125_v60 = vsub.f32 %v8326_v19, %v3944_v44 }
 0xdad   :  { %v8714_v26 = vpop.eup %6275  ;;  %6295 = vpow2.f32 %v4392_v39  ;;  %v4276_v22 = vmul.f32 1.442695, %v4126_v37  ;;  %v4278_v7 = vmul.f32 1.442695, %v4127_v0  ;;  %4510 = vadd.xlane.f32.xlu0 %v4509_v36  ;;  %v4506_v53 = vadd.f32 %v8709_v51, %v8704_v5  ;;  %v10076_v37 = vld [vmem:[#allocation20_spill] sm:$0xff] }
 0xdae   :  { %v4272_v42 = vmul.f32 1.442695, %v4124_v29  ;;  %v8716_v12 = vpop.eup %6277  ;;  %6297 = vpow2.f32 %v4394_v13  ;;  %v4274_v46 = vmul.f32 1.442695, %v4125_v60  ;;  %v4043_v63 = vpop.xlane.xlu0 %4042  ;;  %v10074_v13 = vld [vmem:[#allocation22_spill] sm:$0xff]  ;;  %v10077_v60 = vld [vmem:[#allocation19_spill] sm:$0xff] }
 0xdaf   :  { %v4040_v50 = vpop.xlane.xlu1 %4039  ;;  %v8720_v19 = vpop.eup %6279  ;;  %6299 = vpow2.f32 %v4276_v22  ;;  %v4190_v43 = vsub.f32 %v8342_v58, %v4043_v63  ;;  %v4191_v17 = vsub.f32 %v8344_v61, %v4043_v63  ;;  %4507 = vadd.xlane.f32.xlu1 %v4506_v53  ;;  %v4605_v49 = vadd.f32 %v8716_v12, %v8714_v26 }
 0xdb0   :  { %v4188_v8 = vsub.f32 %v8330_v25, %v4040_v50  ;;  %v8725_v59 = vpop.eup %6281  ;;  %6301 = vpow2.f32 %v4278_v7  ;;  %v4189_v62 = vsub.f32 %v8332_v38, %v4040_v50 }
 0xdb1   :  { %v8730_v33 = vpop.eup %6283  ;;  %6303 = vpow2.f32 %v4272_v42  ;;  %v4404_v28 = vmul.f32 1.442695, %v4190_v43  ;;  %v4406_v21 = vmul.f32 1.442695, %v4191_v17  ;;  %4606 = vadd.xlane.f32.xlu0 %v4605_v49  ;;  %v4602_v25 = vadd.f32 %v8725_v59, %v8720_v19  ;;  %v10078_v49 = vld [vmem:[#allocation24_spill] sm:$0xff] }
 0xdb2   :  { %v4400_v24 = vmul.f32 1.442695, %v4188_v8  ;;  %v8732_v58 = vpop.eup %6285  ;;  %6305 = vpow2.f32 %v4274_v46  ;;  %v4402_v61 = vmul.f32 1.442695, %v4189_v62  ;;  %v3953_v27 = vpop.xlane.xlu0 %3952 }
 0xdb3   :  { %v3950_v39 = vpop.xlane.xlu1 %3949  ;;  %v8736_v38 = vpop.eup %6287  ;;  %6307 = vpow2.f32 %v4404_v28  ;;  %v4130_v9 = vsub.f32 %v10074_v13, %v3953_v27  ;;  %v4131_v44 = vsub.f32 %v10075_v14, %v3953_v27  ;;  %4603 = vadd.xlane.f32.xlu1 %v4602_v25  ;;  %v4515_v22 = vadd.f32 %v8732_v58, %v8730_v33  ;;  %v10080_v25 = vld [vmem:[#allocation18_spill] sm:$0xff] }
 0xdb4   :  { %v4128_v0 = vsub.f32 %v10076_v37, %v3950_v39  ;;  %v8741_v29 = vpop.eup %6289  ;;  %6309 = vpow2.f32 %v4406_v21  ;;  %v4129_v36 = vsub.f32 %v10077_v60, %v3950_v39  ;;  %v10079_v21 = vld [vmem:[#allocation30_spill] sm:$0xff] }
 0xdb5   :  { %v8746_v7 = vpop.eup %6291  ;;  %6311 = vpow2.f32 %v4400_v24  ;;  %v4284_v42 = vmul.f32 1.442695, %v4130_v9  ;;  %v4286_v46 = vmul.f32 1.442695, %v4131_v44  ;;  %4516 = vadd.xlane.f32.xlu0 %v4515_v22  ;;  %v4512_v43 = vadd.f32 %v8741_v29, %v8736_v38 }
 0xdb6   :  { %v4280_v53 = vmul.f32 1.442695, %v4128_v0  ;;  %v8748_v63 = vpop.eup %6293  ;;  %6313 = vpow2.f32 %v4402_v61  ;;  %v4282_v50 = vmul.f32 1.442695, %v4129_v36  ;;  %v4049_v17 = vpop.xlane.xlu0 %4048  ;;  %v10081_v61 = vld [vmem:[#allocation23_spill] sm:$0xff] }
 0xdb7   :  { %v4046_v8 = vpop.xlane.xlu1 %4045  ;;  %v8752_v62 = vpop.eup %6295  ;;  %6315 = vpow2.f32 %v4284_v42  ;;  %v4194_v28 = vsub.f32 %v10078_v49, %v4049_v17  ;;  %v4195_v24 = vsub.f32 %v10079_v21, %v4049_v17  ;;  %4513 = vadd.xlane.f32.xlu1 %v4512_v43  ;;  %v4611_v9 = vadd.f32 %v8748_v63, %v8746_v7  ;;  %v10085_v17 = vld [vmem:[#allocation32_spill] sm:$0xff] }
 0xdb8   :  { %v4192_v27 = vsub.f32 %v10080_v25, %v4046_v8  ;;  %v8757_v39 = vpop.eup %6297  ;;  %6317 = vpow2.f32 %v4286_v46  ;;  %v4193_v13 = vsub.f32 %v10081_v61, %v4046_v8  ;;  %v10086_v49 = vld [vmem:[#allocation36_spill] sm:$0xff] }
 0xdb9   :  { %v8762_v14 = vpop.eup %6299  ;;  %6319 = vpow2.f32 %v4280_v53  ;;  %v4412_v44 = vmul.f32 1.442695, %v4194_v28  ;;  %v4414_v37 = vmul.f32 1.442695, %v4195_v24  ;;  %4612 = vadd.xlane.f32.xlu0 %v4611_v9  ;;  %v4608_v22 = vadd.f32 %v8757_v39, %v8752_v62  ;;  %v10087_v28 = vld [vmem:[#allocation28_spill] sm:$0xff] }
 0xdba   :  { %10082 = vst [vmem:[#allocation22_spill] sm:$0xff] %v8762_v14  ;;  %v4408_v0 = vmul.f32 1.442695, %v4192_v27  ;;  %v8764_v60 = vpop.eup %6301  ;;  %6321 = vpow2.f32 %v4282_v50  ;;  %v4410_v36 = vmul.f32 1.442695, %v4193_v13  ;;  %v3959_v42 = vpop.xlane.xlu0 %3958  ;;  %v10089_v50 = vld [vmem:[#allocation27_spill] sm:$0xff] }
 0xdbb   :  { %10083 = vst [vmem:[#allocation26_spill] sm:$0xff] %v8764_v60  ;;  %v3956_v46 = vpop.xlane.xlu1 %3955  ;;  %v8768_v43 = vpop.eup %6303  ;;  %6323 = vpow2.f32 %v4412_v44  ;;  %v4134_v8 = vsub.f32 %v10085_v17, %v3959_v42  ;;  %v4135_v53 = vsub.f32 %v10086_v49, %v3959_v42  ;;  %4609 = vadd.xlane.f32.xlu1 %v4608_v22  ;;  %v4521_v27 = vadd.f32 %v8764_v60, %v8762_v14  ;;  %v10093_v14 = vld [vmem:[#allocation34_spill] sm:$0xff] }
 0xdbc   :  { %10084 = vst [vmem:[#allocation20_spill] sm:$0xff] %v8768_v43  ;;  %v4132_v21 = vsub.f32 %v10087_v28, %v3956_v46  ;;  %v8773_v24 = vpop.eup %6305  ;;  %6325 = vpow2.f32 %v4414_v37  ;;  %v4133_v25 = vsub.f32 %v10089_v50, %v3956_v46  ;;  %v10092_v28 = vld [vmem:[#allocation31_spill] sm:$0xff] }
 0xdbd   :  { %10088 = vst [vmem:[#allocation19_spill] sm:$0xff] %v8773_v24  ;;  %v8778_v61 = vpop.eup %6307  ;;  %6327 = vpow2.f32 %v4408_v0  ;;  %v4292_v13 = vmul.f32 1.442695, %v4134_v8  ;;  %v4294_v9 = vmul.f32 1.442695, %v4135_v53  ;;  %4522 = vadd.xlane.f32.xlu0 %v4521_v27  ;;  %v4518_v37 = vadd.f32 %v8773_v24, %v8768_v43  ;;  %v10094_v8 = vld [vmem:[#allocation25_spill] sm:$0xff] }
 0xdbe   :  { %10090 = vst [vmem:[#allocation24_spill] sm:$0xff] %v8778_v61  ;;  %v4288_v44 = vmul.f32 1.442695, %v4132_v21  ;;  %v8780_v17 = vpop.eup %6309  ;;  %6329 = vpow2.f32 %v4410_v36  ;;  %v4290_v42 = vmul.f32 1.442695, %v4133_v25  ;;  %v4055_v22 = vpop.xlane.xlu0 %4054  ;;  %v10096_v36 = vld [vmem:[#allocation29_spill] sm:$0xff] }
 0xdbf   :  { %v4052_v49 = vpop.xlane.xlu1 %4051  ;;  %v8784_v46 = vpop.eup %6311  ;;  %6331 = vpow2.f32 %v4292_v13  ;;  %v4198_v50 = vsub.f32 %v10092_v28, %v4055_v22  ;;  %v4199_v0 = vsub.f32 %v10093_v14, %v4055_v22  ;;  %4519 = vadd.xlane.f32.xlu1 %v4518_v37  ;;  %v4617_v27 = vadd.f32 %v8780_v17, %v8778_v61 }
 0xdc0   :  { %10091 = vst [vmem:[#allocation30_spill] sm:$0xff] %v8784_v46  ;;  %v4196_v53 = vsub.f32 %v10094_v8, %v4052_v49  ;;  %v8789_v21 = vpop.eup %6313  ;;  %6333 = vpow2.f32 %v4294_v9  ;;  %v4197_v25 = vsub.f32 %v10096_v36, %v4052_v49  ;;  %v10100_v49 = vld [vmem:[#allocation33_spill] sm:$0xff]  ;;  %v10101_v36 = vld [vmem:[#allocation38_spill] sm:$0xff] }
 0xdc1   :  { %10095 = vst [vmem:[#allocation18_spill] sm:$0xff] %v8789_v21  ;;  %v8794_v43 = vpop.eup %6315  ;;  %6335 = vpow2.f32 %v4288_v44  ;;  %v4420_v24 = vmul.f32 1.442695, %v4198_v50  ;;  %v4422_v13 = vmul.f32 1.442695, %v4199_v0  ;;  %4618 = vadd.xlane.f32.xlu0 %v4617_v27  ;;  %v4614_v9 = vadd.f32 %v8789_v21, %v8784_v46  ;;  %v10104_v27 = vld [vmem:[#allocation40_spill] sm:$0xff] }
 0xdc2   :  { %10097 = vst [vmem:[#allocation23_spill] sm:$0xff] %v8794_v43  ;;  %v4416_v60 = vmul.f32 1.442695, %v4196_v53  ;;  %v8796_v28 = vpop.eup %6317  ;;  %6337 = vpow2.f32 %v4290_v42  ;;  %v4418_v14 = vmul.f32 1.442695, %v4197_v25 }
 0xdc3   :  { %10098 = vst [vmem:[#allocation32_spill] sm:$0xff] %v8796_v28  ;;  %v3962_v37 = vpop.xlane.xlu1 %3961  ;;  %v8800_v22 = vpop.eup %6319  ;;  %6339 = vpow2.f32 %v4420_v24  ;;  %v4527_v44 = vadd.f32 %v8796_v28, %v8794_v43  ;;  %4615 = vadd.xlane.f32.xlu1 %v4614_v9  ;;  %v10108_v28 = vld [vmem:[#allocation37_spill] sm:$0xff] }
 0xdc4   :  { %10099 = vst [vmem:[#allocation36_spill] sm:$0xff] %v8800_v22  ;;  %v4136_v8 = vsub.f32 %v10100_v49, %v3962_v37  ;;  %v4137_v61 = vsub.f32 %v10101_v36, %v3962_v37  ;;  %v8806_v50 = vpop.eup %6321  ;;  %6341 = vpow2.f32 %v4422_v13  ;;  %v3965_v42 = vpop.xlane.xlu0 %3964  ;;  %v10106_v49 = vld [vmem:[#allocation39_spill] sm:$0xff] }
 0xdc5   :  { %10102 = vst [vmem:[#allocation28_spill] sm:$0xff] %v8806_v50  ;;  %v8808_v0 = vpop.eup %6323  ;;  %6343 = vpow2.f32 %v4416_v60  ;;  %v4138_v46 = vsub.f32 %v10104_v27, %v3965_v42  ;;  %v4139_v37 = vsub.f32 %v10106_v49, %v3965_v42  ;;  %4528 = vadd.xlane.f32.xlu0 %v4527_v44  ;;  %v4524_v36 = vadd.f32 %v8806_v50, %v8800_v22 }
 0xdc6   :  { %10103 = vst [vmem:[#allocation27_spill] sm:$0xff] %v8808_v0  ;;  %v4296_v53 = vmul.f32 1.442695, %v4136_v8  ;;  %v4298_v25 = vmul.f32 1.442695, %v4137_v61  ;;  %v8811_v24 = vpop.eup %6325  ;;  %6345 = vpow2.f32 %v4418_v14  ;;  %v10109_v8 = vld [vmem:[#allocation35_spill] sm:$0xff] }
 0xdc7   :  { %10105 = vst [vmem:[#allocation31_spill] sm:$0xff] %v8811_v24  ;;  %v4058_v43 = vpop.xlane.xlu1 %4057  ;;  %v8816_v13 = vpop.eup %6327  ;;  %v4300_v9 = vmul.f32 1.442695, %v4138_v46  ;;  %v4302_v27 = vmul.f32 1.442695, %v4139_v37  ;;  %4525 = vadd.xlane.f32.xlu1 %v4524_v36  ;;  %v4623_v44 = vadd.f32 %v8811_v24, %v8808_v0  ;;  %v10116_v0 = vld [vmem:[#allocation41_spill] sm:$0xff] }
 0xdc8   :  { %10107 = vst [vmem:[#allocation34_spill] sm:$0xff] %v8816_v13  ;;  %6347 = vpow2.f32 %v4296_v53  ;;  %v4200_v60 = vsub.f32 %v10108_v28, %v4058_v43  ;;  %v4201_v61 = vsub.f32 %v10109_v8, %v4058_v43  ;;  %v8820_v21 = vpop.eup %6329  ;;  %v4061_v14 = vpop.xlane.xlu0 %4060  ;;  %v10112_v53 = vld [vmem:[#allocation44_spill] sm:$0xff]  ;;  %v10114_v43 = vld [vmem:[#allocation42_spill] sm:$0xff] }
 0xdc9   :  { %10110 = vst [vmem:[#allocation25_spill] sm:$0xff] %v8820_v21  ;;  %6349 = vpow2.f32 %v4298_v25  ;;  %v8824_v42 = vpop.eup %6331  ;;  %v4202_v46 = vsub.f32 %v10112_v53, %v4061_v14  ;;  %v4203_v28 = vsub.f32 %v10114_v43, %v4061_v14  ;;  %4624 = vadd.xlane.f32.xlu0 %v4623_v44  ;;  %v4620_v25 = vadd.f32 %v8820_v21, %v8816_v13 }
 0xdca   :  { %10111 = vst [vmem:[#allocation29_spill] sm:$0xff] %v8824_v42  ;;  %6351 = vpow2.f32 %v4300_v9  ;;  %v4424_v49 = vmul.f32 1.442695, %v4200_v60  ;;  %v4426_v22 = vmul.f32 1.442695, %v4201_v61  ;;  %v8827_v50 = vpop.eup %6333  ;;  %v10117_v60 = vld [vmem:[#allocation46_spill] sm:$0xff] }
 0xdcb   :  { %10113 = vst [vmem:[#allocation33_spill] sm:$0xff] %v8827_v50  ;;  %6353 = vpow2.f32 %v4302_v27  ;;  %v3968_v37 = vpop.xlane.xlu1 %3967  ;;  %v8832_v36 = vpop.eup %6335  ;;  %v4428_v8 = vmul.f32 1.442695, %v4202_v46  ;;  %v4430_v53 = vmul.f32 1.442695, %v4203_v28  ;;  %4621 = vadd.xlane.f32.xlu1 %v4620_v25  ;;  %v4533_v14 = vadd.f32 %v8827_v50, %v8824_v42  ;;  %v10124_v42 = vld [vmem:[#allocation45_spill] sm:$0xff] }
 0xdcc   :  { %10115 = vst [vmem:[#allocation38_spill] sm:$0xff] %v8832_v36  ;;  %6355 = vpow2.f32 %v4424_v49  ;;  %v4140_v9 = vsub.f32 %v10116_v0, %v3968_v37  ;;  %v4141_v61 = vsub.f32 %v10117_v60, %v3968_v37  ;;  %v8836_v24 = vpop.eup %6337  ;;  %v3971_v27 = vpop.xlane.xlu0 %3970  ;;  %v10120_v49 = vld [vmem:[#allocation48_spill] sm:$0xff]  ;;  %v10122_v0 = vld [vmem:[#allocation47_spill] sm:$0xff] }
 0xdcd   :  { %10118 = vst [vmem:[#allocation40_spill] sm:$0xff] %v8836_v24  ;;  %6357 = vpow2.f32 %v4426_v22  ;;  %v8840_v44 = vpop.eup %6339  ;;  %v4142_v46 = vsub.f32 %v10120_v49, %v3971_v27  ;;  %v4143_v37 = vsub.f32 %v10122_v0, %v3971_v27  ;;  %4534 = vadd.xlane.f32.xlu0 %v4533_v14  ;;  %v4530_v22 = vadd.f32 %v8836_v24, %v8832_v36 }
 0xdce   :  { %10119 = vst [vmem:[#allocation39_spill] sm:$0xff] %v8840_v44  ;;  %6359 = vpow2.f32 %v4428_v8  ;;  %v4304_v43 = vmul.f32 1.442695, %v4140_v9  ;;  %v4306_v13 = vmul.f32 1.442695, %v4141_v61  ;;  %v8843_v21 = vpop.eup %6341  ;;  %v10125_v9 = vld [vmem:[#allocation43_spill] sm:$0xff] }
 0xdcf   :  { %10121 = vst [vmem:[#allocation37_spill] sm:$0xff] %v8843_v21  ;;  %6361 = vpow2.f32 %v4430_v53  ;;  %v4064_v28 = vpop.xlane.xlu1 %4063  ;;  %v8848_v25 = vpop.eup %6343  ;;  %v4308_v60 = vmul.f32 1.442695, %v4142_v46  ;;  %v4310_v49 = vmul.f32 1.442695, %v4143_v37  ;;  %4531 = vadd.xlane.f32.xlu1 %v4530_v22  ;;  %v4629_v27 = vadd.f32 %v8843_v21, %v8840_v44  ;;  %v10132_v44 = vld [vmem:[#allocation49_spill] sm:$0xff] }
 0xdd0   :  { %10123 = vst [vmem:[#allocation35_spill] sm:$0xff] %v8848_v25  ;;  %6363 = vpow2.f32 %v4304_v43  ;;  %v4204_v8 = vsub.f32 %v10124_v42, %v4064_v28  ;;  %v4205_v61 = vsub.f32 %v10125_v9, %v4064_v28  ;;  %v8852_v50 = vpop.eup %6345  ;;  %v4067_v53 = vpop.xlane.xlu0 %4066  ;;  %v10128_v43 = vld [vmem:[#allocation52_spill] sm:$0xff]  ;;  %v10130_v42 = vld [vmem:[#allocation50_spill] sm:$0xff] }
 0xdd1   :  { %10126 = vst [vmem:[#allocation44_spill] sm:$0xff] %v8852_v50  ;;  %6365 = vpow2.f32 %v4306_v13  ;;  %v4206_v46 = vsub.f32 %v10128_v43, %v4067_v53  ;;  %v4207_v28 = vsub.f32 %v10130_v42, %v4067_v53  ;;  %4630 = vadd.xlane.f32.xlu0 %v4629_v27  ;;  %v4626_v13 = vadd.f32 %v8852_v50, %v8848_v25 }
 0xdd2   :  { %v8856_v14 = vpop.eup %6347  ;;  %6367 = vpow2.f32 %v4308_v60  ;;  %v4432_v0 = vmul.f32 1.442695, %v4204_v8  ;;  %v4434_v36 = vmul.f32 1.442695, %v4205_v61  ;;  %v10133_v8 = vld [vmem:[#allocation54_spill] sm:$0xff] }
 0xdd3   :  { %10127 = vst [vmem:[#allocation42_spill] sm:$0xff] %v8856_v14  ;;  %v8859_v24 = vpop.eup %6349  ;;  %6369 = vpow2.f32 %v4310_v49  ;;  %v3974_v37 = vpop.xlane.xlu1 %3973  ;;  %v4436_v9 = vmul.f32 1.442695, %v4206_v46  ;;  %v4438_v43 = vmul.f32 1.442695, %v4207_v28  ;;  %4627 = vadd.xlane.f32.xlu1 %v4626_v13 }
 0xdd4   :  { %10129 = vst [vmem:[#allocation41_spill] sm:$0xff] %v8859_v24  ;;  %v8864_v22 = vpop.eup %6351  ;;  %6371 = vpow2.f32 %v4432_v0  ;;  %v4144_v60 = vsub.f32 %v10132_v44, %v3974_v37  ;;  %v4145_v61 = vsub.f32 %v10133_v8, %v3974_v37  ;;  %v3977_v49 = vpop.xlane.xlu0 %3976  ;;  %v4536_v53 = vadd.f32 %v8859_v24, %v8856_v14  ;;  %v10136_v0 = vld [vmem:[#allocation56_spill] sm:$0xff]  ;;  %v10138_v44 = vld [vmem:[#allocation55_spill] sm:$0xff]  ;;  %v10140_v14 = vld [vmem:[#allocation53_spill] sm:$0xff] }
 0xdd5   :  { %10131 = vst [vmem:[#allocation46_spill] sm:$0xff] %v8864_v22  ;;  %v8868_v21 = vpop.eup %6353  ;;  %6373 = vpow2.f32 %v4434_v36  ;;  %v4146_v46 = vsub.f32 %v10136_v0, %v3977_v49  ;;  %v4147_v37 = vsub.f32 %v10138_v44, %v3977_v49 }
 0xdd6   :  { %10134 = vst [vmem:[#allocation48_spill] sm:$0xff] %v8868_v21  ;;  %v8872_v27 = vpop.eup %6355  ;;  %6375 = vpow2.f32 %v4436_v9  ;;  %v4312_v42 = vmul.f32 1.442695, %v4144_v60  ;;  %v4314_v25 = vmul.f32 1.442695, %v4145_v61  ;;  %v4539_v36 = vadd.f32 %v8868_v21, %v8864_v22  ;;  %v10141_v9 = vld [vmem:[#allocation51_spill] sm:$0xff] }
 0xdd7   :  { %10135 = vst [vmem:[#allocation47_spill] sm:$0xff] %v8872_v27  ;;  %v8875_v50 = vpop.eup %6357  ;;  %6377 = vpow2.f32 %v4438_v43  ;;  %v4070_v28 = vpop.xlane.xlu1 %4069  ;;  %v4316_v8 = vmul.f32 1.442695, %v4146_v46  ;;  %v4318_v0 = vmul.f32 1.442695, %v4147_v37  ;;  %4537 = vadd.xlane.f32.xlu1 %v4536_v53  ;;  %v10144_v46 = vld [vmem:[#allocation60_spill] sm:$0xff] }
 0xdd8   :  { %10137 = vst [vmem:[#allocation45_spill] sm:$0xff] %v8875_v50  ;;  %v8880_v13 = vpop.eup %6359  ;;  %6379 = vpow2.f32 %v4312_v42  ;;  %v4208_v24 = vsub.f32 %v10140_v14, %v4070_v28  ;;  %v4209_v60 = vsub.f32 %v10141_v9, %v4070_v28  ;;  %4540 = vadd.xlane.f32.xlu0 %v4539_v36  ;;  %v4073_v43 = vpop.xlane.xlu0 %4072  ;;  %v4632_v49 = vadd.f32 %v8875_v50, %v8872_v27  ;;  %v10146_v28 = vld [vmem:[#allocation58_spill] sm:$0xff]  ;;  %v10148_v27 = vld [vmem:[#allocation57_spill] sm:$0xff] }
 0xdd9   :  { %10139 = vst [vmem:[#allocation43_spill] sm:$0xff] %v8880_v13  ;;  %v8884_v61 = vpop.eup %6361  ;;  %6381 = vpow2.f32 %v4314_v25  ;;  %v4210_v21 = vsub.f32 %v10144_v46, %v4073_v43  ;;  %v4211_v9 = vsub.f32 %v10146_v28, %v4073_v43 }
 0xdda   :  { %10142 = vst [vmem:[#allocation52_spill] sm:$0xff] %v8884_v61  ;;  %v8888_v44 = vpop.eup %6363  ;;  %6383 = vpow2.f32 %v4316_v8  ;;  %v4440_v22 = vmul.f32 1.442695, %v4208_v24  ;;  %v4442_v42 = vmul.f32 1.442695, %v4209_v60  ;;  %v4635_v25 = vadd.f32 %v8884_v61, %v8880_v13  ;;  %v10149_v8 = vld [vmem:[#allocation62_spill] sm:$0xff] }
 0xddb   :  { %10143 = vst [vmem:[#allocation50_spill] sm:$0xff] %v8888_v44  ;;  %v8891_v14 = vpop.eup %6365  ;;  %6385 = vpow2.f32 %v4318_v0  ;;  %v3980_v53 = vpop.xlane.xlu1 %3979  ;;  %v4444_v36 = vmul.f32 1.442695, %v4210_v21  ;;  %v4446_v46 = vmul.f32 1.442695, %v4211_v9  ;;  %4633 = vadd.xlane.f32.xlu1 %v4632_v49  ;;  %v10152_v21 = vld [vmem:[#allocation64_spill] sm:$0xff] }
 0xddc   :  { %10145 = vst [vmem:[#allocation49_spill] sm:$0xff] %v8891_v14  ;;  %v8896_v37 = vpop.eup %6367  ;;  %6387 = vpow2.f32 %v4440_v22  ;;  %v4148_v50 = vsub.f32 %v10148_v27, %v3980_v53  ;;  %v4149_v24 = vsub.f32 %v10149_v8, %v3980_v53  ;;  %4636 = vadd.xlane.f32.xlu0 %v4635_v25  ;;  %v3983_v0 = vpop.xlane.xlu0 %3982  ;;  %v4542_v43 = vadd.f32 %v8891_v14, %v8888_v44  ;;  %v10154_v53 = vld [vmem:[#allocation63_spill] sm:$0xff]  ;;  %v10156_v44 = vld [vmem:[#allocation61_spill] sm:$0xff] }
 0xddd   :  { %10147 = vst [vmem:[#allocation54_spill] sm:$0xff] %v8896_v37  ;;  %v8900_v60 = vpop.eup %6369  ;;  %6389 = vpow2.f32 %v4442_v42  ;;  %v4150_v61 = vsub.f32 %v10152_v21, %v3983_v0  ;;  %v4151_v8 = vsub.f32 %v10154_v53, %v3983_v0 }
 0xdde   :  { %10150 = vst [vmem:[#allocation56_spill] sm:$0xff] %v8900_v60  ;;  %v8904_v28 = vpop.eup %6371  ;;  %6391 = vpow2.f32 %v4444_v36  ;;  %v4320_v13 = vmul.f32 1.442695, %v4148_v50  ;;  %v4322_v22 = vmul.f32 1.442695, %v4149_v24  ;;  %v4545_v49 = vadd.f32 %v8900_v60, %v8896_v37  ;;  %v10157_v36 = vld [vmem:[#allocation59_spill] sm:$0xff] }
 0xddf   :  { %10151 = vst [vmem:[#allocation55_spill] sm:$0xff] %v8904_v28  ;;  %v8907_v27 = vpop.eup %6373  ;;  %6393 = vpow2.f32 %v4446_v46  ;;  %v4076_v42 = vpop.xlane.xlu1 %4075  ;;  %v4324_v25 = vmul.f32 1.442695, %v4150_v61  ;;  %v4326_v21 = vmul.f32 1.442695, %v4151_v8  ;;  %4543 = vadd.xlane.f32.xlu1 %v4542_v43  ;;  %v10160_v61 = vld [vmem:[#allocation68_spill] sm:$0xff] }
 0xde0   :  { %10153 = vst [vmem:[#allocation53_spill] sm:$0xff] %v8907_v27  ;;  %v8912_v9 = vpop.eup %6375  ;;  %6395 = vpow2.f32 %v4320_v13  ;;  %v4212_v14 = vsub.f32 %v10156_v44, %v4076_v42  ;;  %v4213_v50 = vsub.f32 %v10157_v36, %v4076_v42  ;;  %4546 = vadd.xlane.f32.xlu0 %v4545_v49  ;;  %v4079_v46 = vpop.xlane.xlu0 %4078  ;;  %v4638_v0 = vadd.f32 %v8907_v27, %v8904_v28  ;;  %v10162_v42 = vld [vmem:[#allocation66_spill] sm:$0xff]  ;;  %v10164_v28 = vld [vmem:[#allocation65_spill] sm:$0xff] }
 0xde1   :  { %10155 = vst [vmem:[#allocation51_spill] sm:$0xff] %v8912_v9  ;;  %v8916_v24 = vpop.eup %6377  ;;  %6397 = vpow2.f32 %v4322_v22  ;;  %v4214_v60 = vsub.f32 %v10160_v61, %v4079_v46  ;;  %v4215_v36 = vsub.f32 %v10162_v42, %v4079_v46 }
 0xde2   :  { %10158 = vst [vmem:[#allocation60_spill] sm:$0xff] %v8916_v24  ;;  %v8920_v53 = vpop.eup %6379  ;;  %6399 = vpow2.f32 %v4324_v25  ;;  %v4448_v37 = vmul.f32 1.442695, %v4212_v14  ;;  %v4450_v13 = vmul.f32 1.442695, %v4213_v50  ;;  %v4641_v43 = vadd.f32 %v8916_v24, %v8912_v9  ;;  %v10165_v25 = vld [vmem:[#allocation67_spill] sm:$0xff] }
 0xde3   :  { %10159 = vst [vmem:[#allocation58_spill] sm:$0xff] %v8920_v53  ;;  %v8923_v44 = vpop.eup %6381  ;;  %6401 = vpow2.f32 %v4326_v21  ;;  %v3986_v22 = vpop.xlane.xlu1 %3985  ;;  %v4452_v49 = vmul.f32 1.442695, %v4214_v60  ;;  %v4454_v61 = vmul.f32 1.442695, %v4215_v36  ;;  %4639 = vadd.xlane.f32.xlu1 %v4638_v0  ;;  %v10168_v60 = vld [vmem:[#allocation74_spill] sm:$0xff] }
 0xde4   :  { %10161 = vst [vmem:[#allocation57_spill] sm:$0xff] %v8923_v44  ;;  %v8928_v8 = vpop.eup %6383  ;;  %6403 = vpow2.f32 %v4448_v37  ;;  %v4152_v27 = vsub.f32 %v10164_v28, %v3986_v22  ;;  %v4153_v14 = vsub.f32 %v10165_v25, %v3986_v22  ;;  %4642 = vadd.xlane.f32.xlu0 %v4641_v43  ;;  %v3989_v21 = vpop.xlane.xlu0 %3988  ;;  %v4548_v46 = vadd.f32 %v8923_v44, %v8920_v53  ;;  %v10170_v22 = vld [vmem:[#allocation72_spill] sm:$0xff]  ;;  %v10172_v53 = vld [vmem:[#allocation70_spill] sm:$0xff] }
 0xde5   :  { %10163 = vst [vmem:[#allocation62_spill] sm:$0xff] %v8928_v8  ;;  %v8932_v50 = vpop.eup %6385  ;;  %6405 = vpow2.f32 %v4450_v13  ;;  %v4154_v24 = vsub.f32 %v10168_v60, %v3989_v21  ;;  %v4155_v25 = vsub.f32 %v10170_v22, %v3989_v21 }
 0xde6   :  { %10166 = vst [vmem:[#allocation64_spill] sm:$0xff] %v8932_v50  ;;  %v8936_v42 = vpop.eup %6387  ;;  %6407 = vpow2.f32 %v4452_v49  ;;  %v4328_v9 = vmul.f32 1.442695, %v4152_v27  ;;  %v4330_v37 = vmul.f32 1.442695, %v4153_v14  ;;  %v4551_v0 = vadd.f32 %v8932_v50, %v8928_v8  ;;  %v10173_v49 = vld [vmem:[#allocation71_spill] sm:$0xff] }
 0xde7   :  { %10167 = vst [vmem:[#allocation63_spill] sm:$0xff] %v8936_v42  ;;  %v8939_v28 = vpop.eup %6389  ;;  %6409 = vpow2.f32 %v4454_v61  ;;  %v4082_v13 = vpop.xlane.xlu1 %4081  ;;  %v4332_v43 = vmul.f32 1.442695, %v4154_v24  ;;  %v4334_v60 = vmul.f32 1.442695, %v4155_v25  ;;  %4549 = vadd.xlane.f32.xlu1 %v4548_v46  ;;  %v10176_v24 = vld [vmem:[#allocation69_spill] sm:$0xff] }
 0xde8   :  { %10169 = vst [vmem:[#allocation61_spill] sm:$0xff] %v8939_v28  ;;  %v8944_v36 = vpop.eup %6391  ;;  %6411 = vpow2.f32 %v4328_v9  ;;  %v4216_v44 = vsub.f32 %v10172_v53, %v4082_v13  ;;  %v4217_v27 = vsub.f32 %v10173_v49, %v4082_v13  ;;  %4552 = vadd.xlane.f32.xlu0 %v4551_v0  ;;  %v4085_v61 = vpop.xlane.xlu0 %4084  ;;  %v4644_v21 = vadd.f32 %v8939_v28, %v8936_v42  ;;  %v10178_v13 = vld [vmem:[#allocation76_spill] sm:$0xff]  ;;  %v10180_v42 = vld [vmem:[#allocation6_spill] sm:$0xff] }
 0xde9   :  { %10171 = vst [vmem:[#allocation59_spill] sm:$0xff] %v8944_v36  ;;  %v8948_v14 = vpop.eup %6393  ;;  %6413 = vpow2.f32 %v4330_v37  ;;  %v4218_v50 = vsub.f32 %v10176_v24, %v4085_v61  ;;  %v4219_v49 = vsub.f32 %v10178_v13, %v4085_v61 }
 0xdea   :  { %10174 = vst [vmem:[#allocation68_spill] sm:$0xff] %v8948_v14  ;;  %v8952_v22 = vpop.eup %6395  ;;  %6415 = vpow2.f32 %v4332_v43  ;;  %v4456_v8 = vmul.f32 1.442695, %v4216_v44  ;;  %v4458_v9 = vmul.f32 1.442695, %v4217_v27  ;;  %v4647_v46 = vadd.f32 %v8948_v14, %v8944_v36  ;;  %v10181_v43 = vld [vmem:[#allocation73_spill] sm:$0xff] }
 0xdeb   :  { %10175 = vst [vmem:[#allocation66_spill] sm:$0xff] %v8952_v22  ;;  %v8955_v53 = vpop.eup %6397  ;;  %6417 = vpow2.f32 %v4334_v60  ;;  %v3992_v37 = vpop.xlane.xlu1 %3991  ;;  %v4460_v0 = vmul.f32 1.442695, %v4218_v50  ;;  %v4462_v24 = vmul.f32 1.442695, %v4219_v49  ;;  %4645 = vadd.xlane.f32.xlu1 %v4644_v21  ;;  %v10184_v50 = vld [vmem:[#allocation78_spill] sm:$0xff] }
 0xdec   :  { %10177 = vst [vmem:[#allocation65_spill] sm:$0xff] %v8955_v53  ;;  %v8960_v25 = vpop.eup %6399  ;;  %6419 = vpow2.f32 %v4456_v8  ;;  %v4156_v28 = vsub.f32 %v10180_v42, %v3992_v37  ;;  %v4157_v44 = vsub.f32 %v10181_v43, %v3992_v37  ;;  %4648 = vadd.xlane.f32.xlu0 %v4647_v46  ;;  %v3995_v60 = vpop.xlane.xlu0 %3994  ;;  %v4554_v61 = vadd.f32 %v8955_v53, %v8952_v22  ;;  %v10186_v37 = vld [vmem:[#allocation80_spill] sm:$0xff]  ;;  %v10188_v22 = vld [vmem:[#allocation7_spill] sm:$0xff] }
 0xded   :  { %10179 = vst [vmem:[#allocation67_spill] sm:$0xff] %v8960_v25  ;;  %v8964_v27 = vpop.eup %6401  ;;  %6421 = vpow2.f32 %v4458_v9  ;;  %v4158_v14 = vsub.f32 %v10184_v50, %v3995_v60  ;;  %v4159_v43 = vsub.f32 %v10186_v37, %v3995_v60 }
 0xdee   :  { %10182 = vst [vmem:[#allocation74_spill] sm:$0xff] %v8964_v27  ;;  %v8968_v13 = vpop.eup %6403  ;;  %6423 = vpow2.f32 %v4460_v0  ;;  %v4336_v36 = vmul.f32 1.442695, %v4156_v28  ;;  %v4338_v8 = vmul.f32 1.442695, %v4157_v44  ;;  %v4557_v21 = vadd.f32 %v8964_v27, %v8960_v25  ;;  %v10189_v0 = vld [vmem:[#allocation77_spill] sm:$0xff] }
 0xdef   :  { %10183 = vst [vmem:[#allocation72_spill] sm:$0xff] %v8968_v13  ;;  %v8971_v42 = vpop.eup %6405  ;;  %6425 = vpow2.f32 %v4462_v24  ;;  %v4088_v9 = vpop.xlane.xlu1 %4087  ;;  %v4340_v46 = vmul.f32 1.442695, %v4158_v14  ;;  %v4342_v50 = vmul.f32 1.442695, %v4159_v43  ;;  %4555 = vadd.xlane.f32.xlu1 %v4554_v61  ;;  %v10192_v14 = vld [vmem:[#allocation75_spill] sm:$0xff] }
 0xdf0   :  { %10185 = vst [vmem:[#allocation70_spill] sm:$0xff] %v8971_v42  ;;  %v8976_v49 = vpop.eup %6407  ;;  %6427 = vpow2.f32 %v4336_v36  ;;  %v4220_v53 = vsub.f32 %v10188_v22, %v4088_v9  ;;  %v4221_v28 = vsub.f32 %v10189_v0, %v4088_v9  ;;  %4558 = vadd.xlane.f32.xlu0 %v4557_v21  ;;  %v4091_v24 = vpop.xlane.xlu0 %4090  ;;  %v4650_v60 = vadd.f32 %v8971_v42, %v8968_v13  ;;  %v10194_v9 = vld [vmem:[#allocation85_spill] sm:$0xff]  ;;  %v10196_v13 = vld [vmem:[#allocation79_spill] sm:$0xff] }
 0xdf1   :  { %10187 = vst [vmem:[#allocation71_spill] sm:$0xff] %v8976_v49  ;;  %v8980_v44 = vpop.eup %6409  ;;  %6429 = vpow2.f32 %v4338_v8  ;;  %v4222_v27 = vsub.f32 %v10192_v14, %v4091_v24  ;;  %v4223_v0 = vsub.f32 %v10194_v9, %v4091_v24 }
 0xdf2   :  { %10190 = vst [vmem:[#allocation69_spill] sm:$0xff] %v8980_v44  ;;  %v8984_v37 = vpop.eup %6411  ;;  %6431 = vpow2.f32 %v4340_v46  ;;  %v4464_v25 = vmul.f32 1.442695, %v4220_v53  ;;  %v4466_v36 = vmul.f32 1.442695, %v4221_v28  ;;  %v4653_v61 = vadd.f32 %v8980_v44, %v8976_v49  ;;  %v10197_v46 = vld [vmem:[#allocation83_spill] sm:$0xff] }
 0xdf3   :  { %10191 = vst [vmem:[#allocation76_spill] sm:$0xff] %v8984_v37  ;;  %v8987_v22 = vpop.eup %6413  ;;  %6433 = vpow2.f32 %v4342_v50  ;;  %v3998_v8 = vpop.xlane.xlu1 %3997  ;;  %v4468_v21 = vmul.f32 1.442695, %v4222_v27  ;;  %v4470_v14 = vmul.f32 1.442695, %v4223_v0  ;;  %4651 = vadd.xlane.f32.xlu1 %v4650_v60  ;;  %v10200_v27 = vld [vmem:[#allocation81_spill] sm:$0xff] }
 0xdf4   :  { %10193 = vst [vmem:[#allocation6_spill] sm:$0xff] %v8987_v22  ;;  %v8992_v43 = vpop.eup %6415  ;;  %6435 = vpow2.f32 %v4464_v25  ;;  %v4160_v42 = vsub.f32 %v10196_v13, %v3998_v8  ;;  %v4161_v53 = vsub.f32 %v10197_v46, %v3998_v8  ;;  %4654 = vadd.xlane.f32.xlu0 %v4653_v61  ;;  %v4001_v50 = vpop.xlane.xlu0 %4000  ;;  %v4560_v24 = vadd.f32 %v8987_v22, %v8984_v37  ;;  %v10202_v8 = vld [vmem:[#allocation2_spill] sm:$0xff] }
 0xdf5   :  { %10195 = vst [vmem:[#allocation73_spill] sm:$0xff] %v8992_v43  ;;  %v8996_v28 = vpop.eup %6417  ;;  %6437 = vpow2.f32 %v4466_v36  ;;  %v4162_v44 = vsub.f32 %v10200_v27, %v4001_v50  ;;  %v4163_v46 = vsub.f32 %v10202_v8, %v4001_v50  ;;  %v10204_v37 = vld [vmem:[#allocation82_spill] sm:$0xff] }
 0xdf6   :  { %10198 = vst [vmem:[#allocation78_spill] sm:$0xff] %v8996_v28  ;;  %v9000_v9 = vpop.eup %6419  ;;  %6439 = vpow2.f32 %v4468_v21  ;;  %v4344_v49 = vmul.f32 1.442695, %v4160_v42  ;;  %v4346_v25 = vmul.f32 1.442695, %v4161_v53  ;;  %v4563_v60 = vadd.f32 %v8996_v28, %v8992_v43  ;;  %v10205_v21 = vld [vmem:[#allocation86_spill] sm:$0xff] }
 0xdf7   :  { %10199 = vst [vmem:[#allocation80_spill] sm:$0xff] %v9000_v9  ;;  %v9003_v13 = vpop.eup %6421  ;;  %6441 = vpow2.f32 %v4470_v14  ;;  %v4094_v36 = vpop.xlane.xlu1 %4093  ;;  %v4348_v61 = vmul.f32 1.442695, %v4162_v44  ;;  %v4350_v27 = vmul.f32 1.442695, %v4163_v46  ;;  %4561 = vadd.xlane.f32.xlu1 %v4560_v24  ;;  %v10207_v44 = vld [vmem:[#allocation84_spill] sm:$0xff] }
 0xdf8   :  { %10201 = vst [vmem:[#allocation7_spill] sm:$0xff] %v9003_v13  ;;  %v9008_v0 = vpop.eup %6423  ;;  %6443 = vpow2.f32 %v4344_v49  ;;  %v4224_v22 = vsub.f32 %v10204_v37, %v4094_v36  ;;  %v4225_v42 = vsub.f32 %v10205_v21, %v4094_v36  ;;  %4564 = vadd.xlane.f32.xlu0 %v4563_v60  ;;  %v4097_v14 = vpop.xlane.xlu0 %4096  ;;  %v4656_v50 = vadd.f32 %v9003_v13, %v9000_v9  ;;  %v10209_v36 = vld [vmem:[#allocation3_spill] sm:$0xff]  ;;  %v10211_v9 = vld [vmem:[#allocation4_spill] sm:$0xff] }
 0xdf9   :  { %10203 = vst [vmem:[#allocation77_spill] sm:$0xff] %v9008_v0  ;;  %v9012_v53 = vpop.eup %6425  ;;  %6445 = vpow2.f32 %v4346_v25  ;;  %v4226_v28 = vsub.f32 %v10207_v44, %v4097_v14  ;;  %v4227_v21 = vsub.f32 %v10209_v36, %v4097_v14 }
 0xdfa   :  { %v9016_v8 = vpop.eup %6427  ;;  %6447 = vpow2.f32 %v4348_v61  ;;  %v4472_v43 = vmul.f32 1.442695, %v4224_v22  ;;  %v4474_v49 = vmul.f32 1.442695, %v4225_v42  ;;  %v4659_v24 = vadd.f32 %v9012_v53, %v9008_v0  ;;  %v10212_v61 = vld [vmem:[#allocation88_spill] sm:$0xff] }
 0xdfb   :  { %10206 = vst [vmem:[#allocation75_spill] sm:$0xff] %v9016_v8  ;;  %v9019_v37 = vpop.eup %6429  ;;  %6449 = vpow2.f32 %v4350_v27  ;;  %v4004_v25 = vpop.xlane.xlu1 %4003  ;;  %v4476_v60 = vmul.f32 1.442695, %v4226_v28  ;;  %v4478_v44 = vmul.f32 1.442695, %v4227_v21  ;;  %4657 = vadd.xlane.f32.xlu1 %v4656_v50 }
 0xdfc   :  { %10208 = vst [vmem:[#allocation85_spill] sm:$0xff] %v9019_v37  ;;  %v9024_v46 = vpop.eup %6431  ;;  %6451 = vpow2.f32 %v4472_v43  ;;  %v4164_v13 = vsub.f32 %v10211_v9, %v4004_v25  ;;  %v4165_v22 = vsub.f32 %v10212_v61, %v4004_v25  ;;  %4660 = vadd.xlane.f32.xlu0 %v4659_v24  ;;  %v4007_v27 = vpop.xlane.xlu0 %4006  ;;  %v4566_v14 = vadd.f32 %v9019_v37, %v9016_v8  ;;  %v10214_v25 = vld [vmem:[#allocation91_spill] sm:$0xff] }
 0xdfd   :  { %10210 = vst [vmem:[#allocation79_spill] sm:$0xff] %v9024_v46  ;;  %v9028_v42 = vpop.eup %6433  ;;  %6453 = vpow2.f32 %v4474_v49  ;;  %v4166_v28 = vsub.f32 %v8576_v45, %v4007_v27  ;;  %v4167_v61 = vsub.f32 %v10214_v25, %v4007_v27  ;;  %v10215_v8 = vld [vmem:[#allocation87_spill] sm:$0xff] }
 0xdfe   :  { %10213 = vst [vmem:[#allocation83_spill] sm:$0xff] %v9028_v42  ;;  %v9032_v36 = vpop.eup %6435  ;;  %6455 = vpow2.f32 %v4476_v60  ;;  %v4352_v0 = vmul.f32 1.442695, %v4164_v13  ;;  %v4354_v43 = vmul.f32 1.442695, %v4165_v22  ;;  %v4569_v50 = vadd.f32 %v9028_v42, %v9024_v46  ;;  %v10216_v60 = vld [vmem:[#allocation89_spill] sm:$0xff] }
 0xdff   :  { %v9035_v9 = vpop.eup %6437  ;;  %6457 = vpow2.f32 %v4478_v44  ;;  %v4100_v49 = vpop.xlane.xlu1 %4099  ;;  %v4356_v24 = vmul.f32 1.442695, %v4166_v28  ;;  %v4358_v45 = vmul.f32 1.442695, %v4167_v61  ;;  %4567 = vadd.xlane.f32.xlu1 %v4566_v14  ;;  %v10217_v28 = vld [vmem:[#allocation90_spill] sm:$0xff] }
 0xe00   :  { %v9040_v21 = vpop.eup %6439  ;;  %6459 = vpow2.f32 %v4352_v0  ;;  %v4228_v37 = vsub.f32 %v10215_v8, %v4100_v49  ;;  %v4229_v13 = vsub.f32 %v10216_v60, %v4100_v49  ;;  %4570 = vadd.xlane.f32.xlu0 %v4569_v50  ;;  %v4103_v44 = vpop.xlane.xlu0 %4102  ;;  %v4662_v27 = vadd.f32 %v9035_v9, %v9032_v36  ;;  %v10218_v49 = vld [vmem:[#allocation92_spill] sm:$0xff] }
 0xe01   :  { %v9044_v22 = vpop.eup %6441  ;;  %6461 = vpow2.f32 %v4354_v43  ;;  %v4230_v42 = vsub.f32 %v10217_v28, %v4103_v44  ;;  %v4231_v60 = vsub.f32 %v10218_v49, %v4103_v44 }
 0xe02   :  { %v9048_v25 = vpop.eup %6443  ;;  %6463 = vpow2.f32 %v4356_v24  ;;  %v4480_v46 = vmul.f32 1.442695, %v4228_v37  ;;  %v4482_v0 = vmul.f32 1.442695, %v4229_v13  ;;  %v4665_v14 = vadd.f32 %v9044_v22, %v9040_v21 }
 0xe03   :  { %v9051_v8 = vpop.eup %6445  ;;  %6465 = vpow2.f32 %v4358_v45  ;;  %v4484_v61 = vmul.f32 1.442695, %v4230_v42  ;;  %v4486_v24 = vmul.f32 1.442695, %v4231_v60  ;;  %4663 = vadd.xlane.f32.xlu1 %v4662_v27 }
 0xe04   :  { %v9056_v43 = vpop.eup %6447  ;;  %6467 = vpow2.f32 %v4480_v46  ;;  %4666 = vadd.xlane.f32.xlu0 %v4665_v14  ;;  %v4572_v37 = vadd.f32 %v9051_v8, %v9048_v25 }
 0xe05   :  { %10219 = vst [vmem:[#allocation81_spill] sm:$0xff] %v9056_v43  ;;  %v9058_v50 = vpop.eup %6449  ;;  %6469 = vpow2.f32 %v4482_v0 }
 0xe06   :  { %v9062_v13 = vpop.eup %6451  ;;  %6471 = vpow2.f32 %v4484_v61  ;;  %v4575_v45 = vadd.f32 %v9058_v50, %v9056_v43 }
 0xe07   :  { %10220 = vst [vmem:[#allocation2_spill] sm:$0xff] %v9062_v13  ;;  %v9066_v44 = vpop.eup %6453  ;;  %6473 = vpow2.f32 %v4486_v24  ;;  %4573 = vadd.xlane.f32.xlu1 %v4572_v37 }
 0xe08   :  { %10221 = vst [vmem:[#allocation82_spill] sm:$0xff] %v9066_v44  ;;  %v9068_v46 = vpop.eup %6455  ;;  %4576 = vadd.xlane.f32.xlu0 %v4575_v45  ;;  %v4668_v27 = vadd.f32 %v9066_v44, %v9062_v13 }
 0xe09   :  { %10222 = vst [vmem:[#allocation86_spill] sm:$0xff] %v9068_v46  ;;  %v9070_v42 = vpop.eup %6457 }
 0xe0a   :  { %10223 = vst [vmem:[#allocation84_spill] sm:$0xff] %v9070_v42  ;;  %v9074_v0 = vpop.eup %6459  ;;  %v4671_v28 = vadd.f32 %v9070_v42, %v9068_v46 }
 0xe0b   :  { %10224 = vst [vmem:[#allocation3_spill] sm:$0xff] %v9074_v0  ;;  %v9078_v49 = vpop.eup %6461  ;;  %4669 = vadd.xlane.f32.xlu1 %v4668_v27 }
 0xe0c   :  { %10225 = vst [vmem:[#allocation4_spill] sm:$0xff] %v9078_v49  ;;  %v9080_v60 = vpop.eup %6463  ;;  %4672 = vadd.xlane.f32.xlu0 %v4671_v28  ;;  %v4578_v61 = vadd.f32 %v9078_v49, %v9074_v0 }
 0xe0d   :  { %10226 = vst [vmem:[#allocation88_spill] sm:$0xff] %v9080_v60  ;;  %v9082_v14 = vpop.eup %6465 }
 0xe0e   :  { %10227 = vst [vmem:[#allocation91_spill] sm:$0xff] %v9082_v14  ;;  %v9086_v24 = vpop.eup %6467  ;;  %v4581_v37 = vadd.f32 %v9082_v14, %v9080_v60 }
 0xe0f   :  { %10228 = vst [vmem:[#allocation87_spill] sm:$0xff] %v9086_v24  ;;  %v9090_v45 = vpop.eup %6469  ;;  %4579 = vadd.xlane.f32.xlu1 %v4578_v61 }
 0xe10   :  { %10229 = vst [vmem:[#allocation89_spill] sm:$0xff] %v9090_v45  ;;  %v9092_v13 = vpop.eup %6471  ;;  %4582 = vadd.xlane.f32.xlu0 %v4581_v37  ;;  %v4674_v27 = vadd.f32 %v9090_v45, %v9086_v24 }
 0xe11   :  { %10230 = vst [vmem:[#allocation90_spill] sm:$0xff] %v9092_v13  ;;  %v9094_v46 = vpop.eup %6473 }
 0xe12   :  { %10231 = vst [vmem:[#allocation92_spill] sm:$0xff] %v9094_v46  ;;  %v4677_v28 = vadd.f32 %v9094_v46, %v9092_v13 }
 0xe13   :  { %4675 = vadd.xlane.f32.xlu1 %v4674_v27 }
 0xe14   :  { %4678 = vadd.xlane.f32.xlu0 %v4677_v28 }
 0xe1e   :  { %v4490_v0 = vpop.xlane.xlu1 %4489 }
 0xe1f   :  { %6475 = vrcp.f32 %v4490_v0 }
 0xe22   :  { %v4493_v49 = vpop.xlane.xlu0 %4492 }
 0xe23   :  { %6477 = vrcp.f32 %v4493_v49 }
 0xe24   :  { %v4586_v60 = vpop.xlane.xlu1 %4585 }
 0xe25   :  { %6479 = vrcp.f32 %v4586_v60 }
 0xe26   :  { %v4589_v14 = vpop.xlane.xlu0 %4588 }
 0xe27   :  { %6481 = vrcp.f32 %v4589_v14 }
 0xe29   :  { %v6476_v44 = vpop.eup %6475 }
 0xe2a   :  { %v4499_v42 = vpop.xlane.xlu0 %4498  ;;  %v4682_v45 = vmul.f32 %v6476_v44, %v8602_v6  ;;  %v4681_v28 = vmul.f32 %v6476_v44, %v8600_v11 }
 0xe2b   :  { %6483 = vrcp.f32 %v4499_v42 }
 0xe2c   :  { %v4496_v61 = vpop.xlane.xlu1 %4495 }
 0xe2d   :  { %v6478_v37 = vpop.eup %6477  ;;  %6485 = vrcp.f32 %v4496_v61 }
 0xe2e   :  { %v4595_v24 = vpop.xlane.xlu0 %4594  ;;  %v4685_v27 = vmul.f32 %v6478_v37, %v8612_v57  ;;  %v4684_v0 = vmul.f32 %v6478_v37, %v8610_v55 }
 0xe2f   :  { %v6480_v49 = vpop.eup %6479  ;;  %6487 = vrcp.f32 %v4595_v24 }
 0xe30   :  { %v4592_v60 = vpop.xlane.xlu1 %4591  ;;  %v5664_v13 = vpack.c.bf16 %v4685_v27, %v4682_v45  ;;  %v5666_v14 = vpack.c.bf16 %v4684_v0, %v4681_v28  ;;  %v4778_v61 = vmul.f32 %v6480_v49, %v8619_v34  ;;  %v4777_v6 = vmul.f32 %v6480_v49, %v8614_v30 }
 0xe31   :  { %v6482_v46 = vpop.eup %6481  ;;  %6489 = vrcp.f32 %v4592_v60 }
 0xe32   :  { %v4505_v42 = vpop.xlane.xlu0 %4504  ;;  %5665 = vmatprep.subr.bf16.mxu1 %v5664_v13  ;;  %v4781_v43 = vmul.f32 %v6482_v46, %v8626_v20  ;;  %v4780_v57 = vmul.f32 %v6482_v46, %v8624_v56 }
 0xe33   :  { %6491 = vrcp.f32 %v4505_v42  ;;  %5667 = vmatpush1.bf16.xpose.msra.mxu1 %v5666_v14 }
 0xe34   :  { %v4502_v11 = vpop.xlane.xlu1 %4501  ;;  %v5728_v55 = vpack.c.bf16 %v4781_v43, %v4778_v61  ;;  %v5730_v44 = vpack.c.bf16 %v4780_v57, %v4777_v6 }
 0xe35   :  { %v6484_v24 = vpop.eup %6483  ;;  %6493 = vrcp.f32 %v4502_v11 }
 0xe36   :  { %v4601_v45 = vpop.xlane.xlu0 %4600  ;;  %5729 = vmatprep.subr.bf16.mxu0 %v5728_v55  ;;  %v4691_v37 = vmul.f32 %v6484_v24, %v8638_v32  ;;  %v4690_v13 = vmul.f32 %v6484_v24, %v8636_v31 }
 0xe37   :  { %v6486_v34 = vpop.eup %6485  ;;  %6495 = vrcp.f32 %v4601_v45  ;;  %5731 = vmatpush1.bf16.xpose.msra.mxu0 %v5730_v44 }
 0xe38   :  { %v4598_v20 = vpop.xlane.xlu1 %4597  ;;  %v4688_v30 = vmul.f32 %v6486_v34, %v8645_v54  ;;  %v4687_v56 = vmul.f32 %v6486_v34, %v8640_v48 }
 0xe39   :  { %v6488_v46 = vpop.eup %6487  ;;  %6497 = vrcp.f32 %v4598_v20 }
 0xe3a   :  { %v4511_v43 = vpop.xlane.xlu0 %4510  ;;  %v5668_v27 = vpack.c.bf16 %v4691_v37, %v4688_v30  ;;  %v5670_v28 = vpack.c.bf16 %v4690_v13, %v4687_v56  ;;  %v4787_v0 = vmul.f32 %v6488_v46, %v8652_v47  ;;  %v4786_v49 = vmul.f32 %v6488_v46, %v8650_v18 }
 0xe3b   :  { %v6490_v32 = vpop.eup %6489  ;;  %6499 = vrcp.f32 %v4511_v43 }
 0xe3c   :  { %5669 = vmatprep.subr.bf16.mxu1 %v5668_v27  ;;  %v4508_v31 = vpop.xlane.xlu1 %4507  ;;  %v4784_v60 = vmul.f32 %v6490_v32, %v8661_v1  ;;  %v4783_v14 = vmul.f32 %v6490_v32, %v8656_v35 }
 0xe3d   :  { %v6492_v54 = vpop.eup %6491  ;;  %6501 = vrcp.f32 %v4508_v31  ;;  %5671 = vmatpush1.bf16.xpose.msra.mxu1 %v5670_v28 }
 0xe3e   :  { %v4607_v48 = vpop.xlane.xlu0 %4606  ;;  %v5732_v42 = vpack.c.bf16 %v4787_v0, %v4784_v60  ;;  %v5734_v61 = vpack.c.bf16 %v4786_v49, %v4783_v14  ;;  %v4697_v6 = vmul.f32 %v6492_v54, %v8668_v40  ;;  %v4696_v47 = vmul.f32 %v6492_v54, %v8666_v10 }
 0xe3f   :  { %v6494_v57 = vpop.eup %6493  ;;  %6503 = vrcp.f32 %v4607_v48 }
 0xe40   :  { %5733 = vmatprep.subr.bf16.mxu0 %v5732_v42  ;;  %v4604_v18 = vpop.xlane.xlu1 %4603  ;;  %v4694_v11 = vmul.f32 %v6494_v57, %v8677_v41  ;;  %v4693_v1 = vmul.f32 %v6494_v57, %v8672_v2 }
 0xe41   :  { %v6496_v55 = vpop.eup %6495  ;;  %6505 = vrcp.f32 %v4604_v18  ;;  %5735 = vmatpush1.bf16.xpose.msra.mxu0 %v5734_v61 }
 0xe42   :  { %v4517_v35 = vpop.xlane.xlu0 %4516  ;;  %v5672_v44 = vpack.c.bf16 %v4697_v6, %v4694_v11  ;;  %v5674_v24 = vpack.c.bf16 %v4696_v47, %v4693_v1  ;;  %v4793_v45 = vmul.f32 %v6496_v55, %v8684_v15  ;;  %v4792_v40 = vmul.f32 %v6496_v55, %v8682_v23 }
 0xe43   :  { %v6498_v37 = vpop.eup %6497  ;;  %6507 = vrcp.f32 %v4517_v35 }
 0xe44   :  { %5673 = vmatprep.subr.bf16.mxu1 %v5672_v44  ;;  %v4514_v10 = vpop.xlane.xlu1 %4513  ;;  %v4790_v13 = vmul.f32 %v6498_v37, %v8693_v4  ;;  %v4789_v41 = vmul.f32 %v6498_v37, %v8688_v16 }
 0xe45   :  { %v6500_v34 = vpop.eup %6499  ;;  %6509 = vrcp.f32 %v4514_v10  ;;  %5675 = vmatpush1.bf16.xpose.msra.mxu1 %v5674_v24  ;;  %v10232_v24 = vld [vmem:[#allocation26_spill] sm:$0xff]  ;;  %v10234_v10 = vld [vmem:[#allocation19_spill] sm:$0xff] }
 0xe46   :  { %v4613_v2 = vpop.xlane.xlu0 %4612  ;;  %v5736_v20 = vpack.c.bf16 %v4793_v45, %v4790_v13  ;;  %v5738_v30 = vpack.c.bf16 %v4792_v40, %v4789_v41  ;;  %v4703_v56 = vmul.f32 %v6500_v34, %v8700_v3  ;;  %v4702_v15 = vmul.f32 %v6500_v34, %v8698_v52  ;;  %v10233_v40 = vld [vmem:[#allocation22_spill] sm:$0xff]  ;;  %v10235_v41 = vld [vmem:[#allocation20_spill] sm:$0xff] }
 0xe47   :  { %v6502_v46 = vpop.eup %6501  ;;  %6511 = vrcp.f32 %v4613_v2 }
 0xe48   :  { %5737 = vmatprep.subr.bf16.mxu0 %v5736_v20  ;;  %v4610_v23 = vpop.xlane.xlu1 %4609  ;;  %v4700_v43 = vmul.f32 %v6502_v46, %v8709_v51  ;;  %v4699_v4 = vmul.f32 %v6502_v46, %v8704_v5 }
 0xe49   :  { %v6504_v27 = vpop.eup %6503  ;;  %6513 = vrcp.f32 %v4610_v23  ;;  %5739 = vmatpush1.bf16.xpose.msra.mxu0 %v5738_v30 }
 0xe4a   :  { %v4523_v16 = vpop.xlane.xlu0 %4522  ;;  %v5676_v28 = vpack.c.bf16 %v4703_v56, %v4700_v43  ;;  %v5678_v0 = vpack.c.bf16 %v4702_v15, %v4699_v4  ;;  %v4799_v49 = vmul.f32 %v6504_v27, %v8716_v12  ;;  %v4798_v3 = vmul.f32 %v6504_v27, %v8714_v26  ;;  %v10236_v56 = vld [vmem:[#allocation24_spill] sm:$0xff]  ;;  %v10237_v43 = vld [vmem:[#allocation18_spill] sm:$0xff] }
 0xe4b   :  { %v6506_v32 = vpop.eup %6505  ;;  %6515 = vrcp.f32 %v4523_v16  ;;  %v10238_v27 = vld [vmem:[#allocation30_spill] sm:$0xff] }
 0xe4c   :  { %5677 = vmatprep.subr.bf16.mxu1 %v5676_v28  ;;  %v4520_v52 = vpop.xlane.xlu1 %4519  ;;  %v4796_v31 = vmul.f32 %v6506_v32, %v8725_v59  ;;  %v4795_v51 = vmul.f32 %v6506_v32, %v8720_v19  ;;  %v10239_v32 = vld [vmem:[#allocation32_spill] sm:$0xff] }
 0xe4d   :  { %v6508_v60 = vpop.eup %6507  ;;  %6517 = vrcp.f32 %v4520_v52  ;;  %5679 = vmatpush1.bf16.xpose.msra.mxu1 %v5678_v0 }
 0xe4e   :  { %v4619_v5 = vpop.xlane.xlu0 %4618  ;;  %v5740_v14 = vpack.c.bf16 %v4799_v49, %v4796_v31  ;;  %v5742_v54 = vpack.c.bf16 %v4798_v3, %v4795_v51  ;;  %v4709_v48 = vmul.f32 %v6508_v60, %v8732_v58  ;;  %v4708_v12 = vmul.f32 %v6508_v60, %v8730_v33  ;;  %v10240_v31 = vld [vmem:[#allocation23_spill] sm:$0xff] }
 0xe4f   :  { %v6510_v42 = vpop.eup %6509  ;;  %6519 = vrcp.f32 %v4619_v5  ;;  %v10241_v5 = vld [vmem:[#allocation28_spill] sm:$0xff] }
 0xe50   :  { %5741 = vmatprep.subr.bf16.mxu0 %v5740_v14  ;;  %v4616_v26 = vpop.xlane.xlu1 %4615  ;;  %v4706_v61 = vmul.f32 %v6510_v42, %v8741_v29  ;;  %v4705_v59 = vmul.f32 %v6510_v42, %v8736_v38 }
 0xe51   :  { %v6512_v6 = vpop.eup %6511  ;;  %6521 = vrcp.f32 %v4616_v26  ;;  %5743 = vmatpush1.bf16.xpose.msra.mxu0 %v5742_v54  ;;  %v10242_v54 = vld [vmem:[#allocation36_spill] sm:$0xff] }
 0xe52   :  { %v4529_v19 = vpop.xlane.xlu0 %4528  ;;  %v5680_v47 = vpack.c.bf16 %v4709_v48, %v4706_v61  ;;  %v5682_v57 = vpack.c.bf16 %v4708_v12, %v4705_v59  ;;  %v4805_v18 = vmul.f32 %v6512_v6, %v8748_v63  ;;  %v4804_v58 = vmul.f32 %v6512_v6, %v8746_v7  ;;  %v10243_v61 = vld [vmem:[#allocation31_spill] sm:$0xff] }
 0xe53   :  { %v6514_v11 = vpop.eup %6513  ;;  %6523 = vrcp.f32 %v4529_v19  ;;  %v10244_v6 = vld [vmem:[#allocation27_spill] sm:$0xff] }
 0xe54   :  { %5681 = vmatprep.subr.bf16.mxu1 %v5680_v47  ;;  %v4526_v33 = vpop.xlane.xlu1 %4525  ;;  %v4802_v1 = vmul.f32 %v6514_v11, %v8757_v39  ;;  %v4801_v29 = vmul.f32 %v6514_v11, %v8752_v62 }
 0xe55   :  { %v6516_v55 = vpop.eup %6515  ;;  %6525 = vrcp.f32 %v4526_v33  ;;  %5683 = vmatpush1.bf16.xpose.msra.mxu1 %v5682_v57  ;;  %v10246_v33 = vld [vmem:[#allocation34_spill] sm:$0xff] }
 0xe56   :  { %v4625_v38 = vpop.xlane.xlu0 %4624  ;;  %v5744_v35 = vpack.c.bf16 %v4805_v18, %v4802_v1  ;;  %v5746_v44 = vpack.c.bf16 %v4804_v58, %v4801_v29  ;;  %v4715_v45 = vmul.f32 %v6516_v55, %v10232_v24  ;;  %v4714_v63 = vmul.f32 %v6516_v55, %v10233_v40  ;;  %v10245_v58 = vld [vmem:[#allocation25_spill] sm:$0xff] }
 0xe57   :  { %v6518_v37 = vpop.eup %6517  ;;  %6527 = vrcp.f32 %v4625_v38 }
 0xe58   :  { %5745 = vmatprep.subr.bf16.mxu0 %v5744_v35  ;;  %v4622_v7 = vpop.xlane.xlu1 %4621  ;;  %v4712_v13 = vmul.f32 %v6518_v37, %v10234_v10  ;;  %v4711_v39 = vmul.f32 %v6518_v37, %v10235_v41  ;;  %v10247_v35 = vld [vmem:[#allocation33_spill] sm:$0xff] }
 0xe59   :  { %v6520_v34 = vpop.eup %6519  ;;  %6529 = vrcp.f32 %v4622_v7  ;;  %5747 = vmatpush1.bf16.xpose.msra.mxu0 %v5746_v44  ;;  %v10249_v7 = vld [vmem:[#allocation40_spill] sm:$0xff] }
 0xe5a   :  { %v4535_v62 = vpop.xlane.xlu0 %4534  ;;  %v5684_v2 = vpack.c.bf16 %v4715_v45, %v4712_v13  ;;  %v5686_v20 = vpack.c.bf16 %v4714_v63, %v4711_v39  ;;  %v4811_v30 = vmul.f32 %v6520_v34, %v8780_v17  ;;  %v4810_v15 = vmul.f32 %v6520_v34, %v10236_v56  ;;  %v10248_v45 = vld [vmem:[#allocation29_spill] sm:$0xff]  ;;  %v10250_v13 = vld [vmem:[#allocation38_spill] sm:$0xff]  ;;  %v10252_v56 = vld [vmem:[#allocation39_spill] sm:$0xff] }
 0xe5b   :  { %v6522_v46 = vpop.eup %6521  ;;  %6531 = vrcp.f32 %v4535_v62 }
 0xe5c   :  { %5685 = vmatprep.subr.bf16.mxu1 %v5684_v2  ;;  %v4532_v23 = vpop.xlane.xlu1 %4531  ;;  %v4808_v4 = vmul.f32 %v6522_v46, %v10237_v43  ;;  %v4807_v16 = vmul.f32 %v6522_v46, %v10238_v27  ;;  %v10251_v2 = vld [vmem:[#allocation37_spill] sm:$0xff]  ;;  %v10253_v43 = vld [vmem:[#allocation44_spill] sm:$0xff]  ;;  %v10254_v27 = vld [vmem:[#allocation35_spill] sm:$0xff] }
 0xe5d   :  { %v6524_v28 = vpop.eup %6523  ;;  %6533 = vrcp.f32 %v4532_v23  ;;  %5687 = vmatpush1.bf16.xpose.msra.mxu1 %v5686_v20 }
 0xe5e   :  { %v4631_v0 = vpop.xlane.xlu0 %4630  ;;  %v5748_v49 = vpack.c.bf16 %v4811_v30, %v4808_v4  ;;  %v5750_v3 = vpack.c.bf16 %v4810_v15, %v4807_v16  ;;  %v4721_v52 = vmul.f32 %v6524_v28, %v10239_v32  ;;  %v4720_v17 = vmul.f32 %v6524_v28, %v10240_v31  ;;  %v10255_v31 = vld [vmem:[#allocation41_spill] sm:$0xff] }
 0xe5f   :  { %v6526_v51 = vpop.eup %6525  ;;  %6535 = vrcp.f32 %v4631_v0 }
 0xe60   :  { %5749 = vmatprep.subr.bf16.mxu0 %v5748_v49  ;;  %v4628_v60 = vpop.xlane.xlu1 %4627  ;;  %v4718_v14 = vmul.f32 %v6526_v51, %v10241_v5  ;;  %v4717_v48 = vmul.f32 %v6526_v51, %v10242_v54  ;;  %v10256_v51 = vld [vmem:[#allocation48_spill] sm:$0xff]  ;;  %v10257_v5 = vld [vmem:[#allocation42_spill] sm:$0xff] }
 0xe61   :  { %v6528_v12 = vpop.eup %6527  ;;  %6537 = vrcp.f32 %v4628_v60  ;;  %5751 = vmatpush1.bf16.xpose.msra.mxu0 %v5750_v3  ;;  %v10258_v54 = vld [vmem:[#allocation46_spill] sm:$0xff] }
 0xe62   :  { %v5688_v42 = vpack.c.bf16 %v4721_v52, %v4718_v14  ;;  %v5690_v26 = vpack.c.bf16 %v4720_v17, %v4717_v48  ;;  %v4817_v59 = vmul.f32 %v6528_v12, %v10243_v61  ;;  %v4816_v19 = vmul.f32 %v6528_v12, %v10244_v6 }
 0xe63   :  { %v6530_v47 = vpop.eup %6529 }
 0xe64   :  { %5689 = vmatprep.subr.bf16.mxu1 %v5688_v42  ;;  %v4538_v57 = vpop.xlane.xlu1 %4537  ;;  %v4814_v11 = vmul.f32 %v6530_v47, %v10245_v58  ;;  %v4813_v1 = vmul.f32 %v6530_v47, %v10246_v33  ;;  %v10261_v58 = vld [vmem:[#allocation47_spill] sm:$0xff] }
 0xe65   :  { %v4541_v18 = vpop.xlane.xlu0 %4540  ;;  %v6532_v29 = vpop.eup %6531  ;;  %6539 = vrcp.f32 %v4538_v57  ;;  %5691 = vmatpush1.bf16.xpose.msra.mxu1 %v5690_v26  ;;  %v10260_v57 = vld [vmem:[#allocation52_spill] sm:$0xff]  ;;  %v10262_v33 = vld [vmem:[#allocation43_spill] sm:$0xff] }
 0xe66   :  { %6541 = vrcp.f32 %v4541_v18  ;;  %v5752_v55 = vpack.c.bf16 %v4817_v59, %v4814_v11  ;;  %v5754_v38 = vpack.c.bf16 %v4816_v19, %v4813_v1  ;;  %v4727_v44 = vmul.f32 %v6532_v29, %v10247_v35  ;;  %v10259_v19 = vld [vmem:[#allocation45_spill] sm:$0xff] }
 0xe67   :  { %v6534_v24 = vpop.eup %6533  ;;  %v4726_v40 = vmul.f32 %v6532_v29, %v10248_v45  ;;  %v10263_v45 = vld [vmem:[#allocation49_spill] sm:$0xff] }
 0xe68   :  { %5753 = vmatprep.subr.bf16.mxu0 %v5752_v55  ;;  %v4634_v63 = vpop.xlane.xlu1 %4633  ;;  %v4724_v10 = vmul.f32 %v6534_v24, %v10249_v7  ;;  %v4723_v41 = vmul.f32 %v6534_v24, %v10250_v13  ;;  %v10265_v7 = vld [vmem:[#allocation50_spill] sm:$0xff] }
 0xe69   :  { %v4637_v37 = vpop.xlane.xlu0 %4636  ;;  %v6536_v39 = vpop.eup %6535  ;;  %6543 = vrcp.f32 %v4634_v63  ;;  %5755 = vmatpush1.bf16.xpose.msra.mxu0 %v5754_v38  ;;  %v10264_v63 = vld [vmem:[#allocation56_spill] sm:$0xff]  ;;  %v10266_v13 = vld [vmem:[#allocation54_spill] sm:$0xff] }
 0xe6a   :  { %6545 = vrcp.f32 %v4637_v37  ;;  %v5692_v34 = vpack.c.bf16 %v4727_v44, %v4724_v10  ;;  %v5694_v62 = vpack.c.bf16 %v4726_v40, %v4723_v41  ;;  %v4823_v20 = vmul.f32 %v6536_v39, %v10251_v2 }
 0xe6b   :  { %v6538_v30 = vpop.eup %6537  ;;  %v4822_v15 = vmul.f32 %v6536_v39, %v10252_v56  ;;  %v10267_v56 = vld [vmem:[#allocation53_spill] sm:$0xff] }
 0xe6c   :  { %5693 = vmatprep.subr.bf16.mxu1 %v5692_v34  ;;  %v4544_v46 = vpop.xlane.xlu1 %4543  ;;  %v4820_v4 = vmul.f32 %v6538_v30, %v10253_v43  ;;  %v4819_v16 = vmul.f32 %v6538_v30, %v10254_v27  ;;  %v10269_v43 = vld [vmem:[#allocation55_spill] sm:$0xff] }
 0xe6d   :  { %v4547_v23 = vpop.xlane.xlu0 %4546  ;;  %6547 = vrcp.f32 %v4544_v46  ;;  %5695 = vmatpush1.bf16.xpose.msra.mxu1 %v5694_v62  ;;  %v10268_v46 = vld [vmem:[#allocation60_spill] sm:$0xff]  ;;  %v10270_v27 = vld [vmem:[#allocation51_spill] sm:$0xff] }
 0xe6e   :  { %6549 = vrcp.f32 %v4547_v23  ;;  %v5756_v28 = vpack.c.bf16 %v4823_v20, %v4820_v4  ;;  %v5758_v0 = vpack.c.bf16 %v4822_v15, %v4819_v16 }
 0xe6f   :  { %v6540_v49 = vpop.eup %6539 }
 0xe70   :  { %v6542_v3 = vpop.eup %6541  ;;  %5757 = vmatprep.subr.bf16.mxu0 %v5756_v28  ;;  %v4640_v32 = vpop.xlane.xlu1 %4639  ;;  %v4730_v17 = vmul.f32 %v6540_v49, %v10255_v31  ;;  %v4729_v14 = vmul.f32 %v6540_v49, %v10257_v5  ;;  %v10271_v31 = vld [vmem:[#allocation57_spill] sm:$0xff]  ;;  %v10273_v5 = vld [vmem:[#allocation58_spill] sm:$0xff] }
 0xe71   :  { %v4643_v52 = vpop.xlane.xlu0 %4642  ;;  %6551 = vrcp.f32 %v4640_v32  ;;  %5759 = vmatpush1.bf16.xpose.msra.mxu0 %v5758_v0  ;;  %v4733_v60 = vmul.f32 %v6542_v3, %v10256_v51  ;;  %v4732_v48 = vmul.f32 %v6542_v3, %v10258_v54  ;;  %v10272_v51 = vld [vmem:[#allocation64_spill] sm:$0xff]  ;;  %v10274_v54 = vld [vmem:[#allocation62_spill] sm:$0xff] }
 0xe72   :  { %6553 = vrcp.f32 %v4643_v52 }
 0xe73   :  { %v6544_v12 = vpop.eup %6543  ;;  %v5696_v42 = vpack.c.bf16 %v4733_v60, %v4730_v17  ;;  %v5698_v26 = vpack.c.bf16 %v4732_v48, %v4729_v14 }
 0xe74   :  { %v6546_v61 = vpop.eup %6545  ;;  %v4550_v59 = vpop.xlane.xlu1 %4549  ;;  %v4826_v47 = vmul.f32 %v6544_v12, %v10259_v19  ;;  %v4825_v11 = vmul.f32 %v6544_v12, %v10261_v58  ;;  %v10275_v19 = vld [vmem:[#allocation61_spill] sm:$0xff]  ;;  %v10277_v58 = vld [vmem:[#allocation63_spill] sm:$0xff] }
 0xe75   :  { %v4553_v6 = vpop.xlane.xlu0 %4552  ;;  %6555 = vrcp.f32 %v4550_v59  ;;  %5697 = vmatprep.subr.bf16.mxu1 %v5696_v42  ;;  %v4829_v18 = vmul.f32 %v6546_v61, %v10260_v57  ;;  %v4828_v1 = vmul.f32 %v6546_v61, %v10262_v33  ;;  %v10276_v57 = vld [vmem:[#allocation68_spill] sm:$0xff]  ;;  %v10278_v33 = vld [vmem:[#allocation59_spill] sm:$0xff] }
 0xe76   :  { %6557 = vrcp.f32 %v4553_v6  ;;  %5699 = vmatpush1.bf16.xpose.msra.mxu1 %v5698_v26 }
 0xe77   :  { %v6548_v29 = vpop.eup %6547  ;;  %v5760_v55 = vpack.c.bf16 %v4829_v18, %v4826_v47  ;;  %v5762_v38 = vpack.c.bf16 %v4828_v1, %v4825_v11 }
 0xe78   :  { %v6550_v35 = vpop.eup %6549  ;;  %v4646_v44 = vpop.xlane.xlu1 %4645  ;;  %v4736_v40 = vmul.f32 %v6548_v29, %v10263_v45  ;;  %v4735_v10 = vmul.f32 %v6548_v29, %v10265_v7  ;;  %v10279_v45 = vld [vmem:[#allocation65_spill] sm:$0xff]  ;;  %v10281_v7 = vld [vmem:[#allocation66_spill] sm:$0xff] }
 0xe79   :  { %v4649_v24 = vpop.xlane.xlu0 %4648  ;;  %6559 = vrcp.f32 %v4646_v44  ;;  %5761 = vmatprep.subr.bf16.mxu0 %v5760_v55  ;;  %v4739_v37 = vmul.f32 %v6550_v35, %v10264_v63  ;;  %v4738_v41 = vmul.f32 %v6550_v35, %v10266_v13  ;;  %v10280_v63 = vld [vmem:[#allocation74_spill] sm:$0xff]  ;;  %v10282_v13 = vld [vmem:[#allocation67_spill] sm:$0xff] }
 0xe7a   :  { %6561 = vrcp.f32 %v4649_v24  ;;  %5763 = vmatpush1.bf16.xpose.msra.mxu0 %v5762_v38 }
 0xe7b   :  { %v6552_v39 = vpop.eup %6551  ;;  %v5700_v34 = vpack.c.bf16 %v4739_v37, %v4736_v40  ;;  %v5702_v62 = vpack.c.bf16 %v4738_v41, %v4735_v10 }
 0xe7c   :  { %v6554_v2 = vpop.eup %6553  ;;  %v4556_v20 = vpop.xlane.xlu1 %4555  ;;  %v4832_v15 = vmul.f32 %v6552_v39, %v10267_v56  ;;  %v4831_v4 = vmul.f32 %v6552_v39, %v10269_v43  ;;  %v10283_v56 = vld [vmem:[#allocation70_spill] sm:$0xff]  ;;  %v10285_v43 = vld [vmem:[#allocation72_spill] sm:$0xff] }
 0xe7d   :  { %v4559_v30 = vpop.xlane.xlu0 %4558  ;;  %6563 = vrcp.f32 %v4556_v20  ;;  %5701 = vmatprep.subr.bf16.mxu1 %v5700_v34  ;;  %v4835_v23 = vmul.f32 %v6554_v2, %v10268_v46  ;;  %v4834_v16 = vmul.f32 %v6554_v2, %v10270_v27  ;;  %v10284_v46 = vld [vmem:[#allocation69_spill] sm:$0xff]  ;;  %v10286_v27 = vld [vmem:[#allocation71_spill] sm:$0xff] }
 0xe7e   :  { %6565 = vrcp.f32 %v4559_v30  ;;  %5703 = vmatpush1.bf16.xpose.msra.mxu1 %v5702_v62 }
 0xe7f   :  { %v6556_v28 = vpop.eup %6555  ;;  %v5764_v0 = vpack.c.bf16 %v4835_v23, %v4832_v15  ;;  %v5766_v49 = vpack.c.bf16 %v4834_v16, %v4831_v4 }
 0xe80   :  { %v6558_v3 = vpop.eup %6557  ;;  %v4652_v32 = vpop.xlane.xlu1 %4651  ;;  %v4742_v17 = vmul.f32 %v6556_v28, %v10271_v31  ;;  %v4741_v14 = vmul.f32 %v6556_v28, %v10273_v5  ;;  %v10287_v31 = vld [vmem:[#allocation6_spill] sm:$0xff]  ;;  %v10289_v5 = vld [vmem:[#allocation76_spill] sm:$0xff] }
 0xe81   :  { %v4655_v52 = vpop.xlane.xlu0 %4654  ;;  %6567 = vrcp.f32 %v4652_v32  ;;  %5765 = vmatprep.subr.bf16.mxu0 %v5764_v0  ;;  %v4745_v60 = vmul.f32 %v6558_v3, %v10272_v51  ;;  %v4744_v48 = vmul.f32 %v6558_v3, %v10274_v54  ;;  %v10288_v51 = vld [vmem:[#allocation78_spill] sm:$0xff]  ;;  %v10290_v54 = vld [vmem:[#allocation73_spill] sm:$0xff] }
 0xe82   :  { %6569 = vrcp.f32 %v4655_v52  ;;  %5767 = vmatpush1.bf16.xpose.msra.mxu0 %v5766_v49 }
 0xe83   :  { %v6560_v12 = vpop.eup %6559  ;;  %v5704_v42 = vpack.c.bf16 %v4745_v60, %v4742_v17  ;;  %v5706_v26 = vpack.c.bf16 %v4744_v48, %v4741_v14 }
 0xe84   :  { %v6562_v61 = vpop.eup %6561  ;;  %v4562_v59 = vpop.xlane.xlu1 %4561  ;;  %v4838_v47 = vmul.f32 %v6560_v12, %v10275_v19  ;;  %v4837_v11 = vmul.f32 %v6560_v12, %v10277_v58  ;;  %v10291_v19 = vld [vmem:[#allocation7_spill] sm:$0xff] }
 0xe85   :  { %v4565_v6 = vpop.xlane.xlu0 %4564  ;;  %6571 = vrcp.f32 %v4562_v59  ;;  %5705 = vmatprep.subr.bf16.mxu1 %v5704_v42  ;;  %v4841_v18 = vmul.f32 %v6562_v61, %v10276_v57  ;;  %v4840_v1 = vmul.f32 %v6562_v61, %v10278_v33 }
 0xe86   :  { %6573 = vrcp.f32 %v4565_v6  ;;  %5707 = vmatpush1.bf16.xpose.msra.mxu1 %v5706_v26 }
 0xe87   :  { %v6564_v29 = vpop.eup %6563  ;;  %v5768_v55 = vpack.c.bf16 %v4841_v18, %v4838_v47  ;;  %v5770_v38 = vpack.c.bf16 %v4840_v1, %v4837_v11  ;;  %v10292_v18 = vld [vmem:[#allocation80_spill] sm:$0xff]  ;;  %v10293_v11 = vld [vmem:[#allocation77_spill] sm:$0xff] }
 0xe88   :  { %v6566_v35 = vpop.eup %6565  ;;  %v4658_v44 = vpop.xlane.xlu1 %4657  ;;  %v4748_v40 = vmul.f32 %v6564_v29, %v10279_v45  ;;  %v4747_v10 = vmul.f32 %v6564_v29, %v10281_v7  ;;  %v10297_v7 = vld [vmem:[#allocation79_spill] sm:$0xff] }
 0xe89   :  { %v4661_v24 = vpop.xlane.xlu0 %4660  ;;  %6575 = vrcp.f32 %v4658_v44  ;;  %5769 = vmatprep.subr.bf16.mxu0 %v5768_v55  ;;  %v4751_v37 = vmul.f32 %v6566_v35, %v10280_v63  ;;  %v4750_v41 = vmul.f32 %v6566_v35, %v10282_v13 }
 0xe8a   :  { %6577 = vrcp.f32 %v4661_v24  ;;  %5771 = vmatpush1.bf16.xpose.msra.mxu0 %v5770_v38  ;;  %v10294_v24 = vld [vmem:[#allocation85_spill] sm:$0xff] }
 0xe8b   :  { %v6568_v39 = vpop.eup %6567  ;;  %v5708_v34 = vpack.c.bf16 %v4751_v37, %v4748_v40  ;;  %v5710_v62 = vpack.c.bf16 %v4750_v41, %v4747_v10  ;;  %v10295_v40 = vld [vmem:[#allocation83_spill] sm:$0xff] }
 0xe8c   :  { %v6570_v2 = vpop.eup %6569  ;;  %v4568_v20 = vpop.xlane.xlu1 %4567  ;;  %v4844_v15 = vmul.f32 %v6568_v39, %v10283_v56  ;;  %v4843_v4 = vmul.f32 %v6568_v39, %v10285_v43  ;;  %v10296_v37 = vld [vmem:[#allocation75_spill] sm:$0xff] }
 0xe8d   :  { %v4571_v30 = vpop.xlane.xlu0 %4570  ;;  %6579 = vrcp.f32 %v4568_v20  ;;  %5709 = vmatprep.subr.bf16.mxu1 %v5708_v34  ;;  %v4847_v23 = vmul.f32 %v6570_v2, %v10284_v46  ;;  %v4846_v16 = vmul.f32 %v6570_v2, %v10286_v27 }
 0xe8e   :  { %6581 = vrcp.f32 %v4571_v30  ;;  %5711 = vmatpush1.bf16.xpose.msra.mxu1 %v5710_v62 }
 0xe8f   :  { %v6572_v28 = vpop.eup %6571  ;;  %v5772_v0 = vpack.c.bf16 %v4847_v23, %v4844_v15  ;;  %v5774_v49 = vpack.c.bf16 %v4846_v16, %v4843_v4 }
 0xe90   :  { %v6574_v3 = vpop.eup %6573  ;;  %v4664_v32 = vpop.xlane.xlu1 %4663  ;;  %v4754_v17 = vmul.f32 %v6572_v28, %v10287_v31  ;;  %v4753_v14 = vmul.f32 %v6572_v28, %v10289_v5  ;;  %v10302_v5 = vld [vmem:[#allocation86_spill] sm:$0xff] }
 0xe91   :  { %v4667_v52 = vpop.xlane.xlu0 %4666  ;;  %6583 = vrcp.f32 %v4664_v32  ;;  %5773 = vmatprep.subr.bf16.mxu0 %v5772_v0  ;;  %v4757_v60 = vmul.f32 %v6574_v3, %v10288_v51  ;;  %v4756_v48 = vmul.f32 %v6574_v3, %v10290_v54  ;;  %v10298_v0 = vld [vmem:[#allocation81_spill] sm:$0xff] }
 0xe92   :  { %6585 = vrcp.f32 %v4667_v52  ;;  %5775 = vmatpush1.bf16.xpose.msra.mxu0 %v5774_v49  ;;  %v10299_v52 = vld [vmem:[#allocation82_spill] sm:$0xff] }
 0xe93   :  { %v6576_v12 = vpop.eup %6575  ;;  %v5712_v42 = vpack.c.bf16 %v4757_v60, %v4754_v17  ;;  %v5714_v26 = vpack.c.bf16 %v4756_v48, %v4753_v14  ;;  %v10300_v17 = vld [vmem:[#allocation84_spill] sm:$0xff] }
 0xe94   :  { %v6578_v61 = vpop.eup %6577  ;;  %v4574_v59 = vpop.xlane.xlu1 %4573  ;;  %v4850_v47 = vmul.f32 %v6576_v12, %v10291_v19  ;;  %v4849_v58 = vmul.f32 %v6576_v12, %v10292_v18  ;;  %v10303_v12 = vld [vmem:[#allocation4_spill] sm:$0xff] }
 0xe95   :  { %v4577_v6 = vpop.xlane.xlu0 %4576  ;;  %6587 = vrcp.f32 %v4574_v59  ;;  %5713 = vmatprep.subr.bf16.mxu1 %v5712_v42  ;;  %v4853_v57 = vmul.f32 %v6578_v61, %v9012_v53  ;;  %v4852_v33 = vmul.f32 %v6578_v61, %v10293_v11  ;;  %v10305_v59 = vld [vmem:[#allocation3_spill] sm:$0xff]  ;;  %v10306_v19 = vld [vmem:[#allocation88_spill] sm:$0xff] }
 0xe96   :  { %6589 = vrcp.f32 %v4577_v6  ;;  %5715 = vmatpush1.bf16.xpose.msra.mxu1 %v5714_v26  ;;  %v10304_v26 = vld [vmem:[#allocation91_spill] sm:$0xff] }
 0xe97   :  { %v6580_v1 = vpop.eup %6579  ;;  %v5776_v29 = vpack.c.bf16 %v4853_v57, %v4850_v47  ;;  %v5778_v55 = vpack.c.bf16 %v4852_v33, %v4849_v58  ;;  %v10307_v33 = vld [vmem:[#allocation89_spill] sm:$0xff] }
 0xe98   :  { %v6582_v38 = vpop.eup %6581  ;;  %v4670_v35 = vpop.xlane.xlu1 %4669  ;;  %v4760_v45 = vmul.f32 %v6580_v1, %v10294_v24  ;;  %v4759_v53 = vmul.f32 %v6580_v1, %v10296_v37  ;;  %v10312_v37 = vmov 0.0  }
 0xe99   :  { %v4673_v44 = vpop.xlane.xlu0 %4672  ;;  %6591 = vrcp.f32 %v4670_v35  ;;  %5777 = vmatprep.subr.bf16.mxu0 %v5776_v29  ;;  %v4763_v63 = vmul.f32 %v6582_v38, %v10295_v40  ;;  %v4762_v10 = vmul.f32 %v6582_v38, %v10297_v7  ;;  %v10308_v29 = vld [vmem:[#allocation92_spill] sm:$0xff]  ;;  %v10309_v38 = vld [vmem:[#allocation87_spill] sm:$0xff] }
 0xe9a   :  { %6593 = vrcp.f32 %v4673_v44  ;;  %5779 = vmatpush1.bf16.xpose.msra.mxu0 %v5778_v55  ;;  %v10310_v44 = vld [vmem:[#allocation90_spill] sm:$0xff] }
 0xe9b   :  { %v6584_v13 = vpop.eup %6583  ;;  %v5716_v41 = vpack.c.bf16 %v4763_v63, %v4760_v45  ;;  %v5718_v39 = vpack.c.bf16 %v4762_v10, %v4759_v53  ;;  %v10311_v63 = vld [vmem:[#allocation16_spill] sm:$0xff]  ;;  %v10313_v53 = vld [vmem:[#allocation21_spill] sm:$0xff] }
 0xe9c   :  { %v6586_v34 = vpop.eup %6585  ;;  %v4580_v62 = vpop.xlane.xlu1 %4579  ;;  %v4856_v20 = vmul.f32 %v6584_v13, %v9035_v9  ;;  %v4855_v56 = vmul.f32 %v6584_v13, %v9032_v36 }
 0xe9d   :  { %v4583_v2 = vpop.xlane.xlu0 %4582  ;;  %6595 = vrcp.f32 %v4580_v62  ;;  %5717 = vmatprep.subr.bf16.mxu1 %v5716_v41  ;;  %v4859_v30 = vmul.f32 %v6586_v34, %v9044_v22  ;;  %v4858_v15 = vmul.f32 %v6586_v34, %v9040_v21  ;;  %v10314_v62 = vld [vmem:[#allocation5_spill] sm:$0xff] }
 0xe9e   :  { %6597 = vrcp.f32 %v4583_v2  ;;  %5719 = vmatpush1.bf16.xpose.msra.mxu1 %v5718_v39 }
 0xe9f   :  { %v6588_v46 = vpop.eup %6587  ;;  %v5780_v23 = vpack.c.bf16 %v4859_v30, %v4856_v20  ;;  %v5782_v43 = vpack.c.bf16 %v4858_v15, %v4855_v56 }
 0xea0   :  { %v6590_v4 = vpop.eup %6589  ;;  %v4676_v27 = vpop.xlane.xlu1 %4675  ;;  %v4766_v28 = vmul.f32 %v6588_v46, %v9051_v8  ;;  %v4765_v22 = vmul.f32 %v6588_v46, %v9048_v25  ;;  %v10301_v8 = vld [vmem:[#allocation2_spill] sm:$0xff] }
 0xea1   :  { %v4679_v16 = vpop.xlane.xlu0 %4678  ;;  %6599 = vrcp.f32 %v4676_v27  ;;  %5781 = vmatprep.subr.bf16.mxu0 %v5780_v23  ;;  %v4769_v9 = vmul.f32 %v6590_v4, %v9058_v50  ;;  %v4768_v36 = vmul.f32 %v6590_v4, %v10298_v0  ;;  %v6615_v46 = vld [vmem:[%s9309_s5] sm:$0xf] }
 0xea2   :  { %6601 = vrcp.f32 %v4679_v16  ;;  %5783 = vmatpush1.bf16.xpose.msra.mxu0 %v5782_v43  ;;  %v10315_v43 = vld [vmem:[#allocation9_spill] sm:$0xff] }
 0xea3   :  { %v6592_v21 = vpop.eup %6591  ;;  %v5720_v49 = vpack.c.bf16 %v4769_v9, %v4766_v28  ;;  %v5722_v3 = vpack.c.bf16 %v4768_v36, %v4765_v22  ;;  %v6616_v28 = vld [vmem:[%s9303_s0 + $0x8] sm:$0xff]  ;;  %v10316_v22 = vld [vmem:[#allocation12_spill] sm:$0xff] }
 0xea4   :  { %v6594_v32 = vpop.eup %6593  ;;  %v4862_v31 = vmul.f32 %v6592_v21, %v10299_v52  ;;  %v4861_v60 = vmul.f32 %v6592_v21, %v10301_v8  ;;  %v10317_v8 = vld [vmem:[#allocation14_spill] sm:$0xff] }
 0xea5   :  { %5721 = vmatprep.subr.bf16.mxu1 %v5720_v49  ;;  %v4865_v51 = vmul.f32 %v6594_v32, %v10300_v17  ;;  %v4864_v14 = vmul.f32 %v6594_v32, %v10302_v5  ;;  %v10318_v5 = vld [vmem:[#allocation17_spill] sm:$0xff] }
 0xea6   :  { %5723 = vmatpush1.bf16.xpose.msra.mxu1 %v5722_v3  ;;  %v88_v3 = vld [vmem:[%s9315_s12] sm:$0xf] }
 0xea7   :  { %v6596_v50 = vpop.eup %6595  ;;  %v5784_v25 = vpack.c.bf16 %v4865_v51, %v4862_v31  ;;  %v5786_v54 = vpack.c.bf16 %v4864_v14, %v4861_v60 }
 0xea8   :  { %v6598_v48 = vpop.eup %6597  ;;  %v4772_v42 = vmul.f32 %v6596_v50, %v10303_v12  ;;  %v4771_v6 = vmul.f32 %v6596_v50, %v10305_v59  ;;  %v10319_v50 = vld [vmem:[#allocation8_spill] sm:$0xff] }
 0xea9   :  { %5785 = vmatprep.subr.bf16.mxu0 %v5784_v25  ;;  %v4775_v61 = vmul.f32 %v6598_v48, %v10304_v26  ;;  %v4774_v47 = vmul.f32 %v6598_v48, %v10306_v19 }
 0xeaa   :  { %5787 = vmatpush1.bf16.xpose.msra.mxu0 %v5786_v54  ;;  %v10320_v54 = vld [vmem:[#allocation13_spill] sm:$0xff] }
 0xeab   :  { %v6600_v57 = vpop.eup %6599  ;;  %v5724_v18 = vpack.c.bf16 %v4775_v61, %v4772_v42  ;;  %v5726_v58 = vpack.c.bf16 %v4774_v47, %v4771_v6 }
 0xeac   :  { %v6602_v11 = vpop.eup %6601  ;;  %v4868_v1 = vmul.f32 %v6600_v57, %v10307_v33  ;;  %v4867_v35 = vmul.f32 %v6600_v57, %v10309_v38 }
 0xead   :  { %5725 = vmatprep.subr.bf16.mxu1 %v5724_v18  ;;  %v4871_v55 = vmul.f32 %v6602_v11, %v10308_v29  ;;  %v4870_v24 = vmul.f32 %v6602_v11, %v10310_v44 }
 0xeae   :  { %5727 = vmatpush1.bf16.xpose.msra.mxu1 %v5726_v58 }
 0xeaf   :  { %v5788_v45 = vpack.c.bf16 %v4871_v55, %v4868_v1  ;;  %v5790_v40 = vpack.c.bf16 %v4870_v24, %v4867_v35 }
 0xeb1   :  { %5789 = vmatprep.subr.bf16.mxu0 %v5788_v45 }
 0xeb2   :  { %5791 = vmatpush1.bf16.xpose.msra.mxu0 %v5790_v40 }
 0xeb5   :  { %4947 = vmatmul.mubr.f32.vlgmr.msra.gmra.mrb[138].mxu1 %v10311_v63 }
 0xeb6   :  { %5131 = vmatprep.mubr.f32.mxu1 %v10312_v37 }
 0xeb9   :  { %5028 = vmatmul.mubr.f32.vlgmr.msra.gmra.mrb[140].mxu0 %v10313_v53  ;;  %v6617_v53 = vld [vmem:[%s9310_s7] sm:$0xff] }
 0xeba   :  { %5252 = vmatprep.mubr.f32.mxu0 %v10312_v37 }
 0xf88   :  { %v4948_v7 = vpop.f32.mrb[138].mxu1 }
 0xf89   :  { %v4950_v10 = vpop.f32.mrb[139].mxu1 }
 0xf8a   :  { %v5038_v13 = vcombine.low %v4948_v7, %v4950_v10  ;;  %v10321_v10 = vld [vmem:[#allocation11_spill] sm:$0xff] }
 0xf8c   :  { %v5029_v41 = vpop.f32.mrb[140].mxu0  ;;  %v5045_v2 = vrot.slane %v5038_v13, %v10314_v62 }
 0xf8d   :  { %v5031_v39 = vpop.f32.mrb[141].mxu0 }
 0xf8e   :  { %v5046_v34 = vcombine.low %v5029_v41, %v5031_v39  ;;  %v6618_v41 = vld [vmem:[%s9311_s8] sm:$0xff] }
 0xf90   :  { %v5053_v20 = vrot.slane %v5046_v34, %v10314_v62  ;;  %v10322_v34 = vld [vmem:[#allocation10_spill] sm:$0xff] }
 0xf92   :  { %v5054_v30 = vcombine.low %v5045_v2, %v5053_v20  ;;  %v6619_v2 = vld [vmem:[%s9312_s9] sm:$0xf] }
 0xf94   :  { %v5061_v56 = vrot.slane %v5054_v30, %v10314_v62  ;;  %v10323_v30 = vld [vmem:[#allocation15_spill] sm:$0xff] }
 0xf96   :  { %v5062_v15 = vcombine.high %v5061_v56, %v5061_v56 }
 0xf98   :  { %5526 = vmatprep.subr.msk.mxu1 %vm98_vm0, %v5062_v15 }
 0xf99   :  { %5527 = vmatpush1.msk.msra.mxu1 %vm98_vm0, %v5061_v56 }
 0xf9a   :  { %5528 = vmatmul.mubr.msk.f32.vlgmr.msra.gmra.mrb[140].mxu1 %vm141_vm1, %v6615_v46 }
 0xf9b   :  { %5339 = vmatprep.mubr.f32.mxu1 %v10312_v37 }
0x106d   :  { %v5133_v23 = vpop.f32.mrb[140].mxu1 }
0x106e   :  { %v5134_v4 = vadd.f32 %v5133_v23, %v10315_v43  ;;  %v5135_v27 = vpop.f32.mrb[141].mxu1 }
0x106f   :  { %v5136_v16 = vadd.f32 %v5135_v27, %v10315_v43 }
0x1070   :  { %v9247_v9 = vadd.f32 %v6616_v28, %v5134_v4 }
0x1071   :  { %v9250_v0 = vadd.f32 %v5136_v16, %v10316_v22 }
0x1072   :  { %v5140_v36 = vsel %vm98_vm0, %v9247_v9, 0.0 }
0x1073   :  { %v5141_v21 = vsel %vm98_vm0, %v9250_v0, 0.0 }
0x1074   :  { %v5142_v49 = vadd.f32 %v5141_v21, %v5140_v36 }
0x1076   :  { %5143 = vadd.xlane.f32.xlu1 %v5142_v49 }
0x1087   :  { %91 = vperm.xlu1 %5819, %v88_v3   ;;  %v6620_v3 = vld [vmem:[%s9314_s11] sm:$0xf] }
0x1103   :  { %v5144_v32 = vpop.xlane.xlu1 %5143 }
0x1104   :  { %v5145_v52 = vrot.slane %v5144_v32, 4 }
0x1106   :  { %v5146_v31 = vadd.f32 %v5145_v52, %v5144_v32 }
0x1107   :  { %v9259_v17 = vpop.permute.xlu1 %91 }
0x1108   :  { %v5147_v51 = vrot.slane %v5146_v31, 2  ;;  %v2726_v60 = vadd.f32 %v10317_v8, %v9259_v17  ;;  %v2728_v14 = vadd.f32 %v10318_v5, %v9259_v17 }
0x110a   :  { %v2730_v25 = vadd.f32 %v2726_v60, %v10319_v50  ;;  %v2731_v48 = vadd.f32 %v2728_v14, %v10320_v54  ;;  %v5148_v12 = vadd.f32 %v5147_v51, %v5146_v31 }
0x110c   :  { %v2734_v42 = vcombine.low %v2730_v25, %v2731_v48  ;;  %v5149_v26 = vrot.slane %v5148_v12, 1 }
0x110e   :  { %v5150_v61 = vadd.f32 %v5149_v26, %v5148_v12  ;;  %2736 = vst [vmem:[%s9316_s13] sm:$0xff] %v2734_v42 }
0x1110   :  { %5810 = vpush %v5150_v61 }
0x1141   :  { %s5811_s17 = spop %5810 }
0x1142   :  { %s5152_s6 = smul.f32 0.0009765625, %s5811_s17 }
0x1144   :  { %v5153_v59 = vstv %s5152_s6 }
0x1145   :  { %v5154_v6 = vsub.f32 %v9247_v9, %v5153_v59  ;;  %v5155_v19 = vsub.f32 %v9250_v0, %v5153_v59 }
0x1147   :  { %v5156_v47 = vmul.f32 %v5154_v6, %v5154_v6  ;;  %v5157_v57 = vmul.f32 %v5155_v19, %v5155_v19 }
0x1149   :  { %v5158_v18 = vsel %vm98_vm0, %v5156_v47, 0.0  ;;  %v5159_v58 = vsel %vm98_vm0, %v5157_v57, 0.0 }
0x114a   :  { %v5160_v11 = vadd.f32 %v5159_v58, %v5158_v18 }
0x114c   :  { %5161 = vadd.xlane.f32.xlu0 %v5160_v11 }
0x11d9   :  { %v5162_v33 = vpop.xlane.xlu0 %5161 }
0x11da   :  { %v5163_v1 = vrot.slane %v5162_v33, 4 }
0x11dc   :  { %v5164_v29 = vadd.f32 %v5163_v1, %v5162_v33 }
0x11de   :  { %v5165_v55 = vrot.slane %v5164_v29, 2 }
0x11e0   :  { %v5166_v38 = vadd.f32 %v5165_v55, %v5164_v29 }
0x11e2   :  { %v5167_v35 = vrot.slane %v5166_v38, 1 }
0x11e4   :  { %v5168_v44 = vadd.f32 %v5167_v35, %v5166_v38 }
0x11e6   :  { %5812 = vpush %v5168_v44 }
0x1217   :  { %s5813_s18 = spop %5812 }
0x1218   :  { %s5170_s19 = smul.f32 0.0009765625, %s5813_s18 }
0x121a   :  { %s5171_s20 = sadd.f32 1e-05, %s5170_s19 }
0x121c   :  { %v5172_v24 = vstv %s5171_s20 }
0x121d   :  { %6603 = vrsqrt.f32 %v5172_v24 }
0x1227   :  { %v6604_v45 = vpop.eup %6603 }
0x1228   :  { %5814 = vpush %v6604_v45 }
0x1259   :  { %s5815_s10 = spop %5814 }
0x125a   :  { %v5175_v40 = vstv %s5815_s10 }
0x125b   :  { %v5176_v63 = vmul.f32 %v5175_v40, %v5154_v6  ;;  %v5177_v37 = vmul.f32 %v5175_v40, %v5155_v19 }
0x125d   :  { %v5178_v7 = vmul.f32 %v6617_v53, %v5176_v63  ;;  %v5179_v13 = vmul.f32 %v5177_v37, %v10321_v10 }
0x125f   :  { %v5180_v39 = vadd.f32 %v6618_v41, %v5178_v7  ;;  %v5181_v62 = vadd.f32 %v5179_v13, %v10322_v34 }
0x1261   :  { %5529 = vmatprep.subr.msk.mxu0 %vm98_vm0, %v5181_v62 }
0x1262   :  { %5530 = vmatpush1.msk.msra.mxu0 %vm98_vm0, %v5180_v39 }
0x1263   :  { %5531 = vmatmul.mubr.msk.f32.vlgmr.msra.gmra.mrb[142].mxu0 %vm141_vm1, %v6619_v2 }
0x1336   :  { %v5254_v20 = vpop.f32.mrb[142].mxu0 }
0x1337   :  { %v5255_v56 = vadd.f32 %v5254_v20, %v10323_v30  ;;  %v5256_v15 = vpop.f32.mrb[143].mxu0 }
0x1338   :  { %v5257_v46 = vadd.f32 %v5256_v15, %v10323_v30 }
0x1339   :  { %v5261_v23 = vmul.f32 0.70710677, %v5255_v56  ;;  %v5259_v36 = vmul.f32 0.5, %v5255_v56 }
0x133a   :  { %v5262_v43 = vmul.f32 0.70710677, %v5257_v46  ;;  %v5260_v28 = vmul.f32 0.5, %v5257_v46 }
0x133b   :  { %6605 = verf.f32 %v5261_v23 }
0x133c   :  { %6607 = verf.f32 %v5262_v43 }
0x1345   :  { %v6606_v4 = vpop.eup %6605 }
0x1346   :  { %v6608_v27 = vpop.eup %6607  ;;  %v5265_v16 = vadd.f32 1.0, %v6606_v4 }
0x1347   :  { %v5266_v22 = vadd.f32 1.0, %v6608_v27 }
0x1348   :  { %v5267_v49 = vmul.f32 %v5265_v16, %v5259_v36 }
0x1349   :  { %v5268_v21 = vmul.f32 %v5266_v22, %v5260_v28 }
0x134b   :  { %5532 = vmatprep.subr.msk.mxu1 %vm98_vm0, %v5268_v21 }
0x134c   :  { %5533 = vmatpush1.msk.msra.mxu1 %vm98_vm0, %v5267_v49 }
0x134d   :  { %5534 = vmatmul.mubr.msk.f32.vlgmr.msra.gmra.mrb[142].mxu1 %vm141_vm1, %v6620_v3 }
0x1420   :  { %v5341_v32 = vpop.f32.mrb[142].mxu1 }
0x1421   :  { %v5342_v52 = vadd.f32 %v5341_v32, %v9259_v17  ;;  %v5343_v31 = vpop.f32.mrb[143].mxu1 }
0x1422   :  { %v5344_v51 = vadd.f32 %v5343_v31, %v9259_v17 }
0x1423   :  { %v5346_v8 = vadd.f32 %v5342_v52, %v9247_v9 }
0x1424   :  { %v5347_v60 = vadd.f32 %v5344_v51, %v9250_v0 }
0x1426   :  { %v5350_v5 = vcombine.low %v5346_v8, %v5347_v60 }
0x1428   :  { %5535 = vst [vmem:[%s9316_s13 + $0x8] sm:$0xff] %v5350_v5 }

</bundles_post_ra>
